<compile_context>
chip_gen: v7x
topology: tpu7x:2x2x1
jax: 0.10.0
libtpu: 0.0.40
codegen_flags: <defaults>
</compile_context>

<pallas_src>
import numpy as np

import jax
import jax.numpy as jnp
from jax import lax
from jax.experimental import pallas as pl
from jax.experimental.pallas import tpu as pltpu

LANE = 128  # channel lane padding for all intermediate activations / weights


# ----------------------------------------------------------------------------
# Fused whole-network kernel (one program per batch element)
# ----------------------------------------------------------------------------
def _fcn_fused_kernel(x_ref,
                      g1_ref, w1_ref, b1_ref,
                      g2_ref, w2_ref, b2_ref,
                      g3_ref, w3_ref, b3_ref,
                      g4_ref, w4_ref, b4_ref,
                      g5_ref, w5_ref, b5_ref,
                      g6_ref, w6_ref, b6_ref,
                      wc_ref, bc_ref,
                      o_ref):
    """Entire FCN forward for one batch element, resident in VMEM.

    Each conv/deconv layer is computed as
        y = sum_t (S_t @ x) @ W_t + bias           (t = 9 kernel taps)
    with S_t a 0/1 spatial-selection matrix (stride-2 conv gather or
    transposed-conv scatter-as-gather) and W_t the (128, 128) channel tap with
    the folded BN scale pre-multiplied into its columns.  All matmuls hit the
    MXU with bf16 operands and f32 accumulation; activations are carried as
    lane-dense (H*W, 128) bf16 values (zero-padded channels).
    """
    x = x_ref[0]                                        # (H*W, 128) bf16
    layers = ((g1_ref, w1_ref, b1_ref, False),          # conv1   -> bnd1
              (g2_ref, w2_ref, b2_ref, True),           # conv2   -> bnd2 -> relu1
              (g3_ref, w3_ref, b3_ref, True),           # conv3   -> bnd3 -> relu2 (x2, idempotent)
              (g4_ref, w4_ref, b4_ref, False),          # deconv1 -> bn1
              (g5_ref, w5_ref, b5_ref, True),           # deconv2 -> bn2 -> relu3
              (g6_ref, w6_ref, b6_ref, False))          # deconv3 -> bn3
    for g_ref, w_ref, b_ref, relu in layers:
        mo = g_ref.shape[1]
        acc = jnp.zeros((mo, w_ref.shape[2]), jnp.float32)
        for t in range(9):                               # static unroll: 9 taps
            p = jnp.dot(g_ref[t], x,
                        preferred_element_type=jnp.float32).astype(jnp.bfloat16)
            acc = acc + jnp.dot(p, w_ref[t],
                                preferred_element_type=jnp.float32)
        y = acc + b_ref[...]
        if relu:
            y = jnp.maximum(y, 0.0)
        x = y.astype(jnp.bfloat16)
    # 1x1 classifier; output kept lane-dense (128 cols), sliced by the caller.
    y = jnp.dot(x, wc_ref[...], preferred_element_type=jnp.float32) + bc_ref[...]
    o_ref[0] = y


def fcn_forward(x_nchw, prep):
    """x_nchw: (B, 3, H, W) f32  ->  (B, n_class, H, W) f32 scores."""
    B, C, H, W = x_nchw.shape
    assert (H, W) == (prep["h"], prep["w"]), "prep is specialized to this input size"

    # NCHW -> lane-dense (B, H*W, 128) bf16 (channels zero-padded to 128 lanes).
    # XLA fuses transpose + reshape + pad + cast into one small copy of the raw
    # input; no per-layer patch matrices / pads ever touch HBM.
    x = jnp.transpose(x_nchw, (0, 2, 3, 1)).reshape(B, H * W, C)
    x = jnp.pad(x, ((0, 0), (0, 0), (0, LANE - C))).astype(jnp.bfloat16)

    consts = prep["args"]

    def _const_spec(a):                     # grid-invariant: DMA'd once, kept in VMEM
        nd = a.ndim
        return pl.BlockSpec(a.shape, lambda b, _nd=nd: (0,) * _nd)

    out = pl.pallas_call(
        _fcn_fused_kernel,
        out_shape=jax.ShapeDtypeStruct((B, H * W, LANE), jnp.float32),
        grid=(B,),
        in_specs=[pl.BlockSpec((1, H * W, LANE), lambda b: (b, 0, 0))]
                 + [_const_spec(a) for a in consts],
        out_specs=pl.BlockSpec((1, H * W, LANE), lambda b: (b, 0, 0)),
        compiler_params=pltpu.CompilerParams(
            # batch axis parallel -> v7x's 2 TensorCores each take one image.
            dimension_semantics=("parallel",),
        ),
    )(x, *consts)

    n_class = prep["n_class"]
    y = out[:, :, :n_class].reshape(B, H, W, n_class)
    return jnp.transpose(y, (0, 3, 1, 2)).astype(jnp.float32)


# ----------------------------------------------------------------------------
# One-time host-side preparation: selection matrices, BN folding, bf16 cast,
# 128-lane channel padding.  Specialized to the (H, W) input spatial size.
# ----------------------------------------------------------------------------
def _fold_bn(conv_bias, gamma, beta, mean, var, eps=1e-5):
    scale = gamma / jnp.sqrt(var + eps)
    bias = (conv_bias - mean) * scale + beta
    return scale, bias


def _conv_select_mats(hi, wi):
    """3x3 / stride-2 / pad-1 conv gather: 9 x (Ho*Wo, Hi*Wi) 0/1 matrices."""
    ho, wo = hi // 2, wi // 2
    s = np.zeros((9, ho * wo, hi * wi), np.float32)
    for kh in range(3):
        for kw in range(3):
            t = kh * 3 + kw
            for oi in range(ho):
                ii = 2 * oi + kh - 1
                if not 0 <= ii < hi:
                    continue
                for oj in range(wo):
                    ij = 2 * oj + kw - 1
                    if 0 <= ij < wi:
                        s[t, oi * wo + oj, ii * wi + ij] = 1.0
    return s


def _deconv_select_mats(hi, wi):
    """ConvTranspose2d(k=3, s=2, p=1, output_padding=1) scatter written as a
    gather: out(oi,oj) <- in((oi+1-kh)/2, (oj+1-kw)/2) when the division is
    exact and in range."""
    ho, wo = 2 * hi, 2 * wi
    s = np.zeros((9, ho * wo, hi * wi), np.float32)
    for kh in range(3):
        for kw in range(3):
            t = kh * 3 + kw
            for oi in range(ho):
                ri = oi + 1 - kh
                if ri % 2:
                    continue
                ii = ri // 2
                if not 0 <= ii < hi:
                    continue
                for oj in range(wo):
                    rj = oj + 1 - kw
                    if rj % 2:
                        continue
                    ij = rj // 2
                    if 0 <= ij < wi:
                        s[t, oi * wo + oj, ii * wi + ij] = 1.0
    return s


def _pad2(a, rows, cols):
    pads = [(0, 0)] * (a.ndim - 2) + [(0, rows - a.shape[-2]), (0, cols - a.shape[-1])]
    return jnp.pad(a, pads)


def _prep_conv(p, hi, wi):
    """Conv2d(3x3, s=2, p=1) + folded BN -> selection mats + scale-folded taps."""
    cout, cin = p["w"].shape[0], p["w"].shape[1]
    scale, bias = _fold_bn(p["b"], p["gamma"], p["beta"], p["mean"], p["var"])
    # OIHW -> (9, Cin, Cout), tap t = kh*3 + kw; BN scale folded into columns.
    w = jnp.transpose(p["w"].astype(jnp.float32), (2, 3, 1, 0)).reshape(9, cin, cout)
    w = w * scale[None, None, :]
    return {
        "g": jnp.asarray(_conv_select_mats(hi, wi), jnp.bfloat16),
        "w": _pad2(w, LANE, LANE).astype(jnp.bfloat16),
        "b": _pad2(bias.astype(jnp.float32).reshape(1, cout), 1, LANE),
    }


def _prep_deconv(p, hi, wi):
    """ConvTranspose2d(3x3, s=2, p=1, op=1) + folded BN."""
    cin, cout = p["w"].shape[0], p["w"].shape[1]
    scale, bias = _fold_bn(p["b"], p["gamma"], p["beta"], p["mean"], p["var"])
    # (Cin, Cout, kh, kw) -> (9, Cin, Cout); no spatial flip in the gather form.
    w = jnp.transpose(p["w"].astype(jnp.float32), (2, 3, 0, 1)).reshape(9, cin, cout)
    w = w * scale[None, None, :]
    return {
        "g": jnp.asarray(_deconv_select_mats(hi, wi), jnp.bfloat16),
        "w": _pad2(w, LANE, LANE).astype(jnp.bfloat16),
        "b": _pad2(bias.astype(jnp.float32).reshape(1, cout), 1, LANE),
    }


def _prep_classifier(p):
    n_class, cin = p["w"].shape[0], p["w"].shape[1]
    w = jnp.transpose(p["w"][:, :, 0, 0].astype(jnp.float32))      # (Cin, n_class)
    return {
        "w": _pad2(w, LANE, LANE).astype(jnp.bfloat16),
        "b": _pad2(p["b"].astype(jnp.float32).reshape(1, n_class), 1, LANE),
        "n_class": n_class,
    }


def prepare_params(params, h, w):
    assert h % 8 == 0 and w % 8 == 0, "three stride-2 levels need H, W % 8 == 0"
    c1 = _prep_conv(params["conv1"], h, w)
    c2 = _prep_conv(params["conv2"], h // 2, w // 2)
    c3 = _prep_conv(params["conv3"], h // 4, w // 4)
    d1 = _prep_deconv(params["deconv1"], h // 8, w // 8)
    d2 = _prep_deconv(params["deconv2"], h // 4, w // 4)
    d3 = _prep_deconv(params["deconv3"], h // 2, w // 2)
    cl = _prep_classifier(params["classifier"])
    args = []
    for layer in (c1, c2, c3, d1, d2, d3):
        args += [layer["g"], layer["w"], layer["b"]]
    args += [cl["w"], cl["b"]]
    return {"args": args, "n_class": cl["n_class"], "h": h, "w": w}


# ----------------------------------------------------------------------------
# Plain-XLA f32 reference (for numerical validation only)
# ----------------------------------------------------------------------------
def _ref_conv(x, w, b, stride):
    w_hwio = jnp.transpose(w, (2, 3, 1, 0))
    y = lax.conv_general_dilated(x, w_hwio, window_strides=(stride, stride),
                                 padding=((1, 1), (1, 1)),
                                 dimension_numbers=("NHWC", "HWIO", "NHWC"))
    return y + b


def _ref_deconv(x, w, b):
    w_hwio = jnp.transpose(w[:, :, ::-1, ::-1], (2, 3, 0, 1))
    y = lax.conv_general_dilated(x, w_hwio, window_strides=(1, 1),
                                 padding=((1, 2), (1, 2)), lhs_dilation=(2, 2),
                                 dimension_numbers=("NHWC", "HWIO", "NHWC"))
    return y + b


def _ref_bn(x, p, eps=1e-5):
    return (x - p["mean"]) / jnp.sqrt(p["var"] + eps) * p["gamma"] + p["beta"]


def fcn_reference(x_nchw, params):
    x = jnp.transpose(x_nchw, (0, 2, 3, 1)).astype(jnp.float32)
    p = params["conv1"]; x = _ref_bn(_ref_conv(x, p["w"], p["b"], 2), p)
    p = params["conv2"]; x = jax.nn.relu(_ref_bn(_ref_conv(x, p["w"], p["b"], 2), p))
    p = params["conv3"]; x = jax.nn.relu(_ref_bn(_ref_conv(x, p["w"], p["b"], 2), p))
    p = params["deconv1"]; x = _ref_bn(_ref_deconv(x, p["w"], p["b"]), p)
    p = params["deconv2"]; x = jax.nn.relu(_ref_bn(_ref_deconv(x, p["w"], p["b"]), p))
    p = params["deconv3"]; x = _ref_bn(_ref_deconv(x, p["w"], p["b"]), p)
    p = params["classifier"]
    x = jnp.einsum("nhwc,kc->nhwk", x, p["w"][:, :, 0, 0]) + p["b"]
    return jnp.transpose(x, (0, 3, 1, 2))


# ----------------------------------------------------------------------------
# Deterministic parameter construction
# ----------------------------------------------------------------------------
def _make_conv_bn(key, cin, cout, transposed=False):
    k_w, k_b, k_g, k_be, k_m, k_v = jax.random.split(key, 6)
    w_shape = (cin, cout, 3, 3) if transposed else (cout, cin, 3, 3)
    return {
        "w": jax.random.normal(k_w, w_shape, jnp.float32) * 0.1,
        "b": jax.random.normal(k_b, (cout,), jnp.float32) * 0.05,
        "gamma": jax.random.uniform(k_g, (cout,), jnp.float32, 0.5, 1.5),
        "beta": jax.random.normal(k_be, (cout,), jnp.float32) * 0.1,
        "mean": jax.random.normal(k_m, (cout,), jnp.float32) * 0.1,
        "var": jax.random.uniform(k_v, (cout,), jnp.float32, 0.5, 1.5),
    }


def make_params(key, n_class):
    keys = jax.random.split(key, 8)
    return {
        "conv1": _make_conv_bn(keys[0], 3, 16),
        "conv2": _make_conv_bn(keys[1], 16, 32),
        "conv3": _make_conv_bn(keys[2], 32, 64),
        "deconv1": _make_conv_bn(keys[3], 64, 64, transposed=True),
        "deconv2": _make_conv_bn(keys[4], 64, 32, transposed=True),
        "deconv3": _make_conv_bn(keys[5], 32, 16, transposed=True),
        "classifier": {
            "w": jax.random.normal(keys[6], (n_class, 16, 1, 1), jnp.float32) * 0.1,
            "b": jax.random.normal(keys[7], (n_class,), jnp.float32) * 0.05,
        },
    }


if __name__ == "__main__":
    n_class = 8
    key = jax.random.PRNGKey(0)
    k_params, k_x = jax.random.split(key)
    params = make_params(k_params, n_class)

    B, H, W = 2, 3, 16
    B, H, W = 2, 16, 16
    prep = prepare_params(params, H, W)      # one-time weight / selection-mat prep

    x = jax.random.normal(k_x, (B, 3, H, W), jnp.float32)    # NCHW like PyTorch

    fwd = jax.jit(lambda inp: fcn_forward(inp, prep))
    score = jax.block_until_ready(fwd(x))

    assert score.shape == (B, n_class, H, W), score.shape
    assert bool(jnp.all(jnp.isfinite(score)))

    # Validate against the f32 XLA reference (loose tolerance: bf16 MXU operands).
    ref = jax.block_until_ready(fcn_reference(x, params))
    max_err = float(jnp.max(jnp.abs(score - ref)))
    ref_scale = float(jnp.max(jnp.abs(ref)))
    assert max_err <= 0.1 + 0.05 * ref_scale, (max_err, ref_scale)

    print("KERNEL_OK")
</pallas_src>

<mosaic_0001>
module attributes {stable_mosaic.version = 11 : i64} {
  func.func @_fcn_fused_kernel(%arg0: i32, %arg1: memref<1x256x128xbf16, #tpu.memory_space<vmem>>, %arg2: memref<9x64x256xbf16, #tpu.memory_space<vmem>>, %arg3: memref<9x128x128xbf16, #tpu.memory_space<vmem>>, %arg4: memref<1x128xf32, #tpu.memory_space<vmem>>, %arg5: memref<9x16x64xbf16, #tpu.memory_space<vmem>>, %arg6: memref<9x128x128xbf16, #tpu.memory_space<vmem>>, %arg7: memref<1x128xf32, #tpu.memory_space<vmem>>, %arg8: memref<9x4x16xbf16, #tpu.memory_space<vmem>>, %arg9: memref<9x128x128xbf16, #tpu.memory_space<vmem>>, %arg10: memref<1x128xf32, #tpu.memory_space<vmem>>, %arg11: memref<9x16x4xbf16, #tpu.memory_space<vmem>>, %arg12: memref<9x128x128xbf16, #tpu.memory_space<vmem>>, %arg13: memref<1x128xf32, #tpu.memory_space<vmem>>, %arg14: memref<9x64x16xbf16, #tpu.memory_space<vmem>>, %arg15: memref<9x128x128xbf16, #tpu.memory_space<vmem>>, %arg16: memref<1x128xf32, #tpu.memory_space<vmem>>, %arg17: memref<9x256x64xbf16, #tpu.memory_space<vmem>>, %arg18: memref<9x128x128xbf16, #tpu.memory_space<vmem>>, %arg19: memref<1x128xf32, #tpu.memory_space<vmem>>, %arg20: memref<128x128xbf16, #tpu.memory_space<vmem>>, %arg21: memref<1x128xf32, #tpu.memory_space<vmem>>, %arg22: memref<1x256x128xf32, #tpu.memory_space<vmem>>) attributes {dimension_semantics = [#tpu.dimension_semantics<parallel>], iteration_bounds = array<i64: 2>, scalar_prefetch = 0 : i64, scratch_operands = 0 : i64, tpu.core_type = #tpu.core_type<tc>, window_params = [{transform_indices = @transform_0, window_bounds = array<i64: 1, 256, 128>}, {pipeline_mode = #tpu.pipeline_mode<synchronous>, transform_indices = @transform_1, window_bounds = array<i64: 9, 64, 256>}, {pipeline_mode = #tpu.pipeline_mode<synchronous>, transform_indices = @transform_2, window_bounds = array<i64: 9, 128, 128>}, {pipeline_mode = #tpu.pipeline_mode<synchronous>, transform_indices = @transform_3, window_bounds = array<i64: 1, 128>}, {pipeline_mode = #tpu.pipeline_mode<synchronous>, transform_indices = @transform_4, window_bounds = array<i64: 9, 16, 64>}, {pipeline_mode = #tpu.pipeline_mode<synchronous>, transform_indices = @transform_5, window_bounds = array<i64: 9, 128, 128>}, {pipeline_mode = #tpu.pipeline_mode<synchronous>, transform_indices = @transform_6, window_bounds = array<i64: 1, 128>}, {pipeline_mode = #tpu.pipeline_mode<synchronous>, transform_indices = @transform_7, window_bounds = array<i64: 9, 4, 16>}, {pipeline_mode = #tpu.pipeline_mode<synchronous>, transform_indices = @transform_8, window_bounds = array<i64: 9, 128, 128>}, {pipeline_mode = #tpu.pipeline_mode<synchronous>, transform_indices = @transform_9, window_bounds = array<i64: 1, 128>}, {pipeline_mode = #tpu.pipeline_mode<synchronous>, transform_indices = @transform_10, window_bounds = array<i64: 9, 16, 4>}, {pipeline_mode = #tpu.pipeline_mode<synchronous>, transform_indices = @transform_11, window_bounds = array<i64: 9, 128, 128>}, {pipeline_mode = #tpu.pipeline_mode<synchronous>, transform_indices = @transform_12, window_bounds = array<i64: 1, 128>}, {pipeline_mode = #tpu.pipeline_mode<synchronous>, transform_indices = @transform_13, window_bounds = array<i64: 9, 64, 16>}, {pipeline_mode = #tpu.pipeline_mode<synchronous>, transform_indices = @transform_14, window_bounds = array<i64: 9, 128, 128>}, {pipeline_mode = #tpu.pipeline_mode<synchronous>, transform_indices = @transform_15, window_bounds = array<i64: 1, 128>}, {pipeline_mode = #tpu.pipeline_mode<synchronous>, transform_indices = @transform_16, window_bounds = array<i64: 9, 256, 64>}, {pipeline_mode = #tpu.pipeline_mode<synchronous>, transform_indices = @transform_17, window_bounds = array<i64: 9, 128, 128>}, {pipeline_mode = #tpu.pipeline_mode<synchronous>, transform_indices = @transform_18, window_bounds = array<i64: 1, 128>}, {pipeline_mode = #tpu.pipeline_mode<synchronous>, transform_indices = @transform_19, window_bounds = array<i64: 128, 128>}, {pipeline_mode = #tpu.pipeline_mode<synchronous>, transform_indices = @transform_20, window_bounds = array<i64: 1, 128>}, {transform_indices = @transform_21, window_bounds = array<i64: 1, 256, 128>}]} {
    %c0 = arith.constant 0 : index
    %c0_0 = arith.constant 0 : index
    %c0_1 = arith.constant 0 : index
    %0 = vector.load %arg1[%c0, %c0_0, %c0_1] : memref<1x256x128xbf16, #tpu.memory_space<vmem>>, vector<1x256x128xbf16>
    %1 = vector.shape_cast %0 : vector<1x256x128xbf16> to vector<256x128xbf16>
    %cst = arith.constant 0.000000e+00 : f32
    %2 = vector.broadcast %cst : f32 to vector<64x128xf32>
    %c0_2 = arith.constant 0 : index
    %c0_3 = arith.constant 0 : index
    %c0_4 = arith.constant 0 : index
    %3 = vector.load %arg2[%c0_2, %c0_3, %c0_4] : memref<9x64x256xbf16, #tpu.memory_space<vmem>>, vector<1x64x256xbf16>
    %4 = vector.shape_cast %3 : vector<1x64x256xbf16> to vector<64x256xbf16>
    %cst_5 = arith.constant dense<0.000000e+00> : vector<64x128xf32>
    %5 = tpu.matmul %4, %1, %cst_5 {dimension_numbers = #tpu.dot_dimension_numbers<[1], [0], [0], [1], [0, 0, 1, 1], [], []>} : vector<64x256xbf16>, vector<256x128xbf16>, vector<64x128xf32> -> vector<64x128xf32>
    %6 = arith.truncf %5 : vector<64x128xf32> to vector<64x128xbf16>
    %c0_6 = arith.constant 0 : index
    %c0_7 = arith.constant 0 : index
    %c0_8 = arith.constant 0 : index
    %7 = vector.load %arg3[%c0_6, %c0_7, %c0_8] : memref<9x128x128xbf16, #tpu.memory_space<vmem>>, vector<1x128x128xbf16>
    %8 = vector.shape_cast %7 : vector<1x128x128xbf16> to vector<128x128xbf16>
    %cst_9 = arith.constant dense<0.000000e+00> : vector<64x128xf32>
    %9 = tpu.matmul %6, %8, %cst_9 {dimension_numbers = #tpu.dot_dimension_numbers<[1], [0], [0], [1], [0, 0, 1, 1], [], []>} : vector<64x128xbf16>, vector<128x128xbf16>, vector<64x128xf32> -> vector<64x128xf32>
    %10 = arith.addf %2, %9 : vector<64x128xf32>
    %c1 = arith.constant 1 : index
    %c0_10 = arith.constant 0 : index
    %c0_11 = arith.constant 0 : index
    %11 = vector.load %arg2[%c1, %c0_10, %c0_11] : memref<9x64x256xbf16, #tpu.memory_space<vmem>>, vector<1x64x256xbf16>
    %12 = vector.shape_cast %11 : vector<1x64x256xbf16> to vector<64x256xbf16>
    %cst_12 = arith.constant dense<0.000000e+00> : vector<64x128xf32>
    %13 = tpu.matmul %12, %1, %cst_12 {dimension_numbers = #tpu.dot_dimension_numbers<[1], [0], [0], [1], [0, 0, 1, 1], [], []>} : vector<64x256xbf16>, vector<256x128xbf16>, vector<64x128xf32> -> vector<64x128xf32>
    %14 = arith.truncf %13 : vector<64x128xf32> to vector<64x128xbf16>
    %c1_13 = arith.constant 1 : index
    %c0_14 = arith.constant 0 : index
    %c0_15 = arith.constant 0 : index
    %15 = vector.load %arg3[%c1_13, %c0_14, %c0_15] : memref<9x128x128xbf16, #tpu.memory_space<vmem>>, vector<1x128x128xbf16>
    %16 = vector.shape_cast %15 : vector<1x128x128xbf16> to vector<128x128xbf16>
    %cst_16 = arith.constant dense<0.000000e+00> : vector<64x128xf32>
    %17 = tpu.matmul %14, %16, %cst_16 {dimension_numbers = #tpu.dot_dimension_numbers<[1], [0], [0], [1], [0, 0, 1, 1], [], []>} : vector<64x128xbf16>, vector<128x128xbf16>, vector<64x128xf32> -> vector<64x128xf32>
    %18 = arith.addf %10, %17 : vector<64x128xf32>
    %c2 = arith.constant 2 : index
    %c0_17 = arith.constant 0 : index
    %c0_18 = arith.constant 0 : index
    %19 = vector.load %arg2[%c2, %c0_17, %c0_18] : memref<9x64x256xbf16, #tpu.memory_space<vmem>>, vector<1x64x256xbf16>
    %20 = vector.shape_cast %19 : vector<1x64x256xbf16> to vector<64x256xbf16>
    %cst_19 = arith.constant dense<0.000000e+00> : vector<64x128xf32>
    %21 = tpu.matmul %20, %1, %cst_19 {dimension_numbers = #tpu.dot_dimension_numbers<[1], [0], [0], [1], [0, 0, 1, 1], [], []>} : vector<64x256xbf16>, vector<256x128xbf16>, vector<64x128xf32> -> vector<64x128xf32>
    %22 = arith.truncf %21 : vector<64x128xf32> to vector<64x128xbf16>
    %c2_20 = arith.constant 2 : index
    %c0_21 = arith.constant 0 : index
    %c0_22 = arith.constant 0 : index
    %23 = vector.load %arg3[%c2_20, %c0_21, %c0_22] : memref<9x128x128xbf16, #tpu.memory_space<vmem>>, vector<1x128x128xbf16>
    %24 = vector.shape_cast %23 : vector<1x128x128xbf16> to vector<128x128xbf16>
    %cst_23 = arith.constant dense<0.000000e+00> : vector<64x128xf32>
    %25 = tpu.matmul %22, %24, %cst_23 {dimension_numbers = #tpu.dot_dimension_numbers<[1], [0], [0], [1], [0, 0, 1, 1], [], []>} : vector<64x128xbf16>, vector<128x128xbf16>, vector<64x128xf32> -> vector<64x128xf32>
    %26 = arith.addf %18, %25 : vector<64x128xf32>
    %c3 = arith.constant 3 : index
    %c0_24 = arith.constant 0 : index
    %c0_25 = arith.constant 0 : index
    %27 = vector.load %arg2[%c3, %c0_24, %c0_25] : memref<9x64x256xbf16, #tpu.memory_space<vmem>>, vector<1x64x256xbf16>
    %28 = vector.shape_cast %27 : vector<1x64x256xbf16> to vector<64x256xbf16>
    %cst_26 = arith.constant dense<0.000000e+00> : vector<64x128xf32>
    %29 = tpu.matmul %28, %1, %cst_26 {dimension_numbers = #tpu.dot_dimension_numbers<[1], [0], [0], [1], [0, 0, 1, 1], [], []>} : vector<64x256xbf16>, vector<256x128xbf16>, vector<64x128xf32> -> vector<64x128xf32>
    %30 = arith.truncf %29 : vector<64x128xf32> to vector<64x128xbf16>
    %c3_27 = arith.constant 3 : index
    %c0_28 = arith.constant 0 : index
    %c0_29 = arith.constant 0 : index
    %31 = vector.load %arg3[%c3_27, %c0_28, %c0_29] : memref<9x128x128xbf16, #tpu.memory_space<vmem>>, vector<1x128x128xbf16>
    %32 = vector.shape_cast %31 : vector<1x128x128xbf16> to vector<128x128xbf16>
    %cst_30 = arith.constant dense<0.000000e+00> : vector<64x128xf32>
    %33 = tpu.matmul %30, %32, %cst_30 {dimension_numbers = #tpu.dot_dimension_numbers<[1], [0], [0], [1], [0, 0, 1, 1], [], []>} : vector<64x128xbf16>, vector<128x128xbf16>, vector<64x128xf32> -> vector<64x128xf32>
    %34 = arith.addf %26, %33 : vector<64x128xf32>
    %c4 = arith.constant 4 : index
    %c0_31 = arith.constant 0 : index
    %c0_32 = arith.constant 0 : index
    %35 = vector.load %arg2[%c4, %c0_31, %c0_32] : memref<9x64x256xbf16, #tpu.memory_space<vmem>>, vector<1x64x256xbf16>
    %36 = vector.shape_cast %35 : vector<1x64x256xbf16> to vector<64x256xbf16>
    %cst_33 = arith.constant dense<0.000000e+00> : vector<64x128xf32>
    %37 = tpu.matmul %36, %1, %cst_33 {dimension_numbers = #tpu.dot_dimension_numbers<[1], [0], [0], [1], [0, 0, 1, 1], [], []>} : vector<64x256xbf16>, vector<256x128xbf16>, vector<64x128xf32> -> vector<64x128xf32>
    %38 = arith.truncf %37 : vector<64x128xf32> to vector<64x128xbf16>
    %c4_34 = arith.constant 4 : index
    %c0_35 = arith.constant 0 : index
    %c0_36 = arith.constant 0 : index
    %39 = vector.load %arg3[%c4_34, %c0_35, %c0_36] : memref<9x128x128xbf16, #tpu.memory_space<vmem>>, vector<1x128x128xbf16>
    %40 = vector.shape_cast %39 : vector<1x128x128xbf16> to vector<128x128xbf16>
    %cst_37 = arith.constant dense<0.000000e+00> : vector<64x128xf32>
    %41 = tpu.matmul %38, %40, %cst_37 {dimension_numbers = #tpu.dot_dimension_numbers<[1], [0], [0], [1], [0, 0, 1, 1], [], []>} : vector<64x128xbf16>, vector<128x128xbf16>, vector<64x128xf32> -> vector<64x128xf32>
    %42 = arith.addf %34, %41 : vector<64x128xf32>
    %c5 = arith.constant 5 : index
    %c0_38 = arith.constant 0 : index
    %c0_39 = arith.constant 0 : index
    %43 = vector.load %arg2[%c5, %c0_38, %c0_39] : memref<9x64x256xbf16, #tpu.memory_space<vmem>>, vector<1x64x256xbf16>
    %44 = vector.shape_cast %43 : vector<1x64x256xbf16> to vector<64x256xbf16>
    %cst_40 = arith.constant dense<0.000000e+00> : vector<64x128xf32>
    %45 = tpu.matmul %44, %1, %cst_40 {dimension_numbers = #tpu.dot_dimension_numbers<[1], [0], [0], [1], [0, 0, 1, 1], [], []>} : vector<64x256xbf16>, vector<256x128xbf16>, vector<64x128xf32> -> vector<64x128xf32>
    %46 = arith.truncf %45 : vector<64x128xf32> to vector<64x128xbf16>
    %c5_41 = arith.constant 5 : index
    %c0_42 = arith.constant 0 : index
    %c0_43 = arith.constant 0 : index
    %47 = vector.load %arg3[%c5_41, %c0_42, %c0_43] : memref<9x128x128xbf16, #tpu.memory_space<vmem>>, vector<1x128x128xbf16>
    %48 = vector.shape_cast %47 : vector<1x128x128xbf16> to vector<128x128xbf16>
    %cst_44 = arith.constant dense<0.000000e+00> : vector<64x128xf32>
    %49 = tpu.matmul %46, %48, %cst_44 {dimension_numbers = #tpu.dot_dimension_numbers<[1], [0], [0], [1], [0, 0, 1, 1], [], []>} : vector<64x128xbf16>, vector<128x128xbf16>, vector<64x128xf32> -> vector<64x128xf32>
    %50 = arith.addf %42, %49 : vector<64x128xf32>
    %c6 = arith.constant 6 : index
    %c0_45 = arith.constant 0 : index
    %c0_46 = arith.constant 0 : index
    %51 = vector.load %arg2[%c6, %c0_45, %c0_46] : memref<9x64x256xbf16, #tpu.memory_space<vmem>>, vector<1x64x256xbf16>
    %52 = vector.shape_cast %51 : vector<1x64x256xbf16> to vector<64x256xbf16>
    %cst_47 = arith.constant dense<0.000000e+00> : vector<64x128xf32>
    %53 = tpu.matmul %52, %1, %cst_47 {dimension_numbers = #tpu.dot_dimension_numbers<[1], [0], [0], [1], [0, 0, 1, 1], [], []>} : vector<64x256xbf16>, vector<256x128xbf16>, vector<64x128xf32> -> vector<64x128xf32>
    %54 = arith.truncf %53 : vector<64x128xf32> to vector<64x128xbf16>
    %c6_48 = arith.constant 6 : index
    %c0_49 = arith.constant 0 : index
    %c0_50 = arith.constant 0 : index
    %55 = vector.load %arg3[%c6_48, %c0_49, %c0_50] : memref<9x128x128xbf16, #tpu.memory_space<vmem>>, vector<1x128x128xbf16>
    %56 = vector.shape_cast %55 : vector<1x128x128xbf16> to vector<128x128xbf16>
    %cst_51 = arith.constant dense<0.000000e+00> : vector<64x128xf32>
    %57 = tpu.matmul %54, %56, %cst_51 {dimension_numbers = #tpu.dot_dimension_numbers<[1], [0], [0], [1], [0, 0, 1, 1], [], []>} : vector<64x128xbf16>, vector<128x128xbf16>, vector<64x128xf32> -> vector<64x128xf32>
    %58 = arith.addf %50, %57 : vector<64x128xf32>
    %c7 = arith.constant 7 : index
    %c0_52 = arith.constant 0 : index
    %c0_53 = arith.constant 0 : index
    %59 = vector.load %arg2[%c7, %c0_52, %c0_53] : memref<9x64x256xbf16, #tpu.memory_space<vmem>>, vector<1x64x256xbf16>
    %60 = vector.shape_cast %59 : vector<1x64x256xbf16> to vector<64x256xbf16>
    %cst_54 = arith.constant dense<0.000000e+00> : vector<64x128xf32>
    %61 = tpu.matmul %60, %1, %cst_54 {dimension_numbers = #tpu.dot_dimension_numbers<[1], [0], [0], [1], [0, 0, 1, 1], [], []>} : vector<64x256xbf16>, vector<256x128xbf16>, vector<64x128xf32> -> vector<64x128xf32>
    %62 = arith.truncf %61 : vector<64x128xf32> to vector<64x128xbf16>
    %c7_55 = arith.constant 7 : index
    %c0_56 = arith.constant 0 : index
    %c0_57 = arith.constant 0 : index
    %63 = vector.load %arg3[%c7_55, %c0_56, %c0_57] : memref<9x128x128xbf16, #tpu.memory_space<vmem>>, vector<1x128x128xbf16>
    %64 = vector.shape_cast %63 : vector<1x128x128xbf16> to vector<128x128xbf16>
    %cst_58 = arith.constant dense<0.000000e+00> : vector<64x128xf32>
    %65 = tpu.matmul %62, %64, %cst_58 {dimension_numbers = #tpu.dot_dimension_numbers<[1], [0], [0], [1], [0, 0, 1, 1], [], []>} : vector<64x128xbf16>, vector<128x128xbf16>, vector<64x128xf32> -> vector<64x128xf32>
    %66 = arith.addf %58, %65 : vector<64x128xf32>
    %c8 = arith.constant 8 : index
    %c0_59 = arith.constant 0 : index
    %c0_60 = arith.constant 0 : index
    %67 = vector.load %arg2[%c8, %c0_59, %c0_60] : memref<9x64x256xbf16, #tpu.memory_space<vmem>>, vector<1x64x256xbf16>
    %68 = vector.shape_cast %67 : vector<1x64x256xbf16> to vector<64x256xbf16>
    %cst_61 = arith.constant dense<0.000000e+00> : vector<64x128xf32>
    %69 = tpu.matmul %68, %1, %cst_61 {dimension_numbers = #tpu.dot_dimension_numbers<[1], [0], [0], [1], [0, 0, 1, 1], [], []>} : vector<64x256xbf16>, vector<256x128xbf16>, vector<64x128xf32> -> vector<64x128xf32>
    %70 = arith.truncf %69 : vector<64x128xf32> to vector<64x128xbf16>
    %c8_62 = arith.constant 8 : index
    %c0_63 = arith.constant 0 : index
    %c0_64 = arith.constant 0 : index
    %71 = vector.load %arg3[%c8_62, %c0_63, %c0_64] : memref<9x128x128xbf16, #tpu.memory_space<vmem>>, vector<1x128x128xbf16>
    %72 = vector.shape_cast %71 : vector<1x128x128xbf16> to vector<128x128xbf16>
    %cst_65 = arith.constant dense<0.000000e+00> : vector<64x128xf32>
    %73 = tpu.matmul %70, %72, %cst_65 {dimension_numbers = #tpu.dot_dimension_numbers<[1], [0], [0], [1], [0, 0, 1, 1], [], []>} : vector<64x128xbf16>, vector<128x128xbf16>, vector<64x128xf32> -> vector<64x128xf32>
    %74 = arith.addf %66, %73 : vector<64x128xf32>
    %c0_66 = arith.constant 0 : index
    %c0_67 = arith.constant 0 : index
    %75 = vector.load %arg4[%c0_66, %c0_67] : memref<1x128xf32, #tpu.memory_space<vmem>>, vector<1x128xf32>
    %76 = vector.broadcast %75 : vector<1x128xf32> to vector<64x128xf32>
    %77 = arith.addf %74, %76 : vector<64x128xf32>
    %78 = arith.truncf %77 : vector<64x128xf32> to vector<64x128xbf16>
    %cst_68 = arith.constant 0.000000e+00 : f32
    %79 = vector.broadcast %cst_68 : f32 to vector<16x128xf32>
    %c0_69 = arith.constant 0 : index
    %c0_70 = arith.constant 0 : index
    %c0_71 = arith.constant 0 : index
    %80 = vector.load %arg5[%c0_69, %c0_70, %c0_71] : memref<9x16x64xbf16, #tpu.memory_space<vmem>>, vector<1x16x64xbf16>
    %81 = vector.shape_cast %80 : vector<1x16x64xbf16> to vector<16x64xbf16>
    %cst_72 = arith.constant dense<0.000000e+00> : vector<16x128xf32>
    %82 = tpu.matmul %81, %78, %cst_72 {dimension_numbers = #tpu.dot_dimension_numbers<[1], [0], [0], [1], [0, 0, 1, 1], [], []>} : vector<16x64xbf16>, vector<64x128xbf16>, vector<16x128xf32> -> vector<16x128xf32>
    %83 = arith.truncf %82 : vector<16x128xf32> to vector<16x128xbf16>
    %c0_73 = arith.constant 0 : index
    %c0_74 = arith.constant 0 : index
    %c0_75 = arith.constant 0 : index
    %84 = vector.load %arg6[%c0_73, %c0_74, %c0_75] : memref<9x128x128xbf16, #tpu.memory_space<vmem>>, vector<1x128x128xbf16>
    %85 = vector.shape_cast %84 : vector<1x128x128xbf16> to vector<128x128xbf16>
    %cst_76 = arith.constant dense<0.000000e+00> : vector<16x128xf32>
    %86 = tpu.matmul %83, %85, %cst_76 {dimension_numbers = #tpu.dot_dimension_numbers<[1], [0], [0], [1], [0, 0, 1, 1], [], []>} : vector<16x128xbf16>, vector<128x128xbf16>, vector<16x128xf32> -> vector<16x128xf32>
    %87 = arith.addf %79, %86 : vector<16x128xf32>
    %c1_77 = arith.constant 1 : index
    %c0_78 = arith.constant 0 : index
    %c0_79 = arith.constant 0 : index
    %88 = vector.load %arg5[%c1_77, %c0_78, %c0_79] : memref<9x16x64xbf16, #tpu.memory_space<vmem>>, vector<1x16x64xbf16>
    %89 = vector.shape_cast %88 : vector<1x16x64xbf16> to vector<16x64xbf16>
    %cst_80 = arith.constant dense<0.000000e+00> : vector<16x128xf32>
    %90 = tpu.matmul %89, %78, %cst_80 {dimension_numbers = #tpu.dot_dimension_numbers<[1], [0], [0], [1], [0, 0, 1, 1], [], []>} : vector<16x64xbf16>, vector<64x128xbf16>, vector<16x128xf32> -> vector<16x128xf32>
    %91 = arith.truncf %90 : vector<16x128xf32> to vector<16x128xbf16>
    %c1_81 = arith.constant 1 : index
    %c0_82 = arith.constant 0 : index
    %c0_83 = arith.constant 0 : index
    %92 = vector.load %arg6[%c1_81, %c0_82, %c0_83] : memref<9x128x128xbf16, #tpu.memory_space<vmem>>, vector<1x128x128xbf16>
    %93 = vector.shape_cast %92 : vector<1x128x128xbf16> to vector<128x128xbf16>
    %cst_84 = arith.constant dense<0.000000e+00> : vector<16x128xf32>
    %94 = tpu.matmul %91, %93, %cst_84 {dimension_numbers = #tpu.dot_dimension_numbers<[1], [0], [0], [1], [0, 0, 1, 1], [], []>} : vector<16x128xbf16>, vector<128x128xbf16>, vector<16x128xf32> -> vector<16x128xf32>
    %95 = arith.addf %87, %94 : vector<16x128xf32>
    %c2_85 = arith.constant 2 : index
    %c0_86 = arith.constant 0 : index
    %c0_87 = arith.constant 0 : index
    %96 = vector.load %arg5[%c2_85, %c0_86, %c0_87] : memref<9x16x64xbf16, #tpu.memory_space<vmem>>, vector<1x16x64xbf16>
    %97 = vector.shape_cast %96 : vector<1x16x64xbf16> to vector<16x64xbf16>
    %cst_88 = arith.constant dense<0.000000e+00> : vector<16x128xf32>
    %98 = tpu.matmul %97, %78, %cst_88 {dimension_numbers = #tpu.dot_dimension_numbers<[1], [0], [0], [1], [0, 0, 1, 1], [], []>} : vector<16x64xbf16>, vector<64x128xbf16>, vector<16x128xf32> -> vector<16x128xf32>
    %99 = arith.truncf %98 : vector<16x128xf32> to vector<16x128xbf16>
    %c2_89 = arith.constant 2 : index
    %c0_90 = arith.constant 0 : index
    %c0_91 = arith.constant 0 : index
    %100 = vector.load %arg6[%c2_89, %c0_90, %c0_91] : memref<9x128x128xbf16, #tpu.memory_space<vmem>>, vector<1x128x128xbf16>
    %101 = vector.shape_cast %100 : vector<1x128x128xbf16> to vector<128x128xbf16>
    %cst_92 = arith.constant dense<0.000000e+00> : vector<16x128xf32>
    %102 = tpu.matmul %99, %101, %cst_92 {dimension_numbers = #tpu.dot_dimension_numbers<[1], [0], [0], [1], [0, 0, 1, 1], [], []>} : vector<16x128xbf16>, vector<128x128xbf16>, vector<16x128xf32> -> vector<16x128xf32>
    %103 = arith.addf %95, %102 : vector<16x128xf32>
    %c3_93 = arith.constant 3 : index
    %c0_94 = arith.constant 0 : index
    %c0_95 = arith.constant 0 : index
    %104 = vector.load %arg5[%c3_93, %c0_94, %c0_95] : memref<9x16x64xbf16, #tpu.memory_space<vmem>>, vector<1x16x64xbf16>
    %105 = vector.shape_cast %104 : vector<1x16x64xbf16> to vector<16x64xbf16>
    %cst_96 = arith.constant dense<0.000000e+00> : vector<16x128xf32>
    %106 = tpu.matmul %105, %78, %cst_96 {dimension_numbers = #tpu.dot_dimension_numbers<[1], [0], [0], [1], [0, 0, 1, 1], [], []>} : vector<16x64xbf16>, vector<64x128xbf16>, vector<16x128xf32> -> vector<16x128xf32>
    %107 = arith.truncf %106 : vector<16x128xf32> to vector<16x128xbf16>
    %c3_97 = arith.constant 3 : index
    %c0_98 = arith.constant 0 : index
    %c0_99 = arith.constant 0 : index
    %108 = vector.load %arg6[%c3_97, %c0_98, %c0_99] : memref<9x128x128xbf16, #tpu.memory_space<vmem>>, vector<1x128x128xbf16>
    %109 = vector.shape_cast %108 : vector<1x128x128xbf16> to vector<128x128xbf16>
    %cst_100 = arith.constant dense<0.000000e+00> : vector<16x128xf32>
    %110 = tpu.matmul %107, %109, %cst_100 {dimension_numbers = #tpu.dot_dimension_numbers<[1], [0], [0], [1], [0, 0, 1, 1], [], []>} : vector<16x128xbf16>, vector<128x128xbf16>, vector<16x128xf32> -> vector<16x128xf32>
    %111 = arith.addf %103, %110 : vector<16x128xf32>
    %c4_101 = arith.constant 4 : index
    %c0_102 = arith.constant 0 : index
    %c0_103 = arith.constant 0 : index
    %112 = vector.load %arg5[%c4_101, %c0_102, %c0_103] : memref<9x16x64xbf16, #tpu.memory_space<vmem>>, vector<1x16x64xbf16>
    %113 = vector.shape_cast %112 : vector<1x16x64xbf16> to vector<16x64xbf16>
    %cst_104 = arith.constant dense<0.000000e+00> : vector<16x128xf32>
    %114 = tpu.matmul %113, %78, %cst_104 {dimension_numbers = #tpu.dot_dimension_numbers<[1], [0], [0], [1], [0, 0, 1, 1], [], []>} : vector<16x64xbf16>, vector<64x128xbf16>, vector<16x128xf32> -> vector<16x128xf32>
    %115 = arith.truncf %114 : vector<16x128xf32> to vector<16x128xbf16>
    %c4_105 = arith.constant 4 : index
    %c0_106 = arith.constant 0 : index
    %c0_107 = arith.constant 0 : index
    %116 = vector.load %arg6[%c4_105, %c0_106, %c0_107] : memref<9x128x128xbf16, #tpu.memory_space<vmem>>, vector<1x128x128xbf16>
    %117 = vector.shape_cast %116 : vector<1x128x128xbf16> to vector<128x128xbf16>
    %cst_108 = arith.constant dense<0.000000e+00> : vector<16x128xf32>
    %118 = tpu.matmul %115, %117, %cst_108 {dimension_numbers = #tpu.dot_dimension_numbers<[1], [0], [0], [1], [0, 0, 1, 1], [], []>} : vector<16x128xbf16>, vector<128x128xbf16>, vector<16x128xf32> -> vector<16x128xf32>
    %119 = arith.addf %111, %118 : vector<16x128xf32>
    %c5_109 = arith.constant 5 : index
    %c0_110 = arith.constant 0 : index
    %c0_111 = arith.constant 0 : index
    %120 = vector.load %arg5[%c5_109, %c0_110, %c0_111] : memref<9x16x64xbf16, #tpu.memory_space<vmem>>, vector<1x16x64xbf16>
    %121 = vector.shape_cast %120 : vector<1x16x64xbf16> to vector<16x64xbf16>
    %cst_112 = arith.constant dense<0.000000e+00> : vector<16x128xf32>
    %122 = tpu.matmul %121, %78, %cst_112 {dimension_numbers = #tpu.dot_dimension_numbers<[1], [0], [0], [1], [0, 0, 1, 1], [], []>} : vector<16x64xbf16>, vector<64x128xbf16>, vector<16x128xf32> -> vector<16x128xf32>
    %123 = arith.truncf %122 : vector<16x128xf32> to vector<16x128xbf16>
    %c5_113 = arith.constant 5 : index
    %c0_114 = arith.constant 0 : index
    %c0_115 = arith.constant 0 : index
    %124 = vector.load %arg6[%c5_113, %c0_114, %c0_115] : memref<9x128x128xbf16, #tpu.memory_space<vmem>>, vector<1x128x128xbf16>
    %125 = vector.shape_cast %124 : vector<1x128x128xbf16> to vector<128x128xbf16>
    %cst_116 = arith.constant dense<0.000000e+00> : vector<16x128xf32>
    %126 = tpu.matmul %123, %125, %cst_116 {dimension_numbers = #tpu.dot_dimension_numbers<[1], [0], [0], [1], [0, 0, 1, 1], [], []>} : vector<16x128xbf16>, vector<128x128xbf16>, vector<16x128xf32> -> vector<16x128xf32>
    %127 = arith.addf %119, %126 : vector<16x128xf32>
    %c6_117 = arith.constant 6 : index
    %c0_118 = arith.constant 0 : index
    %c0_119 = arith.constant 0 : index
    %128 = vector.load %arg5[%c6_117, %c0_118, %c0_119] : memref<9x16x64xbf16, #tpu.memory_space<vmem>>, vector<1x16x64xbf16>
    %129 = vector.shape_cast %128 : vector<1x16x64xbf16> to vector<16x64xbf16>
    %cst_120 = arith.constant dense<0.000000e+00> : vector<16x128xf32>
    %130 = tpu.matmul %129, %78, %cst_120 {dimension_numbers = #tpu.dot_dimension_numbers<[1], [0], [0], [1], [0, 0, 1, 1], [], []>} : vector<16x64xbf16>, vector<64x128xbf16>, vector<16x128xf32> -> vector<16x128xf32>
    %131 = arith.truncf %130 : vector<16x128xf32> to vector<16x128xbf16>
    %c6_121 = arith.constant 6 : index
    %c0_122 = arith.constant 0 : index
    %c0_123 = arith.constant 0 : index
    %132 = vector.load %arg6[%c6_121, %c0_122, %c0_123] : memref<9x128x128xbf16, #tpu.memory_space<vmem>>, vector<1x128x128xbf16>
    %133 = vector.shape_cast %132 : vector<1x128x128xbf16> to vector<128x128xbf16>
    %cst_124 = arith.constant dense<0.000000e+00> : vector<16x128xf32>
    %134 = tpu.matmul %131, %133, %cst_124 {dimension_numbers = #tpu.dot_dimension_numbers<[1], [0], [0], [1], [0, 0, 1, 1], [], []>} : vector<16x128xbf16>, vector<128x128xbf16>, vector<16x128xf32> -> vector<16x128xf32>
    %135 = arith.addf %127, %134 : vector<16x128xf32>
    %c7_125 = arith.constant 7 : index
    %c0_126 = arith.constant 0 : index
    %c0_127 = arith.constant 0 : index
    %136 = vector.load %arg5[%c7_125, %c0_126, %c0_127] : memref<9x16x64xbf16, #tpu.memory_space<vmem>>, vector<1x16x64xbf16>
    %137 = vector.shape_cast %136 : vector<1x16x64xbf16> to vector<16x64xbf16>
    %cst_128 = arith.constant dense<0.000000e+00> : vector<16x128xf32>
    %138 = tpu.matmul %137, %78, %cst_128 {dimension_numbers = #tpu.dot_dimension_numbers<[1], [0], [0], [1], [0, 0, 1, 1], [], []>} : vector<16x64xbf16>, vector<64x128xbf16>, vector<16x128xf32> -> vector<16x128xf32>
    %139 = arith.truncf %138 : vector<16x128xf32> to vector<16x128xbf16>
    %c7_129 = arith.constant 7 : index
    %c0_130 = arith.constant 0 : index
    %c0_131 = arith.constant 0 : index
    %140 = vector.load %arg6[%c7_129, %c0_130, %c0_131] : memref<9x128x128xbf16, #tpu.memory_space<vmem>>, vector<1x128x128xbf16>
    %141 = vector.shape_cast %140 : vector<1x128x128xbf16> to vector<128x128xbf16>
    %cst_132 = arith.constant dense<0.000000e+00> : vector<16x128xf32>
    %142 = tpu.matmul %139, %141, %cst_132 {dimension_numbers = #tpu.dot_dimension_numbers<[1], [0], [0], [1], [0, 0, 1, 1], [], []>} : vector<16x128xbf16>, vector<128x128xbf16>, vector<16x128xf32> -> vector<16x128xf32>
    %143 = arith.addf %135, %142 : vector<16x128xf32>
    %c8_133 = arith.constant 8 : index
    %c0_134 = arith.constant 0 : index
    %c0_135 = arith.constant 0 : index
    %144 = vector.load %arg5[%c8_133, %c0_134, %c0_135] : memref<9x16x64xbf16, #tpu.memory_space<vmem>>, vector<1x16x64xbf16>
    %145 = vector.shape_cast %144 : vector<1x16x64xbf16> to vector<16x64xbf16>
    %cst_136 = arith.constant dense<0.000000e+00> : vector<16x128xf32>
    %146 = tpu.matmul %145, %78, %cst_136 {dimension_numbers = #tpu.dot_dimension_numbers<[1], [0], [0], [1], [0, 0, 1, 1], [], []>} : vector<16x64xbf16>, vector<64x128xbf16>, vector<16x128xf32> -> vector<16x128xf32>
    %147 = arith.truncf %146 : vector<16x128xf32> to vector<16x128xbf16>
    %c8_137 = arith.constant 8 : index
    %c0_138 = arith.constant 0 : index
    %c0_139 = arith.constant 0 : index
    %148 = vector.load %arg6[%c8_137, %c0_138, %c0_139] : memref<9x128x128xbf16, #tpu.memory_space<vmem>>, vector<1x128x128xbf16>
    %149 = vector.shape_cast %148 : vector<1x128x128xbf16> to vector<128x128xbf16>
    %cst_140 = arith.constant dense<0.000000e+00> : vector<16x128xf32>
    %150 = tpu.matmul %147, %149, %cst_140 {dimension_numbers = #tpu.dot_dimension_numbers<[1], [0], [0], [1], [0, 0, 1, 1], [], []>} : vector<16x128xbf16>, vector<128x128xbf16>, vector<16x128xf32> -> vector<16x128xf32>
    %151 = arith.addf %143, %150 : vector<16x128xf32>
    %c0_141 = arith.constant 0 : index
    %c0_142 = arith.constant 0 : index
    %152 = vector.load %arg7[%c0_141, %c0_142] : memref<1x128xf32, #tpu.memory_space<vmem>>, vector<1x128xf32>
    %153 = vector.broadcast %152 : vector<1x128xf32> to vector<16x128xf32>
    %154 = arith.addf %151, %153 : vector<16x128xf32>
    %cst_143 = arith.constant 0.000000e+00 : f32
    %155 = vector.broadcast %cst_143 : f32 to vector<16x128xf32>
    %156 = arith.maximumf %154, %155 : vector<16x128xf32>
    %157 = arith.truncf %156 : vector<16x128xf32> to vector<16x128xbf16>
    %cst_144 = arith.constant 0.000000e+00 : f32
    %158 = vector.broadcast %cst_144 : f32 to vector<4x128xf32>
    %c0_145 = arith.constant 0 : index
    %c0_146 = arith.constant 0 : index
    %c0_147 = arith.constant 0 : index
    %159 = vector.load %arg8[%c0_145, %c0_146, %c0_147] : memref<9x4x16xbf16, #tpu.memory_space<vmem>>, vector<1x4x16xbf16>
    %160 = vector.shape_cast %159 : vector<1x4x16xbf16> to vector<4x16xbf16>
    %cst_148 = arith.constant dense<0.000000e+00> : vector<4x128xf32>
    %161 = tpu.matmul %160, %157, %cst_148 {dimension_numbers = #tpu.dot_dimension_numbers<[1], [0], [0], [1], [0, 0, 1, 1], [], []>} : vector<4x16xbf16>, vector<16x128xbf16>, vector<4x128xf32> -> vector<4x128xf32>
    %162 = arith.truncf %161 : vector<4x128xf32> to vector<4x128xbf16>
    %c0_149 = arith.constant 0 : index
    %c0_150 = arith.constant 0 : index
    %c0_151 = arith.constant 0 : index
    %163 = vector.load %arg9[%c0_149, %c0_150, %c0_151] : memref<9x128x128xbf16, #tpu.memory_space<vmem>>, vector<1x128x128xbf16>
    %164 = vector.shape_cast %163 : vector<1x128x128xbf16> to vector<128x128xbf16>
    %cst_152 = arith.constant dense<0.000000e+00> : vector<4x128xf32>
    %165 = tpu.matmul %162, %164, %cst_152 {dimension_numbers = #tpu.dot_dimension_numbers<[1], [0], [0], [1], [0, 0, 1, 1], [], []>} : vector<4x128xbf16>, vector<128x128xbf16>, vector<4x128xf32> -> vector<4x128xf32>
    %166 = arith.addf %158, %165 : vector<4x128xf32>
    %c1_153 = arith.constant 1 : index
    %c0_154 = arith.constant 0 : index
    %c0_155 = arith.constant 0 : index
    %167 = vector.load %arg8[%c1_153, %c0_154, %c0_155] : memref<9x4x16xbf16, #tpu.memory_space<vmem>>, vector<1x4x16xbf16>
    %168 = vector.shape_cast %167 : vector<1x4x16xbf16> to vector<4x16xbf16>
    %cst_156 = arith.constant dense<0.000000e+00> : vector<4x128xf32>
    %169 = tpu.matmul %168, %157, %cst_156 {dimension_numbers = #tpu.dot_dimension_numbers<[1], [0], [0], [1], [0, 0, 1, 1], [], []>} : vector<4x16xbf16>, vector<16x128xbf16>, vector<4x128xf32> -> vector<4x128xf32>
    %170 = arith.truncf %169 : vector<4x128xf32> to vector<4x128xbf16>
    %c1_157 = arith.constant 1 : index
    %c0_158 = arith.constant 0 : index
    %c0_159 = arith.constant 0 : index
    %171 = vector.load %arg9[%c1_157, %c0_158, %c0_159] : memref<9x128x128xbf16, #tpu.memory_space<vmem>>, vector<1x128x128xbf16>
    %172 = vector.shape_cast %171 : vector<1x128x128xbf16> to vector<128x128xbf16>
    %cst_160 = arith.constant dense<0.000000e+00> : vector<4x128xf32>
    %173 = tpu.matmul %170, %172, %cst_160 {dimension_numbers = #tpu.dot_dimension_numbers<[1], [0], [0], [1], [0, 0, 1, 1], [], []>} : vector<4x128xbf16>, vector<128x128xbf16>, vector<4x128xf32> -> vector<4x128xf32>
    %174 = arith.addf %166, %173 : vector<4x128xf32>
    %c2_161 = arith.constant 2 : index
    %c0_162 = arith.constant 0 : index
    %c0_163 = arith.constant 0 : index
    %175 = vector.load %arg8[%c2_161, %c0_162, %c0_163] : memref<9x4x16xbf16, #tpu.memory_space<vmem>>, vector<1x4x16xbf16>
    %176 = vector.shape_cast %175 : vector<1x4x16xbf16> to vector<4x16xbf16>
    %cst_164 = arith.constant dense<0.000000e+00> : vector<4x128xf32>
    %177 = tpu.matmul %176, %157, %cst_164 {dimension_numbers = #tpu.dot_dimension_numbers<[1], [0], [0], [1], [0, 0, 1, 1], [], []>} : vector<4x16xbf16>, vector<16x128xbf16>, vector<4x128xf32> -> vector<4x128xf32>
    %178 = arith.truncf %177 : vector<4x128xf32> to vector<4x128xbf16>
    %c2_165 = arith.constant 2 : index
    %c0_166 = arith.constant 0 : index
    %c0_167 = arith.constant 0 : index
    %179 = vector.load %arg9[%c2_165, %c0_166, %c0_167] : memref<9x128x128xbf16, #tpu.memory_space<vmem>>, vector<1x128x128xbf16>
    %180 = vector.shape_cast %179 : vector<1x128x128xbf16> to vector<128x128xbf16>
    %cst_168 = arith.constant dense<0.000000e+00> : vector<4x128xf32>
    %181 = tpu.matmul %178, %180, %cst_168 {dimension_numbers = #tpu.dot_dimension_numbers<[1], [0], [0], [1], [0, 0, 1, 1], [], []>} : vector<4x128xbf16>, vector<128x128xbf16>, vector<4x128xf32> -> vector<4x128xf32>
    %182 = arith.addf %174, %181 : vector<4x128xf32>
    %c3_169 = arith.constant 3 : index
    %c0_170 = arith.constant 0 : index
    %c0_171 = arith.constant 0 : index
    %183 = vector.load %arg8[%c3_169, %c0_170, %c0_171] : memref<9x4x16xbf16, #tpu.memory_space<vmem>>, vector<1x4x16xbf16>
    %184 = vector.shape_cast %183 : vector<1x4x16xbf16> to vector<4x16xbf16>
    %cst_172 = arith.constant dense<0.000000e+00> : vector<4x128xf32>
    %185 = tpu.matmul %184, %157, %cst_172 {dimension_numbers = #tpu.dot_dimension_numbers<[1], [0], [0], [1], [0, 0, 1, 1], [], []>} : vector<4x16xbf16>, vector<16x128xbf16>, vector<4x128xf32> -> vector<4x128xf32>
    %186 = arith.truncf %185 : vector<4x128xf32> to vector<4x128xbf16>
    %c3_173 = arith.constant 3 : index
    %c0_174 = arith.constant 0 : index
    %c0_175 = arith.constant 0 : index
    %187 = vector.load %arg9[%c3_173, %c0_174, %c0_175] : memref<9x128x128xbf16, #tpu.memory_space<vmem>>, vector<1x128x128xbf16>
    %188 = vector.shape_cast %187 : vector<1x128x128xbf16> to vector<128x128xbf16>
    %cst_176 = arith.constant dense<0.000000e+00> : vector<4x128xf32>
    %189 = tpu.matmul %186, %188, %cst_176 {dimension_numbers = #tpu.dot_dimension_numbers<[1], [0], [0], [1], [0, 0, 1, 1], [], []>} : vector<4x128xbf16>, vector<128x128xbf16>, vector<4x128xf32> -> vector<4x128xf32>
    %190 = arith.addf %182, %189 : vector<4x128xf32>
    %c4_177 = arith.constant 4 : index
    %c0_178 = arith.constant 0 : index
    %c0_179 = arith.constant 0 : index
    %191 = vector.load %arg8[%c4_177, %c0_178, %c0_179] : memref<9x4x16xbf16, #tpu.memory_space<vmem>>, vector<1x4x16xbf16>
    %192 = vector.shape_cast %191 : vector<1x4x16xbf16> to vector<4x16xbf16>
    %cst_180 = arith.constant dense<0.000000e+00> : vector<4x128xf32>
    %193 = tpu.matmul %192, %157, %cst_180 {dimension_numbers = #tpu.dot_dimension_numbers<[1], [0], [0], [1], [0, 0, 1, 1], [], []>} : vector<4x16xbf16>, vector<16x128xbf16>, vector<4x128xf32> -> vector<4x128xf32>
    %194 = arith.truncf %193 : vector<4x128xf32> to vector<4x128xbf16>
    %c4_181 = arith.constant 4 : index
    %c0_182 = arith.constant 0 : index
    %c0_183 = arith.constant 0 : index
    %195 = vector.load %arg9[%c4_181, %c0_182, %c0_183] : memref<9x128x128xbf16, #tpu.memory_space<vmem>>, vector<1x128x128xbf16>
    %196 = vector.shape_cast %195 : vector<1x128x128xbf16> to vector<128x128xbf16>
    %cst_184 = arith.constant dense<0.000000e+00> : vector<4x128xf32>
    %197 = tpu.matmul %194, %196, %cst_184 {dimension_numbers = #tpu.dot_dimension_numbers<[1], [0], [0], [1], [0, 0, 1, 1], [], []>} : vector<4x128xbf16>, vector<128x128xbf16>, vector<4x128xf32> -> vector<4x128xf32>
    %198 = arith.addf %190, %197 : vector<4x128xf32>
    %c5_185 = arith.constant 5 : index
    %c0_186 = arith.constant 0 : index
    %c0_187 = arith.constant 0 : index
    %199 = vector.load %arg8[%c5_185, %c0_186, %c0_187] : memref<9x4x16xbf16, #tpu.memory_space<vmem>>, vector<1x4x16xbf16>
    %200 = vector.shape_cast %199 : vector<1x4x16xbf16> to vector<4x16xbf16>
    %cst_188 = arith.constant dense<0.000000e+00> : vector<4x128xf32>
    %201 = tpu.matmul %200, %157, %cst_188 {dimension_numbers = #tpu.dot_dimension_numbers<[1], [0], [0], [1], [0, 0, 1, 1], [], []>} : vector<4x16xbf16>, vector<16x128xbf16>, vector<4x128xf32> -> vector<4x128xf32>
    %202 = arith.truncf %201 : vector<4x128xf32> to vector<4x128xbf16>
    %c5_189 = arith.constant 5 : index
    %c0_190 = arith.constant 0 : index
    %c0_191 = arith.constant 0 : index
    %203 = vector.load %arg9[%c5_189, %c0_190, %c0_191] : memref<9x128x128xbf16, #tpu.memory_space<vmem>>, vector<1x128x128xbf16>
    %204 = vector.shape_cast %203 : vector<1x128x128xbf16> to vector<128x128xbf16>
    %cst_192 = arith.constant dense<0.000000e+00> : vector<4x128xf32>
    %205 = tpu.matmul %202, %204, %cst_192 {dimension_numbers = #tpu.dot_dimension_numbers<[1], [0], [0], [1], [0, 0, 1, 1], [], []>} : vector<4x128xbf16>, vector<128x128xbf16>, vector<4x128xf32> -> vector<4x128xf32>
    %206 = arith.addf %198, %205 : vector<4x128xf32>
    %c6_193 = arith.constant 6 : index
    %c0_194 = arith.constant 0 : index
    %c0_195 = arith.constant 0 : index
    %207 = vector.load %arg8[%c6_193, %c0_194, %c0_195] : memref<9x4x16xbf16, #tpu.memory_space<vmem>>, vector<1x4x16xbf16>
    %208 = vector.shape_cast %207 : vector<1x4x16xbf16> to vector<4x16xbf16>
    %cst_196 = arith.constant dense<0.000000e+00> : vector<4x128xf32>
    %209 = tpu.matmul %208, %157, %cst_196 {dimension_numbers = #tpu.dot_dimension_numbers<[1], [0], [0], [1], [0, 0, 1, 1], [], []>} : vector<4x16xbf16>, vector<16x128xbf16>, vector<4x128xf32> -> vector<4x128xf32>
    %210 = arith.truncf %209 : vector<4x128xf32> to vector<4x128xbf16>
    %c6_197 = arith.constant 6 : index
    %c0_198 = arith.constant 0 : index
    %c0_199 = arith.constant 0 : index
    %211 = vector.load %arg9[%c6_197, %c0_198, %c0_199] : memref<9x128x128xbf16, #tpu.memory_space<vmem>>, vector<1x128x128xbf16>
    %212 = vector.shape_cast %211 : vector<1x128x128xbf16> to vector<128x128xbf16>
    %cst_200 = arith.constant dense<0.000000e+00> : vector<4x128xf32>
    %213 = tpu.matmul %210, %212, %cst_200 {dimension_numbers = #tpu.dot_dimension_numbers<[1], [0], [0], [1], [0, 0, 1, 1], [], []>} : vector<4x128xbf16>, vector<128x128xbf16>, vector<4x128xf32> -> vector<4x128xf32>
    %214 = arith.addf %206, %213 : vector<4x128xf32>
    %c7_201 = arith.constant 7 : index
    %c0_202 = arith.constant 0 : index
    %c0_203 = arith.constant 0 : index
    %215 = vector.load %arg8[%c7_201, %c0_202, %c0_203] : memref<9x4x16xbf16, #tpu.memory_space<vmem>>, vector<1x4x16xbf16>
    %216 = vector.shape_cast %215 : vector<1x4x16xbf16> to vector<4x16xbf16>
    %cst_204 = arith.constant dense<0.000000e+00> : vector<4x128xf32>
    %217 = tpu.matmul %216, %157, %cst_204 {dimension_numbers = #tpu.dot_dimension_numbers<[1], [0], [0], [1], [0, 0, 1, 1], [], []>} : vector<4x16xbf16>, vector<16x128xbf16>, vector<4x128xf32> -> vector<4x128xf32>
    %218 = arith.truncf %217 : vector<4x128xf32> to vector<4x128xbf16>
    %c7_205 = arith.constant 7 : index
    %c0_206 = arith.constant 0 : index
    %c0_207 = arith.constant 0 : index
    %219 = vector.load %arg9[%c7_205, %c0_206, %c0_207] : memref<9x128x128xbf16, #tpu.memory_space<vmem>>, vector<1x128x128xbf16>
    %220 = vector.shape_cast %219 : vector<1x128x128xbf16> to vector<128x128xbf16>
    %cst_208 = arith.constant dense<0.000000e+00> : vector<4x128xf32>
    %221 = tpu.matmul %218, %220, %cst_208 {dimension_numbers = #tpu.dot_dimension_numbers<[1], [0], [0], [1], [0, 0, 1, 1], [], []>} : vector<4x128xbf16>, vector<128x128xbf16>, vector<4x128xf32> -> vector<4x128xf32>
    %222 = arith.addf %214, %221 : vector<4x128xf32>
    %c8_209 = arith.constant 8 : index
    %c0_210 = arith.constant 0 : index
    %c0_211 = arith.constant 0 : index
    %223 = vector.load %arg8[%c8_209, %c0_210, %c0_211] : memref<9x4x16xbf16, #tpu.memory_space<vmem>>, vector<1x4x16xbf16>
    %224 = vector.shape_cast %223 : vector<1x4x16xbf16> to vector<4x16xbf16>
    %cst_212 = arith.constant dense<0.000000e+00> : vector<4x128xf32>
    %225 = tpu.matmul %224, %157, %cst_212 {dimension_numbers = #tpu.dot_dimension_numbers<[1], [0], [0], [1], [0, 0, 1, 1], [], []>} : vector<4x16xbf16>, vector<16x128xbf16>, vector<4x128xf32> -> vector<4x128xf32>
    %226 = arith.truncf %225 : vector<4x128xf32> to vector<4x128xbf16>
    %c8_213 = arith.constant 8 : index
    %c0_214 = arith.constant 0 : index
    %c0_215 = arith.constant 0 : index
    %227 = vector.load %arg9[%c8_213, %c0_214, %c0_215] : memref<9x128x128xbf16, #tpu.memory_space<vmem>>, vector<1x128x128xbf16>
    %228 = vector.shape_cast %227 : vector<1x128x128xbf16> to vector<128x128xbf16>
    %cst_216 = arith.constant dense<0.000000e+00> : vector<4x128xf32>
    %229 = tpu.matmul %226, %228, %cst_216 {dimension_numbers = #tpu.dot_dimension_numbers<[1], [0], [0], [1], [0, 0, 1, 1], [], []>} : vector<4x128xbf16>, vector<128x128xbf16>, vector<4x128xf32> -> vector<4x128xf32>
    %230 = arith.addf %222, %229 : vector<4x128xf32>
    %c0_217 = arith.constant 0 : index
    %c0_218 = arith.constant 0 : index
    %231 = vector.load %arg10[%c0_217, %c0_218] : memref<1x128xf32, #tpu.memory_space<vmem>>, vector<1x128xf32>
    %232 = vector.broadcast %231 : vector<1x128xf32> to vector<4x128xf32>
    %233 = arith.addf %230, %232 : vector<4x128xf32>
    %cst_219 = arith.constant 0.000000e+00 : f32
    %234 = vector.broadcast %cst_219 : f32 to vector<4x128xf32>
    %235 = arith.maximumf %233, %234 : vector<4x128xf32>
    %236 = arith.truncf %235 : vector<4x128xf32> to vector<4x128xbf16>
    %cst_220 = arith.constant 0.000000e+00 : f32
    %237 = vector.broadcast %cst_220 : f32 to vector<16x128xf32>
    %c0_221 = arith.constant 0 : index
    %c0_222 = arith.constant 0 : index
    %c0_223 = arith.constant 0 : index
    %238 = vector.load %arg11[%c0_221, %c0_222, %c0_223] : memref<9x16x4xbf16, #tpu.memory_space<vmem>>, vector<1x16x4xbf16>
    %239 = vector.shape_cast %238 : vector<1x16x4xbf16> to vector<16x4xbf16>
    %cst_224 = arith.constant dense<0.000000e+00> : vector<16x128xf32>
    %240 = tpu.matmul %239, %236, %cst_224 {dimension_numbers = #tpu.dot_dimension_numbers<[1], [0], [0], [1], [0, 0, 1, 1], [], []>} : vector<16x4xbf16>, vector<4x128xbf16>, vector<16x128xf32> -> vector<16x128xf32>
    %241 = arith.truncf %240 : vector<16x128xf32> to vector<16x128xbf16>
    %c0_225 = arith.constant 0 : index
    %c0_226 = arith.constant 0 : index
    %c0_227 = arith.constant 0 : index
    %242 = vector.load %arg12[%c0_225, %c0_226, %c0_227] : memref<9x128x128xbf16, #tpu.memory_space<vmem>>, vector<1x128x128xbf16>
    %243 = vector.shape_cast %242 : vector<1x128x128xbf16> to vector<128x128xbf16>
    %cst_228 = arith.constant dense<0.000000e+00> : vector<16x128xf32>
    %244 = tpu.matmul %241, %243, %cst_228 {dimension_numbers = #tpu.dot_dimension_numbers<[1], [0], [0], [1], [0, 0, 1, 1], [], []>} : vector<16x128xbf16>, vector<128x128xbf16>, vector<16x128xf32> -> vector<16x128xf32>
    %245 = arith.addf %237, %244 : vector<16x128xf32>
    %c1_229 = arith.constant 1 : index
    %c0_230 = arith.constant 0 : index
    %c0_231 = arith.constant 0 : index
    %246 = vector.load %arg11[%c1_229, %c0_230, %c0_231] : memref<9x16x4xbf16, #tpu.memory_space<vmem>>, vector<1x16x4xbf16>
    %247 = vector.shape_cast %246 : vector<1x16x4xbf16> to vector<16x4xbf16>
    %cst_232 = arith.constant dense<0.000000e+00> : vector<16x128xf32>
    %248 = tpu.matmul %247, %236, %cst_232 {dimension_numbers = #tpu.dot_dimension_numbers<[1], [0], [0], [1], [0, 0, 1, 1], [], []>} : vector<16x4xbf16>, vector<4x128xbf16>, vector<16x128xf32> -> vector<16x128xf32>
    %249 = arith.truncf %248 : vector<16x128xf32> to vector<16x128xbf16>
    %c1_233 = arith.constant 1 : index
    %c0_234 = arith.constant 0 : index
    %c0_235 = arith.constant 0 : index
    %250 = vector.load %arg12[%c1_233, %c0_234, %c0_235] : memref<9x128x128xbf16, #tpu.memory_space<vmem>>, vector<1x128x128xbf16>
    %251 = vector.shape_cast %250 : vector<1x128x128xbf16> to vector<128x128xbf16>
    %cst_236 = arith.constant dense<0.000000e+00> : vector<16x128xf32>
    %252 = tpu.matmul %249, %251, %cst_236 {dimension_numbers = #tpu.dot_dimension_numbers<[1], [0], [0], [1], [0, 0, 1, 1], [], []>} : vector<16x128xbf16>, vector<128x128xbf16>, vector<16x128xf32> -> vector<16x128xf32>
    %253 = arith.addf %245, %252 : vector<16x128xf32>
    %c2_237 = arith.constant 2 : index
    %c0_238 = arith.constant 0 : index
    %c0_239 = arith.constant 0 : index
    %254 = vector.load %arg11[%c2_237, %c0_238, %c0_239] : memref<9x16x4xbf16, #tpu.memory_space<vmem>>, vector<1x16x4xbf16>
    %255 = vector.shape_cast %254 : vector<1x16x4xbf16> to vector<16x4xbf16>
    %cst_240 = arith.constant dense<0.000000e+00> : vector<16x128xf32>
    %256 = tpu.matmul %255, %236, %cst_240 {dimension_numbers = #tpu.dot_dimension_numbers<[1], [0], [0], [1], [0, 0, 1, 1], [], []>} : vector<16x4xbf16>, vector<4x128xbf16>, vector<16x128xf32> -> vector<16x128xf32>
    %257 = arith.truncf %256 : vector<16x128xf32> to vector<16x128xbf16>
    %c2_241 = arith.constant 2 : index
    %c0_242 = arith.constant 0 : index
    %c0_243 = arith.constant 0 : index
    %258 = vector.load %arg12[%c2_241, %c0_242, %c0_243] : memref<9x128x128xbf16, #tpu.memory_space<vmem>>, vector<1x128x128xbf16>
    %259 = vector.shape_cast %258 : vector<1x128x128xbf16> to vector<128x128xbf16>
    %cst_244 = arith.constant dense<0.000000e+00> : vector<16x128xf32>
    %260 = tpu.matmul %257, %259, %cst_244 {dimension_numbers = #tpu.dot_dimension_numbers<[1], [0], [0], [1], [0, 0, 1, 1], [], []>} : vector<16x128xbf16>, vector<128x128xbf16>, vector<16x128xf32> -> vector<16x128xf32>
    %261 = arith.addf %253, %260 : vector<16x128xf32>
    %c3_245 = arith.constant 3 : index
    %c0_246 = arith.constant 0 : index
    %c0_247 = arith.constant 0 : index
    %262 = vector.load %arg11[%c3_245, %c0_246, %c0_247] : memref<9x16x4xbf16, #tpu.memory_space<vmem>>, vector<1x16x4xbf16>
    %263 = vector.shape_cast %262 : vector<1x16x4xbf16> to vector<16x4xbf16>
    %cst_248 = arith.constant dense<0.000000e+00> : vector<16x128xf32>
    %264 = tpu.matmul %263, %236, %cst_248 {dimension_numbers = #tpu.dot_dimension_numbers<[1], [0], [0], [1], [0, 0, 1, 1], [], []>} : vector<16x4xbf16>, vector<4x128xbf16>, vector<16x128xf32> -> vector<16x128xf32>
    %265 = arith.truncf %264 : vector<16x128xf32> to vector<16x128xbf16>
    %c3_249 = arith.constant 3 : index
    %c0_250 = arith.constant 0 : index
    %c0_251 = arith.constant 0 : index
    %266 = vector.load %arg12[%c3_249, %c0_250, %c0_251] : memref<9x128x128xbf16, #tpu.memory_space<vmem>>, vector<1x128x128xbf16>
    %267 = vector.shape_cast %266 : vector<1x128x128xbf16> to vector<128x128xbf16>
    %cst_252 = arith.constant dense<0.000000e+00> : vector<16x128xf32>
    %268 = tpu.matmul %265, %267, %cst_252 {dimension_numbers = #tpu.dot_dimension_numbers<[1], [0], [0], [1], [0, 0, 1, 1], [], []>} : vector<16x128xbf16>, vector<128x128xbf16>, vector<16x128xf32> -> vector<16x128xf32>
    %269 = arith.addf %261, %268 : vector<16x128xf32>
    %c4_253 = arith.constant 4 : index
    %c0_254 = arith.constant 0 : index
    %c0_255 = arith.constant 0 : index
    %270 = vector.load %arg11[%c4_253, %c0_254, %c0_255] : memref<9x16x4xbf16, #tpu.memory_space<vmem>>, vector<1x16x4xbf16>
    %271 = vector.shape_cast %270 : vector<1x16x4xbf16> to vector<16x4xbf16>
    %cst_256 = arith.constant dense<0.000000e+00> : vector<16x128xf32>
    %272 = tpu.matmul %271, %236, %cst_256 {dimension_numbers = #tpu.dot_dimension_numbers<[1], [0], [0], [1], [0, 0, 1, 1], [], []>} : vector<16x4xbf16>, vector<4x128xbf16>, vector<16x128xf32> -> vector<16x128xf32>
    %273 = arith.truncf %272 : vector<16x128xf32> to vector<16x128xbf16>
    %c4_257 = arith.constant 4 : index
    %c0_258 = arith.constant 0 : index
    %c0_259 = arith.constant 0 : index
    %274 = vector.load %arg12[%c4_257, %c0_258, %c0_259] : memref<9x128x128xbf16, #tpu.memory_space<vmem>>, vector<1x128x128xbf16>
    %275 = vector.shape_cast %274 : vector<1x128x128xbf16> to vector<128x128xbf16>
    %cst_260 = arith.constant dense<0.000000e+00> : vector<16x128xf32>
    %276 = tpu.matmul %273, %275, %cst_260 {dimension_numbers = #tpu.dot_dimension_numbers<[1], [0], [0], [1], [0, 0, 1, 1], [], []>} : vector<16x128xbf16>, vector<128x128xbf16>, vector<16x128xf32> -> vector<16x128xf32>
    %277 = arith.addf %269, %276 : vector<16x128xf32>
    %c5_261 = arith.constant 5 : index
    %c0_262 = arith.constant 0 : index
    %c0_263 = arith.constant 0 : index
    %278 = vector.load %arg11[%c5_261, %c0_262, %c0_263] : memref<9x16x4xbf16, #tpu.memory_space<vmem>>, vector<1x16x4xbf16>
    %279 = vector.shape_cast %278 : vector<1x16x4xbf16> to vector<16x4xbf16>
    %cst_264 = arith.constant dense<0.000000e+00> : vector<16x128xf32>
    %280 = tpu.matmul %279, %236, %cst_264 {dimension_numbers = #tpu.dot_dimension_numbers<[1], [0], [0], [1], [0, 0, 1, 1], [], []>} : vector<16x4xbf16>, vector<4x128xbf16>, vector<16x128xf32> -> vector<16x128xf32>
    %281 = arith.truncf %280 : vector<16x128xf32> to vector<16x128xbf16>
    %c5_265 = arith.constant 5 : index
    %c0_266 = arith.constant 0 : index
    %c0_267 = arith.constant 0 : index
    %282 = vector.load %arg12[%c5_265, %c0_266, %c0_267] : memref<9x128x128xbf16, #tpu.memory_space<vmem>>, vector<1x128x128xbf16>
    %283 = vector.shape_cast %282 : vector<1x128x128xbf16> to vector<128x128xbf16>
    %cst_268 = arith.constant dense<0.000000e+00> : vector<16x128xf32>
    %284 = tpu.matmul %281, %283, %cst_268 {dimension_numbers = #tpu.dot_dimension_numbers<[1], [0], [0], [1], [0, 0, 1, 1], [], []>} : vector<16x128xbf16>, vector<128x128xbf16>, vector<16x128xf32> -> vector<16x128xf32>
    %285 = arith.addf %277, %284 : vector<16x128xf32>
    %c6_269 = arith.constant 6 : index
    %c0_270 = arith.constant 0 : index
    %c0_271 = arith.constant 0 : index
    %286 = vector.load %arg11[%c6_269, %c0_270, %c0_271] : memref<9x16x4xbf16, #tpu.memory_space<vmem>>, vector<1x16x4xbf16>
    %287 = vector.shape_cast %286 : vector<1x16x4xbf16> to vector<16x4xbf16>
    %cst_272 = arith.constant dense<0.000000e+00> : vector<16x128xf32>
    %288 = tpu.matmul %287, %236, %cst_272 {dimension_numbers = #tpu.dot_dimension_numbers<[1], [0], [0], [1], [0, 0, 1, 1], [], []>} : vector<16x4xbf16>, vector<4x128xbf16>, vector<16x128xf32> -> vector<16x128xf32>
    %289 = arith.truncf %288 : vector<16x128xf32> to vector<16x128xbf16>
    %c6_273 = arith.constant 6 : index
    %c0_274 = arith.constant 0 : index
    %c0_275 = arith.constant 0 : index
    %290 = vector.load %arg12[%c6_273, %c0_274, %c0_275] : memref<9x128x128xbf16, #tpu.memory_space<vmem>>, vector<1x128x128xbf16>
    %291 = vector.shape_cast %290 : vector<1x128x128xbf16> to vector<128x128xbf16>
    %cst_276 = arith.constant dense<0.000000e+00> : vector<16x128xf32>
    %292 = tpu.matmul %289, %291, %cst_276 {dimension_numbers = #tpu.dot_dimension_numbers<[1], [0], [0], [1], [0, 0, 1, 1], [], []>} : vector<16x128xbf16>, vector<128x128xbf16>, vector<16x128xf32> -> vector<16x128xf32>
    %293 = arith.addf %285, %292 : vector<16x128xf32>
    %c7_277 = arith.constant 7 : index
    %c0_278 = arith.constant 0 : index
    %c0_279 = arith.constant 0 : index
    %294 = vector.load %arg11[%c7_277, %c0_278, %c0_279] : memref<9x16x4xbf16, #tpu.memory_space<vmem>>, vector<1x16x4xbf16>
    %295 = vector.shape_cast %294 : vector<1x16x4xbf16> to vector<16x4xbf16>
    %cst_280 = arith.constant dense<0.000000e+00> : vector<16x128xf32>
    %296 = tpu.matmul %295, %236, %cst_280 {dimension_numbers = #tpu.dot_dimension_numbers<[1], [0], [0], [1], [0, 0, 1, 1], [], []>} : vector<16x4xbf16>, vector<4x128xbf16>, vector<16x128xf32> -> vector<16x128xf32>
    %297 = arith.truncf %296 : vector<16x128xf32> to vector<16x128xbf16>
    %c7_281 = arith.constant 7 : index
    %c0_282 = arith.constant 0 : index
    %c0_283 = arith.constant 0 : index
    %298 = vector.load %arg12[%c7_281, %c0_282, %c0_283] : memref<9x128x128xbf16, #tpu.memory_space<vmem>>, vector<1x128x128xbf16>
    %299 = vector.shape_cast %298 : vector<1x128x128xbf16> to vector<128x128xbf16>
    %cst_284 = arith.constant dense<0.000000e+00> : vector<16x128xf32>
    %300 = tpu.matmul %297, %299, %cst_284 {dimension_numbers = #tpu.dot_dimension_numbers<[1], [0], [0], [1], [0, 0, 1, 1], [], []>} : vector<16x128xbf16>, vector<128x128xbf16>, vector<16x128xf32> -> vector<16x128xf32>
    %301 = arith.addf %293, %300 : vector<16x128xf32>
    %c8_285 = arith.constant 8 : index
    %c0_286 = arith.constant 0 : index
    %c0_287 = arith.constant 0 : index
    %302 = vector.load %arg11[%c8_285, %c0_286, %c0_287] : memref<9x16x4xbf16, #tpu.memory_space<vmem>>, vector<1x16x4xbf16>
    %303 = vector.shape_cast %302 : vector<1x16x4xbf16> to vector<16x4xbf16>
    %cst_288 = arith.constant dense<0.000000e+00> : vector<16x128xf32>
    %304 = tpu.matmul %303, %236, %cst_288 {dimension_numbers = #tpu.dot_dimension_numbers<[1], [0], [0], [1], [0, 0, 1, 1], [], []>} : vector<16x4xbf16>, vector<4x128xbf16>, vector<16x128xf32> -> vector<16x128xf32>
    %305 = arith.truncf %304 : vector<16x128xf32> to vector<16x128xbf16>
    %c8_289 = arith.constant 8 : index
    %c0_290 = arith.constant 0 : index
    %c0_291 = arith.constant 0 : index
    %306 = vector.load %arg12[%c8_289, %c0_290, %c0_291] : memref<9x128x128xbf16, #tpu.memory_space<vmem>>, vector<1x128x128xbf16>
    %307 = vector.shape_cast %306 : vector<1x128x128xbf16> to vector<128x128xbf16>
    %cst_292 = arith.constant dense<0.000000e+00> : vector<16x128xf32>
    %308 = tpu.matmul %305, %307, %cst_292 {dimension_numbers = #tpu.dot_dimension_numbers<[1], [0], [0], [1], [0, 0, 1, 1], [], []>} : vector<16x128xbf16>, vector<128x128xbf16>, vector<16x128xf32> -> vector<16x128xf32>
    %309 = arith.addf %301, %308 : vector<16x128xf32>
    %c0_293 = arith.constant 0 : index
    %c0_294 = arith.constant 0 : index
    %310 = vector.load %arg13[%c0_293, %c0_294] : memref<1x128xf32, #tpu.memory_space<vmem>>, vector<1x128xf32>
    %311 = vector.broadcast %310 : vector<1x128xf32> to vector<16x128xf32>
    %312 = arith.addf %309, %311 : vector<16x128xf32>
    %313 = arith.truncf %312 : vector<16x128xf32> to vector<16x128xbf16>
    %cst_295 = arith.constant 0.000000e+00 : f32
    %314 = vector.broadcast %cst_295 : f32 to vector<64x128xf32>
    %c0_296 = arith.constant 0 : index
    %c0_297 = arith.constant 0 : index
    %c0_298 = arith.constant 0 : index
    %315 = vector.load %arg14[%c0_296, %c0_297, %c0_298] : memref<9x64x16xbf16, #tpu.memory_space<vmem>>, vector<1x64x16xbf16>
    %316 = vector.shape_cast %315 : vector<1x64x16xbf16> to vector<64x16xbf16>
    %cst_299 = arith.constant dense<0.000000e+00> : vector<64x128xf32>
    %317 = tpu.matmul %316, %313, %cst_299 {dimension_numbers = #tpu.dot_dimension_numbers<[1], [0], [0], [1], [0, 0, 1, 1], [], []>} : vector<64x16xbf16>, vector<16x128xbf16>, vector<64x128xf32> -> vector<64x128xf32>
    %318 = arith.truncf %317 : vector<64x128xf32> to vector<64x128xbf16>
    %c0_300 = arith.constant 0 : index
    %c0_301 = arith.constant 0 : index
    %c0_302 = arith.constant 0 : index
    %319 = vector.load %arg15[%c0_300, %c0_301, %c0_302] : memref<9x128x128xbf16, #tpu.memory_space<vmem>>, vector<1x128x128xbf16>
    %320 = vector.shape_cast %319 : vector<1x128x128xbf16> to vector<128x128xbf16>
    %cst_303 = arith.constant dense<0.000000e+00> : vector<64x128xf32>
    %321 = tpu.matmul %318, %320, %cst_303 {dimension_numbers = #tpu.dot_dimension_numbers<[1], [0], [0], [1], [0, 0, 1, 1], [], []>} : vector<64x128xbf16>, vector<128x128xbf16>, vector<64x128xf32> -> vector<64x128xf32>
    %322 = arith.addf %314, %321 : vector<64x128xf32>
    %c1_304 = arith.constant 1 : index
    %c0_305 = arith.constant 0 : index
    %c0_306 = arith.constant 0 : index
    %323 = vector.load %arg14[%c1_304, %c0_305, %c0_306] : memref<9x64x16xbf16, #tpu.memory_space<vmem>>, vector<1x64x16xbf16>
    %324 = vector.shape_cast %323 : vector<1x64x16xbf16> to vector<64x16xbf16>
    %cst_307 = arith.constant dense<0.000000e+00> : vector<64x128xf32>
    %325 = tpu.matmul %324, %313, %cst_307 {dimension_numbers = #tpu.dot_dimension_numbers<[1], [0], [0], [1], [0, 0, 1, 1], [], []>} : vector<64x16xbf16>, vector<16x128xbf16>, vector<64x128xf32> -> vector<64x128xf32>
    %326 = arith.truncf %325 : vector<64x128xf32> to vector<64x128xbf16>
    %c1_308 = arith.constant 1 : index
    %c0_309 = arith.constant 0 : index
    %c0_310 = arith.constant 0 : index
    %327 = vector.load %arg15[%c1_308, %c0_309, %c0_310] : memref<9x128x128xbf16, #tpu.memory_space<vmem>>, vector<1x128x128xbf16>
    %328 = vector.shape_cast %327 : vector<1x128x128xbf16> to vector<128x128xbf16>
    %cst_311 = arith.constant dense<0.000000e+00> : vector<64x128xf32>
    %329 = tpu.matmul %326, %328, %cst_311 {dimension_numbers = #tpu.dot_dimension_numbers<[1], [0], [0], [1], [0, 0, 1, 1], [], []>} : vector<64x128xbf16>, vector<128x128xbf16>, vector<64x128xf32> -> vector<64x128xf32>
    %330 = arith.addf %322, %329 : vector<64x128xf32>
    %c2_312 = arith.constant 2 : index
    %c0_313 = arith.constant 0 : index
    %c0_314 = arith.constant 0 : index
    %331 = vector.load %arg14[%c2_312, %c0_313, %c0_314] : memref<9x64x16xbf16, #tpu.memory_space<vmem>>, vector<1x64x16xbf16>
    %332 = vector.shape_cast %331 : vector<1x64x16xbf16> to vector<64x16xbf16>
    %cst_315 = arith.constant dense<0.000000e+00> : vector<64x128xf32>
    %333 = tpu.matmul %332, %313, %cst_315 {dimension_numbers = #tpu.dot_dimension_numbers<[1], [0], [0], [1], [0, 0, 1, 1], [], []>} : vector<64x16xbf16>, vector<16x128xbf16>, vector<64x128xf32> -> vector<64x128xf32>
    %334 = arith.truncf %333 : vector<64x128xf32> to vector<64x128xbf16>
    %c2_316 = arith.constant 2 : index
    %c0_317 = arith.constant 0 : index
    %c0_318 = arith.constant 0 : index
    %335 = vector.load %arg15[%c2_316, %c0_317, %c0_318] : memref<9x128x128xbf16, #tpu.memory_space<vmem>>, vector<1x128x128xbf16>
    %336 = vector.shape_cast %335 : vector<1x128x128xbf16> to vector<128x128xbf16>
    %cst_319 = arith.constant dense<0.000000e+00> : vector<64x128xf32>
    %337 = tpu.matmul %334, %336, %cst_319 {dimension_numbers = #tpu.dot_dimension_numbers<[1], [0], [0], [1], [0, 0, 1, 1], [], []>} : vector<64x128xbf16>, vector<128x128xbf16>, vector<64x128xf32> -> vector<64x128xf32>
    %338 = arith.addf %330, %337 : vector<64x128xf32>
    %c3_320 = arith.constant 3 : index
    %c0_321 = arith.constant 0 : index
    %c0_322 = arith.constant 0 : index
    %339 = vector.load %arg14[%c3_320, %c0_321, %c0_322] : memref<9x64x16xbf16, #tpu.memory_space<vmem>>, vector<1x64x16xbf16>
    %340 = vector.shape_cast %339 : vector<1x64x16xbf16> to vector<64x16xbf16>
    %cst_323 = arith.constant dense<0.000000e+00> : vector<64x128xf32>
    %341 = tpu.matmul %340, %313, %cst_323 {dimension_numbers = #tpu.dot_dimension_numbers<[1], [0], [0], [1], [0, 0, 1, 1], [], []>} : vector<64x16xbf16>, vector<16x128xbf16>, vector<64x128xf32> -> vector<64x128xf32>
    %342 = arith.truncf %341 : vector<64x128xf32> to vector<64x128xbf16>
    %c3_324 = arith.constant 3 : index
    %c0_325 = arith.constant 0 : index
    %c0_326 = arith.constant 0 : index
    %343 = vector.load %arg15[%c3_324, %c0_325, %c0_326] : memref<9x128x128xbf16, #tpu.memory_space<vmem>>, vector<1x128x128xbf16>
    %344 = vector.shape_cast %343 : vector<1x128x128xbf16> to vector<128x128xbf16>
    %cst_327 = arith.constant dense<0.000000e+00> : vector<64x128xf32>
    %345 = tpu.matmul %342, %344, %cst_327 {dimension_numbers = #tpu.dot_dimension_numbers<[1], [0], [0], [1], [0, 0, 1, 1], [], []>} : vector<64x128xbf16>, vector<128x128xbf16>, vector<64x128xf32> -> vector<64x128xf32>
    %346 = arith.addf %338, %345 : vector<64x128xf32>
    %c4_328 = arith.constant 4 : index
    %c0_329 = arith.constant 0 : index
    %c0_330 = arith.constant 0 : index
    %347 = vector.load %arg14[%c4_328, %c0_329, %c0_330] : memref<9x64x16xbf16, #tpu.memory_space<vmem>>, vector<1x64x16xbf16>
    %348 = vector.shape_cast %347 : vector<1x64x16xbf16> to vector<64x16xbf16>
    %cst_331 = arith.constant dense<0.000000e+00> : vector<64x128xf32>
    %349 = tpu.matmul %348, %313, %cst_331 {dimension_numbers = #tpu.dot_dimension_numbers<[1], [0], [0], [1], [0, 0, 1, 1], [], []>} : vector<64x16xbf16>, vector<16x128xbf16>, vector<64x128xf32> -> vector<64x128xf32>
    %350 = arith.truncf %349 : vector<64x128xf32> to vector<64x128xbf16>
    %c4_332 = arith.constant 4 : index
    %c0_333 = arith.constant 0 : index
    %c0_334 = arith.constant 0 : index
    %351 = vector.load %arg15[%c4_332, %c0_333, %c0_334] : memref<9x128x128xbf16, #tpu.memory_space<vmem>>, vector<1x128x128xbf16>
    %352 = vector.shape_cast %351 : vector<1x128x128xbf16> to vector<128x128xbf16>
    %cst_335 = arith.constant dense<0.000000e+00> : vector<64x128xf32>
    %353 = tpu.matmul %350, %352, %cst_335 {dimension_numbers = #tpu.dot_dimension_numbers<[1], [0], [0], [1], [0, 0, 1, 1], [], []>} : vector<64x128xbf16>, vector<128x128xbf16>, vector<64x128xf32> -> vector<64x128xf32>
    %354 = arith.addf %346, %353 : vector<64x128xf32>
    %c5_336 = arith.constant 5 : index
    %c0_337 = arith.constant 0 : index
    %c0_338 = arith.constant 0 : index
    %355 = vector.load %arg14[%c5_336, %c0_337, %c0_338] : memref<9x64x16xbf16, #tpu.memory_space<vmem>>, vector<1x64x16xbf16>
    %356 = vector.shape_cast %355 : vector<1x64x16xbf16> to vector<64x16xbf16>
    %cst_339 = arith.constant dense<0.000000e+00> : vector<64x128xf32>
    %357 = tpu.matmul %356, %313, %cst_339 {dimension_numbers = #tpu.dot_dimension_numbers<[1], [0], [0], [1], [0, 0, 1, 1], [], []>} : vector<64x16xbf16>, vector<16x128xbf16>, vector<64x128xf32> -> vector<64x128xf32>
    %358 = arith.truncf %357 : vector<64x128xf32> to vector<64x128xbf16>
    %c5_340 = arith.constant 5 : index
    %c0_341 = arith.constant 0 : index
    %c0_342 = arith.constant 0 : index
    %359 = vector.load %arg15[%c5_340, %c0_341, %c0_342] : memref<9x128x128xbf16, #tpu.memory_space<vmem>>, vector<1x128x128xbf16>
    %360 = vector.shape_cast %359 : vector<1x128x128xbf16> to vector<128x128xbf16>
    %cst_343 = arith.constant dense<0.000000e+00> : vector<64x128xf32>
    %361 = tpu.matmul %358, %360, %cst_343 {dimension_numbers = #tpu.dot_dimension_numbers<[1], [0], [0], [1], [0, 0, 1, 1], [], []>} : vector<64x128xbf16>, vector<128x128xbf16>, vector<64x128xf32> -> vector<64x128xf32>
    %362 = arith.addf %354, %361 : vector<64x128xf32>
    %c6_344 = arith.constant 6 : index
    %c0_345 = arith.constant 0 : index
    %c0_346 = arith.constant 0 : index
    %363 = vector.load %arg14[%c6_344, %c0_345, %c0_346] : memref<9x64x16xbf16, #tpu.memory_space<vmem>>, vector<1x64x16xbf16>
    %364 = vector.shape_cast %363 : vector<1x64x16xbf16> to vector<64x16xbf16>
    %cst_347 = arith.constant dense<0.000000e+00> : vector<64x128xf32>
    %365 = tpu.matmul %364, %313, %cst_347 {dimension_numbers = #tpu.dot_dimension_numbers<[1], [0], [0], [1], [0, 0, 1, 1], [], []>} : vector<64x16xbf16>, vector<16x128xbf16>, vector<64x128xf32> -> vector<64x128xf32>
    %366 = arith.truncf %365 : vector<64x128xf32> to vector<64x128xbf16>
    %c6_348 = arith.constant 6 : index
    %c0_349 = arith.constant 0 : index
    %c0_350 = arith.constant 0 : index
    %367 = vector.load %arg15[%c6_348, %c0_349, %c0_350] : memref<9x128x128xbf16, #tpu.memory_space<vmem>>, vector<1x128x128xbf16>
    %368 = vector.shape_cast %367 : vector<1x128x128xbf16> to vector<128x128xbf16>
    %cst_351 = arith.constant dense<0.000000e+00> : vector<64x128xf32>
    %369 = tpu.matmul %366, %368, %cst_351 {dimension_numbers = #tpu.dot_dimension_numbers<[1], [0], [0], [1], [0, 0, 1, 1], [], []>} : vector<64x128xbf16>, vector<128x128xbf16>, vector<64x128xf32> -> vector<64x128xf32>
    %370 = arith.addf %362, %369 : vector<64x128xf32>
    %c7_352 = arith.constant 7 : index
    %c0_353 = arith.constant 0 : index
    %c0_354 = arith.constant 0 : index
    %371 = vector.load %arg14[%c7_352, %c0_353, %c0_354] : memref<9x64x16xbf16, #tpu.memory_space<vmem>>, vector<1x64x16xbf16>
    %372 = vector.shape_cast %371 : vector<1x64x16xbf16> to vector<64x16xbf16>
    %cst_355 = arith.constant dense<0.000000e+00> : vector<64x128xf32>
    %373 = tpu.matmul %372, %313, %cst_355 {dimension_numbers = #tpu.dot_dimension_numbers<[1], [0], [0], [1], [0, 0, 1, 1], [], []>} : vector<64x16xbf16>, vector<16x128xbf16>, vector<64x128xf32> -> vector<64x128xf32>
    %374 = arith.truncf %373 : vector<64x128xf32> to vector<64x128xbf16>
    %c7_356 = arith.constant 7 : index
    %c0_357 = arith.constant 0 : index
    %c0_358 = arith.constant 0 : index
    %375 = vector.load %arg15[%c7_356, %c0_357, %c0_358] : memref<9x128x128xbf16, #tpu.memory_space<vmem>>, vector<1x128x128xbf16>
    %376 = vector.shape_cast %375 : vector<1x128x128xbf16> to vector<128x128xbf16>
    %cst_359 = arith.constant dense<0.000000e+00> : vector<64x128xf32>
    %377 = tpu.matmul %374, %376, %cst_359 {dimension_numbers = #tpu.dot_dimension_numbers<[1], [0], [0], [1], [0, 0, 1, 1], [], []>} : vector<64x128xbf16>, vector<128x128xbf16>, vector<64x128xf32> -> vector<64x128xf32>
    %378 = arith.addf %370, %377 : vector<64x128xf32>
    %c8_360 = arith.constant 8 : index
    %c0_361 = arith.constant 0 : index
    %c0_362 = arith.constant 0 : index
    %379 = vector.load %arg14[%c8_360, %c0_361, %c0_362] : memref<9x64x16xbf16, #tpu.memory_space<vmem>>, vector<1x64x16xbf16>
    %380 = vector.shape_cast %379 : vector<1x64x16xbf16> to vector<64x16xbf16>
    %cst_363 = arith.constant dense<0.000000e+00> : vector<64x128xf32>
    %381 = tpu.matmul %380, %313, %cst_363 {dimension_numbers = #tpu.dot_dimension_numbers<[1], [0], [0], [1], [0, 0, 1, 1], [], []>} : vector<64x16xbf16>, vector<16x128xbf16>, vector<64x128xf32> -> vector<64x128xf32>
    %382 = arith.truncf %381 : vector<64x128xf32> to vector<64x128xbf16>
    %c8_364 = arith.constant 8 : index
    %c0_365 = arith.constant 0 : index
    %c0_366 = arith.constant 0 : index
    %383 = vector.load %arg15[%c8_364, %c0_365, %c0_366] : memref<9x128x128xbf16, #tpu.memory_space<vmem>>, vector<1x128x128xbf16>
    %384 = vector.shape_cast %383 : vector<1x128x128xbf16> to vector<128x128xbf16>
    %cst_367 = arith.constant dense<0.000000e+00> : vector<64x128xf32>
    %385 = tpu.matmul %382, %384, %cst_367 {dimension_numbers = #tpu.dot_dimension_numbers<[1], [0], [0], [1], [0, 0, 1, 1], [], []>} : vector<64x128xbf16>, vector<128x128xbf16>, vector<64x128xf32> -> vector<64x128xf32>
    %386 = arith.addf %378, %385 : vector<64x128xf32>
    %c0_368 = arith.constant 0 : index
    %c0_369 = arith.constant 0 : index
    %387 = vector.load %arg16[%c0_368, %c0_369] : memref<1x128xf32, #tpu.memory_space<vmem>>, vector<1x128xf32>
    %388 = vector.broadcast %387 : vector<1x128xf32> to vector<64x128xf32>
    %389 = arith.addf %386, %388 : vector<64x128xf32>
    %cst_370 = arith.constant 0.000000e+00 : f32
    %390 = vector.broadcast %cst_370 : f32 to vector<64x128xf32>
    %391 = arith.maximumf %389, %390 : vector<64x128xf32>
    %392 = arith.truncf %391 : vector<64x128xf32> to vector<64x128xbf16>
    %cst_371 = arith.constant 0.000000e+00 : f32
    %393 = vector.broadcast %cst_371 : f32 to vector<256x128xf32>
    %c0_372 = arith.constant 0 : index
    %c0_373 = arith.constant 0 : index
    %c0_374 = arith.constant 0 : index
    %394 = vector.load %arg17[%c0_372, %c0_373, %c0_374] : memref<9x256x64xbf16, #tpu.memory_space<vmem>>, vector<1x256x64xbf16>
    %395 = vector.shape_cast %394 : vector<1x256x64xbf16> to vector<256x64xbf16>
    %cst_375 = arith.constant dense<0.000000e+00> : vector<256x128xf32>
    %396 = tpu.matmul %395, %392, %cst_375 {dimension_numbers = #tpu.dot_dimension_numbers<[1], [0], [0], [1], [0, 0, 1, 1], [], []>} : vector<256x64xbf16>, vector<64x128xbf16>, vector<256x128xf32> -> vector<256x128xf32>
    %397 = arith.truncf %396 : vector<256x128xf32> to vector<256x128xbf16>
    %c0_376 = arith.constant 0 : index
    %c0_377 = arith.constant 0 : index
    %c0_378 = arith.constant 0 : index
    %398 = vector.load %arg18[%c0_376, %c0_377, %c0_378] : memref<9x128x128xbf16, #tpu.memory_space<vmem>>, vector<1x128x128xbf16>
    %399 = vector.shape_cast %398 : vector<1x128x128xbf16> to vector<128x128xbf16>
    %cst_379 = arith.constant dense<0.000000e+00> : vector<256x128xf32>
    %400 = tpu.matmul %397, %399, %cst_379 {dimension_numbers = #tpu.dot_dimension_numbers<[1], [0], [0], [1], [0, 0, 1, 1], [], []>} : vector<256x128xbf16>, vector<128x128xbf16>, vector<256x128xf32> -> vector<256x128xf32>
    %401 = arith.addf %393, %400 : vector<256x128xf32>
    %c1_380 = arith.constant 1 : index
    %c0_381 = arith.constant 0 : index
    %c0_382 = arith.constant 0 : index
    %402 = vector.load %arg17[%c1_380, %c0_381, %c0_382] : memref<9x256x64xbf16, #tpu.memory_space<vmem>>, vector<1x256x64xbf16>
    %403 = vector.shape_cast %402 : vector<1x256x64xbf16> to vector<256x64xbf16>
    %cst_383 = arith.constant dense<0.000000e+00> : vector<256x128xf32>
    %404 = tpu.matmul %403, %392, %cst_383 {dimension_numbers = #tpu.dot_dimension_numbers<[1], [0], [0], [1], [0, 0, 1, 1], [], []>} : vector<256x64xbf16>, vector<64x128xbf16>, vector<256x128xf32> -> vector<256x128xf32>
    %405 = arith.truncf %404 : vector<256x128xf32> to vector<256x128xbf16>
    %c1_384 = arith.constant 1 : index
    %c0_385 = arith.constant 0 : index
    %c0_386 = arith.constant 0 : index
    %406 = vector.load %arg18[%c1_384, %c0_385, %c0_386] : memref<9x128x128xbf16, #tpu.memory_space<vmem>>, vector<1x128x128xbf16>
    %407 = vector.shape_cast %406 : vector<1x128x128xbf16> to vector<128x128xbf16>
    %cst_387 = arith.constant dense<0.000000e+00> : vector<256x128xf32>
    %408 = tpu.matmul %405, %407, %cst_387 {dimension_numbers = #tpu.dot_dimension_numbers<[1], [0], [0], [1], [0, 0, 1, 1], [], []>} : vector<256x128xbf16>, vector<128x128xbf16>, vector<256x128xf32> -> vector<256x128xf32>
    %409 = arith.addf %401, %408 : vector<256x128xf32>
    %c2_388 = arith.constant 2 : index
    %c0_389 = arith.constant 0 : index
    %c0_390 = arith.constant 0 : index
    %410 = vector.load %arg17[%c2_388, %c0_389, %c0_390] : memref<9x256x64xbf16, #tpu.memory_space<vmem>>, vector<1x256x64xbf16>
    %411 = vector.shape_cast %410 : vector<1x256x64xbf16> to vector<256x64xbf16>
    %cst_391 = arith.constant dense<0.000000e+00> : vector<256x128xf32>
    %412 = tpu.matmul %411, %392, %cst_391 {dimension_numbers = #tpu.dot_dimension_numbers<[1], [0], [0], [1], [0, 0, 1, 1], [], []>} : vector<256x64xbf16>, vector<64x128xbf16>, vector<256x128xf32> -> vector<256x128xf32>
    %413 = arith.truncf %412 : vector<256x128xf32> to vector<256x128xbf16>
    %c2_392 = arith.constant 2 : index
    %c0_393 = arith.constant 0 : index
    %c0_394 = arith.constant 0 : index
    %414 = vector.load %arg18[%c2_392, %c0_393, %c0_394] : memref<9x128x128xbf16, #tpu.memory_space<vmem>>, vector<1x128x128xbf16>
    %415 = vector.shape_cast %414 : vector<1x128x128xbf16> to vector<128x128xbf16>
    %cst_395 = arith.constant dense<0.000000e+00> : vector<256x128xf32>
    %416 = tpu.matmul %413, %415, %cst_395 {dimension_numbers = #tpu.dot_dimension_numbers<[1], [0], [0], [1], [0, 0, 1, 1], [], []>} : vector<256x128xbf16>, vector<128x128xbf16>, vector<256x128xf32> -> vector<256x128xf32>
    %417 = arith.addf %409, %416 : vector<256x128xf32>
    %c3_396 = arith.constant 3 : index
    %c0_397 = arith.constant 0 : index
    %c0_398 = arith.constant 0 : index
    %418 = vector.load %arg17[%c3_396, %c0_397, %c0_398] : memref<9x256x64xbf16, #tpu.memory_space<vmem>>, vector<1x256x64xbf16>
    %419 = vector.shape_cast %418 : vector<1x256x64xbf16> to vector<256x64xbf16>
    %cst_399 = arith.constant dense<0.000000e+00> : vector<256x128xf32>
    %420 = tpu.matmul %419, %392, %cst_399 {dimension_numbers = #tpu.dot_dimension_numbers<[1], [0], [0], [1], [0, 0, 1, 1], [], []>} : vector<256x64xbf16>, vector<64x128xbf16>, vector<256x128xf32> -> vector<256x128xf32>
    %421 = arith.truncf %420 : vector<256x128xf32> to vector<256x128xbf16>
    %c3_400 = arith.constant 3 : index
    %c0_401 = arith.constant 0 : index
    %c0_402 = arith.constant 0 : index
    %422 = vector.load %arg18[%c3_400, %c0_401, %c0_402] : memref<9x128x128xbf16, #tpu.memory_space<vmem>>, vector<1x128x128xbf16>
    %423 = vector.shape_cast %422 : vector<1x128x128xbf16> to vector<128x128xbf16>
    %cst_403 = arith.constant dense<0.000000e+00> : vector<256x128xf32>
    %424 = tpu.matmul %421, %423, %cst_403 {dimension_numbers = #tpu.dot_dimension_numbers<[1], [0], [0], [1], [0, 0, 1, 1], [], []>} : vector<256x128xbf16>, vector<128x128xbf16>, vector<256x128xf32> -> vector<256x128xf32>
    %425 = arith.addf %417, %424 : vector<256x128xf32>
    %c4_404 = arith.constant 4 : index
    %c0_405 = arith.constant 0 : index
    %c0_406 = arith.constant 0 : index
    %426 = vector.load %arg17[%c4_404, %c0_405, %c0_406] : memref<9x256x64xbf16, #tpu.memory_space<vmem>>, vector<1x256x64xbf16>
    %427 = vector.shape_cast %426 : vector<1x256x64xbf16> to vector<256x64xbf16>
    %cst_407 = arith.constant dense<0.000000e+00> : vector<256x128xf32>
    %428 = tpu.matmul %427, %392, %cst_407 {dimension_numbers = #tpu.dot_dimension_numbers<[1], [0], [0], [1], [0, 0, 1, 1], [], []>} : vector<256x64xbf16>, vector<64x128xbf16>, vector<256x128xf32> -> vector<256x128xf32>
    %429 = arith.truncf %428 : vector<256x128xf32> to vector<256x128xbf16>
    %c4_408 = arith.constant 4 : index
    %c0_409 = arith.constant 0 : index
    %c0_410 = arith.constant 0 : index
    %430 = vector.load %arg18[%c4_408, %c0_409, %c0_410] : memref<9x128x128xbf16, #tpu.memory_space<vmem>>, vector<1x128x128xbf16>
    %431 = vector.shape_cast %430 : vector<1x128x128xbf16> to vector<128x128xbf16>
    %cst_411 = arith.constant dense<0.000000e+00> : vector<256x128xf32>
    %432 = tpu.matmul %429, %431, %cst_411 {dimension_numbers = #tpu.dot_dimension_numbers<[1], [0], [0], [1], [0, 0, 1, 1], [], []>} : vector<256x128xbf16>, vector<128x128xbf16>, vector<256x128xf32> -> vector<256x128xf32>
    %433 = arith.addf %425, %432 : vector<256x128xf32>
    %c5_412 = arith.constant 5 : index
    %c0_413 = arith.constant 0 : index
    %c0_414 = arith.constant 0 : index
    %434 = vector.load %arg17[%c5_412, %c0_413, %c0_414] : memref<9x256x64xbf16, #tpu.memory_space<vmem>>, vector<1x256x64xbf16>
    %435 = vector.shape_cast %434 : vector<1x256x64xbf16> to vector<256x64xbf16>
    %cst_415 = arith.constant dense<0.000000e+00> : vector<256x128xf32>
    %436 = tpu.matmul %435, %392, %cst_415 {dimension_numbers = #tpu.dot_dimension_numbers<[1], [0], [0], [1], [0, 0, 1, 1], [], []>} : vector<256x64xbf16>, vector<64x128xbf16>, vector<256x128xf32> -> vector<256x128xf32>
    %437 = arith.truncf %436 : vector<256x128xf32> to vector<256x128xbf16>
    %c5_416 = arith.constant 5 : index
    %c0_417 = arith.constant 0 : index
    %c0_418 = arith.constant 0 : index
    %438 = vector.load %arg18[%c5_416, %c0_417, %c0_418] : memref<9x128x128xbf16, #tpu.memory_space<vmem>>, vector<1x128x128xbf16>
    %439 = vector.shape_cast %438 : vector<1x128x128xbf16> to vector<128x128xbf16>
    %cst_419 = arith.constant dense<0.000000e+00> : vector<256x128xf32>
    %440 = tpu.matmul %437, %439, %cst_419 {dimension_numbers = #tpu.dot_dimension_numbers<[1], [0], [0], [1], [0, 0, 1, 1], [], []>} : vector<256x128xbf16>, vector<128x128xbf16>, vector<256x128xf32> -> vector<256x128xf32>
    %441 = arith.addf %433, %440 : vector<256x128xf32>
    %c6_420 = arith.constant 6 : index
    %c0_421 = arith.constant 0 : index
    %c0_422 = arith.constant 0 : index
    %442 = vector.load %arg17[%c6_420, %c0_421, %c0_422] : memref<9x256x64xbf16, #tpu.memory_space<vmem>>, vector<1x256x64xbf16>
    %443 = vector.shape_cast %442 : vector<1x256x64xbf16> to vector<256x64xbf16>
    %cst_423 = arith.constant dense<0.000000e+00> : vector<256x128xf32>
    %444 = tpu.matmul %443, %392, %cst_423 {dimension_numbers = #tpu.dot_dimension_numbers<[1], [0], [0], [1], [0, 0, 1, 1], [], []>} : vector<256x64xbf16>, vector<64x128xbf16>, vector<256x128xf32> -> vector<256x128xf32>
    %445 = arith.truncf %444 : vector<256x128xf32> to vector<256x128xbf16>
    %c6_424 = arith.constant 6 : index
    %c0_425 = arith.constant 0 : index
    %c0_426 = arith.constant 0 : index
    %446 = vector.load %arg18[%c6_424, %c0_425, %c0_426] : memref<9x128x128xbf16, #tpu.memory_space<vmem>>, vector<1x128x128xbf16>
    %447 = vector.shape_cast %446 : vector<1x128x128xbf16> to vector<128x128xbf16>
    %cst_427 = arith.constant dense<0.000000e+00> : vector<256x128xf32>
    %448 = tpu.matmul %445, %447, %cst_427 {dimension_numbers = #tpu.dot_dimension_numbers<[1], [0], [0], [1], [0, 0, 1, 1], [], []>} : vector<256x128xbf16>, vector<128x128xbf16>, vector<256x128xf32> -> vector<256x128xf32>
    %449 = arith.addf %441, %448 : vector<256x128xf32>
    %c7_428 = arith.constant 7 : index
    %c0_429 = arith.constant 0 : index
    %c0_430 = arith.constant 0 : index
    %450 = vector.load %arg17[%c7_428, %c0_429, %c0_430] : memref<9x256x64xbf16, #tpu.memory_space<vmem>>, vector<1x256x64xbf16>
    %451 = vector.shape_cast %450 : vector<1x256x64xbf16> to vector<256x64xbf16>
    %cst_431 = arith.constant dense<0.000000e+00> : vector<256x128xf32>
    %452 = tpu.matmul %451, %392, %cst_431 {dimension_numbers = #tpu.dot_dimension_numbers<[1], [0], [0], [1], [0, 0, 1, 1], [], []>} : vector<256x64xbf16>, vector<64x128xbf16>, vector<256x128xf32> -> vector<256x128xf32>
    %453 = arith.truncf %452 : vector<256x128xf32> to vector<256x128xbf16>
    %c7_432 = arith.constant 7 : index
    %c0_433 = arith.constant 0 : index
    %c0_434 = arith.constant 0 : index
    %454 = vector.load %arg18[%c7_432, %c0_433, %c0_434] : memref<9x128x128xbf16, #tpu.memory_space<vmem>>, vector<1x128x128xbf16>
    %455 = vector.shape_cast %454 : vector<1x128x128xbf16> to vector<128x128xbf16>
    %cst_435 = arith.constant dense<0.000000e+00> : vector<256x128xf32>
    %456 = tpu.matmul %453, %455, %cst_435 {dimension_numbers = #tpu.dot_dimension_numbers<[1], [0], [0], [1], [0, 0, 1, 1], [], []>} : vector<256x128xbf16>, vector<128x128xbf16>, vector<256x128xf32> -> vector<256x128xf32>
    %457 = arith.addf %449, %456 : vector<256x128xf32>
    %c8_436 = arith.constant 8 : index
    %c0_437 = arith.constant 0 : index
    %c0_438 = arith.constant 0 : index
    %458 = vector.load %arg17[%c8_436, %c0_437, %c0_438] : memref<9x256x64xbf16, #tpu.memory_space<vmem>>, vector<1x256x64xbf16>
    %459 = vector.shape_cast %458 : vector<1x256x64xbf16> to vector<256x64xbf16>
    %cst_439 = arith.constant dense<0.000000e+00> : vector<256x128xf32>
    %460 = tpu.matmul %459, %392, %cst_439 {dimension_numbers = #tpu.dot_dimension_numbers<[1], [0], [0], [1], [0, 0, 1, 1], [], []>} : vector<256x64xbf16>, vector<64x128xbf16>, vector<256x128xf32> -> vector<256x128xf32>
    %461 = arith.truncf %460 : vector<256x128xf32> to vector<256x128xbf16>
    %c8_440 = arith.constant 8 : index
    %c0_441 = arith.constant 0 : index
    %c0_442 = arith.constant 0 : index
    %462 = vector.load %arg18[%c8_440, %c0_441, %c0_442] : memref<9x128x128xbf16, #tpu.memory_space<vmem>>, vector<1x128x128xbf16>
    %463 = vector.shape_cast %462 : vector<1x128x128xbf16> to vector<128x128xbf16>
    %cst_443 = arith.constant dense<0.000000e+00> : vector<256x128xf32>
    %464 = tpu.matmul %461, %463, %cst_443 {dimension_numbers = #tpu.dot_dimension_numbers<[1], [0], [0], [1], [0, 0, 1, 1], [], []>} : vector<256x128xbf16>, vector<128x128xbf16>, vector<256x128xf32> -> vector<256x128xf32>
    %465 = arith.addf %457, %464 : vector<256x128xf32>
    %c0_444 = arith.constant 0 : index
    %c0_445 = arith.constant 0 : index
    %466 = vector.load %arg19[%c0_444, %c0_445] : memref<1x128xf32, #tpu.memory_space<vmem>>, vector<1x128xf32>
    %467 = vector.broadcast %466 : vector<1x128xf32> to vector<256x128xf32>
    %468 = arith.addf %465, %467 : vector<256x128xf32>
    %469 = arith.truncf %468 : vector<256x128xf32> to vector<256x128xbf16>
    %c0_446 = arith.constant 0 : index
    %c0_447 = arith.constant 0 : index
    %470 = vector.load %arg20[%c0_446, %c0_447] : memref<128x128xbf16, #tpu.memory_space<vmem>>, vector<128x128xbf16>
    %cst_448 = arith.constant dense<0.000000e+00> : vector<256x128xf32>
    %471 = tpu.matmul %469, %470, %cst_448 {dimension_numbers = #tpu.dot_dimension_numbers<[1], [0], [0], [1], [0, 0, 1, 1], [], []>} : vector<256x128xbf16>, vector<128x128xbf16>, vector<256x128xf32> -> vector<256x128xf32>
    %c0_449 = arith.constant 0 : index
    %c0_450 = arith.constant 0 : index
    %472 = vector.load %arg21[%c0_449, %c0_450] : memref<1x128xf32, #tpu.memory_space<vmem>>, vector<1x128xf32>
    %473 = vector.broadcast %472 : vector<1x128xf32> to vector<256x128xf32>
    %474 = arith.addf %471, %473 : vector<256x128xf32>
    %c0_451 = arith.constant 0 : index
    %c0_452 = arith.constant 0 : index
    %c0_453 = arith.constant 0 : index
    %475 = vector.load %arg22[%c0_451, %c0_452, %c0_453] : memref<1x256x128xf32, #tpu.memory_space<vmem>>, vector<1x256x128xf32>
    %476 = vector.shape_cast %475 : vector<1x256x128xf32> to vector<256x128xf32>
    %477 = vector.shape_cast %474 : vector<256x128xf32> to vector<1x256x128xf32>
    tpu.vector_store %arg22[%c0_451, %c0_452, %c0_453], %477 {strides = array<i32>} : memref<1x256x128xf32, #tpu.memory_space<vmem>>, vector<1x256x128xf32>,
    return
  }
  func.func @transform_0(%arg0: i32) -> (i32, i32, i32) {
    %c0_i32 = arith.constant 0 : i32
    %c0_i32_0 = arith.constant 0 : i32
    %c0_i32_1 = arith.constant 0 : i32
    return %arg0, %c0_i32, %c0_i32_0 : i32, i32, i32
  }
  func.func @transform_1(%arg0: i32) -> (i32, i32, i32) {
    %c0_i32 = arith.constant 0 : i32
    %c0_i32_0 = arith.constant 0 : i32
    %c0_i32_1 = arith.constant 0 : i32
    %c0_i32_2 = arith.constant 0 : i32
    return %c0_i32, %c0_i32_0, %c0_i32_1 : i32, i32, i32
  }
  func.func @transform_2(%arg0: i32) -> (i32, i32, i32) {
    %c0_i32 = arith.constant 0 : i32
    %c0_i32_0 = arith.constant 0 : i32
    %c0_i32_1 = arith.constant 0 : i32
    %c0_i32_2 = arith.constant 0 : i32
    return %c0_i32, %c0_i32_0, %c0_i32_1 : i32, i32, i32
  }
  func.func @transform_3(%arg0: i32) -> (i32, i32) {
    %c0_i32 = arith.constant 0 : i32
    %c0_i32_0 = arith.constant 0 : i32
    %c0_i32_1 = arith.constant 0 : i32
    return %c0_i32, %c0_i32_0 : i32, i32
  }
  func.func @transform_4(%arg0: i32) -> (i32, i32, i32) {
    %c0_i32 = arith.constant 0 : i32
    %c0_i32_0 = arith.constant 0 : i32
    %c0_i32_1 = arith.constant 0 : i32
    %c0_i32_2 = arith.constant 0 : i32
    return %c0_i32, %c0_i32_0, %c0_i32_1 : i32, i32, i32
  }
  func.func @transform_5(%arg0: i32) -> (i32, i32, i32) {
    %c0_i32 = arith.constant 0 : i32
    %c0_i32_0 = arith.constant 0 : i32
    %c0_i32_1 = arith.constant 0 : i32
    %c0_i32_2 = arith.constant 0 : i32
    return %c0_i32, %c0_i32_0, %c0_i32_1 : i32, i32, i32
  }
  func.func @transform_6(%arg0: i32) -> (i32, i32) {
    %c0_i32 = arith.constant 0 : i32
    %c0_i32_0 = arith.constant 0 : i32
    %c0_i32_1 = arith.constant 0 : i32
    return %c0_i32, %c0_i32_0 : i32, i32
  }
  func.func @transform_7(%arg0: i32) -> (i32, i32, i32) {
    %c0_i32 = arith.constant 0 : i32
    %c0_i32_0 = arith.constant 0 : i32
    %c0_i32_1 = arith.constant 0 : i32
    %c0_i32_2 = arith.constant 0 : i32
    return %c0_i32, %c0_i32_0, %c0_i32_1 : i32, i32, i32
  }
  func.func @transform_8(%arg0: i32) -> (i32, i32, i32) {
    %c0_i32 = arith.constant 0 : i32
    %c0_i32_0 = arith.constant 0 : i32
    %c0_i32_1 = arith.constant 0 : i32
    %c0_i32_2 = arith.constant 0 : i32
    return %c0_i32, %c0_i32_0, %c0_i32_1 : i32, i32, i32
  }
  func.func @transform_9(%arg0: i32) -> (i32, i32) {
    %c0_i32 = arith.constant 0 : i32
    %c0_i32_0 = arith.constant 0 : i32
    %c0_i32_1 = arith.constant 0 : i32
    return %c0_i32, %c0_i32_0 : i32, i32
  }
  func.func @transform_10(%arg0: i32) -> (i32, i32, i32) {
    %c0_i32 = arith.constant 0 : i32
    %c0_i32_0 = arith.constant 0 : i32
    %c0_i32_1 = arith.constant 0 : i32
    %c0_i32_2 = arith.constant 0 : i32
    return %c0_i32, %c0_i32_0, %c0_i32_1 : i32, i32, i32
  }
  func.func @transform_11(%arg0: i32) -> (i32, i32, i32) {
    %c0_i32 = arith.constant 0 : i32
    %c0_i32_0 = arith.constant 0 : i32
    %c0_i32_1 = arith.constant 0 : i32
    %c0_i32_2 = arith.constant 0 : i32
    return %c0_i32, %c0_i32_0, %c0_i32_1 : i32, i32, i32
  }
  func.func @transform_12(%arg0: i32) -> (i32, i32) {
    %c0_i32 = arith.constant 0 : i32
    %c0_i32_0 = arith.constant 0 : i32
    %c0_i32_1 = arith.constant 0 : i32
    return %c0_i32, %c0_i32_0 : i32, i32
  }
  func.func @transform_13(%arg0: i32) -> (i32, i32, i32) {
    %c0_i32 = arith.constant 0 : i32
    %c0_i32_0 = arith.constant 0 : i32
    %c0_i32_1 = arith.constant 0 : i32
    %c0_i32_2 = arith.constant 0 : i32
    return %c0_i32, %c0_i32_0, %c0_i32_1 : i32, i32, i32
  }
  func.func @transform_14(%arg0: i32) -> (i32, i32, i32) {
    %c0_i32 = arith.constant 0 : i32
    %c0_i32_0 = arith.constant 0 : i32
    %c0_i32_1 = arith.constant 0 : i32
    %c0_i32_2 = arith.constant 0 : i32
    return %c0_i32, %c0_i32_0, %c0_i32_1 : i32, i32, i32
  }
  func.func @transform_15(%arg0: i32) -> (i32, i32) {
    %c0_i32 = arith.constant 0 : i32
    %c0_i32_0 = arith.constant 0 : i32
    %c0_i32_1 = arith.constant 0 : i32
    return %c0_i32, %c0_i32_0 : i32, i32
  }
  func.func @transform_16(%arg0: i32) -> (i32, i32, i32) {
    %c0_i32 = arith.constant 0 : i32
    %c0_i32_0 = arith.constant 0 : i32
    %c0_i32_1 = arith.constant 0 : i32
    %c0_i32_2 = arith.constant 0 : i32
    return %c0_i32, %c0_i32_0, %c0_i32_1 : i32, i32, i32
  }
  func.func @transform_17(%arg0: i32) -> (i32, i32, i32) {
    %c0_i32 = arith.constant 0 : i32
    %c0_i32_0 = arith.constant 0 : i32
    %c0_i32_1 = arith.constant 0 : i32
    %c0_i32_2 = arith.constant 0 : i32
    return %c0_i32, %c0_i32_0, %c0_i32_1 : i32, i32, i32
  }
  func.func @transform_18(%arg0: i32) -> (i32, i32) {
    %c0_i32 = arith.constant 0 : i32
    %c0_i32_0 = arith.constant 0 : i32
    %c0_i32_1 = arith.constant 0 : i32
    return %c0_i32, %c0_i32_0 : i32, i32
  }
  func.func @transform_19(%arg0: i32) -> (i32, i32) {
    %c0_i32 = arith.constant 0 : i32
    %c0_i32_0 = arith.constant 0 : i32
    %c0_i32_1 = arith.constant 0 : i32
    return %c0_i32, %c0_i32_0 : i32, i32
  }
  func.func @transform_20(%arg0: i32) -> (i32, i32) {
    %c0_i32 = arith.constant 0 : i32
    %c0_i32_0 = arith.constant 0 : i32
    %c0_i32_1 = arith.constant 0 : i32
    return %c0_i32, %c0_i32_0 : i32, i32
  }
  func.func @transform_21(%arg0: i32) -> (i32, i32, i32) {
    %c0_i32 = arith.constant 0 : i32
    %c0_i32_0 = arith.constant 0 : i32
    %c0_i32_1 = arith.constant 0 : i32
    return %arg0, %c0_i32, %c0_i32_0 : i32, i32, i32
  }
}

</mosaic_0001>

<bundles_post_ra>
// kernel: _lambda_.1
= control target key start
LH: loop header
LB: loop body
LE: loop exit
PB: predicated region body
PF: predicated region fallthrough
CT: control target
= control target key end

     0   :  { %s25931_s0 = inlined_call_operand.vmem [shape: bf16[2,256,128], index: 0, kind: input, shape index: {}]   ;;  %s25932_s1 = inlined_call_operand.vmem [shape: bf16[9,64,256], index: 1, kind: input, shape index: {}]   ;;  %s25933_s2 = inlined_call_operand.hbm [shape: bf16[9,128,128], index: 2, kind: input, shape index: {}]   ;;  %s25934_s3 = inlined_call_operand.hbm [shape: f32[1,128], index: 3, kind: input, shape index: {}]   ;;  %s25935_s4 = inlined_call_operand.vmem [shape: bf16[9,16,64], index: 4, kind: input, shape index: {}]   ;;  %s25936_s5 = inlined_call_operand.hbm [shape: bf16[9,128,128], index: 5, kind: input, shape index: {}]   ;;  %s25937_s6 = inlined_call_operand.vmem [shape: f32[1,128], index: 6, kind: input, shape index: {}]   ;;  %s25938_s7 = inlined_call_operand.hbm [shape: bf16[9,4,16], index: 7, kind: input, shape index: {}]   ;;  %s25939_s8 = inlined_call_operand.hbm [shape: bf16[9,128,128], index: 8, kind: input, shape index: {}]   ;;  %s25940_s9 = inlined_call_operand.vmem [shape: f32[1,128], index: 9, kind: input, shape index: {}]   ;;  %s25941_s10 = inlined_call_operand.vmem [shape: bf16[9,16,4], index: 10, kind: input, shape index: {}]   ;;  %s25942_s11 = inlined_call_operand.hbm [shape: bf16[9,128,128], index: 11, kind: input, shape index: {}]   ;;  %s25943_s12 = inlined_call_operand.vmem [shape: f32[1,128], index: 12, kind: input, shape index: {}]   ;;  %s25944_s13 = inlined_call_operand.vmem [shape: bf16[9,64,16], index: 13, kind: input, shape index: {}]   ;;  %s25945_s14 = inlined_call_operand.hbm [shape: bf16[9,128,128], index: 14, kind: input, shape index: {}]   ;;  %s25946_s15 = inlined_call_operand.vmem [shape: f32[1,128], index: 15, kind: input, shape index: {}]   ;;  %s25947_s16 = inlined_call_operand.vmem [shape: bf16[9,256,64], index: 16, kind: input, shape index: {}]   ;;  %s25948_s17 = inlined_call_operand.vmem [shape: bf16[9,128,128], index: 17, kind: input, shape index: {}]   ;;  %s25949_s18 = inlined_call_operand.vmem [shape: f32[1,128], index: 18, kind: input, shape index: {}]   ;;  %s25950_s19 = inlined_call_operand.vmem [shape: bf16[128,128], index: 19, kind: input, shape index: {}]   ;;  %s25951_s20 = inlined_call_operand.vmem [shape: f32[1,128], index: 20, kind: input, shape index: {}]   ;;  %s25952_s21 = inlined_call_operand.vmem [shape: f32[2,256,128], index: 21, kind: output, shape index: {}]  }
   0x1   :  { %26011 = sst [smem:[#allocation35_spill]] %s25931_s0 }
   0x2   :  { %26012 = sst [smem:[#allocation36_spill]] %s25932_s1 }
   0x3   :  { %26013 = sst [smem:[#allocation37_spill]] %s25933_s2 }
   0x4   :  { %26014 = sst [smem:[#allocation38_spill]] %s25934_s3 }
   0x5   :  { %26015 = sst [smem:[#allocation39_spill]] %s25935_s4 }
   0x6   :  { %26016 = sst [smem:[#allocation40_spill]] %s25936_s5 }
   0x7   :  { %26017 = sst [smem:[#allocation41_spill]] %s25938_s7 }
   0x8   :  { %26018 = sst [smem:[#allocation42_spill]] %s25942_s11 }
   0x9   :  { %26019 = sst [smem:[#allocation43_spill]] %s25949_s18 }
   0xa   :  { %26020 = sst [smem:[#allocation44_spill]] %s25950_s19 }
   0xb   :  { %26021 = sst [smem:[#allocation45_spill]] %s25951_s20 }
   0xc   :  { %26022 = sst [smem:[#allocation46_spill]] %s25952_s21 }
   0xd   :  { %26 = vsyncpa [#allocation3], 0 }
   0xe   :  { %27 = vsyncpa [#allocation5], 0 }
   0xf   :  { %28 = vsyncpa [#allocation8], 0 }
  0x10   :  { %29 = vsyncpa [#allocation11], 0  ;;  %s22047_s2 = smov 0  }
  0x11 LB: > { %26023 = sst [smem:[#allocation17_spill]] %s21922_s2  ;;  %s21924_s25 = smov [#allocation4]   ;;  %s21922_s2 = sphi %s22047_s2, %s35_s2  }
  0x12   : > { %s541_s26 = sshll.u32 %s21924_s25, 4  ;;  %s22053_s27 = sadd.s32 4294967295, %s21922_s2   ;;  %s542_s26 = int_to_ptr.vmem [resolvable:$true] %s541_s26 }
  0x13   : > { %p15464_p0 = scmp.ge.s32.totalorder %s21922_s2, 1  ;;  %p512_p1 = scmp.lt.s32.totalorder %s21922_s2, 3 }
  0x14   : > { %p25959_p2 = scmp.eq.s32.totalorder %s22053_s27, 0  ;;  %s21925_s28 = smov [#allocation7]  }
  0x15   : > { %p22058_p3 = pnand %p15464_p0, %p512_p1  ;;  %s570_s29 = sshll.u32 %s21925_s28, 4  ;;  %s22064_s29 = int_to_ptr.vmem [resolvable:$true] %s570_s29 }
  0x16   : > { %s21926_s4 = smov [#allocation10]   ;;  %s26026_s23 = sld [smem:[#allocation38_spill]] }
  0x17   : > { %s26024_s3 = scalar_select %p22058_p3, 1, 0 }
  0x18   : > { %p20868_p4 = pneg %p22058_p3  ;;  %s22072_s30 = sshll.u32 %s21926_s4, 4  ;;  %s603_s30 = int_to_ptr.vmem [resolvable:$true] %s22072_s30 }
  0x1a   : > { %p22068_p5 = pnand %p25959_p2, %p20868_p4 }
  0x1c   : > { %s21704_s1 = scalar_lea.hbm %s26026_s23, 16  ;;  %p22082_p7 = pneg %p22068_p5 }
  0x1d   : > { %p21705_p6 = scmp.ne.s32.totalorder %s26026_s23, %s21704_s1  ;;  %p21711_p10 = scmp.lt.u32.totalorder %s21704_s1, %s26026_s23 }
  0x1f   : > { %p21707_p8 = pnand %p22082_p7, %p21705_p6 }
  0x21   : > { %p21708_p9 = pneg %p21707_p8 }
  0x23   : > { %p21713_p11 = pnand %p21711_p10, %p21708_p9 }
  0x25   : > { %21716 = shalt.err (!%p21713_p11)
}
  0x26   : > { %s21717_s5 = scalar_lea.vmem %s542_s26, 16  ;;  %s21724_s22 = scalar_lea.vmem %s542_s26, 32 }
  0x27   : > { %p21718_p12 = scmp.ne.s32.totalorder %s542_s26, %s21717_s5  ;;  %p21725_p1 = scmp.lt.s32.totalorder %s542_s26, %s542_s26 }
  0x28   : > { %p21726_p4 = scmp.lt.s32.totalorder %s21724_s22, %s21717_s5 }
  0x29   : > { %p21720_p13 = pnand %p21718_p12, %p22082_p7 }
  0x2a   : > { %p21727_p2 = por %p21726_p4, %p21725_p1 }
  0x2b   : > { %p21721_p0 = pneg %p21720_p13 }
  0x2d   : > { %p21728_p3 = pnand %p21727_p2, %p21721_p0 }
  0x2f   : > { %21731 = shalt.err (!%p21728_p3)
}
  0x30   : > { %20874 = dma.hbm_to_vmem [thread:$0]  (!%p22068_p5), %s26026_s23, 16, %s542_s26, [#allocation5]  }
  0x31   : > { %s26028_s7 = sld [smem:[#allocation41_spill]] }
  0x37   : > { %s21732_s4 = scalar_lea.hbm %s26028_s7, 288 }
  0x38   : > { %p21733_p6 = scmp.ne.s32.totalorder %s26028_s7, %s21732_s4  ;;  %p21739_p2 = scmp.lt.u32.totalorder %s21732_s4, %s26028_s7 }
  0x3a   : > { %p21735_p8 = pnand %p21733_p6, %p22082_p7 }
  0x3c   : > { %p21736_p9 = pneg %p21735_p8 }
  0x3e   : > { %p21741_p3 = pnand %p21739_p2, %p21736_p9 }
  0x40   : > { %21744 = shalt.err (!%p21741_p3)
}
  0x41   : > { %s21745_s26 = scalar_lea.vmem %s22064_s29, 288  ;;  %p21753_p13 = scmp.lt.s32.totalorder %s22064_s29, %s22064_s29 }
  0x42   : > { %p21746_p10 = scmp.ne.s32.totalorder %s22064_s29, %s21745_s26  ;;  %p21754_p0 = scmp.lt.s32.totalorder %s21745_s26, %s21745_s26 }
  0x44   : > { %p21748_p11 = pnand %p21746_p10, %p22082_p7  ;;  %p21755_p1 = por %p21754_p0, %p21753_p13 }
  0x46   : > { %p21749_p12 = pneg %p21748_p11 }
  0x48   : > { %p21756_p4 = pnand %p21755_p1, %p21749_p12 }
  0x4a   : > { %21759 = shalt.err (!%p21756_p4)
}
  0x4b   : > { %s21927_s20 = smov 32   ;;  %s21928_s21 = smov 2  }
  0x4c   : > { %20880 = dma.hbm_to_vmem [thread:$0]  (!%p22068_p5), %s26028_s7, 288, %s22064_s29, [#allocation8], %s21927_s20, %s21927_s20, %s21928_s21  }
  0x4d   : > { %s21929_s2 = smov [#allocation2]   ;;  %s26029_s11 = sld [smem:[#allocation42_spill]] }
  0x4e   : > { %s527_s1 = sshll.u32 %s21929_s2, 4  ;;  %s528_s1 = int_to_ptr.vmem [resolvable:$true] %s527_s1 }
  0x53   : > { %s21760_s22 = scalar_lea.hbm %s26029_s11, 9216 }
  0x54   : > { %p21761_p6 = scmp.ne.s32.totalorder %s26029_s11, %s21760_s22  ;;  %p21767_p2 = scmp.lt.u32.totalorder %s21760_s22, %s26029_s11 }
  0x56   : > { %p21763_p8 = pnand %p21761_p6, %p22082_p7 }
  0x58   : > { %p21764_p9 = pneg %p21763_p8 }
  0x5a   : > { %p21769_p3 = pnand %p21767_p2, %p21764_p9 }
  0x5c   : > { %21772 = shalt.err (!%p21769_p3)
}
  0x5d   : > { %s21773_s29 = scalar_lea.vmem %s603_s30, 9216  ;;  %p21781_p13 = scmp.lt.s32.totalorder %s603_s30, %s603_s30 }
  0x5e   : > { %p21774_p10 = scmp.ne.s32.totalorder %s603_s30, %s21773_s29  ;;  %p21782_p0 = scmp.lt.s32.totalorder %s21773_s29, %s21773_s29 }
  0x60   : > { %p21776_p11 = pnand %p21774_p10, %p22082_p7  ;;  %p21783_p1 = por %p21782_p0, %p21781_p13 }
  0x62   : > { %p21777_p12 = pneg %p21776_p11 }
  0x64   : > { %p21784_p4 = pnand %p21783_p1, %p21777_p12 }
  0x66   : > { %21787 = shalt.err (!%p21784_p4)
}
  0x67   : > { %s21930_s23 = smov 64   ;;  %s21931_s20 = smov 4  }
  0x68   : > { %20886 = dma.hbm_to_vmem [thread:$0]  (!%p22068_p5), %s26029_s11, 9216, %s603_s30, [#allocation11], %s21930_s23, %s21930_s23, %s21931_s20  }
  0x69   : > { %s26030_s25 = sld [smem:[#allocation37_spill]] }
  0x6f   : > { %s21788_s2 = scalar_lea.hbm %s26030_s25, 9216 }
  0x70   : > { %p21789_p6 = scmp.ne.s32.totalorder %s26030_s25, %s21788_s2  ;;  %p21795_p2 = scmp.lt.u32.totalorder %s21788_s2, %s26030_s25 }
  0x72   : > { %p21791_p8 = pnand %p21789_p6, %p22082_p7 }
  0x74   : > { %p21792_p9 = pneg %p21791_p8 }
  0x76   : > { %p21797_p3 = pnand %p21795_p2, %p21792_p9 }
  0x78   : > { %21800 = shalt.err (!%p21797_p3)
}
  0x79   : > { %s21801_s29 = scalar_lea.vmem %s528_s1, 9216  ;;  %p21809_p13 = scmp.lt.s32.totalorder %s528_s1, %s528_s1 }
  0x7a   : > { %p21802_p10 = scmp.ne.s32.totalorder %s528_s1, %s21801_s29  ;;  %p21810_p0 = scmp.lt.s32.totalorder %s21801_s29, %s21801_s29 }
  0x7c   : > { %p21804_p11 = pnand %p21802_p10, %p22082_p7  ;;  %p21811_p1 = por %p21810_p0, %p21809_p13 }
  0x7e   : > { %p21805_p12 = pneg %p21804_p11 }
  0x80   : > { %p21812_p4 = pnand %p21811_p1, %p21805_p12 }
  0x82   : > { %21815 = shalt.err (!%p21812_p4)
}
  0x83   : > { %20871 = dma.hbm_to_vmem [thread:$0]  (!%p22068_p5), %s26030_s25, 9216, %s528_s1, [#allocation3], %s21930_s23, %s21930_s23, %s21931_s20  }
  0x84   : > { %s21932_s19 = smov [#allocation6]   ;;  %s21933_s24 = smov [#allocation9]  }
  0x85   : > { %s554_s21 = sshll.u32 %s21932_s19, 4  ;;  %s583_s2 = sshll.u32 %s21933_s24, 4  ;;  %s555_s21 = int_to_ptr.vmem [resolvable:$true] %s554_s21  ;;  %s584_s2 = int_to_ptr.vmem [resolvable:$true] %s583_s2 }
  0x86   : > { %s26031_s22 = sld [smem:[#allocation40_spill]] }
  0x8c   : > { %s21816_s26 = scalar_lea.hbm %s26031_s22, 9216 }
  0x8d   : > { %p21817_p6 = scmp.ne.s32.totalorder %s26031_s22, %s21816_s26  ;;  %p21823_p2 = scmp.lt.u32.totalorder %s21816_s26, %s26031_s22 }
  0x8f   : > { %p21819_p8 = pnand %p21817_p6, %p22082_p7 }
  0x91   : > { %p21820_p9 = pneg %p21819_p8 }
  0x93   : > { %p21825_p3 = pnand %p21823_p2, %p21820_p9 }
  0x95   : > { %21828 = shalt.err (!%p21825_p3)
}
  0x96   : > { %s21829_s1 = scalar_lea.vmem %s555_s21, 9216  ;;  %p21837_p13 = scmp.lt.s32.totalorder %s555_s21, %s555_s21 }
  0x97   : > { %p21830_p10 = scmp.ne.s32.totalorder %s555_s21, %s21829_s1  ;;  %p21838_p0 = scmp.lt.s32.totalorder %s21829_s1, %s21829_s1 }
  0x99   : > { %p21832_p11 = pnand %p21830_p10, %p22082_p7  ;;  %p21839_p1 = por %p21838_p0, %p21837_p13 }
  0x9b   : > { %p21833_p12 = pneg %p21832_p11 }
  0x9d   : > { %p21840_p4 = pnand %p21839_p1, %p21833_p12 }
  0x9f   : > { %21843 = shalt.err (!%p21840_p4)
}
  0xa0   : > { %20877 = dma.hbm_to_vmem [thread:$0]  (!%p22068_p5), %s26031_s22, 9216, %s555_s21, [#allocation5], %s21930_s23, %s21930_s23, %s21931_s20  }
  0xa1   : > { %s21844_s24 = scalar_lea.hbm %s25939_s8, 9216 }
  0xa2   : > { %p21845_p6 = scmp.ne.s32.totalorder %s25939_s8, %s21844_s24  ;;  %p21851_p2 = scmp.lt.u32.totalorder %s21844_s24, %s25939_s8 }
  0xa4   : > { %p21847_p8 = pnand %p21845_p6, %p22082_p7 }
  0xa6   : > { %p21848_p9 = pneg %p21847_p8 }
  0xa8   : > { %p21853_p3 = pnand %p21851_p2, %p21848_p9 }
  0xaa   : > { %21856 = shalt.err (!%p21853_p3)
}
  0xab   : > { %s21857_s30 = scalar_lea.vmem %s584_s2, 9216  ;;  %p21865_p13 = scmp.lt.s32.totalorder %s584_s2, %s584_s2 }
  0xac   : > { %p21858_p10 = scmp.ne.s32.totalorder %s584_s2, %s21857_s30  ;;  %p21866_p0 = scmp.lt.s32.totalorder %s21857_s30, %s21857_s30 }
  0xae   : > { %p21860_p11 = pnand %p21858_p10, %p22082_p7  ;;  %p21867_p1 = por %p21866_p0, %p21865_p13 }
  0xb0   : > { %p21861_p12 = pneg %p21860_p11 }
  0xb2   : > { %p21868_p4 = pnand %p21867_p1, %p21861_p12 }
  0xb4   : > { %21871 = shalt.err (!%p21868_p4)
}
  0xb5   : > { %20883 = dma.hbm_to_vmem [thread:$0]  (!%p22068_p5), %s25939_s8, 9216, %s584_s2, [#allocation8], %s21930_s23, %s21930_s23, %s21931_s20  }
  0xb6   : > { %s21934_s7 = smov [#allocation12]   ;;  %s21872_s24 = scalar_lea.hbm %s25945_s14, 9216 }
  0xb7   : > { %s621_s11 = sshll.u32 %s21934_s7, 4  ;;  %p21873_p6 = scmp.ne.s32.totalorder %s25945_s14, %s21872_s24  ;;  %s622_s11 = int_to_ptr.vmem [resolvable:$true] %s621_s11 }
  0xb8   : > { %p21879_p2 = scmp.lt.u32.totalorder %s21872_s24, %s25945_s14 }
  0xb9   : > { %p21875_p8 = pnand %p21873_p6, %p22082_p7 }
  0xbb   : > { %p21876_p9 = pneg %p21875_p8 }
  0xbd   : > { %p21881_p3 = pnand %p21879_p2, %p21876_p9 }
  0xbf   : > { %21884 = shalt.err (!%p21881_p3)
}
  0xc0   : > { %s21885_s2 = scalar_lea.vmem %s622_s11, 9216  ;;  %p21893_p13 = scmp.lt.s32.totalorder %s622_s11, %s622_s11 }
  0xc1   : > { %p21886_p10 = scmp.ne.s32.totalorder %s622_s11, %s21885_s2  ;;  %p21894_p0 = scmp.lt.s32.totalorder %s21885_s2, %s21885_s2 }
  0xc3   : > { %p21888_p11 = pnand %p21886_p10, %p22082_p7  ;;  %p21895_p1 = por %p21894_p0, %p21893_p13 }
  0xc5   : > { %p21889_p12 = pneg %p21888_p11 }
  0xc7   : > { %p21896_p4 = pnand %p21895_p1, %p21889_p12 }
  0xc9   : > { %21899 = shalt.err (!%p21896_p4)
}
  0xca   : > { %20889 = dma.hbm_to_vmem [thread:$0]  (!%p22068_p5), %s25945_s14, 9216, %s622_s11, [#allocation11], %s21930_s23, %s21930_s23, %s21931_s20  }
  0xcb   : > { %p26032_p6 = scmp.ne.s32.totalorder %s26024_s3, 0 }
  0xcd   : > { %663 = sbr.rel (%p26032_p6) target bundleno = 7068 (0x1b9c), region = 104 }
  0xd4   : > { %p26033_p7 = scmp.eq.s32.totalorder %s22053_s27, 0 }
  0xd6   : > { %21905 = dma.done.wait (%p26033_p7), [#allocation3], 9216   ;;  %p26034_p8 = pmov %p26033_p7 }
  0xd7   : > { %p26035_p9 = pmov %p26033_p7 }
  0xd8   : > { %21907 = vsyncadd (%p26034_p8), [#allocation3], 4294958080 }
  0xd9   : > { %21909 = dma.done.wait (%p26035_p9), [#allocation5], 9232   ;;  %p26036_p2 = pmov %p26033_p7 }
  0xdb   : > { %21911 = vsyncadd (%p26036_p2), [#allocation5], 4294958064  ;;  %p26037_p3 = pmov %p26036_p2 }
  0xdc   : > { %p26038_p5 = pmov %p26036_p2 }
  0xdd   : > { %21913 = dma.done.wait (%p26037_p3), [#allocation8], 9504  }
  0xde   : > { %21915 = vsyncadd (%p26038_p5), [#allocation8], 4294957792  ;;  %p26039_p10 = pmov %p26036_p2 }
  0xdf   : > { %p26040_p11 = pmov %p26036_p2 }
  0xe0   : > { %21917 = dma.done.wait (%p26039_p10), [#allocation11], 18432  }
  0xe1   : > { %21919 = vsyncadd (%p26040_p11), [#allocation11], 4294948864  ;;  %p747_p12 = scmp.lt.s32.totalorder %s22053_s27, 1  ;;  %s26041_s23 = sld [smem:[#allocation35_spill]]  ;;  %v21019_v37 = vld [vmem:[#allocation2 + $0x40] sm:$0xff]   ;;  %v21020_v40 = vld [vmem:[#allocation2 + $0x48] sm:$0xff]  }
  0xe2   : > { %s26042_s11 = sld [smem:[#allocation36_spill]]  ;;  %v21024_v41 = vld [vmem:[#allocation2 + $0x50] sm:$0xff]   ;;  %v21025_v44 = vld [vmem:[#allocation2 + $0x58] sm:$0xff]   ;;  %v21029_v45 = vld [vmem:[#allocation2 + $0x60] sm:$0xff]   ;;  %vm21936_vm0 = vmmov 0   ;;  %vm3198_vm1 = vcmask 523264  }
  0xe3   : > { %s26272_s27 = smov (!%p747_p12, %s22053_s27), 1  ;;  %v21030_v54 = vld [vmem:[#allocation2 + $0x68] sm:$0xff]   ;;  %v21034_v55 = vld [vmem:[#allocation2 + $0x70] sm:$0xff]   ;;  %v21035_v58 = vld [vmem:[#allocation2 + $0x78] sm:$0xff]   ;;  %vm4648_vm2 = vcmask 130048   ;;  %vm6033_vm3 = vcmask 1041408  }
  0xe4   : > { %s16971_s3 = sshll.u32 %s26272_s27, 7  ;;  %v21039_v59 = vld [vmem:[#allocation2] sm:$0xff]   ;;  %vm6029_vm4 = vcmask 31744   ;;  %s26225_s5 = sld [smem:[#allocation44_spill]] }
  0xe5   : > { %s26267_s26 = sld [smem:[#allocation43_spill]]  ;;  %s16972_s29 = sshll.u32 %s26272_s27, 8 }
  0xe6   : > { %s26268_s30 = sld [smem:[#allocation45_spill]]  ;;  %s26269_s0 = sld [smem:[#allocation46_spill]] }
  0xe7   : > { %s22253_s20 = scalar_lea.vmem %s26041_s23, %s16971_s3  ;;  %s26043_s23 = sld [smem:[#allocation39_spill]] }
  0xe8   : > { %v22256_v0 = vld [vmem:[%s22253_s20 + $0x40] sm:$0xff]   ;;  %v22263_v2 = vld [vmem:[%s22253_s20 + $0x48] sm:$0xff]   ;;  %v22273_v4 = vld [vmem:[%s22253_s20 + $0x50] sm:$0xff]  }
  0xe9   : > { %v22259_v1 = vld [vmem:[%s22253_s20] sm:$0xff]   ;;  %17013 = vmatprep.subr.bf16.mxu1 %v22256_v0  ;;  %16973 = vmatprep.subr.bf16.mxu0 %v22256_v0  ;;  %v22268_v3 = vld [vmem:[%s22253_s20 + $0x8] sm:$0xff]   ;;  %v22278_v5 = vld [vmem:[%s22253_s20 + $0x10] sm:$0xff]  }
  0xea   : > { %17014 = vmatpush3.bf16.msra.mxu1 %v22259_v1  ;;  %16974 = vmatpush3.bf16.msra.mxu0 %v22259_v1  ;;  %v22283_v6 = vld [vmem:[%s22253_s20 + $0x58] sm:$0xff]   ;;  %v22293_v8 = vld [vmem:[%s22253_s20 + $0x60] sm:$0xff]   ;;  %v22303_v10 = vld [vmem:[%s22253_s20 + $0x68] sm:$0xff]  }
  0xeb   : > { %17015 = vmatprep.subr.bf16.mxu1 %v22263_v2  ;;  %16975 = vmatprep.subr.bf16.mxu0 %v22263_v2  ;;  %v22288_v7 = vld [vmem:[%s22253_s20 + $0x18] sm:$0xff]   ;;  %v22298_v9 = vld [vmem:[%s22253_s20 + $0x20] sm:$0xff]   ;;  %v22311_v12 = vld [vmem:[%s22253_s20 + $0x28] sm:$0xff]  }
  0xec   : > { %v20943_v11 = vld [vmem:[%s26042_s11 + $0x44] ss:$8 sps:$4 sm:$0xff]   ;;  %v22315_v13 = vld [vmem:[%s22253_s20 + $0x70] sm:$0xff]   ;;  %v22328_v16 = vld [vmem:[%s22253_s20 + $0x78] sm:$0xff]   ;;  %s25862_s28 = scalar_lea.vmem %s26269_s0, %s16972_s29 }
  0xed   : > { %1100 = vmatprep.mubr.bf16.mxu1 %v20943_v11  ;;  %v20954_v14 = vld [vmem:[%s26042_s11 + $0x4] ss:$8 sps:$4 sm:$0xff]   ;;  %v22324_v15 = vld [vmem:[%s22253_s20 + $0x30] sm:$0xff]   ;;  %v22334_v17 = vld [vmem:[%s22253_s20 + $0x38] sm:$0xff]  }
  0xee   : > { %17016 = vmatpush3.bf16.msra.mxu1 %v22268_v3  ;;  %16976 = vmatpush3.bf16.msra.mxu0 %v22268_v3  ;;  %v20941_v18 = vld [vmem:[%s26042_s11 + $0x40] ss:$8 sps:$4 sm:$0xff]   ;;  %v20944_v19 = vld [vmem:[%s26042_s11 + $0x54] ss:$8 sps:$4 sm:$0xff]   ;;  %v20946_v22 = vld [vmem:[%s26042_s11 + $0x50] ss:$8 sps:$4 sm:$0xff]  }
  0xef   : > { %17017 = vmatprep.subr.bf16.mxu1 %v22273_v4  ;;  %16977 = vmatprep.subr.bf16.mxu0 %v22273_v4  ;;  %v20952_v20 = vld [vmem:[%s26042_s11] ss:$8 sps:$4 sm:$0xff]   ;;  %v20956_v21 = vld [vmem:[%s26042_s11 + $0x14] ss:$8 sps:$4 sm:$0xff]   ;;  %v20947_v23 = vld [vmem:[%s26042_s11 + $0x64] ss:$8 sps:$4 sm:$0xff]  }
  0xf0   : > { %966 = vmatprep.mubr.bf16.mxu0 %v20954_v14  ;;  %v20958_v24 = vld [vmem:[%s26042_s11 + $0x10] ss:$8 sps:$4 sm:$0xff]   ;;  %v20959_v25 = vld [vmem:[%s26042_s11 + $0x24] ss:$8 sps:$4 sm:$0xff]   ;;  %v20949_v26 = vld [vmem:[%s26042_s11 + $0x60] ss:$8 sps:$4 sm:$0xff]  }
  0xf1   : > { %v20950_v27 = vld [vmem:[%s26042_s11 + $0x74] ss:$8 sps:$4 sm:$0xff]   ;;  %v20961_v28 = vld [vmem:[%s26042_s11 + $0x20] ss:$8 sps:$4 sm:$0xff]   ;;  %v20955_v30 = vld [vmem:[%s26042_s11 + $0x70] ss:$8 sps:$4 sm:$0xff]  }
  0xf2   : > { %17018 = vmatpush3.bf16.msra.mxu1 %v22278_v5  ;;  %16978 = vmatpush3.bf16.msra.mxu0 %v22278_v5  ;;  %v20965_v29 = vld [vmem:[%s26042_s11 + $0x34] ss:$8 sps:$4 sm:$0xff]   ;;  %v20964_v31 = vld [vmem:[%s26042_s11 + $0x84] ss:$8 sps:$4 sm:$0xff]   ;;  %v20967_v32 = vld [vmem:[%s26042_s11 + $0x30] ss:$8 sps:$4 sm:$0xff]  }
  0xf3   : > { %17019 = vmatprep.subr.bf16.mxu1 %v22283_v6  ;;  %16979 = vmatprep.subr.bf16.mxu0 %v22283_v6  ;;  %v20962_v33 = vld [vmem:[%s26042_s11 + $0x80] ss:$8 sps:$4 sm:$0xff]   ;;  %v20968_v34 = vld [vmem:[%s26042_s11 + $0x94] ss:$8 sps:$4 sm:$0xff]   ;;  %v20970_v35 = vld [vmem:[%s26042_s11 + $0x90] ss:$8 sps:$4 sm:$0xff]  }
  0xf4   : > { %v20971_v36 = vld [vmem:[%s26042_s11 + $0xa4] ss:$8 sps:$4 sm:$0xff]   ;;  %v20973_v38 = vld [vmem:[%s26042_s11 + $0xa0] ss:$8 sps:$4 sm:$0xff]   ;;  %v20974_v39 = vld [vmem:[%s26042_s11 + $0xb4] ss:$8 sps:$4 sm:$0xff]  }
  0xf5   : > { %v20976_v42 = vld [vmem:[%s26042_s11 + $0xb0] ss:$8 sps:$4 sm:$0xff]   ;;  %v20979_v43 = vld [vmem:[%s26042_s11 + $0xc4] ss:$8 sps:$4 sm:$0xff]   ;;  %v20977_v46 = vld [vmem:[%s26042_s11 + $0xc0] ss:$8 sps:$4 sm:$0xff]  }
  0xf6   : > { %17020 = vmatpush3.bf16.msra.mxu1 %v22288_v7  ;;  %16980 = vmatpush3.bf16.msra.mxu0 %v22288_v7  ;;  %v20980_v47 = vld [vmem:[%s26042_s11 + $0xd4] ss:$8 sps:$4 sm:$0xff]   ;;  %v20982_v48 = vld [vmem:[%s26042_s11 + $0xd0] ss:$8 sps:$4 sm:$0xff]   ;;  %v20983_v49 = vld [vmem:[%s26042_s11 + $0xe4] ss:$8 sps:$4 sm:$0xff]  }
  0xf7   : > { %17021 = vmatprep.subr.bf16.mxu1 %v22293_v8  ;;  %16981 = vmatprep.subr.bf16.mxu0 %v22293_v8  ;;  %v20985_v50 = vld [vmem:[%s26042_s11 + $0xe0] ss:$8 sps:$4 sm:$0xff]   ;;  %v20986_v51 = vld [vmem:[%s26042_s11 + $0xf4] ss:$8 sps:$4 sm:$0xff]   ;;  %v20988_v52 = vld [vmem:[%s26042_s11 + $0xf0] ss:$8 sps:$4 sm:$0xff]  }
  0xf8   : > { %v20991_v53 = vld [vmem:[%s26042_s11 + $0x104] ss:$8 sps:$4 sm:$0xff]   ;;  %v20989_v56 = vld [vmem:[%s26042_s11 + $0x100] ss:$8 sps:$4 sm:$0xff]   ;;  %v20992_v57 = vld [vmem:[%s26042_s11 + $0x114] ss:$8 sps:$4 sm:$0xff]  }
  0xf9   : > { %v20994_v60 = vld [vmem:[%s26042_s11 + $0x110] ss:$8 sps:$4 sm:$0xff]   ;;  %v20995_v61 = vld [vmem:[%s26042_s11 + $0x124] ss:$8 sps:$4 sm:$0xff]   ;;  %v20997_v62 = vld [vmem:[%s26042_s11 + $0x120] ss:$8 sps:$4 sm:$0xff]  }
  0xfa   : > { %17022 = vmatpush3.bf16.msra.mxu1 %v22298_v9  ;;  %16982 = vmatpush3.bf16.msra.mxu0 %v22298_v9  ;;  %v20998_v63 = vld [vmem:[%s26042_s11 + $0x134] ss:$8 sps:$4 sm:$0xff]  }
  0xfb   : > { %17023 = vmatprep.subr.bf16.mxu1 %v22303_v10  ;;  %16983 = vmatprep.subr.bf16.mxu0 %v22303_v10  ;;  %v22555_v11 = vld [vmem:[%s22253_s20 + $0x10] sm:$0xff]  }
  0xfc   : > { %v21010_v14 = vld [vmem:[%s26042_s11 + $0x174] ss:$8 sps:$4 sm:$0xff]  }
  0xfe   : > { %17024 = vmatpush3.bf16.msra.mxu1 %v22311_v12  ;;  %16984 = vmatpush3.bf16.msra.mxu0 %v22311_v12 }
  0xff   : > { %17025 = vmatprep.subr.bf16.mxu1 %v22315_v13  ;;  %16985 = vmatprep.subr.bf16.mxu0 %v22315_v13 }
 0x102   : > { %17026 = vmatpush3.bf16.msra.mxu1 %v22324_v15  ;;  %16986 = vmatpush3.bf16.msra.mxu0 %v22324_v15 }
 0x103   : > { %17027 = vmatprep.subr.bf16.mxu1 %v22328_v16  ;;  %16987 = vmatprep.subr.bf16.mxu0 %v22328_v16 }
 0x106   : > { %17028 = vmatpush3.bf16.msra.mxu1 %v22334_v17  ;;  %16988 = vmatpush3.bf16.msra.mxu0 %v22334_v17 }
 0x107   : > { %17077 = vmatprep.subr.bf16.mxu1 %v22256_v0  ;;  %18338 = vmatprep.subr.bf16.mxu0 %v21019_v37 }
 0x109   : > { %1101 = vmatmul.mubr.bf16.vlgmr.msra.gmra.mrb[0].mxu1 %v20941_v18  ;;  %967 = vmatmul.mubr.bf16.vlgmr.msra.gmra.mrb[0].mxu0 %v20952_v20  ;;  %v22581_v18 = vld [vmem:[%s22253_s20 + $0x68] sm:$0xff]  }
 0x10a   : > { %1108 = vmatprep.mubr.bf16.mxu1 %v20944_v19  ;;  %17078 = vmatpush3.bf16.msra.mxu1 %v22259_v1  ;;  %v21012_v19 = vld [vmem:[%s26042_s11 + $0x170] ss:$8 sps:$4 sm:$0xff]   ;;  %v21015_v20 = vld [vmem:[%s26042_s11 + $0x184] ss:$8 sps:$4 sm:$0xff]  }
 0x10b   : > { %17079 = vmatprep.subr.bf16.mxu1 %v22263_v2  ;;  %974 = vmatprep.mubr.bf16.mxu0 %v20956_v21  ;;  %v22591_v21 = vld [vmem:[%s22253_s20 + $0x28] sm:$0xff]  }
 0x10c   : > { %18339 = vmatpush3.bf16.msra.mxu0 %v21019_v37  ;;  %v21041_v37 = vld [vmem:[%s26042_s11 + $0x1e4] ss:$8 sps:$4 sm:$0xff]  }
 0x10d   : > { %18340 = vmatprep.subr.bf16.mxu0 %v21020_v40 }
 0x10e   : > { %17080 = vmatpush3.bf16.msra.mxu1 %v22268_v3 }
 0x10f   : > { %17081 = vmatprep.subr.bf16.mxu1 %v22273_v4 }
 0x110   : > { %18341 = vmatpush3.bf16.msra.mxu0 %v21020_v40  ;;  %v21048_v40 = vld [vmem:[%s26042_s11 + $0x1f0] ss:$8 sps:$4 sm:$0xff]  }
 0x111   : > { %1109 = vmatmul.mubr.bf16.gmra.mrb[4].mxu1 %v20946_v22  ;;  %975 = vmatmul.mubr.bf16.gmra.mrb[4].mxu0 %v20958_v24  ;;  %v22595_v22 = vld [vmem:[%s22253_s20 + $0x70] sm:$0xff]   ;;  %v22603_v24 = vld [vmem:[%s22253_s20 + $0x78] sm:$0xff]  }
 0x112   : > { %1116 = vmatprep.mubr.bf16.mxu1 %v20947_v23  ;;  %17082 = vmatpush3.bf16.msra.mxu1 %v22278_v5  ;;  %v22599_v23 = vld [vmem:[%s22253_s20 + $0x30] sm:$0xff]  }
 0x113   : > { %17083 = vmatprep.subr.bf16.mxu1 %v22283_v6  ;;  %982 = vmatprep.mubr.bf16.mxu0 %v20959_v25  ;;  %v21013_v25 = vld [vmem:[%s26042_s11 + $0x180] ss:$8 sps:$4 sm:$0xff]  }
 0x114   : > { %18342 = vmatprep.subr.bf16.mxu0 %v21024_v41 }
 0x115   : > { %18343 = vmatpush3.bf16.msra.mxu0 %v21024_v41 }
 0x116   : > { %17084 = vmatpush3.bf16.msra.mxu1 %v22288_v7  ;;  %18344 = vmatprep.subr.bf16.mxu0 %v21025_v44 }
 0x117   : > { %17085 = vmatprep.subr.bf16.mxu1 %v22293_v8 }
 0x119   : > { %1117 = vmatmul.mubr.bf16.gmra.mrb[8].mxu1 %v20949_v26  ;;  %983 = vmatmul.mubr.bf16.gmra.mrb[8].mxu0 %v20961_v28  ;;  %v21016_v26 = vld [vmem:[%s26042_s11 + $0x194] ss:$8 sps:$4 sm:$0xff]   ;;  %v21018_v28 = vld [vmem:[%s26042_s11 + $0x190] ss:$8 sps:$4 sm:$0xff]  }
 0x11a   : > { %1124 = vmatprep.mubr.bf16.mxu1 %v20950_v27  ;;  %17086 = vmatpush3.bf16.msra.mxu1 %v22298_v9  ;;  %v22613_v27 = vld [vmem:[%s22253_s20 + $0x38] sm:$0xff]  }
 0x11b   : > { %17087 = vmatprep.subr.bf16.mxu1 %v22303_v10  ;;  %990 = vmatprep.mubr.bf16.mxu0 %v20965_v29  ;;  %v21021_v29 = vld [vmem:[%s26042_s11 + $0x1a4] ss:$8 sps:$4 sm:$0xff]  }
 0x11c   : > { %18345 = vmatpush3.bf16.msra.mxu0 %v21025_v44 }
 0x11d   : > { %18346 = vmatprep.subr.bf16.mxu0 %v21029_v45 }
 0x11e   : > { %17088 = vmatpush3.bf16.msra.mxu1 %v22311_v12 }
 0x11f   : > { %17089 = vmatprep.subr.bf16.mxu1 %v22315_v13 }
 0x120   : > { %18347 = vmatpush3.bf16.msra.mxu0 %v21029_v45 }
 0x121   : > { %1125 = vmatmul.mubr.bf16.gmra.mrb[12].mxu1 %v20955_v30  ;;  %991 = vmatmul.mubr.bf16.gmra.mrb[12].mxu0 %v20967_v32  ;;  %v21023_v30 = vld [vmem:[%s26042_s11 + $0x1a0] ss:$8 sps:$4 sm:$0xff]   ;;  %v21028_v32 = vld [vmem:[%s26042_s11 + $0x1b0] ss:$8 sps:$4 sm:$0xff]  }
 0x122   : > { %17090 = vmatpush3.bf16.msra.mxu1 %v22324_v15  ;;  %1461 = vmatprep.mubr.bf16.mxu1 %v20964_v31  ;;  %v21026_v31 = vld [vmem:[%s26042_s11 + $0x1b4] ss:$8 sps:$4 sm:$0xff]  }
 0x123   : > { %17091 = vmatprep.subr.bf16.mxu1 %v22328_v16  ;;  %18348 = vmatprep.subr.bf16.mxu0 %v21030_v54 }
 0x124   : > { %18349 = vmatpush3.bf16.msra.mxu0 %v21030_v54 }
 0x125   : > { %18350 = vmatprep.subr.bf16.mxu0 %v21034_v55 }
 0x126   : > { %17092 = vmatpush3.bf16.msra.mxu1 %v22334_v17 }
 0x127   : > { %17129 = vmatprep.subr.bf16.mxu1 %v22256_v0 }
 0x128   : > { %18351 = vmatpush3.bf16.msra.mxu0 %v21034_v55  ;;  %v21051_v55 = vld [vmem:[%s26042_s11 + $0x200] ss:$8 sps:$4 sm:$0xff]  }
 0x129   : > { %1462 = vmatmul.mubr.bf16.vlgmr.msra.gmra.mrb[16].mxu1 %v20962_v33  ;;  %18352 = vmatprep.subr.bf16.mxu0 %v21035_v58  ;;  %v21033_v33 = vld [vmem:[%s26042_s11 + $0x1c4] ss:$8 sps:$4 sm:$0xff]  }
 0x12a   : > { %17130 = vmatpush3.bf16.msra.mxu1 %v22259_v1  ;;  %1469 = vmatprep.mubr.bf16.mxu1 %v20968_v34  ;;  %v21031_v34 = vld [vmem:[%s26042_s11 + $0x1c0] ss:$8 sps:$4 sm:$0xff]  }
 0x12b   : > { %17131 = vmatprep.subr.bf16.mxu1 %v22263_v2 }
 0x12c   : > { %18353 = vmatpush3.bf16.msra.mxu0 %v21035_v58  ;;  %v21056_v58 = vld [vmem:[%s26042_s11 + $0x214] ss:$8 sps:$4 sm:$0xff]  }
 0x12d   : > { %18362 = vmatprep.subr.bf16.mxu0 %v21039_v59 }
 0x12e   : > { %17132 = vmatpush3.bf16.msra.mxu1 %v22268_v3 }
 0x12f   : > { %17133 = vmatprep.subr.bf16.mxu1 %v22273_v4 }
 0x131   : > { %1470 = vmatmul.mubr.bf16.gmra.mrb[20].mxu1 %v20970_v35  ;;  %v21036_v35 = vld [vmem:[%s26042_s11 + $0x1d4] ss:$8 sps:$4 sm:$0xff]  }
 0x132   : > { %17134 = vmatpush3.bf16.msra.mxu1 %v22278_v5  ;;  %1477 = vmatprep.mubr.bf16.mxu1 %v20971_v36  ;;  %v21038_v36 = vld [vmem:[%s26042_s11 + $0x1d0] ss:$8 sps:$4 sm:$0xff]  }
 0x133   : > { %17135 = vmatprep.subr.bf16.mxu1 %v22283_v6 }
 0x136   : > { %17136 = vmatpush3.bf16.msra.mxu1 %v22288_v7 }
 0x137   : > { %17137 = vmatprep.subr.bf16.mxu1 %v22293_v8 }
 0x139   : > { %1478 = vmatmul.mubr.bf16.gmra.mrb[24].mxu1 %v20973_v38  ;;  %v21043_v38 = vld [vmem:[%s26042_s11 + $0x1e0] ss:$8 sps:$4 sm:$0xff]  }
 0x13a   : > { %17138 = vmatpush3.bf16.msra.mxu1 %v22298_v9  ;;  %1485 = vmatprep.mubr.bf16.mxu1 %v20974_v39  ;;  %v21046_v39 = vld [vmem:[%s26042_s11 + $0x1f4] ss:$8 sps:$4 sm:$0xff]  }
 0x13b   : > { %17139 = vmatprep.subr.bf16.mxu1 %v22303_v10 }
 0x13e   : > { %17140 = vmatpush3.bf16.msra.mxu1 %v22311_v12 }
 0x13f   : > { %17141 = vmatprep.subr.bf16.mxu1 %v22315_v13 }
 0x141   : > { %1486 = vmatmul.mubr.bf16.gmra.mrb[28].mxu1 %v20976_v42  ;;  %v21053_v42 = vld [vmem:[%s26042_s11 + $0x204] ss:$8 sps:$4 sm:$0xff]  }
 0x142   : > { %17142 = vmatpush3.bf16.msra.mxu1 %v22324_v15  ;;  %1717 = vmatprep.mubr.bf16.mxu1 %v20979_v43 }
 0x143   : > { %17143 = vmatprep.subr.bf16.mxu1 %v22328_v16 }
 0x146   : > { %17144 = vmatpush3.bf16.msra.mxu1 %v22334_v17 }
 0x147   : > { %17181 = vmatprep.subr.bf16.mxu1 %v22256_v0 }
 0x149   : > { %1718 = vmatmul.mubr.bf16.vlgmr.msra.gmra.mrb[32].mxu1 %v20977_v46 }
 0x14a   : > { %17182 = vmatpush3.bf16.msra.mxu1 %v22259_v1  ;;  %1725 = vmatprep.mubr.bf16.mxu1 %v20980_v47 }
 0x14b   : > { %17183 = vmatprep.subr.bf16.mxu1 %v22263_v2 }
 0x14e   : > { %17184 = vmatpush3.bf16.msra.mxu1 %v22268_v3 }
 0x14f   : > { %17185 = vmatprep.subr.bf16.mxu1 %v22273_v4 }
 0x151   : > { %1726 = vmatmul.mubr.bf16.gmra.mrb[36].mxu1 %v20982_v48 }
 0x152   : > { %17186 = vmatpush3.bf16.msra.mxu1 %v22278_v5  ;;  %1733 = vmatprep.mubr.bf16.mxu1 %v20983_v49 }
 0x153   : > { %17187 = vmatprep.subr.bf16.mxu1 %v22283_v6 }
 0x156   : > { %17188 = vmatpush3.bf16.msra.mxu1 %v22288_v7 }
 0x157   : > { %17189 = vmatprep.subr.bf16.mxu1 %v22293_v8 }
 0x159   : > { %1734 = vmatmul.mubr.bf16.gmra.mrb[40].mxu1 %v20985_v50 }
 0x15a   : > { %17190 = vmatpush3.bf16.msra.mxu1 %v22298_v9  ;;  %1741 = vmatprep.mubr.bf16.mxu1 %v20986_v51 }
 0x15b   : > { %17191 = vmatprep.subr.bf16.mxu1 %v22303_v10 }
 0x15e   : > { %17192 = vmatpush3.bf16.msra.mxu1 %v22311_v12 }
 0x15f   : > { %17193 = vmatprep.subr.bf16.mxu1 %v22315_v13 }
 0x161   : > { %1742 = vmatmul.mubr.bf16.gmra.mrb[44].mxu1 %v20988_v52 }
 0x162   : > { %17194 = vmatpush3.bf16.msra.mxu1 %v22324_v15  ;;  %1973 = vmatprep.mubr.bf16.mxu1 %v20991_v53 }
 0x163   : > { %17195 = vmatprep.subr.bf16.mxu1 %v22328_v16 }
 0x166   : > { %17196 = vmatpush3.bf16.msra.mxu1 %v22334_v17 }
 0x167   : > { %17233 = vmatprep.subr.bf16.mxu1 %v22256_v0  ;;  %v21000_v0 = vld [vmem:[%s26042_s11 + $0x130] ss:$8 sps:$4 sm:$0xff]  }
 0x169   : > { %1974 = vmatmul.mubr.bf16.vlgmr.msra.gmra.mrb[48].mxu1 %v20989_v56 }
 0x16a   : > { %17234 = vmatpush3.bf16.msra.mxu1 %v22259_v1  ;;  %1981 = vmatprep.mubr.bf16.mxu1 %v20992_v57  ;;  %v21003_v1 = vld [vmem:[%s26042_s11 + $0x144] ss:$8 sps:$4 sm:$0xff]  }
 0x16b   : > { %17235 = vmatprep.subr.bf16.mxu1 %v22263_v2  ;;  %v21001_v2 = vld [vmem:[%s26042_s11 + $0x140] ss:$8 sps:$4 sm:$0xff]  }
 0x16e   : > { %17236 = vmatpush3.bf16.msra.mxu1 %v22268_v3  ;;  %v21004_v3 = vld [vmem:[%s26042_s11 + $0x154] ss:$8 sps:$4 sm:$0xff]  }
 0x16f   : > { %17237 = vmatprep.subr.bf16.mxu1 %v22273_v4  ;;  %v22529_v4 = vld [vmem:[%s22253_s20 + $0x40] sm:$0xff]  }
 0x171   : > { %1982 = vmatmul.mubr.bf16.gmra.mrb[52].mxu1 %v20994_v60 }
 0x172   : > { %17238 = vmatpush3.bf16.msra.mxu1 %v22278_v5  ;;  %1989 = vmatprep.mubr.bf16.mxu1 %v20995_v61  ;;  %v22533_v5 = vld [vmem:[%s22253_s20] sm:$0xff]  }
 0x173   : > { %17239 = vmatprep.subr.bf16.mxu1 %v22283_v6  ;;  %v22537_v6 = vld [vmem:[%s22253_s20 + $0x48] sm:$0xff]  }
 0x176   : > { %17240 = vmatpush3.bf16.msra.mxu1 %v22288_v7  ;;  %v21006_v7 = vld [vmem:[%s26042_s11 + $0x150] ss:$8 sps:$4 sm:$0xff]  }
 0x177   : > { %17241 = vmatprep.subr.bf16.mxu1 %v22293_v8  ;;  %v21007_v8 = vld [vmem:[%s26042_s11 + $0x164] ss:$8 sps:$4 sm:$0xff]  }
 0x179   : > { %1990 = vmatmul.mubr.bf16.gmra.mrb[56].mxu1 %v20997_v62 }
 0x17a   : > { %17242 = vmatpush3.bf16.msra.mxu1 %v22298_v9  ;;  %1997 = vmatprep.mubr.bf16.mxu1 %v20998_v63  ;;  %v22547_v9 = vld [vmem:[%s22253_s20 + $0x8] sm:$0xff]  }
 0x17b   : > { %17243 = vmatprep.subr.bf16.mxu1 %v22303_v10  ;;  %v22551_v10 = vld [vmem:[%s22253_s20 + $0x50] sm:$0xff]  }
 0x17e   : > { %17244 = vmatpush3.bf16.msra.mxu1 %v22311_v12  ;;  %v22559_v12 = vld [vmem:[%s22253_s20 + $0x58] sm:$0xff]  }
 0x17f   : > { %17245 = vmatprep.subr.bf16.mxu1 %v22315_v13  ;;  %v21009_v13 = vld [vmem:[%s26042_s11 + $0x160] ss:$8 sps:$4 sm:$0xff]  }
 0x181   : > { %1998 = vmatmul.mubr.bf16.gmra.mrb[60].mxu1 %v21000_v0 }
 0x182   : > { %17246 = vmatpush3.bf16.msra.mxu1 %v22324_v15  ;;  %2229 = vmatprep.mubr.bf16.mxu1 %v21003_v1  ;;  %v22569_v15 = vld [vmem:[%s22253_s20 + $0x18] sm:$0xff]  }
 0x183   : > { %17247 = vmatprep.subr.bf16.mxu1 %v22328_v16  ;;  %v22573_v16 = vld [vmem:[%s22253_s20 + $0x60] sm:$0xff]  }
 0x186   : > { %17248 = vmatpush3.bf16.msra.mxu1 %v22334_v17  ;;  %v22577_v17 = vld [vmem:[%s22253_s20 + $0x20] sm:$0xff]  }
 0x187   : > { %17285 = vmatprep.subr.bf16.mxu1 %v22529_v4 }
 0x189   : > { %2230 = vmatmul.mubr.bf16.vlgmr.msra.gmra.mrb[64].mxu1 %v21001_v2 }
 0x18a   : > { %17286 = vmatpush3.bf16.msra.mxu1 %v22533_v5  ;;  %2237 = vmatprep.mubr.bf16.mxu1 %v21004_v3 }
 0x18b   : > { %17287 = vmatprep.subr.bf16.mxu1 %v22537_v6 }
 0x18e   : > { %17288 = vmatpush3.bf16.msra.mxu1 %v22547_v9 }
 0x18f   : > { %17289 = vmatprep.subr.bf16.mxu1 %v22551_v10 }
 0x191   : > { %2238 = vmatmul.mubr.bf16.gmra.mrb[68].mxu1 %v21006_v7 }
 0x192   : > { %17290 = vmatpush3.bf16.msra.mxu1 %v22555_v11  ;;  %2245 = vmatprep.mubr.bf16.mxu1 %v21007_v8  ;;  %v21058_v8 = vld [vmem:[%s26042_s11 + $0x210] ss:$8 sps:$4 sm:$0xff]  }
 0x193   : > { %17291 = vmatprep.subr.bf16.mxu1 %v22559_v12 }
 0x196   : > { %17292 = vmatpush3.bf16.msra.mxu1 %v22569_v15 }
 0x197   : > { %17293 = vmatprep.subr.bf16.mxu1 %v22573_v16 }
 0x199   : > { %2246 = vmatmul.mubr.bf16.gmra.mrb[72].mxu1 %v21009_v13 }
 0x19a   : > { %17294 = vmatpush3.bf16.msra.mxu1 %v22577_v17  ;;  %2253 = vmatprep.mubr.bf16.mxu1 %v21010_v14  ;;  %v21044_v14 = vld [vmem:[#allocation2 + $0x10] sm:$0xff]  }
 0x19b   : > { %17295 = vmatprep.subr.bf16.mxu1 %v22581_v18 }
 0x19e   : > { %17296 = vmatpush3.bf16.msra.mxu1 %v22591_v21 }
 0x19f   : > { %17297 = vmatprep.subr.bf16.mxu1 %v22595_v22 }
 0x1a1   : > { %2254 = vmatmul.mubr.bf16.gmra.mrb[76].mxu1 %v21012_v19 }
 0x1a2   : > { %17298 = vmatpush3.bf16.msra.mxu1 %v22599_v23  ;;  %2485 = vmatprep.mubr.bf16.mxu1 %v21015_v20 }
 0x1a3   : > { %17299 = vmatprep.subr.bf16.mxu1 %v22603_v24 }
 0x1a6   : > { %17300 = vmatpush3.bf16.msra.mxu1 %v22613_v27 }
 0x1a7   : > { %17337 = vmatprep.subr.bf16.mxu1 %v22529_v4 }
 0x1a9   : > { %2486 = vmatmul.mubr.bf16.vlgmr.msra.gmra.mrb[80].mxu1 %v21013_v25 }
 0x1aa   : > { %17338 = vmatpush3.bf16.msra.mxu1 %v22533_v5  ;;  %2493 = vmatprep.mubr.bf16.mxu1 %v21016_v26 }
 0x1ab   : > { %17339 = vmatprep.subr.bf16.mxu1 %v22537_v6 }
 0x1ae   : > { %17340 = vmatpush3.bf16.msra.mxu1 %v22547_v9 }
 0x1af   : > { %17341 = vmatprep.subr.bf16.mxu1 %v22551_v10 }
 0x1b1   : > { %2494 = vmatmul.mubr.bf16.gmra.mrb[84].mxu1 %v21018_v28 }
 0x1b2   : > { %17342 = vmatpush3.bf16.msra.mxu1 %v22555_v11  ;;  %2501 = vmatprep.mubr.bf16.mxu1 %v21021_v29  ;;  %v21066_v29 = vld [vmem:[%s26042_s11 + $0x234] ss:$8 sps:$4 sm:$0xff]  }
 0x1b3   : > { %17343 = vmatprep.subr.bf16.mxu1 %v22559_v12 }
 0x1b6   : > { %17344 = vmatpush3.bf16.msra.mxu1 %v22569_v15 }
 0x1b7   : > { %17345 = vmatprep.subr.bf16.mxu1 %v22573_v16 }
 0x1b9   : > { %2502 = vmatmul.mubr.bf16.gmra.mrb[88].mxu1 %v21023_v30 }
 0x1ba   : > { %17346 = vmatpush3.bf16.msra.mxu1 %v22577_v17  ;;  %2509 = vmatprep.mubr.bf16.mxu1 %v21026_v31 }
 0x1bb   : > { %17347 = vmatprep.subr.bf16.mxu1 %v22581_v18 }
 0x1be   : > { %17348 = vmatpush3.bf16.msra.mxu1 %v22591_v21 }
 0x1bf   : > { %17349 = vmatprep.subr.bf16.mxu1 %v22595_v22 }
 0x1c1   : > { %2510 = vmatmul.mubr.bf16.gmra.mrb[92].mxu1 %v21028_v32  ;;  %v21049_v32 = vld [vmem:[#allocation2 + $0x20] sm:$0xff]  }
 0x1c2   : > { %17350 = vmatpush3.bf16.msra.mxu1 %v22599_v23  ;;  %2741 = vmatprep.mubr.bf16.mxu1 %v21033_v33 }
 0x1c3   : > { %17351 = vmatprep.subr.bf16.mxu1 %v22603_v24 }
 0x1c6   : > { %17352 = vmatpush3.bf16.msra.mxu1 %v22613_v27 }
 0x1c7   : > { %17389 = vmatprep.subr.bf16.mxu1 %v22529_v4 }
 0x1c9   : > { %2742 = vmatmul.mubr.bf16.vlgmr.msra.gmra.mrb[96].mxu1 %v21031_v34 }
 0x1ca   : > { %17390 = vmatpush3.bf16.msra.mxu1 %v22533_v5  ;;  %2749 = vmatprep.mubr.bf16.mxu1 %v21036_v35 }
 0x1cb   : > { %17391 = vmatprep.subr.bf16.mxu1 %v22537_v6  ;;  %v21040_v6 = vld [vmem:[#allocation2 + $0x8] sm:$0xff]  }
 0x1ce   : > { %17392 = vmatpush3.bf16.msra.mxu1 %v22547_v9 }
 0x1cf   : > { %17393 = vmatprep.subr.bf16.mxu1 %v22551_v10 }
 0x1d1   : > { %2750 = vmatmul.mubr.bf16.gmra.mrb[100].mxu1 %v21038_v36 }
 0x1d2   : > { %17394 = vmatpush3.bf16.msra.mxu1 %v22555_v11  ;;  %2757 = vmatprep.mubr.bf16.mxu1 %v21041_v37  ;;  %v21061_v11 = vld [vmem:[%s26042_s11 + $0x224] ss:$8 sps:$4 sm:$0xff]  }
 0x1d3   : > { %17395 = vmatprep.subr.bf16.mxu1 %v22559_v12  ;;  %v21703_v12 = vld [vmem:[#allocation2] sm:$0xff]  }
 0x1d6   : > { %17396 = vmatpush3.bf16.msra.mxu1 %v22569_v15 }
 0x1d7   : > { %17397 = vmatprep.subr.bf16.mxu1 %v22573_v16 }
 0x1d9   : > { %2758 = vmatmul.mubr.bf16.gmra.mrb[104].mxu1 %v21043_v38 }
 0x1da   : > { %17398 = vmatpush3.bf16.msra.mxu1 %v22577_v17  ;;  %2765 = vmatprep.mubr.bf16.mxu1 %v21046_v39 }
 0x1db   : > { %17399 = vmatprep.subr.bf16.mxu1 %v22581_v18 }
 0x1dc   : > { %v17029_v41 = vpop.f32.mrb[0].mxu1  ;;  %v16989_v46 = vpop.f32.mrb[0].mxu0 }
 0x1dd   : > { %v17030_v43 = vpop.f32.mrb[1].mxu1  ;;  %v16990_v48 = vpop.f32.mrb[1].mxu0 }
 0x1de   : > { %v17031_v44 = vadd.f32 %v17030_v43, %v17029_v41  ;;  %v17032_v45 = vpop.f32.mrb[2].mxu1  ;;  %17400 = vmatpush3.bf16.msra.mxu1 %v22591_v21  ;;  %v16992_v50 = vpop.f32.mrb[2].mxu0  ;;  %v22687_v51 = vadd.f32 %v16990_v48, %v16989_v46  ;;  %v21050_v41 = vld [vmem:[#allocation2 + $0x28] sm:$0xff]  }
 0x1df   : > { %v17033_v47 = vpop.f32.mrb[3].mxu1  ;;  %17401 = vmatprep.subr.bf16.mxu1 %v22595_v22  ;;  %v16993_v52 = vpop.f32.mrb[3].mxu0 }
 0x1e0   : > { %v17034_v49 = vadd.f32 %v17033_v47, %v17032_v45  ;;  %v22690_v54 = vadd.f32 %v16993_v52, %v16992_v50  ;;  %v21068_v45 = vld [vmem:[%s26042_s11 + $0x230] ss:$8 sps:$4 sm:$0xff]  }
 0x1e1   : > { %2766 = vmatmul.mubr.bf16.gmra.mrb[108].mxu1 %v21048_v40 }
 0x1e2   : > { %v1133_v53 = vpack.c.bf16 %v17034_v49, %v17031_v44  ;;  %17402 = vmatpush3.bf16.msra.mxu1 %v22599_v23  ;;  %2997 = vmatprep.mubr.bf16.mxu1 %v21053_v42  ;;  %v999_v57 = vpack.c.bf16 %v22690_v54, %v22687_v51  ;;  %v21045_v23 = vld [vmem:[#allocation2 + $0x18] sm:$0xff]   ;;  %v21054_v49 = vld [vmem:[#allocation2 + $0x30] sm:$0xff]  }
 0x1e3   : > { %17403 = vmatprep.subr.bf16.mxu1 %v22603_v24 }
 0x1e4   : > { %v17035_v56 = vpop.f32.mrb[4].mxu1  ;;  %18354 = vmatprep.mubr.bf16.mxu0 %v1133_v53  ;;  %v16995_v62 = vpop.f32.mrb[4].mxu0 }
 0x1e5   : > { %v17036_v59 = vpop.f32.mrb[5].mxu1  ;;  %v16996_v0 = vpop.f32.mrb[5].mxu0 }
 0x1e6   : > { %v17038_v60 = vpop.f32.mrb[6].mxu1  ;;  %v17037_v61 = vadd.f32 %v17036_v59, %v17035_v56  ;;  %17404 = vmatpush3.bf16.msra.mxu1 %v22613_v27  ;;  %v16998_v2 = vpop.f32.mrb[6].mxu0  ;;  %v22702_v3 = vadd.f32 %v16996_v0, %v16995_v62  ;;  %v21063_v27 = vld [vmem:[%s26042_s11 + $0x220] ss:$8 sps:$4 sm:$0xff]   ;;  %v21055_v56 = vld [vmem:[#allocation2 + $0x38] sm:$0xff]  }
 0x1e7   : > { %v17039_v63 = vpop.f32.mrb[7].mxu1  ;;  %v16999_v4 = vpop.f32.mrb[7].mxu0 }
 0x1e8   : > { %v17040_v1 = vadd.f32 %v17039_v63, %v17038_v60  ;;  %v22704_v7 = vadd.f32 %v16999_v4, %v16998_v2  ;;  %v21060_v63 = vld [vmem:[#allocation2 + $0x88] sm:$0xff]   ;;  %v21064_v4 = vld [vmem:[#allocation2 + $0x90] sm:$0xff]  }
 0x1e9   : > { %2998 = vmatmul.mubr.bf16.vlgmr.msra.gmra.mrb[112].mxu1 %v21051_v55 }
 0x1ea   : > { %v1134_v5 = vpack.c.bf16 %v17040_v1, %v17037_v61  ;;  %3005 = vmatprep.mubr.bf16.mxu1 %v21056_v58  ;;  %v1000_v10 = vpack.c.bf16 %v22704_v7, %v22702_v3  ;;  %v21059_v61 = vld [vmem:[#allocation2 + $0x80] sm:$0xff]  }
 0x1eb   : > { %v21069_v7 = vld [vmem:[#allocation2 + $0xa0] sm:$0xff]  }
 0x1ec   : > { %18355 = vmatmul.mubr.bf16.vlgmr.msra.gmra.mrb[16].mxu0 %v1134_v5  ;;  %v17041_v9 = vpop.f32.mrb[8].mxu1  ;;  %v17001_v17 = vpop.f32.mrb[8].mxu0 }
 0x1ed   : > { %18363 = vmatpush3.bf16.msra.mxu0 %v21703_v12  ;;  %v17042_v13 = vpop.f32.mrb[9].mxu1  ;;  %v17002_v19 = vpop.f32.mrb[9].mxu0 }
 0x1ee   : > { %18364 = vmatprep.subr.bf16.mxu0 %v21040_v6  ;;  %v17044_v15 = vpop.f32.mrb[10].mxu1  ;;  %v17043_v16 = vadd.f32 %v17042_v13, %v17041_v9  ;;  %v17004_v21 = vpop.f32.mrb[10].mxu0  ;;  %v22714_v22 = vadd.f32 %v17002_v19, %v17001_v17  ;;  %v21070_v17 = vld [vmem:[#allocation2 + $0xa8] sm:$0xff]  }
 0x1ef   : > { %v17045_v18 = vpop.f32.mrb[11].mxu1  ;;  %v17005_v24 = vpop.f32.mrb[11].mxu0 }
 0x1f0   : > { %v17046_v20 = vadd.f32 %v17045_v18, %v17044_v15  ;;  %v17006_v26 = vadd.f32 %v17005_v24, %v17004_v21  ;;  %v21071_v21 = vld [vmem:[#allocation2 + $0xb0] sm:$0xff]  }
 0x1f1   : > { %18365 = vmatpush3.bf16.msra.mxu0 %v21040_v6  ;;  %3006 = vmatmul.mubr.bf16.gmra.mrb[116].mxu1 %v21058_v8 }
 0x1f2   : > { %18366 = vmatprep.subr.bf16.mxu0 %v21044_v14  ;;  %v1135_v25 = vpack.c.bf16 %v17046_v20, %v17043_v16  ;;  %3013 = vmatprep.mubr.bf16.mxu1 %v21061_v11  ;;  %v1001_v30 = vpack.c.bf16 %v17006_v26, %v22714_v22  ;;  %v21065_v11 = vld [vmem:[#allocation2 + $0x98] sm:$0xff]  }
 0x1f3   : > { %v21072_v26 = vld [vmem:[#allocation2 + $0xb8] sm:$0xff]  }
 0x1f4   : > { %v17047_v28 = vpop.f32.mrb[12].mxu1  ;;  %18358 = vmatprep.mubr.bf16.mxu0 %v1135_v25  ;;  %v17007_v35 = vpop.f32.mrb[12].mxu0 }
 0x1f5   : > { %18367 = vmatpush3.bf16.msra.mxu0 %v21044_v14  ;;  %v17048_v31 = vpop.f32.mrb[13].mxu1  ;;  %v17008_v37 = vpop.f32.mrb[13].mxu0 }
 0x1f6   : > { %18368 = vmatprep.subr.bf16.mxu0 %v21045_v23  ;;  %v17049_v33 = vadd.f32 %v17048_v31, %v17047_v28  ;;  %v17050_v34 = vpop.f32.mrb[14].mxu1  ;;  %v17010_v39 = vpop.f32.mrb[14].mxu0  ;;  %v17009_v40 = vadd.f32 %v17008_v37, %v17007_v35  ;;  %v21074_v35 = vld [vmem:[#allocation2 + $0xc8] sm:$0xff]  }
 0x1f7   : > { %v17051_v36 = vpop.f32.mrb[15].mxu1  ;;  %v17011_v42 = vpop.f32.mrb[15].mxu0 }
 0x1f8   : > { %v17052_v38 = vadd.f32 %v17051_v36, %v17050_v34  ;;  %v17012_v44 = vadd.f32 %v17011_v42, %v17010_v39  ;;  %v21075_v39 = vld [vmem:[#allocation2 + $0xd0] sm:$0xff]  }
 0x1f9   : > { %18369 = vmatpush3.bf16.msra.mxu0 %v21045_v23  ;;  %3014 = vmatmul.mubr.bf16.gmra.mrb[120].mxu1 %v21063_v27 }
 0x1fa   : > { %18370 = vmatprep.subr.bf16.mxu0 %v21049_v32  ;;  %v1136_v43 = vpack.c.bf16 %v17052_v38, %v17049_v33  ;;  %3021 = vmatprep.mubr.bf16.mxu1 %v21066_v29  ;;  %v1002_v47 = vpack.c.bf16 %v17012_v44, %v17009_v40  ;;  %v21076_v44 = vld [vmem:[#allocation2 + $0xd8] sm:$0xff]  }
 0x1fc   : > { %18359 = vmatmul.mubr.bf16.gmra.mrb[20].mxu0 %v1136_v43  ;;  %v17093_v46 = vpop.f32.mrb[16].mxu1 }
 0x1fd   : > { %18371 = vmatpush3.bf16.msra.mxu0 %v21049_v32  ;;  %18378 = vmatprep.mubr.bf16.mxu0 %v999_v57  ;;  %v17094_v48 = vpop.f32.mrb[17].mxu1 }
 0x1fe   : > { %18372 = vmatprep.subr.bf16.mxu0 %v21050_v41  ;;  %v17095_v50 = vadd.f32 %v17094_v48, %v17093_v46  ;;  %v17096_v52 = vpop.f32.mrb[18].mxu1  ;;  %v21077_v48 = vld [vmem:[#allocation2 + $0xe0] sm:$0xff]  }
 0x1ff   : > { %v17097_v53 = vpop.f32.mrb[19].mxu1 }
 0x200   : > { %v17098_v55 = vadd.f32 %v17097_v53, %v17096_v52 }
 0x201   : > { %18373 = vmatpush3.bf16.msra.mxu0 %v21050_v41  ;;  %3022 = vmatmul.mubr.bf16.gmra.mrb[124].mxu1 %v21068_v45 }
 0x202   : > { %18374 = vmatprep.subr.bf16.mxu0 %v21054_v49  ;;  %v1494_v58 = vpack.c.bf16 %v17098_v55, %v17095_v50  ;;  %v21078_v55 = vld [vmem:[#allocation2 + $0xe8] sm:$0xff]  }
 0x204   : > { %v17099_v59 = vpop.f32.mrb[20].mxu1 }
 0x205   : > { %18375 = vmatpush3.bf16.msra.mxu0 %v21054_v49  ;;  %v17100_v60 = vpop.f32.mrb[21].mxu1 }
 0x206   : > { %18376 = vmatprep.subr.bf16.mxu0 %v21055_v56  ;;  %v22729_v62 = vadd.f32 %v17100_v60, %v17099_v59  ;;  %v17102_v51 = vpop.f32.mrb[22].mxu1  ;;  %v21079_v60 = vld [vmem:[#allocation2 + $0xf0] sm:$0xff]  }
 0x207   : > { %v17103_v54 = vpop.f32.mrb[23].mxu1 }
 0x208   : > { %v17104_v57 = vadd.f32 %v17103_v54, %v17102_v51 }
 0x209   : > { %18377 = vmatpush3.bf16.msra.mxu0 %v21055_v56 }
 0x20a   : > { %18386 = vmatprep.subr.bf16.mxu0 %v21059_v61  ;;  %v1495_v0 = vpack.c.bf16 %v17104_v57, %v22729_v62  ;;  %v21080_v57 = vld [vmem:[#allocation2 + $0xf8] sm:$0xff]  }
 0x20c   : > { %18379 = vmatmul.mubr.bf16.vlgmr.msra.gmra.mrb[16].mxu0 %v1000_v10  ;;  %v17105_v1 = vpop.f32.mrb[24].mxu1 }
 0x20d   : > { %18387 = vmatpush3.bf16.msra.mxu0 %v21059_v61  ;;  %18382 = vmatprep.mubr.bf16.mxu0 %v1001_v30  ;;  %v17106_v2 = vpop.f32.mrb[25].mxu1  ;;  %v21073_v30 = vld [vmem:[#allocation2 + $0xc0] sm:$0xff]  }
 0x20e   : > { %18388 = vmatprep.subr.bf16.mxu0 %v21060_v63  ;;  %v17107_v5 = vadd.f32 %v17106_v2, %v17105_v1  ;;  %v17108_v6 = vpop.f32.mrb[26].mxu1  ;;  %v21081_v2 = vld [vmem:[#allocation2 + $0x100] sm:$0xff]  }
 0x20f   : > { %v17109_v8 = vpop.f32.mrb[27].mxu1 }
 0x210   : > { %v17110_v9 = vadd.f32 %v17109_v8, %v17108_v6 }
 0x211   : > { %18389 = vmatpush3.bf16.msra.mxu0 %v21060_v63 }
 0x212   : > { %18390 = vmatprep.subr.bf16.mxu0 %v21064_v4  ;;  %v1496_v12 = vpack.c.bf16 %v17110_v9, %v17107_v5  ;;  %v21082_v9 = vld [vmem:[#allocation2 + $0x108] sm:$0xff]  }
 0x214   : > { %18383 = vmatmul.mubr.bf16.gmra.mrb[20].mxu0 %v1002_v47  ;;  %v17111_v13 = vpop.f32.mrb[28].mxu1 }
 0x215   : > { %18391 = vmatpush3.bf16.msra.mxu0 %v21064_v4  ;;  %18402 = vmatprep.mubr.bf16.mxu0 %v1494_v58  ;;  %v17112_v3 = vpop.f32.mrb[29].mxu1 }
 0x216   : > { %18392 = vmatprep.subr.bf16.mxu0 %v21065_v11  ;;  %v17113_v10 = vadd.f32 %v17112_v3, %v17111_v13  ;;  %v17114_v14 = vpop.f32.mrb[30].mxu1  ;;  %v21083_v3 = vld [vmem:[#allocation2 + $0x110] sm:$0xff]  }
 0x217   : > { %v17115_v15 = vpop.f32.mrb[31].mxu1 }
 0x218   : > { %v17116_v16 = vadd.f32 %v17115_v15, %v17114_v14 }
 0x219   : > { %18393 = vmatpush3.bf16.msra.mxu0 %v21065_v11 }
 0x21a   : > { %18394 = vmatprep.subr.bf16.mxu0 %v21069_v7  ;;  %v1497_v18 = vpack.c.bf16 %v17116_v16, %v17113_v10  ;;  %v21084_v16 = vld [vmem:[#allocation2 + $0x118] sm:$0xff]  }
 0x21c   : > { %v17145_v19 = vpop.f32.mrb[32].mxu1 }
 0x21d   : > { %18395 = vmatpush3.bf16.msra.mxu0 %v21069_v7  ;;  %v17146_v20 = vpop.f32.mrb[33].mxu1 }
 0x21e   : > { %18396 = vmatprep.subr.bf16.mxu0 %v21070_v17  ;;  %v17147_v22 = vadd.f32 %v17146_v20, %v17145_v19  ;;  %v17148_v23 = vpop.f32.mrb[34].mxu1  ;;  %v21085_v20 = vld [vmem:[#allocation2 + $0x120] sm:$0xff]  }
 0x21f   : > { %v17149_v24 = vpop.f32.mrb[35].mxu1 }
 0x220   : > { %v17150_v25 = vadd.f32 %v17149_v24, %v17148_v23 }
 0x221   : > { %18397 = vmatpush3.bf16.msra.mxu0 %v21070_v17 }
 0x222   : > { %18398 = vmatprep.subr.bf16.mxu0 %v21071_v21  ;;  %v1750_v27 = vpack.c.bf16 %v17150_v25, %v17147_v22  ;;  %v21086_v25 = vld [vmem:[#allocation2 + $0x128] sm:$0xff]  }
 0x224   : > { %v17151_v28 = vpop.f32.mrb[36].mxu1 }
 0x225   : > { %18399 = vmatpush3.bf16.msra.mxu0 %v21071_v21  ;;  %v17152_v29 = vpop.f32.mrb[37].mxu1 }
 0x226   : > { %18400 = vmatprep.subr.bf16.mxu0 %v21072_v26  ;;  %v22735_v31 = vadd.f32 %v17152_v29, %v17151_v28  ;;  %v17154_v32 = vpop.f32.mrb[38].mxu1  ;;  %v21087_v29 = vld [vmem:[#allocation2 + $0x130] sm:$0xff]  }
 0x227   : > { %v17155_v33 = vpop.f32.mrb[39].mxu1 }
 0x228   : > { %v17156_v34 = vadd.f32 %v17155_v33, %v17154_v32 }
 0x229   : > { %18401 = vmatpush3.bf16.msra.mxu0 %v21072_v26 }
 0x22a   : > { %18410 = vmatprep.subr.bf16.mxu0 %v21073_v30  ;;  %v1751_v36 = vpack.c.bf16 %v17156_v34, %v22735_v31  ;;  %v21088_v34 = vld [vmem:[#allocation2 + $0x138] sm:$0xff]  }
 0x22c   : > { %18403 = vmatmul.mubr.bf16.vlgmr.msra.gmra.mrb[16].mxu0 %v1495_v0  ;;  %v17157_v37 = vpop.f32.mrb[40].mxu1 }
 0x22d   : > { %18411 = vmatpush3.bf16.msra.mxu0 %v21073_v30  ;;  %18406 = vmatprep.mubr.bf16.mxu0 %v1496_v12  ;;  %v17158_v38 = vpop.f32.mrb[41].mxu1 }
 0x22e   : > { %18412 = vmatprep.subr.bf16.mxu0 %v21074_v35  ;;  %v17159_v40 = vadd.f32 %v17158_v38, %v17157_v37  ;;  %v17160_v41 = vpop.f32.mrb[42].mxu1  ;;  %v21089_v38 = vld [vmem:[#allocation2 + $0x140] sm:$0xff]  }
 0x22f   : > { %v17161_v42 = vpop.f32.mrb[43].mxu1 }
 0x230   : > { %v17162_v43 = vadd.f32 %v17161_v42, %v17160_v41  ;;  %v21090_v42 = vld [vmem:[#allocation2 + $0x148] sm:$0xff]  }
 0x231   : > { %18413 = vmatpush3.bf16.msra.mxu0 %v21074_v35 }
 0x232   : > { %18414 = vmatprep.subr.bf16.mxu0 %v21075_v39  ;;  %v1752_v45 = vpack.c.bf16 %v17162_v43, %v17159_v40 }
 0x234   : > { %18407 = vmatmul.mubr.bf16.gmra.mrb[20].mxu0 %v1497_v18  ;;  %v17163_v46 = vpop.f32.mrb[44].mxu1 }
 0x235   : > { %18415 = vmatpush3.bf16.msra.mxu0 %v21075_v39  ;;  %18426 = vmatprep.mubr.bf16.mxu0 %v1750_v27  ;;  %v17164_v47 = vpop.f32.mrb[45].mxu1 }
 0x236   : > { %18416 = vmatprep.subr.bf16.mxu0 %v21076_v44  ;;  %v17165_v49 = vadd.f32 %v17164_v47, %v17163_v46  ;;  %v17166_v50 = vpop.f32.mrb[46].mxu1  ;;  %v21091_v47 = vld [vmem:[#allocation2 + $0x150] sm:$0xff]  }
 0x237   : > { %v17167_v52 = vpop.f32.mrb[47].mxu1 }
 0x238   : > { %v17168_v53 = vadd.f32 %v17167_v52, %v17166_v50  ;;  %v21092_v52 = vld [vmem:[#allocation2 + $0x158] sm:$0xff]  }
 0x239   : > { %18417 = vmatpush3.bf16.msra.mxu0 %v21076_v44 }
 0x23a   : > { %18418 = vmatprep.subr.bf16.mxu0 %v21077_v48  ;;  %v1753_v56 = vpack.c.bf16 %v17168_v53, %v17165_v49 }
 0x23c   : > { %v17197_v58 = vpop.f32.mrb[48].mxu1 }
 0x23d   : > { %18419 = vmatpush3.bf16.msra.mxu0 %v21077_v48  ;;  %v17198_v59 = vpop.f32.mrb[49].mxu1 }
 0x23e   : > { %18420 = vmatprep.subr.bf16.mxu0 %v21078_v55  ;;  %v17199_v61 = vadd.f32 %v17198_v59, %v17197_v58  ;;  %v17200_v62 = vpop.f32.mrb[50].mxu1  ;;  %v21093_v59 = vld [vmem:[#allocation2 + $0x160] sm:$0xff]  }
 0x23f   : > { %v17201_v51 = vpop.f32.mrb[51].mxu1 }
 0x240   : > { %v17202_v54 = vadd.f32 %v17201_v51, %v17200_v62  ;;  %v21094_v51 = vld [vmem:[#allocation2 + $0x168] sm:$0xff]  }
 0x241   : > { %18421 = vmatpush3.bf16.msra.mxu0 %v21078_v55 }
 0x242   : > { %18422 = vmatprep.subr.bf16.mxu0 %v21079_v60  ;;  %v2006_v63 = vpack.c.bf16 %v17202_v54, %v17199_v61 }
 0x244   : > { %v17203_v0 = vpop.f32.mrb[52].mxu1 }
 0x245   : > { %18423 = vmatpush3.bf16.msra.mxu0 %v21079_v60  ;;  %v17204_v1 = vpop.f32.mrb[53].mxu1 }
 0x246   : > { %18424 = vmatprep.subr.bf16.mxu0 %v21080_v57  ;;  %v22738_v4 = vadd.f32 %v17204_v1, %v17203_v0  ;;  %v17206_v5 = vpop.f32.mrb[54].mxu1  ;;  %v21095_v1 = vld [vmem:[#allocation2 + $0x170] sm:$0xff]  }
 0x247   : > { %v17207_v6 = vpop.f32.mrb[55].mxu1 }
 0x248   : > { %v17208_v8 = vadd.f32 %v17207_v6, %v17206_v5  ;;  %v21096_v6 = vld [vmem:[#allocation2 + $0x178] sm:$0xff]  }
 0x249   : > { %18425 = vmatpush3.bf16.msra.mxu0 %v21080_v57 }
 0x24a   : > { %18434 = vmatprep.subr.bf16.mxu0 %v21081_v2  ;;  %v2007_v11 = vpack.c.bf16 %v17208_v8, %v22738_v4 }
 0x24c   : > { %18427 = vmatmul.mubr.bf16.vlgmr.msra.gmra.mrb[16].mxu0 %v1751_v36  ;;  %v17209_v12 = vpop.f32.mrb[56].mxu1 }
 0x24d   : > { %18435 = vmatpush3.bf16.msra.mxu0 %v21081_v2  ;;  %18430 = vmatprep.mubr.bf16.mxu0 %v1752_v45  ;;  %v17210_v13 = vpop.f32.mrb[57].mxu1 }
 0x24e   : > { %18436 = vmatprep.subr.bf16.mxu0 %v21082_v9  ;;  %v17211_v7 = vadd.f32 %v17210_v13, %v17209_v12  ;;  %v17212_v10 = vpop.f32.mrb[58].mxu1  ;;  %v21097_v13 = vld [vmem:[#allocation2 + $0x180] sm:$0xff]  }
 0x24f   : > { %v17213_v14 = vpop.f32.mrb[59].mxu1 }
 0x250   : > { %v17214_v15 = vadd.f32 %v17213_v14, %v17212_v10  ;;  %v21098_v14 = vld [vmem:[#allocation2 + $0x188] sm:$0xff]  }
 0x251   : > { %18437 = vmatpush3.bf16.msra.mxu0 %v21082_v9 }
 0x252   : > { %18438 = vmatprep.subr.bf16.mxu0 %v21083_v3  ;;  %v2008_v17 = vpack.c.bf16 %v17214_v15, %v17211_v7 }
 0x254   : > { %18431 = vmatmul.mubr.bf16.gmra.mrb[20].mxu0 %v1753_v56  ;;  %v17215_v18 = vpop.f32.mrb[60].mxu1 }
 0x255   : > { %18439 = vmatpush3.bf16.msra.mxu0 %v21083_v3  ;;  %18450 = vmatprep.mubr.bf16.mxu0 %v2006_v63  ;;  %v17216_v19 = vpop.f32.mrb[61].mxu1 }
 0x256   : > { %18440 = vmatprep.subr.bf16.mxu0 %v21084_v16  ;;  %v17217_v21 = vadd.f32 %v17216_v19, %v17215_v18  ;;  %v17218_v22 = vpop.f32.mrb[62].mxu1  ;;  %v21099_v19 = vld [vmem:[#allocation2 + $0x190] sm:$0xff]  }
 0x257   : > { %v17219_v23 = vpop.f32.mrb[63].mxu1 }
 0x258   : > { %v17220_v24 = vadd.f32 %v17219_v23, %v17218_v22  ;;  %v21100_v23 = vld [vmem:[#allocation2 + $0x198] sm:$0xff]  }
 0x259   : > { %18441 = vmatpush3.bf16.msra.mxu0 %v21084_v16 }
 0x25a   : > { %18442 = vmatprep.subr.bf16.mxu0 %v21085_v20  ;;  %v2009_v26 = vpack.c.bf16 %v17220_v24, %v17217_v21 }
 0x25c   : > { %v17249_v27 = vpop.f32.mrb[64].mxu1 }
 0x25d   : > { %18443 = vmatpush3.bf16.msra.mxu0 %v21085_v20  ;;  %v17250_v28 = vpop.f32.mrb[65].mxu1 }
 0x25e   : > { %18444 = vmatprep.subr.bf16.mxu0 %v21086_v25  ;;  %v17251_v30 = vadd.f32 %v17250_v28, %v17249_v27  ;;  %v17252_v31 = vpop.f32.mrb[66].mxu1  ;;  %v21101_v28 = vld [vmem:[#allocation2 + $0x1a0] sm:$0xff]  }
 0x25f   : > { %v17253_v32 = vpop.f32.mrb[67].mxu1 }
 0x260   : > { %v17254_v33 = vadd.f32 %v17253_v32, %v17252_v31  ;;  %v21102_v32 = vld [vmem:[#allocation2 + $0x1a8] sm:$0xff]  }
 0x261   : > { %18445 = vmatpush3.bf16.msra.mxu0 %v21086_v25 }
 0x262   : > { %18446 = vmatprep.subr.bf16.mxu0 %v21087_v29  ;;  %v2262_v35 = vpack.c.bf16 %v17254_v33, %v17251_v30 }
 0x264   : > { %v17255_v36 = vpop.f32.mrb[68].mxu1 }
 0x265   : > { %18447 = vmatpush3.bf16.msra.mxu0 %v21087_v29  ;;  %v17256_v37 = vpop.f32.mrb[69].mxu1 }
 0x266   : > { %18448 = vmatprep.subr.bf16.mxu0 %v21088_v34  ;;  %v22741_v39 = vadd.f32 %v17256_v37, %v17255_v36  ;;  %v17258_v40 = vpop.f32.mrb[70].mxu1  ;;  %v21103_v37 = vld [vmem:[#allocation2 + $0x1b0] sm:$0xff]  }
 0x267   : > { %v17259_v41 = vpop.f32.mrb[71].mxu1 }
 0x268   : > { %v17260_v43 = vadd.f32 %v17259_v41, %v17258_v40  ;;  %v21104_v41 = vld [vmem:[#allocation2 + $0x1b8] sm:$0xff]  }
 0x269   : > { %18449 = vmatpush3.bf16.msra.mxu0 %v21088_v34 }
 0x26a   : > { %18458 = vmatprep.subr.bf16.mxu0 %v21089_v38  ;;  %v2263_v44 = vpack.c.bf16 %v17260_v43, %v22741_v39 }
 0x26c   : > { %18451 = vmatmul.mubr.bf16.vlgmr.msra.gmra.mrb[16].mxu0 %v2007_v11  ;;  %v17261_v45 = vpop.f32.mrb[72].mxu1 }
 0x26d   : > { %18459 = vmatpush3.bf16.msra.mxu0 %v21089_v38  ;;  %18454 = vmatprep.mubr.bf16.mxu0 %v2008_v17  ;;  %v17262_v46 = vpop.f32.mrb[73].mxu1 }
 0x26e   : > { %18460 = vmatprep.subr.bf16.mxu0 %v21090_v42  ;;  %v17263_v48 = vadd.f32 %v17262_v46, %v17261_v45  ;;  %v17264_v49 = vpop.f32.mrb[74].mxu1  ;;  %v21105_v46 = vld [vmem:[#allocation2 + $0x1c0] sm:$0xff]  }
 0x26f   : > { %v17265_v50 = vpop.f32.mrb[75].mxu1 }
 0x270   : > { %v17266_v53 = vadd.f32 %v17265_v50, %v17264_v49  ;;  %v21106_v50 = vld [vmem:[#allocation2 + $0x1c8] sm:$0xff]  }
 0x271   : > { %18461 = vmatpush3.bf16.msra.mxu0 %v21090_v42 }
 0x272   : > { %18462 = vmatprep.subr.bf16.mxu0 %v21091_v47  ;;  %v2264_v55 = vpack.c.bf16 %v17266_v53, %v17263_v48 }
 0x274   : > { %18455 = vmatmul.mubr.bf16.gmra.mrb[20].mxu0 %v2009_v26  ;;  %v17267_v56 = vpop.f32.mrb[76].mxu1 }
 0x275   : > { %18463 = vmatpush3.bf16.msra.mxu0 %v21091_v47  ;;  %18474 = vmatprep.mubr.bf16.mxu0 %v2262_v35  ;;  %v17268_v58 = vpop.f32.mrb[77].mxu1 }
 0x276   : > { %18464 = vmatprep.subr.bf16.mxu0 %v21092_v52  ;;  %v17269_v60 = vadd.f32 %v17268_v58, %v17267_v56  ;;  %v17270_v61 = vpop.f32.mrb[78].mxu1  ;;  %v21107_v58 = vld [vmem:[#allocation2 + $0x1d0] sm:$0xff]  }
 0x277   : > { %v17271_v62 = vpop.f32.mrb[79].mxu1 }
 0x278   : > { %v17272_v54 = vadd.f32 %v17271_v62, %v17270_v61  ;;  %v21108_v62 = vld [vmem:[#allocation2 + $0x1d8] sm:$0xff]  }
 0x279   : > { %18465 = vmatpush3.bf16.msra.mxu0 %v21092_v52 }
 0x27a   : > { %18466 = vmatprep.subr.bf16.mxu0 %v21093_v59  ;;  %v2265_v57 = vpack.c.bf16 %v17272_v54, %v17269_v60 }
 0x27c   : > { %v17301_v63 = vpop.f32.mrb[80].mxu1 }
 0x27d   : > { %18467 = vmatpush3.bf16.msra.mxu0 %v21093_v59  ;;  %v17302_v0 = vpop.f32.mrb[81].mxu1 }
 0x27e   : > { %18468 = vmatprep.subr.bf16.mxu0 %v21094_v51  ;;  %v17303_v2 = vadd.f32 %v17302_v0, %v17301_v63  ;;  %v17304_v4 = vpop.f32.mrb[82].mxu1  ;;  %v21109_v0 = vld [vmem:[#allocation2 + $0x1e0] sm:$0xff]  }
 0x27f   : > { %v17305_v5 = vpop.f32.mrb[83].mxu1 }
 0x280   : > { %v17306_v8 = vadd.f32 %v17305_v5, %v17304_v4  ;;  %v21110_v5 = vld [vmem:[#allocation2 + $0x1e8] sm:$0xff]  }
 0x281   : > { %18469 = vmatpush3.bf16.msra.mxu0 %v21094_v51 }
 0x282   : > { %18470 = vmatprep.subr.bf16.mxu0 %v21095_v1  ;;  %v2518_v9 = vpack.c.bf16 %v17306_v8, %v17303_v2 }
 0x284   : > { %v17307_v11 = vpop.f32.mrb[84].mxu1 }
 0x285   : > { %18471 = vmatpush3.bf16.msra.mxu0 %v21095_v1  ;;  %v17308_v12 = vpop.f32.mrb[85].mxu1 }
 0x286   : > { %18472 = vmatprep.subr.bf16.mxu0 %v21096_v6  ;;  %v22744_v3 = vadd.f32 %v17308_v12, %v17307_v11  ;;  %v17310_v7 = vpop.f32.mrb[86].mxu1  ;;  %v21111_v12 = vld [vmem:[#allocation2 + $0x1f0] sm:$0xff]  }
 0x287   : > { %v17311_v10 = vpop.f32.mrb[87].mxu1 }
 0x288   : > { %v17312_v15 = vadd.f32 %v17311_v10, %v17310_v7  ;;  %v21112_v10 = vld [vmem:[#allocation2 + $0x1f8] sm:$0xff]  }
 0x289   : > { %18473 = vmatpush3.bf16.msra.mxu0 %v21096_v6 }
 0x28a   : > { %18482 = vmatprep.subr.bf16.mxu0 %v21097_v13  ;;  %v2519_v16 = vpack.c.bf16 %v17312_v15, %v22744_v3 }
 0x28c   : > { %18475 = vmatmul.mubr.bf16.vlgmr.msra.gmra.mrb[16].mxu0 %v2263_v44  ;;  %v17313_v17 = vpop.f32.mrb[88].mxu1 }
 0x28d   : > { %18483 = vmatpush3.bf16.msra.mxu0 %v21097_v13  ;;  %18478 = vmatprep.mubr.bf16.mxu0 %v2264_v55  ;;  %v17314_v18 = vpop.f32.mrb[89].mxu1 }
 0x28e   : > { %18484 = vmatprep.subr.bf16.mxu0 %v21098_v14  ;;  %v17315_v20 = vadd.f32 %v17314_v18, %v17313_v17  ;;  %v17316_v21 = vpop.f32.mrb[90].mxu1  ;;  %v21113_v18 = vld [vmem:[#allocation2 + $0x200] sm:$0xff]  }
 0x28f   : > { %v17317_v22 = vpop.f32.mrb[91].mxu1 }
 0x290   : > { %v17318_v24 = vadd.f32 %v17317_v22, %v17316_v21  ;;  %v21114_v22 = vld [vmem:[#allocation2 + $0x208] sm:$0xff]  }
 0x291   : > { %18485 = vmatpush3.bf16.msra.mxu0 %v21098_v14 }
 0x292   : > { %18486 = vmatprep.subr.bf16.mxu0 %v21099_v19  ;;  %v2520_v25 = vpack.c.bf16 %v17318_v24, %v17315_v20 }
 0x294   : > { %18479 = vmatmul.mubr.bf16.gmra.mrb[20].mxu0 %v2265_v57  ;;  %v17319_v26 = vpop.f32.mrb[92].mxu1 }
 0x295   : > { %18487 = vmatpush3.bf16.msra.mxu0 %v21099_v19  ;;  %18498 = vmatprep.mubr.bf16.mxu0 %v2518_v9  ;;  %v17320_v27 = vpop.f32.mrb[93].mxu1 }
 0x296   : > { %18488 = vmatprep.subr.bf16.mxu0 %v21100_v23  ;;  %v17321_v29 = vadd.f32 %v17320_v27, %v17319_v26  ;;  %v17322_v30 = vpop.f32.mrb[94].mxu1  ;;  %v21115_v27 = vld [vmem:[#allocation2 + $0x210] sm:$0xff]  }
 0x297   : > { %v17323_v31 = vpop.f32.mrb[95].mxu1 }
 0x298   : > { %v17324_v33 = vadd.f32 %v17323_v31, %v17322_v30  ;;  %v21116_v31 = vld [vmem:[#allocation2 + $0x218] sm:$0xff]  }
 0x299   : > { %18489 = vmatpush3.bf16.msra.mxu0 %v21100_v23 }
 0x29a   : > { %18490 = vmatprep.subr.bf16.mxu0 %v21101_v28  ;;  %v2521_v34 = vpack.c.bf16 %v17324_v33, %v17321_v29 }
 0x29c   : > { %v17353_v35 = vpop.f32.mrb[96].mxu1 }
 0x29d   : > { %18491 = vmatpush3.bf16.msra.mxu0 %v21101_v28  ;;  %v17354_v36 = vpop.f32.mrb[97].mxu1 }
 0x29e   : > { %18492 = vmatprep.subr.bf16.mxu0 %v21102_v32  ;;  %v17355_v38 = vadd.f32 %v17354_v36, %v17353_v35  ;;  %v17356_v39 = vpop.f32.mrb[98].mxu1  ;;  %v21117_v36 = vld [vmem:[#allocation2 + $0x220] sm:$0xff]  }
 0x29f   : > { %v17357_v40 = vpop.f32.mrb[99].mxu1 }
 0x2a0   : > { %v17358_v42 = vadd.f32 %v17357_v40, %v17356_v39  ;;  %v21118_v40 = vld [vmem:[#allocation2 + $0x228] sm:$0xff]  }
 0x2a1   : > { %18493 = vmatpush3.bf16.msra.mxu0 %v21102_v32 }
 0x2a2   : > { %18494 = vmatprep.subr.bf16.mxu0 %v21103_v37  ;;  %v2774_v43 = vpack.c.bf16 %v17358_v42, %v17355_v38 }
 0x2a4   : > { %v17359_v44 = vpop.f32.mrb[100].mxu1 }
 0x2a5   : > { %18495 = vmatpush3.bf16.msra.mxu0 %v21103_v37  ;;  %v17360_v45 = vpop.f32.mrb[101].mxu1 }
 0x2a6   : > { %18496 = vmatprep.subr.bf16.mxu0 %v21104_v41  ;;  %v22747_v47 = vadd.f32 %v17360_v45, %v17359_v44  ;;  %v17362_v48 = vpop.f32.mrb[102].mxu1  ;;  %v21120_v44 = vld [vmem:[#allocation2 + $0x238] sm:$0xff]   ;;  %v21935_v45 = vmov 0.0  }
 0x2a7   : > { %v17363_v49 = vpop.f32.mrb[103].mxu1  ;;  %18554 = vmatprep.subr.bf16.mxu1 %v21935_v45  ;;  %18562 = vmatprep.mubr.msk.bf16.mxu1 %vm21936_vm0, %v21935_v45 }
 0x2a8   : > { %v17364_v52 = vadd.f32 %v17363_v49, %v17362_v48  ;;  %v21126_v48 = vld [vmem:[#allocation6 + $0x10] sm:$0xff]   ;;  %v21128_v49 = vld [vmem:[#allocation6 + $0x18] sm:$0xff]  }
 0x2a9   : > { %18497 = vmatpush3.bf16.msra.mxu0 %v21104_v41 }
 0x2aa   : > { %18506 = vmatprep.subr.bf16.mxu0 %v21105_v46  ;;  %v2775_v53 = vpack.c.bf16 %v17364_v52, %v22747_v47  ;;  %v21124_v47 = vld [vmem:[#allocation6 + $0x8] sm:$0xff]  }
 0x2ab   : > { %v21132_v52 = vld [vmem:[#allocation6 + $0x28] sm:$0xff]  }
 0x2ac   : > { %18499 = vmatmul.mubr.bf16.vlgmr.msra.gmra.mrb[16].mxu0 %v2519_v16  ;;  %v17365_v55 = vpop.f32.mrb[104].mxu1 }
 0x2ad   : > { %18507 = vmatpush3.bf16.msra.mxu0 %v21105_v46  ;;  %18502 = vmatprep.mubr.bf16.mxu0 %v2520_v25  ;;  %v17366_v56 = vpop.f32.mrb[105].mxu1  ;;  %v21123_v46 = vld [vmem:[#allocation6] sm:$0xff]  }
 0x2ae   : > { %18508 = vmatprep.subr.bf16.mxu0 %v21106_v50  ;;  %v17367_v59 = vadd.f32 %v17366_v56, %v17365_v55  ;;  %v17368_v60 = vpop.f32.mrb[106].mxu1  ;;  %v15709_v56 = vld [vmem:[#allocation4] ss:$0 sm:$0xff] }
 0x2af   : > { %v17369_v61 = vpop.f32.mrb[107].mxu1 }
 0x2b0   : > { %v17370_v51 = vadd.f32 %v17369_v61, %v17368_v60 }
 0x2b1   : > { %18509 = vmatpush3.bf16.msra.mxu0 %v21106_v50  ;;  %v21130_v50 = vld [vmem:[#allocation6 + $0x20] sm:$0xff]  }
 0x2b2   : > { %18510 = vmatprep.subr.bf16.mxu0 %v21107_v58  ;;  %v2776_v54 = vpack.c.bf16 %v17370_v51, %v17367_v59 }
 0x2b4   : > { %18503 = vmatmul.mubr.bf16.gmra.mrb[20].mxu0 %v2521_v34  ;;  %v17371_v57 = vpop.f32.mrb[108].mxu1 }
 0x2b5   : > { %18511 = vmatpush3.bf16.msra.mxu0 %v21107_v58  ;;  %18522 = vmatprep.mubr.bf16.mxu0 %v2774_v43  ;;  %v17372_v63 = vpop.f32.mrb[109].mxu1  ;;  %v21119_v43 = vld [vmem:[#allocation2 + $0x230] sm:$0xff]  }
 0x2b6   : > { %18512 = vmatprep.subr.bf16.mxu0 %v21108_v62  ;;  %v17373_v1 = vadd.f32 %v17372_v63, %v17371_v57  ;;  %v17374_v2 = vpop.f32.mrb[110].mxu1 }
 0x2b7   : > { %v17375_v4 = vpop.f32.mrb[111].mxu1 }
 0x2b8   : > { %v17376_v6 = vadd.f32 %v17375_v4, %v17374_v2 }
 0x2b9   : > { %18513 = vmatpush3.bf16.msra.mxu0 %v21108_v62 }
 0x2ba   : > { %18514 = vmatprep.subr.bf16.mxu0 %v21109_v0  ;;  %v2777_v8 = vpack.c.bf16 %v17376_v6, %v17373_v1 }
 0x2bc   : > { %v17405_v9 = vpop.f32.mrb[112].mxu1 }
 0x2bd   : > { %18515 = vmatpush3.bf16.msra.mxu0 %v21109_v0  ;;  %v17406_v11 = vpop.f32.mrb[113].mxu1 }
 0x2be   : > { %18516 = vmatprep.subr.bf16.mxu0 %v21110_v5  ;;  %v17407_v13 = vadd.f32 %v17406_v11, %v17405_v9  ;;  %v17408_v3 = vpop.f32.mrb[114].mxu1 }
 0x2bf   : > { %v17409_v7 = vpop.f32.mrb[115].mxu1 }
 0x2c0   : > { %v17410_v14 = vadd.f32 %v17409_v7, %v17408_v3  ;;  %v21122_v3 = vld [vmem:[%s26043_s23 + $0x8] sm:$0xff]  }
 0x2c1   : > { %18517 = vmatpush3.bf16.msra.mxu0 %v21110_v5  ;;  %v21125_v7 = vld [vmem:[#allocation6 + $0x40] sm:$0xff]  }
 0x2c2   : > { %18518 = vmatprep.subr.bf16.mxu0 %v21111_v12  ;;  %v3030_v15 = vpack.c.bf16 %v17410_v14, %v17407_v13  ;;  %v21121_v13 = vld [vmem:[%s26043_s23] sm:$0xff]   ;;  %v21129_v14 = vld [vmem:[#allocation6 + $0x50] sm:$0xff]  }
 0x2c4   : > { %v17411_v16 = vpop.f32.mrb[116].mxu1 }
 0x2c5   : > { %18519 = vmatpush3.bf16.msra.mxu0 %v21111_v12  ;;  %v17412_v17 = vpop.f32.mrb[117].mxu1 }
 0x2c6   : > { %18520 = vmatprep.subr.bf16.mxu0 %v21112_v10  ;;  %v17413_v19 = vadd.f32 %v17412_v17, %v17411_v16  ;;  %v17414_v20 = vpop.f32.mrb[118].mxu1  ;;  %v21133_v16 = vld [vmem:[#allocation6 + $0x60] sm:$0xff]   ;;  %v21136_v17 = vld [vmem:[#allocation6 + $0x38] sm:$0xff]  }
 0x2c7   : > { %v17415_v21 = vpop.f32.mrb[119].mxu1 }
 0x2c8   : > { %v17416_v23 = vadd.f32 %v17415_v21, %v17414_v20  ;;  %v21138_v20 = vld [vmem:[#allocation6 + $0x78] sm:$0xff]  }
 0x2c9   : > { %18521 = vmatpush3.bf16.msra.mxu0 %v21112_v10  ;;  %v21127_v10 = vld [vmem:[#allocation6 + $0x48] sm:$0xff]  }
 0x2ca   : > { %18530 = vmatprep.subr.bf16.mxu0 %v21113_v18  ;;  %v3031_v24 = vpack.c.bf16 %v17416_v23, %v17413_v19  ;;  %v21137_v19 = vld [vmem:[#allocation6 + $0x70] sm:$0xff]  }
 0x2cc   : > { %18523 = vmatmul.mubr.bf16.vlgmr.msra.gmra.mrb[16].mxu0 %v2775_v53  ;;  %v17417_v25 = vpop.f32.mrb[120].mxu1  ;;  %v21134_v53 = vld [vmem:[#allocation6 + $0x30] sm:$0xff]  }
 0x2cd   : > { %18531 = vmatpush3.bf16.msra.mxu0 %v21113_v18  ;;  %18526 = vmatprep.mubr.bf16.mxu0 %v2776_v54  ;;  %v17418_v26 = vpop.f32.mrb[121].mxu1  ;;  %v21135_v18 = vld [vmem:[#allocation6 + $0x68] sm:$0xff]  }
 0x2ce   : > { %18532 = vmatprep.subr.bf16.mxu0 %v21114_v22  ;;  %v17419_v28 = vadd.f32 %v17418_v26, %v17417_v25  ;;  %v17420_v29 = vpop.f32.mrb[122].mxu1 }
 0x2cf   : > { %v17421_v30 = vpop.f32.mrb[123].mxu1 }
 0x2d0   : > { %v17422_v32 = vadd.f32 %v17421_v30, %v17420_v29 }
 0x2d1   : > { %18533 = vmatpush3.bf16.msra.mxu0 %v21114_v22 }
 0x2d2   : > { %18534 = vmatprep.subr.bf16.mxu0 %v21115_v27  ;;  %v3032_v33 = vpack.c.bf16 %v17422_v32, %v17419_v28  ;;  %v21139_v32 = vld [vmem:[%s26043_s23 + $0x10] sm:$0xff]  }
 0x2d4   : > { %18527 = vmatmul.mubr.bf16.gmra.mrb[20].mxu0 %v2777_v8  ;;  %v17423_v34 = vpop.f32.mrb[124].mxu1 }
 0x2d5   : > { %18535 = vmatpush3.bf16.msra.mxu0 %v21115_v27  ;;  %18546 = vmatprep.mubr.bf16.mxu0 %v3030_v15  ;;  %v17424_v35 = vpop.f32.mrb[125].mxu1  ;;  %v21131_v15 = vld [vmem:[#allocation6 + $0x58] sm:$0xff]  }
 0x2d6   : > { %18536 = vmatprep.subr.bf16.mxu0 %v21116_v31  ;;  %v17425_v37 = vadd.f32 %v17424_v35, %v17423_v34  ;;  %v17426_v38 = vpop.f32.mrb[126].mxu1  ;;  %v21142_v34 = vld [vmem:[#allocation6 + $0x88] sm:$0xff]   ;;  %v21143_v35 = vld [vmem:[#allocation6 + $0x90] sm:$0xff]  }
 0x2d7   : > { %v17427_v39 = vpop.f32.mrb[127].mxu1 }
 0x2d8   : > { %v17428_v41 = vadd.f32 %v17427_v39, %v17426_v38  ;;  %v21146_v38 = vld [vmem:[#allocation6 + $0xc0] sm:$0xff]   ;;  %v21148_v39 = vld [vmem:[#allocation6 + $0xc8] sm:$0xff]  }
 0x2d9   : > { %18537 = vmatpush3.bf16.msra.mxu0 %v21116_v31 }
 0x2da   : > { %18538 = vmatprep.subr.bf16.mxu0 %v21117_v36  ;;  %v3033_v42 = vpack.c.bf16 %v17428_v41, %v17425_v37  ;;  %v21145_v37 = vld [vmem:[#allocation6 + $0xa0] sm:$0xff]   ;;  %v21150_v41 = vld [vmem:[#allocation6 + $0xd0] sm:$0xff]  }
 0x2dd   : > { %18539 = vmatpush3.bf16.msra.mxu0 %v21117_v36  ;;  %v21144_v36 = vld [vmem:[#allocation6 + $0x98] sm:$0xff]  }
 0x2de   : > { %18540 = vmatprep.subr.bf16.mxu0 %v21118_v40 }
 0x2e1   : > { %18541 = vmatpush3.bf16.msra.mxu0 %v21118_v40  ;;  %v21147_v40 = vld [vmem:[#allocation6 + $0xa8] sm:$0xff]  }
 0x2e2   : > { %18542 = vmatprep.subr.bf16.mxu0 %v21119_v43 }
 0x2e5   : > { %18543 = vmatpush3.bf16.msra.mxu0 %v21119_v43  ;;  %v21151_v43 = vld [vmem:[#allocation6 + $0xb8] sm:$0xff]  }
 0x2e6   : > { %18544 = vmatprep.subr.bf16.mxu0 %v21120_v44 }
 0x2e9   : > { %18545 = vmatpush3.bf16.msra.mxu0 %v21120_v44  ;;  %v21152_v44 = vld [vmem:[#allocation6 + $0xd8] sm:$0xff]  }
 0x2ea   : > { %18598 = vmatprep.subr.bf16.mxu0 %v21935_v45 }
 0x2ec   : > { %18547 = vmatmul.mubr.bf16.vlgmr.msra.gmra.mrb[16].mxu0 %v3031_v24  ;;  %v21141_v24 = vld [vmem:[#allocation6 + $0x80] sm:$0xff]  }
 0x2ed   : > { %18550 = vmatprep.mubr.bf16.mxu0 %v3032_v33  ;;  %18599 = vmatpush3.bf16.msra.mxu0 %v21123_v46  ;;  %v21140_v33 = vld [vmem:[%s26043_s23 + $0x18] sm:$0xff]   ;;  %v21153_v46 = vld [vmem:[#allocation6 + $0xe0] sm:$0xff]  }
 0x2ee   : > { %18600 = vmatprep.subr.bf16.mxu0 %v21935_v45 }
 0x2f1   : > { %18601 = vmatpush3.bf16.msra.mxu0 %v21124_v47  ;;  %v21154_v47 = vld [vmem:[#allocation6 + $0xe8] sm:$0xff]  }
 0x2f2   : > { %18602 = vmatprep.subr.bf16.mxu0 %v21935_v45 }
 0x2f4   : > { %18551 = vmatmul.mubr.bf16.gmra.mrb[20].mxu0 %v3033_v42  ;;  %v21149_v42 = vld [vmem:[#allocation6 + $0xb0] sm:$0xff]  }
 0x2f5   : > { %18614 = vmatprep.mubr.msk.bf16.mxu0 %vm21936_vm0, %v21935_v45  ;;  %18603 = vmatpush3.bf16.msra.mxu0 %v21126_v48  ;;  %v21155_v48 = vld [vmem:[#allocation6 + $0xf0] sm:$0xff]  }
 0x2f6   : > { %18604 = vmatprep.subr.bf16.mxu0 %v21935_v45 }
 0x2f9   : > { %18605 = vmatpush3.bf16.msra.mxu0 %v21128_v49  ;;  %v21156_v49 = vld [vmem:[#allocation6 + $0xf8] sm:$0xff]  }
 0x2fa   : > { %18606 = vmatprep.subr.bf16.mxu0 %v21935_v45 }
 0x2fd   : > { %18607 = vmatpush3.bf16.msra.mxu0 %v21130_v50 }
 0x2fe   : > { %18608 = vmatprep.subr.bf16.mxu0 %v21935_v45 }
 0x301   : > { %18609 = vmatpush3.bf16.msra.mxu0 %v21132_v52 }
 0x302   : > { %18610 = vmatprep.subr.bf16.mxu0 %v21935_v45 }
 0x305   : > { %18611 = vmatpush3.bf16.msra.mxu0 %v21134_v53 }
 0x306   : > { %18612 = vmatprep.subr.bf16.mxu0 %v21935_v45 }
 0x309   : > { %18613 = vmatpush3.bf16.msra.mxu0 %v21136_v17  ;;  %v21164_v17 = vld [vmem:[#allocation6 + $0x140] sm:$0xff]  }
 0x30a   : > { %18630 = vmatprep.subr.bf16.mxu0 %v21935_v45 }
 0x3bf   : > { %v18548_v55 = vpop.f32.mrb[16].mxu0 }
 0x3c0   : > { %v3133_v58 = vpop.f32.mrb[17].mxu0  ;;  %v3181_v61 = vadd.f32 %v18548_v55, %v15709_v56 }
 0x3c1   : > { %v18549_v59 = vpop.f32.mrb[18].mxu0  ;;  %v3179_v51 = vadd.f32 %v15709_v56, %v3133_v58 }
 0x3c2   : > { %v3136_v60 = vpop.f32.mrb[19].mxu0  ;;  %v3182_v62 = vadd.f32 %v18549_v59, %v15709_v56 }
 0x3c3   : > { %v3180_v54 = vadd.f32 %v15709_v56, %v3136_v60 }
 0x3c4   : > { %v22763_v57 = vpack.c.bf16 %v3182_v62, %v3181_v61 }
 0x3c5   : > { %v22765_v63 = vpack.c.bf16 %v3180_v54, %v3179_v51 }
 0x3c7   : > { %v18552_v0 = vpop.f32.mrb[20].mxu0  ;;  %18555 = vmatpush3.bf16.msra.mxu1 %v22765_v63 }
 0x3c8   : > { %v3149_v1 = vpop.f32.mrb[21].mxu0  ;;  %18556 = vmatprep.subr.bf16.mxu1 %v21935_v45  ;;  %v3185_v4 = vadd.f32 %v18552_v0, %v15709_v56 }
 0x3c9   : > { %v18553_v2 = vpop.f32.mrb[22].mxu0  ;;  %v3183_v8 = vadd.f32 %v15709_v56, %v3149_v1 }
 0x3ca   : > { %v3186_v5 = vadd.f32 %v18553_v2, %v15709_v56  ;;  %v3152_v6 = vpop.f32.mrb[23].mxu0 }
 0x3cb   : > { %v3184_v9 = vadd.f32 %v15709_v56, %v3152_v6  ;;  %18557 = vmatpush3.bf16.msra.mxu1 %v22763_v57  ;;  %v21157_v6 = vld [vmem:[%s26043_s23 + $0x20] sm:$0xff]  }
 0x3cc   : > { %v22770_v11 = vpack.c.bf16 %v3186_v5, %v3185_v4  ;;  %18558 = vmatprep.subr.bf16.mxu1 %v21935_v45 }
 0x3cd   : > { %v22773_v12 = vpack.c.bf16 %v3184_v9, %v3183_v8 }
 0x3cf   : > { %18559 = vmatpush3.bf16.msra.mxu1 %v22773_v12 }
 0x3d0   : > { %18560 = vmatprep.subr.bf16.mxu1 %v21935_v45 }
 0x3d3   : > { %18561 = vmatpush3.bf16.msra.mxu1 %v22770_v11 }
 0x3d4   : > { %18566 = vmatprep.subr.bf16.mxu1 %v21935_v45 }
 0x3d6   : > { %18563 = vmatmul.mubr.msk.bf16.vlgmr.msra.gmra.mrb[128].mxu1 %vm3198_vm1, %v21121_v13  ;;  %v21159_v13 = vld [vmem:[#allocation6 + $0x100] sm:$0xff]  }
 0x3d7   : > { %18567 = vmatpush3.bf16.msra.mxu1 %v22765_v63  ;;  %18574 = vmatprep.mubr.msk.bf16.mxu1 %vm21936_vm0, %v21935_v45 }
 0x3d8   : > { %18568 = vmatprep.subr.bf16.mxu1 %v21935_v45 }
 0x3db   : > { %18569 = vmatpush3.bf16.msra.mxu1 %v22763_v57 }
 0x3dc   : > { %18570 = vmatprep.subr.bf16.mxu1 %v21935_v45 }
 0x3df   : > { %18571 = vmatpush3.bf16.msra.mxu1 %v22773_v12 }
 0x3e0   : > { %18572 = vmatprep.subr.bf16.mxu1 %v21935_v45 }
 0x3e3   : > { %18573 = vmatpush3.bf16.msra.mxu1 %v22770_v11 }
 0x3e4   : > { %18578 = vmatprep.subr.bf16.mxu1 %v21935_v45 }
 0x3e6   : > { %18575 = vmatmul.mubr.msk.bf16.vlgmr.msra.gmra.mrb[132].mxu1 %vm3198_vm1, %v21122_v3 }
 0x3e7   : > { %18579 = vmatpush3.bf16.msra.mxu1 %v21125_v7  ;;  %18594 = vmatprep.mubr.msk.bf16.mxu1 %vm21936_vm0, %v21935_v45  ;;  %v21160_v7 = vld [vmem:[#allocation6 + $0x108] sm:$0xff]  }
 0x3e8   : > { %18580 = vmatprep.subr.bf16.mxu1 %v21935_v45 }
 0x3eb   : > { %18581 = vmatpush3.bf16.msra.mxu1 %v21127_v10  ;;  %v21161_v10 = vld [vmem:[#allocation6 + $0x110] sm:$0xff]  }
 0x3ec   : > { %18582 = vmatprep.subr.bf16.mxu1 %v21935_v45 }
 0x3ef   : > { %18583 = vmatpush3.bf16.msra.mxu1 %v21129_v14  ;;  %v21158_v14 = vld [vmem:[%s26043_s23 + $0x28] sm:$0xff]  }
 0x3f0   : > { %18584 = vmatprep.subr.bf16.mxu1 %v21935_v45 }
 0x3f3   : > { %18585 = vmatpush3.bf16.msra.mxu1 %v21131_v15  ;;  %v21162_v15 = vld [vmem:[#allocation6 + $0x118] sm:$0xff]  }
 0x3f4   : > { %18586 = vmatprep.subr.bf16.mxu1 %v21935_v45 }
 0x3f7   : > { %18587 = vmatpush3.bf16.msra.mxu1 %v21133_v16  ;;  %v21163_v16 = vld [vmem:[#allocation6 + $0x120] sm:$0xff]  }
 0x3f8   : > { %18588 = vmatprep.subr.bf16.mxu1 %v21935_v45 }
 0x3fb   : > { %18589 = vmatpush3.bf16.msra.mxu1 %v21135_v18  ;;  %v21165_v18 = vld [vmem:[#allocation6 + $0x128] sm:$0xff]  }
 0x3fc   : > { %18590 = vmatprep.subr.bf16.mxu1 %v21935_v45 }
 0x3ff   : > { %18591 = vmatpush3.bf16.msra.mxu1 %v21137_v19  ;;  %v21166_v19 = vld [vmem:[#allocation6 + $0x148] sm:$0xff]  }
 0x400   : > { %18592 = vmatprep.subr.bf16.mxu1 %v21935_v45 }
 0x403   : > { %18593 = vmatpush3.bf16.msra.mxu1 %v21138_v20  ;;  %v21167_v20 = vld [vmem:[#allocation6 + $0x130] sm:$0xff]  }
 0x404   : > { %18618 = vmatprep.subr.bf16.mxu1 %v21935_v45 }
 0x4a9   : > { %v3236_v21 = vpop.f32.mrb[128].mxu1 }
 0x4aa   : > { %v18564_v22 = vpop.f32.mrb[129].mxu1 }
 0x4ab   : > { %v3239_v23 = vpop.f32.mrb[130].mxu1  ;;  %v21169_v22 = vld [vmem:[#allocation6 + $0x138] sm:$0xff]  }
 0x4ac   : > { %v3243_v25 = vpack.c.bf16 %v3239_v23, %v3236_v21  ;;  %v18565_v26 = vpop.f32.mrb[131].mxu1  ;;  %v21168_v21 = vld [vmem:[#allocation6 + $0x150] sm:$0xff]   ;;  %v21170_v23 = vld [vmem:[#allocation6 + $0x158] sm:$0xff]  }
 0x4ad   : > { %v21173_v26 = vld [vmem:[#allocation6 + $0x170] sm:$0xff]  }
 0x4ae   : > { %18615 = vmatmul.mubr.bf16.vlgmr.msra.gmra.mrb[24].mxu0 %v3243_v25  ;;  %v21172_v25 = vld [vmem:[#allocation6 + $0x168] sm:$0xff]  }
 0x4af   : > { %18631 = vmatpush3.bf16.msra.mxu0 %v21141_v24  ;;  %18646 = vmatprep.mubr.msk.bf16.mxu0 %vm21936_vm0, %v21935_v45  ;;  %v21171_v24 = vld [vmem:[#allocation6 + $0x160] sm:$0xff]  }
 0x4b0   : > { %18632 = vmatprep.subr.bf16.mxu0 %v21935_v45 }
 0x4b3   : > { %18633 = vmatpush3.bf16.msra.mxu0 %v21142_v34 }
 0x4b4   : > { %18634 = vmatprep.subr.bf16.mxu0 %v21935_v45 }
 0x4b7   : > { %18635 = vmatpush3.bf16.msra.mxu0 %v21143_v35 }
 0x4b8   : > { %18636 = vmatprep.subr.bf16.mxu0 %v21935_v45 }
 0x4b9   : > { %v3305_v27 = vpop.f32.mrb[132].mxu1 }
 0x4ba   : > { %v18576_v28 = vpop.f32.mrb[133].mxu1 }
 0x4bb   : > { %v3308_v29 = vpop.f32.mrb[134].mxu1  ;;  %18637 = vmatpush3.bf16.msra.mxu0 %v21144_v36 }
 0x4bc   : > { %v3312_v30 = vpack.c.bf16 %v3308_v29, %v3305_v27  ;;  %v18577_v31 = vpop.f32.mrb[135].mxu1  ;;  %18638 = vmatprep.subr.bf16.mxu0 %v21935_v45  ;;  %v21174_v27 = vld [vmem:[#allocation6 + $0x178] sm:$0xff]  }
 0x4be   : > { %18595 = vmatmul.mubr.bf16.vlgmr.msra.gmra.mrb[136].mxu1 %v3312_v30 }
 0x4bf   : > { %18619 = vmatpush3.bf16.msra.mxu1 %v22765_v63  ;;  %18626 = vmatprep.mubr.msk.bf16.mxu1 %vm21936_vm0, %v21935_v45 }
 0x4c0   : > { %18620 = vmatprep.subr.bf16.mxu1 %v21935_v45  ;;  %18639 = vmatpush3.bf16.msra.mxu0 %v21145_v37 }
 0x4c1   : > { %18640 = vmatprep.subr.bf16.mxu0 %v21935_v45 }
 0x4c3   : > { %18621 = vmatpush3.bf16.msra.mxu1 %v22763_v57 }
 0x4c4   : > { %18622 = vmatprep.subr.bf16.mxu1 %v21935_v45  ;;  %18641 = vmatpush3.bf16.msra.mxu0 %v21147_v40 }
 0x4c5   : > { %18642 = vmatprep.subr.bf16.mxu0 %v21935_v45 }
 0x4c7   : > { %18623 = vmatpush3.bf16.msra.mxu1 %v22773_v12 }
 0x4c8   : > { %18624 = vmatprep.subr.bf16.mxu1 %v21935_v45  ;;  %18643 = vmatpush3.bf16.msra.mxu0 %v21149_v42 }
 0x4c9   : > { %18644 = vmatprep.subr.bf16.mxu0 %v21935_v45 }
 0x4cb   : > { %18625 = vmatpush3.bf16.msra.mxu1 %v22770_v11 }
 0x4cc   : > { %18650 = vmatprep.subr.bf16.mxu1 %v21935_v45  ;;  %18645 = vmatpush3.bf16.msra.mxu0 %v21151_v43 }
 0x4cd   : > { %18682 = vmatprep.subr.bf16.mxu0 %v21935_v45 }
 0x4ce   : > { %18627 = vmatmul.mubr.msk.bf16.vlgmr.msra.gmra.mrb[140].mxu1 %vm3198_vm1, %v21139_v32 }
 0x4cf   : > { %18651 = vmatpush3.bf16.msra.mxu1 %v22765_v63  ;;  %18658 = vmatprep.mubr.msk.bf16.mxu1 %vm21936_vm0, %v21935_v45 }
 0x4d0   : > { %18652 = vmatprep.subr.bf16.mxu1 %v21935_v45 }
 0x4d3   : > { %18653 = vmatpush3.bf16.msra.mxu1 %v22763_v57 }
 0x4d4   : > { %18654 = vmatprep.subr.bf16.mxu1 %v21935_v45 }
 0x4d7   : > { %18655 = vmatpush3.bf16.msra.mxu1 %v22773_v12 }
 0x4d8   : > { %18656 = vmatprep.subr.bf16.mxu1 %v21935_v45 }
 0x4db   : > { %18657 = vmatpush3.bf16.msra.mxu1 %v22770_v11 }
 0x4dc   : > { %18662 = vmatprep.subr.bf16.mxu1 %v21935_v45 }
 0x4de   : > { %18659 = vmatmul.mubr.msk.bf16.vlgmr.msra.gmra.mrb[144].mxu1 %vm3198_vm1, %v21140_v33 }
 0x4df   : > { %18678 = vmatprep.mubr.msk.bf16.mxu1 %vm21936_vm0, %v21935_v45  ;;  %18663 = vmatpush3.bf16.msra.mxu1 %v21146_v38 }
 0x4e0   : > { %18664 = vmatprep.subr.bf16.mxu1 %v21935_v45 }
 0x4e3   : > { %18665 = vmatpush3.bf16.msra.mxu1 %v21148_v39 }
 0x4e4   : > { %18666 = vmatprep.subr.bf16.mxu1 %v21935_v45 }
 0x4e7   : > { %18667 = vmatpush3.bf16.msra.mxu1 %v21150_v41 }
 0x4e8   : > { %18668 = vmatprep.subr.bf16.mxu1 %v21935_v45 }
 0x4eb   : > { %18669 = vmatpush3.bf16.msra.mxu1 %v21152_v44 }
 0x4ec   : > { %18670 = vmatprep.subr.bf16.mxu1 %v21935_v45 }
 0x4ef   : > { %18671 = vmatpush3.bf16.msra.mxu1 %v21153_v46 }
 0x4f0   : > { %18672 = vmatprep.subr.bf16.mxu1 %v21935_v45 }
 0x4f3   : > { %18673 = vmatpush3.bf16.msra.mxu1 %v21154_v47 }
 0x4f4   : > { %18674 = vmatprep.subr.bf16.mxu1 %v21935_v45 }
 0x4f7   : > { %18675 = vmatpush3.bf16.msra.mxu1 %v21155_v48  ;;  %v21175_v48 = vld [vmem:[%s26043_s23 + $0x30] sm:$0xff]  }
 0x4f8   : > { %18676 = vmatprep.subr.bf16.mxu1 %v21935_v45 }
 0x4fb   : > { %18677 = vmatpush3.bf16.msra.mxu1 %v21156_v49 }
 0x4fc   : > { %18714 = vmatprep.subr.bf16.mxu1 %v21935_v45 }
 0x581   : > { %v3501_v50 = vpop.f32.mrb[24].mxu0 }
 0x582   : > { %v18616_v52 = vpop.f32.mrb[25].mxu0 }
 0x583   : > { %v3504_v53 = vpop.f32.mrb[26].mxu0  ;;  %v21177_v52 = vld [vmem:[#allocation6 + $0x180] sm:$0xff]  }
 0x584   : > { %v18617_v55 = vpop.f32.mrb[27].mxu0 }
 0x585   : > { %v21178_v55 = vld [vmem:[#allocation6 + $0x188] sm:$0xff]  }
 0x591   : > { %v3412_v56 = vpop.f32.mrb[136].mxu1 }
 0x592   : > { %v18596_v58 = vpop.f32.mrb[137].mxu1  ;;  %v22856_v59 = vadd.f32 %v3501_v50, %v3412_v56  ;;  %v21179_v56 = vld [vmem:[#allocation6 + $0x190] sm:$0xff]  }
 0x593   : > { %v3415_v60 = vpop.f32.mrb[138].mxu1  ;;  %v21176_v58 = vld [vmem:[%s26043_s23 + $0x38] sm:$0xff]  }
 0x594   : > { %v18597_v61 = vpop.f32.mrb[139].mxu1  ;;  %v22858_v62 = vadd.f32 %v3504_v53, %v3415_v60  ;;  %v21181_v60 = vld [vmem:[#allocation6 + $0x1a0] sm:$0xff]  }
 0x595   : > { %v21182_v61 = vld [vmem:[#allocation6 + $0x1c0] sm:$0xff]  }
 0x5a1   : > { %v3553_v51 = vpop.f32.mrb[140].mxu1 }
 0x5a2   : > { %v18628_v54 = vpop.f32.mrb[141].mxu1 }
 0x5a3   : > { %v3556_v0 = vpop.f32.mrb[142].mxu1  ;;  %v21185_v54 = vld [vmem:[#allocation6 + $0x1b0] sm:$0xff]  }
 0x5a4   : > { %v3560_v1 = vpack.c.bf16 %v3556_v0, %v3553_v51  ;;  %v18629_v2 = vpop.f32.mrb[143].mxu1  ;;  %v21184_v51 = vld [vmem:[#allocation6 + $0x1c8] sm:$0xff]   ;;  %v21186_v0 = vld [vmem:[#allocation6 + $0x1d0] sm:$0xff]  }
 0x5a5   : > { %v21188_v2 = vld [vmem:[#allocation6 + $0x1d8] sm:$0xff]  }
 0x5a6   : > { %18647 = vmatmul.mubr.bf16.vlgmr.msra.gmra.mrb[28].mxu0 %v3560_v1  ;;  %v21187_v1 = vld [vmem:[#allocation6 + $0x1b8] sm:$0xff]  }
 0x5a7   : > { %18683 = vmatpush3.bf16.msra.mxu0 %v22765_v63  ;;  %18690 = vmatprep.mubr.msk.bf16.mxu0 %vm21936_vm0, %v21935_v45 }
 0x5a8   : > { %18684 = vmatprep.subr.bf16.mxu0 %v21935_v45 }
 0x5ab   : > { %18685 = vmatpush3.bf16.msra.mxu0 %v22763_v57 }
 0x5ac   : > { %18686 = vmatprep.subr.bf16.mxu0 %v21935_v45 }
 0x5af   : > { %18687 = vmatpush3.bf16.msra.mxu0 %v22773_v12 }
 0x5b0   : > { %18688 = vmatprep.subr.bf16.mxu0 %v21935_v45 }
 0x5b1   : > { %v3714_v4 = vpop.f32.mrb[144].mxu1 }
 0x5b2   : > { %v18660_v5 = vpop.f32.mrb[145].mxu1 }
 0x5b3   : > { %18689 = vmatpush3.bf16.msra.mxu0 %v22770_v11  ;;  %v3717_v8 = vpop.f32.mrb[146].mxu1  ;;  %v21190_v5 = vld [vmem:[#allocation6 + $0x1e8] sm:$0xff]  }
 0x5b4   : > { %v3721_v9 = vpack.c.bf16 %v3717_v8, %v3714_v4  ;;  %18694 = vmatprep.subr.bf16.mxu0 %v21935_v45  ;;  %v18661_v3 = vpop.f32.mrb[147].mxu1  ;;  %v21189_v4 = vld [vmem:[#allocation6 + $0x1e0] sm:$0xff]   ;;  %v21192_v8 = vld [vmem:[#allocation6 + $0x1f8] sm:$0xff]  }
 0x5b6   : > { %18691 = vmatmul.mubr.msk.bf16.vlgmr.msra.gmra.mrb[32].mxu0 %vm3198_vm1, %v21157_v6  ;;  %18679 = vmatmul.mubr.bf16.vlgmr.msra.gmra.mrb[148].mxu1 %v3721_v9  ;;  %v21191_v6 = vld [vmem:[#allocation6 + $0x1f0] sm:$0xff]  }
 0x5b7   : > { %18715 = vmatpush3.bf16.msra.mxu1 %v22765_v63  ;;  %18722 = vmatprep.mubr.msk.bf16.mxu1 %vm21936_vm0, %v21935_v45 }
 0x5b8   : > { %18716 = vmatprep.subr.bf16.mxu1 %v21935_v45  ;;  %18695 = vmatpush3.bf16.msra.mxu0 %v21159_v13 }
 0x5b9   : > { %18696 = vmatprep.subr.bf16.mxu0 %v21935_v45  ;;  %18710 = vmatprep.mubr.msk.bf16.mxu0 %vm21936_vm0, %v21935_v45 }
 0x5bb   : > { %18717 = vmatpush3.bf16.msra.mxu1 %v22763_v57 }
 0x5bc   : > { %18718 = vmatprep.subr.bf16.mxu1 %v21935_v45  ;;  %18697 = vmatpush3.bf16.msra.mxu0 %v21160_v7 }
 0x5bd   : > { %18698 = vmatprep.subr.bf16.mxu0 %v21935_v45 }
 0x5bf   : > { %18719 = vmatpush3.bf16.msra.mxu1 %v22773_v12 }
 0x5c0   : > { %18720 = vmatprep.subr.bf16.mxu1 %v21935_v45  ;;  %18699 = vmatpush3.bf16.msra.mxu0 %v21161_v10 }
 0x5c1   : > { %18700 = vmatprep.subr.bf16.mxu0 %v21935_v45 }
 0x5c3   : > { %18721 = vmatpush3.bf16.msra.mxu1 %v22770_v11 }
 0x5c4   : > { %18726 = vmatprep.subr.bf16.mxu1 %v21935_v45  ;;  %18701 = vmatpush3.bf16.msra.mxu0 %v21162_v15 }
 0x5c5   : > { %18702 = vmatprep.subr.bf16.mxu0 %v21935_v45 }
 0x5c6   : > { %18723 = vmatmul.mubr.msk.bf16.vlgmr.msra.gmra.mrb[152].mxu1 %vm3198_vm1, %v21158_v14 }
 0x5c7   : > { %18742 = vmatprep.mubr.msk.bf16.mxu1 %vm21936_vm0, %v21935_v45  ;;  %18727 = vmatpush3.bf16.msra.mxu1 %v21164_v17 }
 0x5c8   : > { %18703 = vmatpush3.bf16.msra.mxu0 %v21163_v16  ;;  %18728 = vmatprep.subr.bf16.mxu1 %v21935_v45 }
 0x5c9   : > { %18704 = vmatprep.subr.bf16.mxu0 %v21935_v45 }
 0x5cb   : > { %18729 = vmatpush3.bf16.msra.mxu1 %v21166_v19 }
 0x5cc   : > { %18705 = vmatpush3.bf16.msra.mxu0 %v21165_v18  ;;  %18730 = vmatprep.subr.bf16.mxu1 %v21935_v45 }
 0x5cd   : > { %18706 = vmatprep.subr.bf16.mxu0 %v21935_v45 }
 0x5cf   : > { %18731 = vmatpush3.bf16.msra.mxu1 %v21168_v21 }
 0x5d0   : > { %18707 = vmatpush3.bf16.msra.mxu0 %v21167_v20  ;;  %18732 = vmatprep.subr.bf16.mxu1 %v21935_v45 }
 0x5d1   : > { %18708 = vmatprep.subr.bf16.mxu0 %v21935_v45 }
 0x5d3   : > { %18733 = vmatpush3.bf16.msra.mxu1 %v21170_v23 }
 0x5d4   : > { %18709 = vmatpush3.bf16.msra.mxu0 %v21169_v22  ;;  %18734 = vmatprep.subr.bf16.mxu1 %v21935_v45 }
 0x5d5   : > { %18746 = vmatprep.subr.bf16.mxu0 %v21935_v45 }
 0x5d7   : > { %18735 = vmatpush3.bf16.msra.mxu1 %v21171_v24 }
 0x5d8   : > { %18736 = vmatprep.subr.bf16.mxu1 %v21935_v45 }
 0x5db   : > { %18737 = vmatpush3.bf16.msra.mxu1 %v21172_v25 }
 0x5dc   : > { %18738 = vmatprep.subr.bf16.mxu1 %v21935_v45 }
 0x5df   : > { %18739 = vmatpush3.bf16.msra.mxu1 %v21173_v26 }
 0x5e0   : > { %18740 = vmatprep.subr.bf16.mxu1 %v21935_v45 }
 0x5e3   : > { %18741 = vmatpush3.bf16.msra.mxu1 %v21174_v27 }
 0x5e4   : > { %18778 = vmatprep.subr.bf16.mxu1 %v21935_v45 }
 0x679   : > { %v3660_v28 = vpop.f32.mrb[28].mxu0 }
 0x67a   : > { %v3667_v29 = vadd.f32 %v3660_v28, %v22856_v59  ;;  %v18648_v30 = vpop.f32.mrb[29].mxu0  ;;  %v21180_v59 = vld [vmem:[#allocation6 + $0x198] sm:$0xff]  }
 0x67b   : > { %v3663_v31 = vpop.f32.mrb[30].mxu0  ;;  %v21193_v28 = vld [vmem:[%s26043_s23 + $0x40] sm:$0xff]  }
 0x67c   : > { %v3668_v32 = vadd.f32 %v3663_v31, %v22858_v62  ;;  %v18649_v33 = vpop.f32.mrb[31].mxu0  ;;  %v21183_v62 = vld [vmem:[#allocation6 + $0x1a8] sm:$0xff]   ;;  %v21197_v31 = vld [vmem:[#allocation6 + $0x218] sm:$0xff]  }
 0x67d   : > { %v21199_v33 = vld [vmem:[#allocation6 + $0x228] sm:$0xff]  }
 0x689   : > { %v3875_v34 = vpop.f32.mrb[32].mxu0  ;;  %v3821_v35 = vpop.f32.mrb[148].mxu1 }
 0x68a   : > { %v18692_v36 = vpop.f32.mrb[33].mxu0  ;;  %v18680_v37 = vpop.f32.mrb[149].mxu1  ;;  %v22910_v38 = vadd.f32 %v3821_v35, %v3667_v29  ;;  %v21194_v29 = vld [vmem:[#allocation6 + $0x200] sm:$0xff]   ;;  %v21201_v35 = vld [vmem:[#allocation6 + $0x238] sm:$0xff]  }
 0x68b   : > { %v3878_v39 = vpop.f32.mrb[34].mxu0  ;;  %v3824_v40 = vpop.f32.mrb[150].mxu1 }
 0x68c   : > { %v3882_v41 = vpack.c.bf16 %v3878_v39, %v3875_v34  ;;  %v18693_v42 = vpop.f32.mrb[35].mxu0  ;;  %v18681_v43 = vpop.f32.mrb[151].mxu1  ;;  %v22912_v44 = vadd.f32 %v3824_v40, %v3668_v32  ;;  %v21198_v32 = vld [vmem:[#allocation6 + $0x220] sm:$0xff]   ;;  %v21200_v34 = vld [vmem:[#allocation6 + $0x230] sm:$0xff]  }
 0x68e   : > { %18711 = vmatmul.mubr.bf16.vlgmr.msra.gmra.mrb[36].mxu0 %v3882_v41 }
 0x68f   : > { %18747 = vmatpush3.bf16.msra.mxu0 %v22765_v63  ;;  %18754 = vmatprep.mubr.msk.bf16.mxu0 %vm21936_vm0, %v21935_v45 }
 0x690   : > { %18748 = vmatprep.subr.bf16.mxu0 %v21935_v45 }
 0x693   : > { %18749 = vmatpush3.bf16.msra.mxu0 %v22763_v57 }
 0x694   : > { %18750 = vmatprep.subr.bf16.mxu0 %v21935_v45 }
 0x697   : > { %18751 = vmatpush3.bf16.msra.mxu0 %v22773_v12 }
 0x698   : > { %18752 = vmatprep.subr.bf16.mxu0 %v21935_v45 }
 0x699   : > { %v4036_v46 = vpop.f32.mrb[152].mxu1 }
 0x69a   : > { %v18724_v47 = vpop.f32.mrb[153].mxu1 }
 0x69b   : > { %18753 = vmatpush3.bf16.msra.mxu0 %v22770_v11  ;;  %v4039_v49 = vpop.f32.mrb[154].mxu1 }
 0x69c   : > { %v4043_v50 = vpack.c.bf16 %v4039_v49, %v4036_v46  ;;  %18758 = vmatprep.subr.bf16.mxu0 %v21935_v45  ;;  %v18725_v53 = vpop.f32.mrb[155].mxu1 }
 0x69e   : > { %18755 = vmatmul.mubr.msk.bf16.vlgmr.msra.gmra.mrb[40].mxu0 %vm3198_vm1, %v21175_v48  ;;  %18743 = vmatmul.mubr.bf16.vlgmr.msra.gmra.mrb[156].mxu1 %v4043_v50 }
 0x69f   : > { %18779 = vmatpush3.bf16.msra.mxu1 %v22765_v63  ;;  %18786 = vmatprep.mubr.msk.bf16.mxu1 %vm21936_vm0, %v21935_v45 }
 0x6a0   : > { %18780 = vmatprep.subr.bf16.mxu1 %v21935_v45  ;;  %18759 = vmatpush3.bf16.msra.mxu0 %v21177_v52 }
 0x6a1   : > { %18760 = vmatprep.subr.bf16.mxu0 %v21935_v45  ;;  %18774 = vmatprep.mubr.msk.bf16.mxu0 %vm21936_vm0, %v21935_v45 }
 0x6a3   : > { %18781 = vmatpush3.bf16.msra.mxu1 %v22763_v57 }
 0x6a4   : > { %18782 = vmatprep.subr.bf16.mxu1 %v21935_v45  ;;  %18761 = vmatpush3.bf16.msra.mxu0 %v21178_v55 }
 0x6a5   : > { %18762 = vmatprep.subr.bf16.mxu0 %v21935_v45 }
 0x6a7   : > { %18783 = vmatpush3.bf16.msra.mxu1 %v22773_v12 }
 0x6a8   : > { %18784 = vmatprep.subr.bf16.mxu1 %v21935_v45  ;;  %18763 = vmatpush3.bf16.msra.mxu0 %v21179_v56  ;;  %v21203_v56 = vld [vmem:[#allocation9] sm:$0xff]  }
 0x6a9   : > { %18764 = vmatprep.subr.bf16.mxu0 %v21935_v45 }
 0x6ab   : > { %18785 = vmatpush3.bf16.msra.mxu1 %v22770_v11 }
 0x6ac   : > { %18790 = vmatprep.subr.bf16.mxu1 %v21935_v45  ;;  %18765 = vmatpush3.bf16.msra.mxu0 %v21180_v59  ;;  %v21207_v59 = vld [vmem:[#allocation9 + $0x10] sm:$0xff]  }
 0x6ad   : > { %18766 = vmatprep.subr.bf16.mxu0 %v21935_v45 }
 0x6ae   : > { %18787 = vmatmul.mubr.msk.bf16.vlgmr.msra.gmra.mrb[160].mxu1 %vm3198_vm1, %v21176_v58  ;;  %v21205_v58 = vld [vmem:[#allocation9 + $0x8] sm:$0xff]  }
 0x6af   : > { %18806 = vmatprep.mubr.msk.bf16.mxu1 %vm21936_vm0, %v21935_v45  ;;  %18791 = vmatpush3.bf16.msra.mxu1 %v21182_v61  ;;  %v21211_v61 = vld [vmem:[#allocation9 + $0x20] sm:$0xff]  }
 0x6b0   : > { %18767 = vmatpush3.bf16.msra.mxu0 %v21181_v60  ;;  %18792 = vmatprep.subr.bf16.mxu1 %v21935_v45  ;;  %v21209_v60 = vld [vmem:[#allocation9 + $0x18] sm:$0xff]  }
 0x6b1   : > { %18768 = vmatprep.subr.bf16.mxu0 %v21935_v45 }
 0x6b3   : > { %18793 = vmatpush3.bf16.msra.mxu1 %v21184_v51 }
 0x6b4   : > { %18769 = vmatpush3.bf16.msra.mxu0 %v21183_v62  ;;  %18794 = vmatprep.subr.bf16.mxu1 %v21935_v45  ;;  %v21213_v62 = vld [vmem:[#allocation9 + $0x28] sm:$0xff]  }
 0x6b5   : > { %18770 = vmatprep.subr.bf16.mxu0 %v21935_v45 }
 0x6b7   : > { %18795 = vmatpush3.bf16.msra.mxu1 %v21186_v0 }
 0x6b8   : > { %18771 = vmatpush3.bf16.msra.mxu0 %v21185_v54  ;;  %18796 = vmatprep.subr.bf16.mxu1 %v21935_v45  ;;  %v15816_v54 = vld [vmem:[%s25937_s6] ss:$0 sm:$0xff] }
 0x6b9   : > { %18772 = vmatprep.subr.bf16.mxu0 %v21935_v45 }
 0x6bb   : > { %18797 = vmatpush3.bf16.msra.mxu1 %v21188_v2 }
 0x6bc   : > { %18773 = vmatpush3.bf16.msra.mxu0 %v21187_v1  ;;  %18798 = vmatprep.subr.bf16.mxu1 %v21935_v45 }
 0x6bd   : > { %18810 = vmatprep.subr.bf16.mxu0 %v21935_v45 }
 0x6bf   : > { %18799 = vmatpush3.bf16.msra.mxu1 %v21189_v4 }
 0x6c0   : > { %18800 = vmatprep.subr.bf16.mxu1 %v21935_v45 }
 0x6c3   : > { %18801 = vmatpush3.bf16.msra.mxu1 %v21190_v5 }
 0x6c4   : > { %18802 = vmatprep.subr.bf16.mxu1 %v21935_v45 }
 0x6c7   : > { %18803 = vmatpush3.bf16.msra.mxu1 %v21191_v6 }
 0x6c8   : > { %18804 = vmatprep.subr.bf16.mxu1 %v21935_v45 }
 0x6cb   : > { %18805 = vmatpush3.bf16.msra.mxu1 %v21192_v8 }
 0x6cc   : > { %18842 = vmatprep.subr.bf16.mxu1 %v21935_v45 }
 0x761   : > { %v3982_v9 = vpop.f32.mrb[36].mxu0 }
 0x762   : > { %v3989_v13 = vadd.f32 %v3982_v9, %v22910_v38  ;;  %v18712_v3 = vpop.f32.mrb[37].mxu0 }
 0x763   : > { %v3985_v7 = vpop.f32.mrb[38].mxu0 }
 0x764   : > { %v3990_v10 = vadd.f32 %v3985_v7, %v22912_v44  ;;  %v18713_v14 = vpop.f32.mrb[39].mxu0  ;;  %v4647_v7 = vld [vmem:[#allocation7] sm:$0x3] }
 0x765   : > { %v21202_v14 = vld [vmem:[#allocation9 + $0x40] sm:$0xff]  }
 0x771   : > { %v4197_v15 = vpop.f32.mrb[40].mxu0  ;;  %v4143_v16 = vpop.f32.mrb[156].mxu1 }
 0x772   : > { %v18756_v17 = vpop.f32.mrb[41].mxu0  ;;  %v18744_v18 = vpop.f32.mrb[157].mxu1  ;;  %v4150_v19 = vadd.f32 %v4143_v16, %v3989_v13  ;;  %v21206_v16 = vld [vmem:[#allocation9 + $0x50] sm:$0xff]  }
 0x773   : > { %v4200_v20 = vpop.f32.mrb[42].mxu0  ;;  %v4146_v21 = vpop.f32.mrb[158].mxu1  ;;  %v21208_v17 = vld [vmem:[#allocation9 + $0x58] sm:$0xff]   ;;  %v21210_v18 = vld [vmem:[#allocation9 + $0x60] sm:$0xff]  }
 0x774   : > { %v4204_v22 = vpack.c.bf16 %v4200_v20, %v4197_v15  ;;  %v18757_v23 = vpop.f32.mrb[43].mxu0  ;;  %v18745_v24 = vpop.f32.mrb[159].mxu1  ;;  %v4151_v25 = vadd.f32 %v4146_v21, %v3990_v10  ;;  %v4710_v10 = vld [vmem:[#allocation7 + $0x2] sm:$0x3]  ;;  %v21204_v15 = vld [vmem:[#allocation9 + $0x48] sm:$0xff]  }
 0x775   : > { %v21214_v20 = vld [vmem:[#allocation9 + $0x70] sm:$0xff]   ;;  %v21216_v23 = vld [vmem:[#allocation9 + $0x78] sm:$0xff]  }
 0x776   : > { %18775 = vmatmul.mubr.bf16.vlgmr.msra.gmra.mrb[44].mxu0 %v4204_v22  ;;  %v21215_v21 = vld [vmem:[#allocation9 + $0x30] sm:$0xff]   ;;  %v21217_v22 = vld [vmem:[#allocation9 + $0x38] sm:$0xff]  }
 0x777   : > { %18811 = vmatpush3.bf16.msra.mxu0 %v22765_v63  ;;  %18818 = vmatprep.mubr.msk.bf16.mxu0 %vm21936_vm0, %v21935_v45 }
 0x778   : > { %18812 = vmatprep.subr.bf16.mxu0 %v21935_v45 }
 0x77b   : > { %18813 = vmatpush3.bf16.msra.mxu0 %v22763_v57 }
 0x77c   : > { %18814 = vmatprep.subr.bf16.mxu0 %v21935_v45 }
 0x77f   : > { %18815 = vmatpush3.bf16.msra.mxu0 %v22773_v12  ;;  %v21195_v12 = vld [vmem:[#allocation6 + $0x208] sm:$0xff]  }
 0x780   : > { %18816 = vmatprep.subr.bf16.mxu0 %v21935_v45 }
 0x781   : > { %v4358_v26 = vpop.f32.mrb[160].mxu1 }
 0x782   : > { %v18788_v27 = vpop.f32.mrb[161].mxu1 }
 0x783   : > { %18817 = vmatpush3.bf16.msra.mxu0 %v22770_v11  ;;  %v4361_v63 = vpop.f32.mrb[162].mxu1  ;;  %v21196_v11 = vld [vmem:[#allocation6 + $0x210] sm:$0xff]  }
 0x784   : > { %v4365_v30 = vpack.c.bf16 %v4361_v63, %v4358_v26  ;;  %18822 = vmatprep.subr.bf16.mxu0 %v21935_v45  ;;  %v18789_v57 = vpop.f32.mrb[163].mxu1 }
 0x786   : > { %18819 = vmatmul.mubr.msk.bf16.vlgmr.msra.gmra.mrb[48].mxu0 %vm3198_vm1, %v21193_v28  ;;  %18807 = vmatmul.mubr.bf16.vlgmr.msra.gmra.mrb[164].mxu1 %v4365_v30 }
 0x787   : > { %18823 = vmatpush3.bf16.msra.mxu0 %v21194_v29  ;;  %18838 = vmatprep.mubr.msk.bf16.mxu0 %vm21936_vm0, %v21935_v45 }
 0x788   : > { %18824 = vmatprep.subr.bf16.mxu0 %v21935_v45  ;;  %18844 = vmatprep.mubr.msk.bf16.mxu1 %vm21936_vm0, %v21935_v45 }
 0x78b   : > { %18825 = vmatpush3.bf16.msra.mxu0 %v21195_v12 }
 0x78c   : > { %18826 = vmatprep.subr.bf16.mxu0 %v21935_v45 }
 0x78f   : > { %18827 = vmatpush3.bf16.msra.mxu0 %v21196_v11  ;;  %v4949_v11 = vld [vmem:[#allocation7 + $0x4] sm:$0x3] }
 0x790   : > { %18828 = vmatprep.subr.bf16.mxu0 %v21935_v45 }
 0x793   : > { %18829 = vmatpush3.bf16.msra.mxu0 %v21197_v31  ;;  %v21218_v31 = vld [vmem:[#allocation9 + $0x80] sm:$0xff]  }
 0x794   : > { %18830 = vmatprep.subr.bf16.mxu0 %v21935_v45 }
 0x797   : > { %18831 = vmatpush3.bf16.msra.mxu0 %v21198_v32  ;;  %v21219_v32 = vld [vmem:[#allocation9 + $0x88] sm:$0xff]  }
 0x798   : > { %18832 = vmatprep.subr.bf16.mxu0 %v21935_v45 }
 0x79b   : > { %18833 = vmatpush3.bf16.msra.mxu0 %v21199_v33  ;;  %v21220_v33 = vld [vmem:[#allocation9 + $0x90] sm:$0xff]  }
 0x79c   : > { %18834 = vmatprep.subr.bf16.mxu0 %v21935_v45 }
 0x79f   : > { %18835 = vmatpush3.bf16.msra.mxu0 %v21200_v34  ;;  %v21221_v34 = vld [vmem:[#allocation9 + $0x98] sm:$0xff]  }
 0x7a0   : > { %18836 = vmatprep.subr.bf16.mxu0 %v21935_v45 }
 0x7a3   : > { %18837 = vmatpush3.bf16.msra.mxu0 %v21201_v35  ;;  %v21222_v35 = vld [vmem:[#allocation9 + $0xa0] sm:$0xff]  }
 0x7a4   : > { %18874 = vmatprep.subr.bf16.mxu0 %v21935_v45 }
 0x849   : > { %v4304_v36 = vpop.f32.mrb[44].mxu0 }
 0x84a   : > { %v4311_v37 = vadd.f32 %v4304_v36, %v4150_v19  ;;  %v18776_v38 = vpop.f32.mrb[45].mxu0  ;;  %v21212_v19 = vld [vmem:[#allocation9 + $0x68] sm:$0xff]  }
 0x84b   : > { %v4307_v39 = vpop.f32.mrb[46].mxu0  ;;  %v21223_v36 = vld [vmem:[#allocation9 + $0xa8] sm:$0xff]   ;;  %v21225_v38 = vld [vmem:[#allocation9 + $0xb8] sm:$0xff]  }
 0x84c   : > { %v4312_v40 = vadd.f32 %v4307_v39, %v4151_v25  ;;  %v18777_v41 = vpop.f32.mrb[47].mxu0  ;;  %v21226_v39 = vld [vmem:[#allocation9 + $0xc0] sm:$0xff]  }
 0x84d   : > { %v21228_v41 = vld [vmem:[#allocation9 + $0xd0] sm:$0xff]  }
 0x859   : > { %v4519_v42 = vpop.f32.mrb[48].mxu0  ;;  %v4465_v43 = vpop.f32.mrb[164].mxu1 }
 0x85a   : > { %v18820_v44 = vpop.f32.mrb[49].mxu0  ;;  %v18808_v46 = vpop.f32.mrb[165].mxu1  ;;  %v4472_v47 = vadd.f32 %v4465_v43, %v4311_v37  ;;  %v21224_v37 = vld [vmem:[#allocation9 + $0xb0] sm:$0xff]   ;;  %v21232_v43 = vld [vmem:[#allocation9 + $0xe0] sm:$0xff]  }
 0x85b   : > { %v4522_v48 = vpop.f32.mrb[50].mxu0  ;;  %v4468_v49 = vpop.f32.mrb[166].mxu1  ;;  %v21234_v44 = vld [vmem:[#allocation9 + $0xe8] sm:$0xff]  }
 0x85c   : > { %v4526_v50 = vpack.c.bf16 %v4522_v48, %v4519_v42  ;;  %v18821_v52 = vpop.f32.mrb[51].mxu0  ;;  %v4473_v53 = vadd.f32 %v4468_v49, %v4312_v40  ;;  %v18809_v55 = vpop.f32.mrb[167].mxu1  ;;  %v21227_v40 = vld [vmem:[#allocation9 + $0xc8] sm:$0xff]   ;;  %v21230_v42 = vld [vmem:[#allocation9 + $0xd8] sm:$0xff]  }
 0x85e   : > { %18839 = vmatmul.mubr.bf16.vlgmr.msra.gmra.mrb[52].mxu0 %v4526_v50 }
 0x85f   : > { %18890 = vmatprep.mubr.msk.bf16.mxu0 %vm21936_vm0, %v21935_v45  ;;  %18875 = vmatpush3.bf16.msra.mxu0 %v21203_v56 }
 0x860   : > { %18876 = vmatprep.subr.bf16.mxu0 %v21935_v45 }
 0x863   : > { %18877 = vmatpush3.bf16.msra.mxu0 %v21205_v58 }
 0x864   : > { %18878 = vmatprep.subr.bf16.mxu0 %v21935_v45 }
 0x867   : > { %18879 = vmatpush3.bf16.msra.mxu0 %v21207_v59 }
 0x868   : > { %18880 = vmatprep.subr.bf16.mxu0 %v21935_v45 }
 0x86b   : > { %18881 = vmatpush3.bf16.msra.mxu0 %v21209_v60 }
 0x86c   : > { %18882 = vmatprep.subr.bf16.mxu0 %v21935_v45 }
 0x86f   : > { %18883 = vmatpush3.bf16.msra.mxu0 %v21211_v61 }
 0x870   : > { %18884 = vmatprep.subr.bf16.mxu0 %v21935_v45 }
 0x873   : > { %18885 = vmatpush3.bf16.msra.mxu0 %v21213_v62 }
 0x874   : > { %18886 = vmatprep.subr.bf16.mxu0 %v21935_v45 }
 0x877   : > { %18887 = vmatpush3.bf16.msra.mxu0 %v21215_v21 }
 0x878   : > { %18888 = vmatprep.subr.bf16.mxu0 %v21935_v45 }
 0x87b   : > { %18889 = vmatpush3.bf16.msra.mxu0 %v21217_v22 }
 0x87c   : > { %18926 = vmatprep.subr.bf16.mxu0 %v21935_v45 }
 0x931   : > { %v4626_v51 = vpop.f32.mrb[52].mxu0 }
 0x932   : > { %v4633_v0 = vadd.f32 %v4626_v51, %v4472_v47  ;;  %v18840_v1 = vpop.f32.mrb[53].mxu0  ;;  %v5101_v51 = vld [vmem:[#allocation7 + $0x6] sm:$0x3] }
 0x933   : > { %v4629_v2 = vpop.f32.mrb[54].mxu0  ;;  %v21231_v1 = vld [vmem:[#allocation9 + $0x108] sm:$0xff]  }
 0x934   : > { %v4642_v4 = vadd.f32 %v15816_v54, %v4633_v0  ;;  %v4634_v5 = vadd.f32 %v4629_v2, %v4473_v53  ;;  %v18841_v6 = vpop.f32.mrb[55].mxu0  ;;  %v21229_v0 = vld [vmem:[#allocation9 + $0x100] sm:$0xff]   ;;  %v21233_v2 = vld [vmem:[#allocation9 + $0x110] sm:$0xff]  }
 0x935   : > { %v21237_v6 = vld [vmem:[#allocation9 + $0x120] sm:$0xff]  }
 0x936   : > { %v4643_v8 = vadd.f32 %v15816_v54, %v4634_v5  ;;  %v4644_v9 = vmax.f32 %v4642_v4, 0.0  ;;  %v5253_v54 = vld [vmem:[#allocation7 + $0x8] sm:$0x3]  ;;  %v21235_v4 = vld [vmem:[#allocation9 + $0x118] sm:$0xff]  }
 0x937   : > { %v21236_v5 = vld [vmem:[#allocation9 + $0xf0] sm:$0xff]  }
 0x938   : > { %v4645_v13 = vmax.f32 %v4643_v8, 0.0  ;;  %v21238_v8 = vld [vmem:[#allocation9 + $0xf8] sm:$0xff]  }
 0x93a   : > { %v23001_v3 = vpack.c.bf16 %v4645_v13, %v4644_v9  ;;  %v21239_v9 = vld [vmem:[#allocation9 + $0x128] sm:$0xff]   ;;  %v21240_v13 = vld [vmem:[#allocation9 + $0x130] sm:$0xff]  }
 0x93c   : > { %18843 = vmatpush3.bf16.msra.mxu1 %v23001_v3 }
 0x93d   : > { %18848 = vmatprep.subr.bf16.mxu1 %v21935_v45 }
 0x93f   : > { %18845 = vmatmul.mubr.msk.bf16.vlgmr.msra.gmra.mrb[168].mxu1 %vm4648_vm2, %v4647_v7  ;;  %v21241_v7 = vld [vmem:[#allocation9 + $0x138] sm:$0xff]  }
 0x940   : > { %18849 = vmatpush3.bf16.msra.mxu1 %v23001_v3  ;;  %18850 = vmatprep.mubr.msk.bf16.mxu1 %vm21936_vm0, %v21935_v45 }
 0x941   : > { %18854 = vmatprep.subr.bf16.mxu1 %v21935_v45 }
 0x947   : > { %18851 = vmatmul.mubr.msk.bf16.vlgmr.msra.gmra.mrb[172].mxu1 %vm4648_vm2, %v4710_v10 }
 0x948   : > { %18855 = vmatpush3.bf16.msra.mxu1 %v21202_v14  ;;  %18870 = vmatprep.mubr.msk.bf16.mxu1 %vm21936_vm0, %v21935_v45 }
 0x949   : > { %18856 = vmatprep.subr.bf16.mxu1 %v21935_v45 }
 0x94c   : > { %18857 = vmatpush3.bf16.msra.mxu1 %v21204_v15 }
 0x94d   : > { %18858 = vmatprep.subr.bf16.mxu1 %v21935_v45 }
 0x950   : > { %18859 = vmatpush3.bf16.msra.mxu1 %v21206_v16 }
 0x951   : > { %18860 = vmatprep.subr.bf16.mxu1 %v21935_v45 }
 0x954   : > { %18861 = vmatpush3.bf16.msra.mxu1 %v21208_v17 }
 0x955   : > { %18862 = vmatprep.subr.bf16.mxu1 %v21935_v45 }
 0x958   : > { %18863 = vmatpush3.bf16.msra.mxu1 %v21210_v18 }
 0x959   : > { %18864 = vmatprep.subr.bf16.mxu1 %v21935_v45 }
 0x95c   : > { %18865 = vmatpush3.bf16.msra.mxu1 %v21212_v19 }
 0x95d   : > { %18866 = vmatprep.subr.bf16.mxu1 %v21935_v45 }
 0x960   : > { %18867 = vmatpush3.bf16.msra.mxu1 %v21214_v20 }
 0x961   : > { %18868 = vmatprep.subr.bf16.mxu1 %v21935_v45 }
 0x964   : > { %18869 = vmatpush3.bf16.msra.mxu1 %v21216_v23 }
 0x965   : > { %18894 = vmatprep.subr.bf16.mxu1 %v21935_v45 }
 0xa12   : > { %v4686_v24 = vpop.f32.mrb[168].mxu1 }
 0xa13   : > { %v4692_v25 = vpack.c.bf16 %v4686_v24, %v4686_v24  ;;  %v18846_v26 = vpop.f32.mrb[169].mxu1  ;;  %v5405_v24 = vld [vmem:[#allocation7 + $0xa] sm:$0x3] }
 0xa14   : > { %v4689_v27 = vpop.f32.mrb[170].mxu1 }
 0xa15   : > { %v18847_v28 = vpop.f32.mrb[171].mxu1  ;;  %18891 = vmatmul.mubr.bf16.vlgmr.msra.gmra.mrb[56].mxu0 %v4692_v25  ;;  %v21242_v27 = vld [vmem:[#allocation9 + $0x140] sm:$0xff]  }
 0xa16   : > { %18942 = vmatprep.mubr.msk.bf16.mxu0 %vm21936_vm0, %v21935_v45  ;;  %18927 = vmatpush3.bf16.msra.mxu0 %v21226_v39  ;;  %v21255_v39 = vld [vmem:[#allocation9 + $0x1a8] sm:$0xff]  }
 0xa17   : > { %18928 = vmatprep.subr.bf16.mxu0 %v21935_v45 }
 0xa1a   : > { %v4748_v63 = vpop.f32.mrb[172].mxu1  ;;  %18929 = vmatpush3.bf16.msra.mxu0 %v21227_v40  ;;  %v21256_v40 = vld [vmem:[#allocation9 + $0x1b0] sm:$0xff]  }
 0xa1b   : > { %v4754_v29 = vpack.c.bf16 %v4748_v63, %v4748_v63  ;;  %v18852_v30 = vpop.f32.mrb[173].mxu1  ;;  %18930 = vmatprep.subr.bf16.mxu0 %v21935_v45 }
 0xa1c   : > { %v4751_v57 = vpop.f32.mrb[174].mxu1  ;;  %v5557_v30 = vld [vmem:[#allocation7 + $0xc] sm:$0x3] }
 0xa1d   : > { %18871 = vmatmul.mubr.bf16.vlgmr.msra.gmra.mrb[176].mxu1 %v4754_v29  ;;  %v18853_v12 = vpop.f32.mrb[175].mxu1  ;;  %v21243_v29 = vld [vmem:[#allocation9 + $0x148] sm:$0xff]   ;;  %v21245_v57 = vld [vmem:[#allocation9 + $0x180] sm:$0xff]  }
 0xa1e   : > { %18895 = vmatpush3.bf16.msra.mxu1 %v23001_v3  ;;  %18896 = vmatprep.mubr.msk.bf16.mxu1 %vm21936_vm0, %v21935_v45  ;;  %v21244_v12 = vld [vmem:[#allocation9 + $0x150] sm:$0xff]  }
 0xa1f   : > { %18900 = vmatprep.subr.bf16.mxu1 %v21935_v45  ;;  %18931 = vmatpush3.bf16.msra.mxu0 %v21228_v41  ;;  %v21257_v41 = vld [vmem:[#allocation9 + $0x1b8] sm:$0xff]  }
 0xa20   : > { %18932 = vmatprep.subr.bf16.mxu0 %v21935_v45 }
 0xa23   : > { %18933 = vmatpush3.bf16.msra.mxu0 %v21230_v42 }
 0xa24   : > { %18934 = vmatprep.subr.bf16.mxu0 %v21935_v45 }
 0xa25   : > { %18897 = vmatmul.mubr.msk.bf16.vlgmr.msra.gmra.mrb[180].mxu1 %vm4648_vm2, %v4949_v11  ;;  %v21247_v11 = vld [vmem:[#allocation9 + $0x188] sm:$0xff]  }
 0xa26   : > { %18901 = vmatpush3.bf16.msra.mxu1 %v21218_v31  ;;  %18916 = vmatprep.mubr.msk.bf16.mxu1 %vm21936_vm0, %v21935_v45  ;;  %v21246_v31 = vld [vmem:[#allocation9 + $0x158] sm:$0xff]  }
 0xa27   : > { %18902 = vmatprep.subr.bf16.mxu1 %v21935_v45  ;;  %18935 = vmatpush3.bf16.msra.mxu0 %v21232_v43 }
 0xa28   : > { %18936 = vmatprep.subr.bf16.mxu0 %v21935_v45 }
 0xa2a   : > { %18903 = vmatpush3.bf16.msra.mxu1 %v21219_v32  ;;  %v21249_v32 = vld [vmem:[#allocation9 + $0x190] sm:$0xff]  }
 0xa2b   : > { %18904 = vmatprep.subr.bf16.mxu1 %v21935_v45  ;;  %18937 = vmatpush3.bf16.msra.mxu0 %v21234_v44 }
 0xa2c   : > { %18938 = vmatprep.subr.bf16.mxu0 %v21935_v45 }
 0xa2e   : > { %18905 = vmatpush3.bf16.msra.mxu1 %v21220_v33  ;;  %v21248_v33 = vld [vmem:[#allocation9 + $0x160] sm:$0xff]  }
 0xa2f   : > { %18906 = vmatprep.subr.bf16.mxu1 %v21935_v45  ;;  %18939 = vmatpush3.bf16.msra.mxu0 %v21236_v5  ;;  %v5861_v5 = vld [vmem:[#allocation7 + $0x10] sm:$0x3] }
 0xa30   : > { %18940 = vmatprep.subr.bf16.mxu0 %v21935_v45 }
 0xa32   : > { %18907 = vmatpush3.bf16.msra.mxu1 %v21221_v34  ;;  %v21251_v34 = vld [vmem:[#allocation9 + $0x198] sm:$0xff]  }
 0xa33   : > { %18908 = vmatprep.subr.bf16.mxu1 %v21935_v45  ;;  %18941 = vmatpush3.bf16.msra.mxu0 %v21238_v8  ;;  %v21260_v8 = vld [vmem:[#allocation9 + $0x1d0] sm:$0xff]  }
 0xa34   : > { %18972 = vmatprep.subr.bf16.mxu0 %v21935_v45 }
 0xa36   : > { %18909 = vmatpush3.bf16.msra.mxu1 %v21222_v35  ;;  %v21250_v35 = vld [vmem:[#allocation9 + $0x168] sm:$0xff]  }
 0xa37   : > { %18910 = vmatprep.subr.bf16.mxu1 %v21935_v45 }
 0xa3a   : > { %18911 = vmatpush3.bf16.msra.mxu1 %v21223_v36  ;;  %v21252_v36 = vld [vmem:[#allocation9 + $0x170] sm:$0xff]  }
 0xa3b   : > { %18912 = vmatprep.subr.bf16.mxu1 %v21935_v45 }
 0xa3e   : > { %18913 = vmatpush3.bf16.msra.mxu1 %v21224_v37  ;;  %v21253_v37 = vld [vmem:[#allocation9 + $0x1a0] sm:$0xff]  }
 0xa3f   : > { %18914 = vmatprep.subr.bf16.mxu1 %v21935_v45 }
 0xa42   : > { %18915 = vmatpush3.bf16.msra.mxu1 %v21225_v38  ;;  %v21254_v38 = vld [vmem:[#allocation9 + $0x178] sm:$0xff]  }
 0xa43   : > { %18920 = vmatprep.subr.bf16.mxu1 %v21935_v45 }
 0xae8   : > { %v4942_v46 = vpop.f32.mrb[56].mxu0 }
 0xae9   : > { %v18892_v47 = vpop.f32.mrb[57].mxu0 }
 0xaea   : > { %v4945_v48 = vpop.f32.mrb[58].mxu0 }
 0xaeb   : > { %v18893_v49 = vpop.f32.mrb[59].mxu0 }
 0xaf0   : > { %v4854_v50 = vpop.f32.mrb[176].mxu1 }
 0xaf1   : > { %v4943_v52 = vadd.f32 %v4942_v46, %v4854_v50  ;;  %v18872_v53 = vpop.f32.mrb[177].mxu1 }
 0xaf2   : > { %v4857_v55 = vpop.f32.mrb[178].mxu1 }
 0xaf3   : > { %v18873_v56 = vpop.f32.mrb[179].mxu1 }
 0xaf8   : > { %v4987_v58 = vpop.f32.mrb[180].mxu1 }
 0xaf9   : > { %v4993_v59 = vpack.c.bf16 %v4987_v58, %v4987_v58  ;;  %v18898_v60 = vpop.f32.mrb[181].mxu1 }
 0xafa   : > { %v4990_v61 = vpop.f32.mrb[182].mxu1 }
 0xafb   : > { %18917 = vmatmul.mubr.bf16.vlgmr.msra.gmra.mrb[184].mxu1 %v4993_v59  ;;  %v18899_v62 = vpop.f32.mrb[183].mxu1 }
 0xafc   : > { %18921 = vmatpush3.bf16.msra.mxu1 %v23001_v3  ;;  %18922 = vmatprep.mubr.msk.bf16.mxu1 %vm21936_vm0, %v21935_v45  ;;  %v5709_v62 = vld [vmem:[#allocation7 + $0xe] sm:$0x3] }
 0xafd   : > { %18946 = vmatprep.subr.bf16.mxu1 %v21935_v45 }
 0xb03   : > { %18923 = vmatmul.mubr.msk.bf16.vlgmr.msra.gmra.mrb[188].mxu1 %vm4648_vm2, %v5101_v51 }
 0xb04   : > { %18947 = vmatpush3.bf16.msra.mxu1 %v23001_v3  ;;  %18948 = vmatprep.mubr.msk.bf16.mxu1 %vm21936_vm0, %v21935_v45 }
 0xb05   : > { %18952 = vmatprep.subr.bf16.mxu1 %v21935_v45 }
 0xb0b   : > { %18949 = vmatmul.mubr.msk.bf16.vlgmr.msra.gmra.mrb[192].mxu1 %vm4648_vm2, %v5253_v54 }
 0xb0c   : > { %18953 = vmatpush3.bf16.msra.mxu1 %v21229_v0  ;;  %18968 = vmatprep.mubr.msk.bf16.mxu1 %vm21936_vm0, %v21935_v45  ;;  %v21258_v0 = vld [vmem:[#allocation9 + $0x1c0] sm:$0xff]  }
 0xb0d   : > { %18954 = vmatprep.subr.bf16.mxu1 %v21935_v45 }
 0xb10   : > { %18955 = vmatpush3.bf16.msra.mxu1 %v21231_v1 }
 0xb11   : > { %18956 = vmatprep.subr.bf16.mxu1 %v21935_v45 }
 0xb14   : > { %18957 = vmatpush3.bf16.msra.mxu1 %v21233_v2 }
 0xb15   : > { %18958 = vmatprep.subr.bf16.mxu1 %v21935_v45 }
 0xb18   : > { %18959 = vmatpush3.bf16.msra.mxu1 %v21235_v4  ;;  %v21259_v4 = vld [vmem:[#allocation9 + $0x1c8] sm:$0xff]  }
 0xb19   : > { %18960 = vmatprep.subr.bf16.mxu1 %v21935_v45 }
 0xb1c   : > { %18961 = vmatpush3.bf16.msra.mxu1 %v21237_v6  ;;  %v21261_v6 = vld [vmem:[#allocation9 + $0x200] sm:$0xff]  }
 0xb1d   : > { %18962 = vmatprep.subr.bf16.mxu1 %v21935_v45 }
 0xb20   : > { %18963 = vmatpush3.bf16.msra.mxu1 %v21239_v9  ;;  %v21262_v9 = vld [vmem:[#allocation9 + $0x1d8] sm:$0xff]  }
 0xb21   : > { %18964 = vmatprep.subr.bf16.mxu1 %v21935_v45 }
 0xb24   : > { %18965 = vmatpush3.bf16.msra.mxu1 %v21240_v13  ;;  %v21265_v13 = vld [vmem:[#allocation9 + $0x210] sm:$0xff]  }
 0xb25   : > { %18966 = vmatprep.subr.bf16.mxu1 %v21935_v45 }
 0xb28   : > { %18967 = vmatpush3.bf16.msra.mxu1 %v21241_v7  ;;  %v21264_v7 = vld [vmem:[#allocation9 + $0x1e0] sm:$0xff]  }
 0xb29   : > { %18998 = vmatprep.subr.bf16.mxu1 %v21935_v45 }
 0xbce   : > { %v5093_v10 = vpop.f32.mrb[184].mxu1 }
 0xbcf   : > { %v18918_v14 = vpop.f32.mrb[185].mxu1  ;;  %v23068_v15 = vadd.f32 %v5093_v10, %v4943_v52  ;;  %v21266_v10 = vld [vmem:[#allocation9 + $0x1e8] sm:$0xff]  }
 0xbd0   : > { %v5096_v16 = vpop.f32.mrb[186].mxu1  ;;  %v21267_v14 = vld [vmem:[#allocation9 + $0x218] sm:$0xff]  }
 0xbd1   : > { %v18919_v17 = vpop.f32.mrb[187].mxu1  ;;  %v21269_v16 = vld [vmem:[#allocation9 + $0x220] sm:$0xff]  }
 0xbd2   : > { %v21270_v17 = vld [vmem:[#allocation9 + $0x1f8] sm:$0xff]  }
 0xbd6   : > { %v5139_v18 = vpop.f32.mrb[188].mxu1 }
 0xbd7   : > { %v5145_v19 = vpack.c.bf16 %v5139_v18, %v5139_v18  ;;  %v18924_v20 = vpop.f32.mrb[189].mxu1  ;;  %v21271_v18 = vld [vmem:[#allocation9 + $0x228] sm:$0xff]  }
 0xbd8   : > { %v5142_v21 = vpop.f32.mrb[190].mxu1  ;;  %v21273_v20 = vld [vmem:[#allocation9 + $0x238] sm:$0xff]  }
 0xbd9   : > { %18943 = vmatmul.mubr.bf16.vlgmr.msra.gmra.mrb[60].mxu0 %v5145_v19  ;;  %v18925_v22 = vpop.f32.mrb[191].mxu1  ;;  %v21272_v19 = vld [vmem:[#allocation9 + $0x230] sm:$0xff]  }
 0xbda   : > { %18973 = vmatpush3.bf16.msra.mxu0 %v23001_v3  ;;  %18974 = vmatprep.mubr.msk.bf16.mxu0 %vm21936_vm0, %v21935_v45 }
 0xbdb   : > { %18978 = vmatprep.subr.bf16.mxu0 %v21935_v45 }
 0xbde   : > { %v5291_v23 = vpop.f32.mrb[192].mxu1 }
 0xbdf   : > { %v5297_v25 = vpack.c.bf16 %v5291_v23, %v5291_v23  ;;  %v18950_v26 = vpop.f32.mrb[193].mxu1 }
 0xbe0   : > { %v5294_v28 = vpop.f32.mrb[194].mxu1 }
 0xbe1   : > { %18969 = vmatmul.mubr.bf16.vlgmr.msra.gmra.mrb[196].mxu1 %v5297_v25  ;;  %18975 = vmatmul.mubr.msk.bf16.vlgmr.msra.gmra.mrb[64].mxu0 %vm4648_vm2, %v5405_v24  ;;  %v18951_v63 = vpop.f32.mrb[195].mxu1 }
 0xbe2   : > { %18999 = vmatpush3.bf16.msra.mxu1 %v23001_v3  ;;  %19000 = vmatprep.mubr.msk.bf16.mxu1 %vm21936_vm0, %v21935_v45 }
 0xbe3   : > { %18979 = vmatpush3.bf16.msra.mxu0 %v21242_v27  ;;  %19004 = vmatprep.subr.bf16.mxu1 %v21935_v45 }
 0xbe4   : > { %18980 = vmatprep.subr.bf16.mxu0 %v21935_v45  ;;  %18994 = vmatprep.mubr.msk.bf16.mxu0 %vm21936_vm0, %v21935_v45 }
 0xbe7   : > { %18981 = vmatpush3.bf16.msra.mxu0 %v21243_v29 }
 0xbe8   : > { %18982 = vmatprep.subr.bf16.mxu0 %v21935_v45 }
 0xbe9   : > { %19001 = vmatmul.mubr.msk.bf16.vlgmr.msra.gmra.mrb[200].mxu1 %vm4648_vm2, %v5557_v30 }
 0xbea   : > { %19005 = vmatpush3.bf16.msra.mxu1 %v21245_v57  ;;  %19020 = vmatprep.mubr.msk.bf16.mxu1 %vm21936_vm0, %v21935_v45 }
 0xbeb   : > { %18983 = vmatpush3.bf16.msra.mxu0 %v21244_v12  ;;  %19006 = vmatprep.subr.bf16.mxu1 %v21935_v45 }
 0xbec   : > { %18984 = vmatprep.subr.bf16.mxu0 %v21935_v45 }
 0xbee   : > { %19007 = vmatpush3.bf16.msra.mxu1 %v21247_v11 }
 0xbef   : > { %18985 = vmatpush3.bf16.msra.mxu0 %v21246_v31  ;;  %19008 = vmatprep.subr.bf16.mxu1 %v21935_v45 }
 0xbf0   : > { %18986 = vmatprep.subr.bf16.mxu0 %v21935_v45 }
 0xbf2   : > { %19009 = vmatpush3.bf16.msra.mxu1 %v21249_v32 }
 0xbf3   : > { %18987 = vmatpush3.bf16.msra.mxu0 %v21248_v33  ;;  %19010 = vmatprep.subr.bf16.mxu1 %v21935_v45 }
 0xbf4   : > { %18988 = vmatprep.subr.bf16.mxu0 %v21935_v45 }
 0xbf6   : > { %19011 = vmatpush3.bf16.msra.mxu1 %v21251_v34 }
 0xbf7   : > { %18989 = vmatpush3.bf16.msra.mxu0 %v21250_v35  ;;  %19012 = vmatprep.subr.bf16.mxu1 %v21935_v45 }
 0xbf8   : > { %18990 = vmatprep.subr.bf16.mxu0 %v21935_v45 }
 0xbfa   : > { %19013 = vmatpush3.bf16.msra.mxu1 %v21253_v37  ;;  %v21276_v37 = vld [vmem:[#allocation10] sm:$0xff]  }
 0xbfb   : > { %18991 = vmatpush3.bf16.msra.mxu0 %v21252_v36  ;;  %19014 = vmatprep.subr.bf16.mxu1 %v21935_v45 }
 0xbfc   : > { %18992 = vmatprep.subr.bf16.mxu0 %v21935_v45 }
 0xbfe   : > { %19015 = vmatpush3.bf16.msra.mxu1 %v21255_v39  ;;  %v21279_v39 = vld [vmem:[#allocation10 + $0x10] sm:$0xff]  }
 0xbff   : > { %18993 = vmatpush3.bf16.msra.mxu0 %v21254_v38  ;;  %19016 = vmatprep.subr.bf16.mxu1 %v21935_v45  ;;  %v21277_v38 = vld [vmem:[#allocation10 + $0x8] sm:$0xff]  }
 0xc00   : > { %19024 = vmatprep.subr.bf16.mxu0 %v21935_v45 }
 0xc02   : > { %19017 = vmatpush3.bf16.msra.mxu1 %v21256_v40  ;;  %v21281_v40 = vld [vmem:[#allocation10 + $0x18] sm:$0xff]  }
 0xc03   : > { %19018 = vmatprep.subr.bf16.mxu1 %v21935_v45 }
 0xc06   : > { %19019 = vmatpush3.bf16.msra.mxu1 %v21257_v41  ;;  %v21283_v41 = vld [vmem:[#allocation10 + $0x20] sm:$0xff]  }
 0xc07   : > { %19050 = vmatprep.subr.bf16.mxu1 %v21935_v45 }
 0xcac   : > { %v5245_v42 = vpop.f32.mrb[60].mxu0 }
 0xcad   : > { %v5251_v43 = vadd.f32 %v5245_v42, %v23068_v15  ;;  %v18944_v44 = vpop.f32.mrb[61].mxu0  ;;  %v21268_v15 = vld [vmem:[#allocation9 + $0x1f0] sm:$0xff]   ;;  %v21285_v42 = vld [vmem:[#allocation10 + $0x28] sm:$0xff]  }
 0xcae   : > { %v5248_v46 = vpop.f32.mrb[62].mxu0 }
 0xcaf   : > { %v18945_v47 = vpop.f32.mrb[63].mxu0 }
 0xcb4   : > { %v5397_v48 = vpop.f32.mrb[196].mxu1  ;;  %v5443_v49 = vpop.f32.mrb[64].mxu0 }
 0xcb5   : > { %v5449_v50 = vpack.c.bf16 %v5443_v49, %v5443_v49  ;;  %v18970_v52 = vpop.f32.mrb[197].mxu1  ;;  %v18976_v53 = vpop.f32.mrb[65].mxu0  ;;  %v23101_v55 = vadd.f32 %v5397_v48, %v5251_v43  ;;  %v21287_v43 = vld [vmem:[#allocation10 + $0x30] sm:$0xff]  }
 0xcb6   : > { %v5400_v56 = vpop.f32.mrb[198].mxu1  ;;  %v5446_v58 = vpop.f32.mrb[66].mxu0  ;;  %v15898_v52 = vld [vmem:[%s25940_s9] ss:$0 sm:$0xff] }
 0xcb7   : > { %18995 = vmatmul.mubr.bf16.vlgmr.msra.gmra.mrb[68].mxu0 %v5449_v50  ;;  %v18971_v59 = vpop.f32.mrb[199].mxu1  ;;  %v18977_v60 = vpop.f32.mrb[67].mxu0 }
 0xcb8   : > { %19025 = vmatpush3.bf16.msra.mxu0 %v23001_v3  ;;  %19026 = vmatprep.mubr.msk.bf16.mxu0 %vm21936_vm0, %v21935_v45 }
 0xcb9   : > { %19030 = vmatprep.subr.bf16.mxu0 %v21935_v45 }
 0xcbc   : > { %v5595_v61 = vpop.f32.mrb[200].mxu1 }
 0xcbd   : > { %v5601_v51 = vpack.c.bf16 %v5595_v61, %v5595_v61  ;;  %v19002_v54 = vpop.f32.mrb[201].mxu1 }
 0xcbe   : > { %v5598_v1 = vpop.f32.mrb[202].mxu1  ;;  %v21275_v54 = vld [vmem:[%s25941_s10 + $0x8] sm:$0xff]  }
 0xcbf   : > { %19021 = vmatmul.mubr.bf16.vlgmr.msra.gmra.mrb[204].mxu1 %v5601_v51  ;;  %19027 = vmatmul.mubr.msk.bf16.vlgmr.msra.gmra.mrb[72].mxu0 %vm4648_vm2, %v5709_v62  ;;  %v19003_v2 = vpop.f32.mrb[203].mxu1  ;;  %v21274_v51 = vld [vmem:[%s25941_s10] sm:$0xff]  }
 0xcc0   : > { %19051 = vmatpush3.bf16.msra.mxu1 %v23001_v3  ;;  %19052 = vmatprep.mubr.msk.bf16.mxu1 %vm21936_vm0, %v21935_v45  ;;  %v21263_v3 = vld [vmem:[#allocation9 + $0x208] sm:$0xff]   ;;  %v21282_v2 = vld [vmem:[#allocation10 + $0x50] sm:$0xff]  }
 0xcc1   : > { %19031 = vmatpush3.bf16.msra.mxu0 %v21258_v0  ;;  %19056 = vmatprep.subr.bf16.mxu1 %v21935_v45  ;;  %v21278_v0 = vld [vmem:[#allocation10 + $0x40] sm:$0xff]   ;;  %v21280_v1 = vld [vmem:[#allocation10 + $0x48] sm:$0xff]  }
 0xcc2   : > { %19032 = vmatprep.subr.bf16.mxu0 %v21935_v45  ;;  %19046 = vmatprep.mubr.msk.bf16.mxu0 %vm21936_vm0, %v21935_v45 }
 0xcc5   : > { %19033 = vmatpush3.bf16.msra.mxu0 %v21259_v4  ;;  %v21284_v4 = vld [vmem:[#allocation10 + $0x58] sm:$0xff]  }
 0xcc6   : > { %19034 = vmatprep.subr.bf16.mxu0 %v21935_v45 }
 0xcc7   : > { %19053 = vmatmul.mubr.msk.bf16.vlgmr.msra.gmra.mrb[208].mxu1 %vm4648_vm2, %v5861_v5  ;;  %v21286_v5 = vld [vmem:[#allocation10 + $0x60] sm:$0xff]  }
 0xcc8   : > { %19057 = vmatpush3.bf16.msra.mxu1 %v21261_v6  ;;  %19072 = vmatprep.mubr.msk.bf16.mxu1 %vm21936_vm0, %v21935_v45  ;;  %v21288_v6 = vld [vmem:[#allocation10 + $0x68] sm:$0xff]  }
 0xcc9   : > { %19035 = vmatpush3.bf16.msra.mxu0 %v21260_v8  ;;  %19058 = vmatprep.subr.bf16.mxu1 %v21935_v45  ;;  %v21289_v8 = vld [vmem:[#allocation10 + $0x38] sm:$0xff]  }
 0xcca   : > { %19036 = vmatprep.subr.bf16.mxu0 %v21935_v45 }
 0xccc   : > { %19059 = vmatpush3.bf16.msra.mxu1 %v21263_v3  ;;  %v21290_v3 = vld [vmem:[#allocation10 + $0x70] sm:$0xff]  }
 0xccd   : > { %19037 = vmatpush3.bf16.msra.mxu0 %v21262_v9  ;;  %19060 = vmatprep.subr.bf16.mxu1 %v21935_v45  ;;  %v21291_v9 = vld [vmem:[#allocation10 + $0x78] sm:$0xff]  }
 0xcce   : > { %19038 = vmatprep.subr.bf16.mxu0 %v21935_v45 }
 0xcd0   : > { %19061 = vmatpush3.bf16.msra.mxu1 %v21265_v13 }
 0xcd1   : > { %19039 = vmatpush3.bf16.msra.mxu0 %v21264_v7  ;;  %19062 = vmatprep.subr.bf16.mxu1 %v21935_v45 }
 0xcd2   : > { %19040 = vmatprep.subr.bf16.mxu0 %v21935_v45 }
 0xcd4   : > { %19063 = vmatpush3.bf16.msra.mxu1 %v21267_v14 }
 0xcd5   : > { %19041 = vmatpush3.bf16.msra.mxu0 %v21266_v10  ;;  %19064 = vmatprep.subr.bf16.mxu1 %v21935_v45 }
 0xcd6   : > { %19042 = vmatprep.subr.bf16.mxu0 %v21935_v45 }
 0xcd8   : > { %19065 = vmatpush3.bf16.msra.mxu1 %v21269_v16 }
 0xcd9   : > { %19043 = vmatpush3.bf16.msra.mxu0 %v21268_v15  ;;  %19066 = vmatprep.subr.bf16.mxu1 %v21935_v45 }
 0xcda   : > { %19044 = vmatprep.subr.bf16.mxu0 %v21935_v45 }
 0xcdc   : > { %19067 = vmatpush3.bf16.msra.mxu1 %v21271_v18  ;;  %v21292_v18 = vld [vmem:[%s25941_s10 + $0x18] sm:$0xff]  }
 0xcdd   : > { %19045 = vmatpush3.bf16.msra.mxu0 %v21270_v17  ;;  %19068 = vmatprep.subr.bf16.mxu1 %v21935_v45 }
 0xcde   : > { %19076 = vmatprep.subr.bf16.mxu0 %v21935_v45 }
 0xce0   : > { %19069 = vmatpush3.bf16.msra.mxu1 %v21272_v19 }
 0xce1   : > { %19070 = vmatprep.subr.bf16.mxu1 %v21935_v45 }
 0xce4   : > { %19071 = vmatpush3.bf16.msra.mxu1 %v21273_v20 }
 0xce5   : > { %19108 = vmatprep.subr.bf16.mxu1 %v21935_v45 }
 0xd8a   : > { %v5549_v21 = vpop.f32.mrb[68].mxu0 }
 0xd8b   : > { %v5555_v22 = vadd.f32 %v5549_v21, %v23101_v55  ;;  %v18996_v23 = vpop.f32.mrb[69].mxu0 }
 0xd8c   : > { %v5552_v24 = vpop.f32.mrb[70].mxu0  ;;  %v21295_v23 = vld [vmem:[#allocation10 + $0xc8] sm:$0xff]  }
 0xd8d   : > { %v18997_v25 = vpop.f32.mrb[71].mxu0  ;;  %v21293_v24 = vld [vmem:[%s25941_s10 + $0x10] sm:$0xff]  }
 0xd8e   : > { %v21296_v25 = vld [vmem:[#allocation10 + $0x80] sm:$0xff]  }
 0xd92   : > { %v5701_v26 = vpop.f32.mrb[204].mxu1  ;;  %v5747_v27 = vpop.f32.mrb[72].mxu0 }
 0xd93   : > { %v5753_v28 = vpack.c.bf16 %v5747_v27, %v5747_v27  ;;  %v19022_v63 = vpop.f32.mrb[205].mxu1  ;;  %v19028_v29 = vpop.f32.mrb[73].mxu0  ;;  %v5707_v30 = vadd.f32 %v5701_v26, %v5555_v22  ;;  %v21294_v22 = vld [vmem:[#allocation10 + $0xc0] sm:$0xff]   ;;  %v21297_v26 = vld [vmem:[#allocation10 + $0xd0] sm:$0xff]   ;;  %v21298_v27 = vld [vmem:[#allocation10 + $0x88] sm:$0xff]  }
 0xd94   : > { %v5704_v57 = vpop.f32.mrb[206].mxu1  ;;  %v5750_v12 = vpop.f32.mrb[74].mxu0  ;;  %v21300_v63 = vld [vmem:[#allocation10 + $0x90] sm:$0xff]   ;;  %v21301_v29 = vld [vmem:[#allocation10 + $0xe0] sm:$0xff]  }
 0xd95   : > { %19047 = vmatmul.mubr.bf16.vlgmr.msra.gmra.mrb[76].mxu0 %v5753_v28  ;;  %v19023_v11 = vpop.f32.mrb[207].mxu1  ;;  %v19029_v31 = vpop.f32.mrb[75].mxu0  ;;  %v21299_v28 = vld [vmem:[#allocation10 + $0xd8] sm:$0xff]   ;;  %v21303_v57 = vld [vmem:[#allocation10 + $0xe8] sm:$0xff]   ;;  %v21304_v12 = vld [vmem:[#allocation10 + $0xa0] sm:$0xff]  }
 0xd96   : > { %19078 = vmatprep.mubr.msk.bf16.mxu0 %vm21936_vm0, %v21935_v45  ;;  %v21305_v11 = vld [vmem:[#allocation10 + $0xf0] sm:$0xff]   ;;  %v21306_v31 = vld [vmem:[#allocation10 + $0xa8] sm:$0xff]  }
 0xd9a   : > { %v5899_v32 = vpop.f32.mrb[208].mxu1 }
 0xd9b   : > { %v5905_v33 = vpack.c.bf16 %v5899_v32, %v5899_v32  ;;  %v19054_v34 = vpop.f32.mrb[209].mxu1  ;;  %v21307_v32 = vld [vmem:[#allocation10 + $0xf8] sm:$0xff]  }
 0xd9c   : > { %v5902_v35 = vpop.f32.mrb[210].mxu1  ;;  %v21309_v34 = vld [vmem:[#allocation10 + $0xb8] sm:$0xff]  }
 0xd9d   : > { %19073 = vmatmul.mubr.bf16.vlgmr.msra.gmra.mrb[212].mxu1 %v5905_v33  ;;  %v19055_v36 = vpop.f32.mrb[211].mxu1  ;;  %v21308_v33 = vld [vmem:[#allocation10 + $0xb0] sm:$0xff]  }
 0xd9e   : > { %19124 = vmatprep.mubr.msk.bf16.mxu1 %vm21936_vm0, %v21935_v45  ;;  %19109 = vmatpush3.bf16.msra.mxu1 %v21276_v37 }
 0xd9f   : > { %19110 = vmatprep.subr.bf16.mxu1 %v21935_v45 }
 0xda2   : > { %19111 = vmatpush3.bf16.msra.mxu1 %v21277_v38 }
 0xda3   : > { %19112 = vmatprep.subr.bf16.mxu1 %v21935_v45 }
 0xda6   : > { %19113 = vmatpush3.bf16.msra.mxu1 %v21279_v39 }
 0xda7   : > { %19114 = vmatprep.subr.bf16.mxu1 %v21935_v45 }
 0xdaa   : > { %19115 = vmatpush3.bf16.msra.mxu1 %v21281_v40 }
 0xdab   : > { %19116 = vmatprep.subr.bf16.mxu1 %v21935_v45 }
 0xdae   : > { %19117 = vmatpush3.bf16.msra.mxu1 %v21283_v41 }
 0xdaf   : > { %19118 = vmatprep.subr.bf16.mxu1 %v21935_v45 }
 0xdb2   : > { %19119 = vmatpush3.bf16.msra.mxu1 %v21285_v42 }
 0xdb3   : > { %19120 = vmatprep.subr.bf16.mxu1 %v21935_v45 }
 0xdb6   : > { %19121 = vmatpush3.bf16.msra.mxu1 %v21287_v43 }
 0xdb7   : > { %19122 = vmatprep.subr.bf16.mxu1 %v21935_v45 }
 0xdba   : > { %19123 = vmatpush3.bf16.msra.mxu1 %v21289_v8  ;;  %v21321_v8 = vld [vmem:[#allocation10 + $0x168] sm:$0xff]  }
 0xdbb   : > { %19154 = vmatprep.subr.bf16.mxu1 %v21935_v45 }
 0xe68   : > { %v5853_v44 = vpop.f32.mrb[76].mxu0 }
 0xe69   : > { %v5859_v46 = vadd.f32 %v5853_v44, %v5707_v30  ;;  %v19048_v47 = vpop.f32.mrb[77].mxu0  ;;  %v21302_v30 = vld [vmem:[#allocation10 + $0x98] sm:$0xff]  }
 0xe6a   : > { %v5856_v48 = vpop.f32.mrb[78].mxu0 }
 0xe6b   : > { %v19049_v49 = vpop.f32.mrb[79].mxu0 }
 0xe70   : > { %v6005_v50 = vpop.f32.mrb[212].mxu1 }
 0xe71   : > { %v6011_v53 = vadd.f32 %v6005_v50, %v5859_v46  ;;  %v19074_v55 = vpop.f32.mrb[213].mxu1 }
 0xe72   : > { %v6008_v56 = vpop.f32.mrb[214].mxu1  ;;  %v21310_v55 = vld [vmem:[%s25941_s10 + $0x28] sm:$0xff]  }
 0xe73   : > { %v6019_v58 = vadd.f32 %v15898_v52, %v6011_v53  ;;  %v19075_v59 = vpop.f32.mrb[215].mxu1 }
 0xe75   : > { %v6020_v60 = vmax.f32 %v6019_v58, 0.0 }
 0xe77   : > { %v6021_v61 = vpack.c.bf16 %v6020_v60, %v6020_v60  ;;  %v21312_v60 = vld [vmem:[#allocation10 + $0x140] sm:$0xff]  }
 0xe79   : > { %v23148_v62 = vsel %vm6033_vm3, %v6021_v61, 0  ;;  %v21313_v61 = vld [vmem:[#allocation10 + $0x148] sm:$0xff]  }
 0xe7a   : > { %19077 = vmatpush3.bf16.msra.mxu0 %v23148_v62 }
 0xe7b   : > { %19082 = vmatprep.subr.bf16.mxu0 %v21935_v45 }
 0xe7d   : > { %19079 = vmatmul.mubr.msk.bf16.vlgmr.msra.gmra.mrb[80].mxu0 %vm6029_vm4, %v21274_v51  ;;  %v21311_v51 = vld [vmem:[%s25941_s10 + $0x20] sm:$0xff]  }
 0xe7e   : > { %19083 = vmatpush3.bf16.msra.mxu0 %v23148_v62  ;;  %19084 = vmatprep.mubr.msk.bf16.mxu0 %vm21936_vm0, %v21935_v45 }
 0xe7f   : > { %19088 = vmatprep.subr.bf16.mxu0 %v21935_v45 }
 0xe85   : > { %19085 = vmatmul.mubr.msk.bf16.vlgmr.msra.gmra.mrb[84].mxu0 %vm6029_vm4, %v21275_v54  ;;  %v21314_v54 = vld [vmem:[#allocation10 + $0x100] sm:$0xff]  }
 0xe86   : > { %19089 = vmatpush3.bf16.msra.mxu0 %v21278_v0  ;;  %19104 = vmatprep.mubr.msk.bf16.mxu0 %vm21936_vm0, %v21935_v45  ;;  %v21315_v0 = vld [vmem:[#allocation10 + $0x150] sm:$0xff]  }
 0xe87   : > { %19090 = vmatprep.subr.bf16.mxu0 %v21935_v45 }
 0xe8a   : > { %19091 = vmatpush3.bf16.msra.mxu0 %v21280_v1  ;;  %v21316_v1 = vld [vmem:[#allocation10 + $0x108] sm:$0xff]  }
 0xe8b   : > { %19092 = vmatprep.subr.bf16.mxu0 %v21935_v45 }
 0xe8e   : > { %19093 = vmatpush3.bf16.msra.mxu0 %v21282_v2  ;;  %v21317_v2 = vld [vmem:[#allocation10 + $0x158] sm:$0xff]  }
 0xe8f   : > { %19094 = vmatprep.subr.bf16.mxu0 %v21935_v45 }
 0xe92   : > { %19095 = vmatpush3.bf16.msra.mxu0 %v21284_v4  ;;  %v21318_v4 = vld [vmem:[#allocation10 + $0x110] sm:$0xff]  }
 0xe93   : > { %19096 = vmatprep.subr.bf16.mxu0 %v21935_v45 }
 0xe96   : > { %19097 = vmatpush3.bf16.msra.mxu0 %v21286_v5  ;;  %v21319_v5 = vld [vmem:[#allocation10 + $0x160] sm:$0xff]  }
 0xe97   : > { %19098 = vmatprep.subr.bf16.mxu0 %v21935_v45 }
 0xe9a   : > { %19099 = vmatpush3.bf16.msra.mxu0 %v21288_v6  ;;  %v21320_v6 = vld [vmem:[#allocation10 + $0x118] sm:$0xff]  }
 0xe9b   : > { %19100 = vmatprep.subr.bf16.mxu0 %v21935_v45 }
 0xe9e   : > { %19101 = vmatpush3.bf16.msra.mxu0 %v21290_v3  ;;  %v21322_v3 = vld [vmem:[#allocation10 + $0x120] sm:$0xff]  }
 0xe9f   : > { %19102 = vmatprep.subr.bf16.mxu0 %v21935_v45 }
 0xea2   : > { %19103 = vmatpush3.bf16.msra.mxu0 %v21291_v9  ;;  %v21323_v9 = vld [vmem:[#allocation10 + $0x170] sm:$0xff]  }
 0xea3   : > { %19128 = vmatprep.subr.bf16.mxu0 %v21935_v45 }
 0xf50   : > { %v6071_v13 = vpop.f32.mrb[80].mxu0 }
 0xf51   : > { %v19080_v7 = vpop.f32.mrb[81].mxu0 }
 0xf52   : > { %v6074_v10 = vpop.f32.mrb[82].mxu0  ;;  %v21325_v7 = vld [vmem:[#allocation10 + $0x178] sm:$0xff]  }
 0xf53   : > { %v6078_v14 = vpack.c.bf16 %v6074_v10, %v6071_v13  ;;  %v19081_v15 = vpop.f32.mrb[83].mxu0  ;;  %v21324_v13 = vld [vmem:[#allocation10 + $0x128] sm:$0xff]   ;;  %v21326_v10 = vld [vmem:[#allocation10 + $0x130] sm:$0xff]  }
 0xf55   : > { %19125 = vmatmul.mubr.bf16.vlgmr.msra.gmra.mrb[216].mxu1 %v6078_v14  ;;  %v21327_v14 = vld [vmem:[#allocation10 + $0x138] sm:$0xff]  }
 0xf56   : > { %19155 = vmatpush3.bf16.msra.mxu1 %v23148_v62  ;;  %19156 = vmatprep.mubr.msk.bf16.mxu1 %vm21936_vm0, %v21935_v45 }
 0xf57   : > { %19160 = vmatprep.subr.bf16.mxu1 %v21935_v45 }
 0xf58   : > { %v6140_v16 = vpop.f32.mrb[84].mxu0 }
 0xf59   : > { %v19086_v17 = vpop.f32.mrb[85].mxu0 }
 0xf5a   : > { %v6143_v19 = vpop.f32.mrb[86].mxu0 }
 0xf5b   : > { %v6147_v20 = vpack.c.bf16 %v6143_v19, %v6140_v16  ;;  %v19087_v21 = vpop.f32.mrb[87].mxu0 }
 0xf5d   : > { %19105 = vmatmul.mubr.bf16.vlgmr.msra.gmra.mrb[88].mxu0 %v6147_v20  ;;  %19157 = vmatmul.mubr.msk.bf16.vlgmr.msra.gmra.mrb[220].mxu1 %vm6029_vm4, %v21292_v18 }
 0xf5e   : > { %19129 = vmatpush3.bf16.msra.mxu0 %v23148_v62  ;;  %19130 = vmatprep.mubr.msk.bf16.mxu0 %vm21936_vm0, %v21935_v45 }
 0xf5f   : > { %19161 = vmatpush3.bf16.msra.mxu1 %v21294_v22  ;;  %19134 = vmatprep.subr.bf16.mxu0 %v21935_v45 }
 0xf60   : > { %19162 = vmatprep.subr.bf16.mxu1 %v21935_v45  ;;  %19176 = vmatprep.mubr.msk.bf16.mxu1 %vm21936_vm0, %v21935_v45 }
 0xf63   : > { %19163 = vmatpush3.bf16.msra.mxu1 %v21295_v23 }
 0xf64   : > { %19164 = vmatprep.subr.bf16.mxu1 %v21935_v45 }
 0xf65   : > { %19131 = vmatmul.mubr.msk.bf16.vlgmr.msra.gmra.mrb[92].mxu0 %vm6029_vm4, %v21293_v24 }
 0xf66   : > { %19135 = vmatpush3.bf16.msra.mxu0 %v21296_v25  ;;  %19150 = vmatprep.mubr.msk.bf16.mxu0 %vm21936_vm0, %v21935_v45 }
 0xf67   : > { %19165 = vmatpush3.bf16.msra.mxu1 %v21297_v26  ;;  %19136 = vmatprep.subr.bf16.mxu0 %v21935_v45 }
 0xf68   : > { %19166 = vmatprep.subr.bf16.mxu1 %v21935_v45 }
 0xf6a   : > { %19137 = vmatpush3.bf16.msra.mxu0 %v21298_v27 }
 0xf6b   : > { %19167 = vmatpush3.bf16.msra.mxu1 %v21299_v28  ;;  %19138 = vmatprep.subr.bf16.mxu0 %v21935_v45 }
 0xf6c   : > { %19168 = vmatprep.subr.bf16.mxu1 %v21935_v45 }
 0xf6e   : > { %19139 = vmatpush3.bf16.msra.mxu0 %v21300_v63 }
 0xf6f   : > { %19169 = vmatpush3.bf16.msra.mxu1 %v21301_v29  ;;  %19140 = vmatprep.subr.bf16.mxu0 %v21935_v45 }
 0xf70   : > { %19170 = vmatprep.subr.bf16.mxu1 %v21935_v45 }
 0xf72   : > { %19141 = vmatpush3.bf16.msra.mxu0 %v21302_v30 }
 0xf73   : > { %19171 = vmatpush3.bf16.msra.mxu1 %v21303_v57  ;;  %19142 = vmatprep.subr.bf16.mxu0 %v21935_v45 }
 0xf74   : > { %19172 = vmatprep.subr.bf16.mxu1 %v21935_v45 }
 0xf76   : > { %19143 = vmatpush3.bf16.msra.mxu0 %v21304_v12 }
 0xf77   : > { %19173 = vmatpush3.bf16.msra.mxu1 %v21305_v11  ;;  %19144 = vmatprep.subr.bf16.mxu0 %v21935_v45  ;;  %v21329_v11 = vld [vmem:[%s25941_s10 + $0x38] sm:$0xff]  }
 0xf78   : > { %19174 = vmatprep.subr.bf16.mxu1 %v21935_v45 }
 0xf7a   : > { %19145 = vmatpush3.bf16.msra.mxu0 %v21306_v31 }
 0xf7b   : > { %19175 = vmatpush3.bf16.msra.mxu1 %v21307_v32  ;;  %19146 = vmatprep.subr.bf16.mxu0 %v21935_v45 }
 0xf7c   : > { %19206 = vmatprep.subr.bf16.mxu1 %v21935_v45 }
 0xf7e   : > { %19147 = vmatpush3.bf16.msra.mxu0 %v21308_v33 }
 0xf7f   : > { %19148 = vmatprep.subr.bf16.mxu0 %v21935_v45 }
 0xf82   : > { %19149 = vmatpush3.bf16.msra.mxu0 %v21309_v34  ;;  %v21331_v34 = vld [vmem:[#allocation10 + $0x1c0] sm:$0xff]  }
 0xf83   : > { %19180 = vmatprep.subr.bf16.mxu0 %v21935_v45 }
0x1028   : > { %v6336_v35 = vpop.f32.mrb[216].mxu1 }
0x1029   : > { %v19126_v36 = vpop.f32.mrb[217].mxu1 }
0x102a   : > { %v6339_v37 = vpop.f32.mrb[218].mxu1  ;;  %v21328_v36 = vld [vmem:[%s25941_s10 + $0x30] sm:$0xff]  }
0x102b   : > { %v19127_v38 = vpop.f32.mrb[219].mxu1 }
0x102c   : > { %v21335_v38 = vld [vmem:[#allocation10 + $0x1d0] sm:$0xff]  }
0x1030   : > { %v6247_v39 = vpop.f32.mrb[88].mxu0  ;;  %v6549_v40 = vpop.f32.mrb[220].mxu1 }
0x1031   : > { %v23211_v41 = vadd.f32 %v6336_v35, %v6247_v39  ;;  %v19106_v42 = vpop.f32.mrb[89].mxu0  ;;  %v19158_v43 = vpop.f32.mrb[221].mxu1  ;;  %v21333_v35 = vld [vmem:[#allocation10 + $0x1c8] sm:$0xff]  }
0x1032   : > { %v6250_v44 = vpop.f32.mrb[90].mxu0  ;;  %v6552_v46 = vpop.f32.mrb[222].mxu1  ;;  %v21332_v39 = vld [vmem:[#allocation10 + $0x188] sm:$0xff]   ;;  %v21336_v42 = vld [vmem:[#allocation10 + $0x198] sm:$0xff]   ;;  %v21338_v43 = vld [vmem:[#allocation10 + $0x1a0] sm:$0xff]  }
0x1033   : > { %v23213_v47 = vadd.f32 %v6339_v37, %v6250_v44  ;;  %v6556_v48 = vpack.c.bf16 %v6552_v46, %v6549_v40  ;;  %v19107_v49 = vpop.f32.mrb[91].mxu0  ;;  %v19159_v50 = vpop.f32.mrb[223].mxu1  ;;  %v21330_v37 = vld [vmem:[#allocation10 + $0x180] sm:$0xff]   ;;  %v21337_v40 = vld [vmem:[#allocation10 + $0x1d8] sm:$0xff]   ;;  %v21340_v46 = vld [vmem:[#allocation10 + $0x1a8] sm:$0xff]  }
0x1034   : > { %v21339_v44 = vld [vmem:[#allocation10 + $0x1e0] sm:$0xff]   ;;  %v21343_v49 = vld [vmem:[#allocation10 + $0x1f0] sm:$0xff]   ;;  %v21344_v50 = vld [vmem:[#allocation10 + $0x1b8] sm:$0xff]  }
0x1035   : > { %19177 = vmatmul.mubr.bf16.vlgmr.msra.gmra.mrb[224].mxu1 %v6556_v48  ;;  %v21342_v48 = vld [vmem:[#allocation10 + $0x1b0] sm:$0xff]  }
0x1036   : > { %19207 = vmatpush3.bf16.msra.mxu1 %v23148_v62  ;;  %19208 = vmatprep.mubr.msk.bf16.mxu1 %vm21936_vm0, %v21935_v45 }
0x1037   : > { %19212 = vmatprep.subr.bf16.mxu1 %v21935_v45 }
0x1038   : > { %v6388_v52 = vpop.f32.mrb[92].mxu0 }
0x1039   : > { %v19132_v53 = vpop.f32.mrb[93].mxu0 }
0x103a   : > { %v6391_v56 = vpop.f32.mrb[94].mxu0 }
0x103b   : > { %v6395_v58 = vpack.c.bf16 %v6391_v56, %v6388_v52  ;;  %v19133_v59 = vpop.f32.mrb[95].mxu0  ;;  %v21345_v52 = vld [vmem:[#allocation10 + $0x1f8] sm:$0xff]  }
0x103d   : > { %19151 = vmatmul.mubr.bf16.vlgmr.msra.gmra.mrb[96].mxu0 %v6395_v58  ;;  %19209 = vmatmul.mubr.msk.bf16.vlgmr.msra.gmra.mrb[228].mxu1 %vm6029_vm4, %v21310_v55 }
0x103e   : > { %19181 = vmatpush3.bf16.msra.mxu0 %v23148_v62  ;;  %19182 = vmatprep.mubr.msk.bf16.mxu0 %vm21936_vm0, %v21935_v45 }
0x103f   : > { %19213 = vmatpush3.bf16.msra.mxu1 %v21312_v60  ;;  %19186 = vmatprep.subr.bf16.mxu0 %v21935_v45 }
0x1040   : > { %19214 = vmatprep.subr.bf16.mxu1 %v21935_v45  ;;  %19228 = vmatprep.mubr.msk.bf16.mxu1 %vm21936_vm0, %v21935_v45 }
0x1043   : > { %19215 = vmatpush3.bf16.msra.mxu1 %v21313_v61 }
0x1044   : > { %19216 = vmatprep.subr.bf16.mxu1 %v21935_v45 }
0x1045   : > { %19183 = vmatmul.mubr.msk.bf16.vlgmr.msra.gmra.mrb[100].mxu0 %vm6029_vm4, %v21311_v51 }
0x1046   : > { %19187 = vmatpush3.bf16.msra.mxu0 %v21314_v54  ;;  %19202 = vmatprep.mubr.msk.bf16.mxu0 %vm21936_vm0, %v21935_v45 }
0x1047   : > { %19217 = vmatpush3.bf16.msra.mxu1 %v21315_v0  ;;  %19188 = vmatprep.subr.bf16.mxu0 %v21935_v45 }
0x1048   : > { %19218 = vmatprep.subr.bf16.mxu1 %v21935_v45 }
0x104a   : > { %19189 = vmatpush3.bf16.msra.mxu0 %v21316_v1 }
0x104b   : > { %19219 = vmatpush3.bf16.msra.mxu1 %v21317_v2  ;;  %19190 = vmatprep.subr.bf16.mxu0 %v21935_v45 }
0x104c   : > { %19220 = vmatprep.subr.bf16.mxu1 %v21935_v45 }
0x104e   : > { %19191 = vmatpush3.bf16.msra.mxu0 %v21318_v4 }
0x104f   : > { %19221 = vmatpush3.bf16.msra.mxu1 %v21319_v5  ;;  %19192 = vmatprep.subr.bf16.mxu0 %v21935_v45 }
0x1050   : > { %19222 = vmatprep.subr.bf16.mxu1 %v21935_v45 }
0x1052   : > { %19193 = vmatpush3.bf16.msra.mxu0 %v21320_v6 }
0x1053   : > { %19223 = vmatpush3.bf16.msra.mxu1 %v21321_v8  ;;  %19194 = vmatprep.subr.bf16.mxu0 %v21935_v45 }
0x1054   : > { %19224 = vmatprep.subr.bf16.mxu1 %v21935_v45 }
0x1056   : > { %19195 = vmatpush3.bf16.msra.mxu0 %v21322_v3 }
0x1057   : > { %19225 = vmatpush3.bf16.msra.mxu1 %v21323_v9  ;;  %19196 = vmatprep.subr.bf16.mxu0 %v21935_v45 }
0x1058   : > { %19226 = vmatprep.subr.bf16.mxu1 %v21935_v45 }
0x105a   : > { %19197 = vmatpush3.bf16.msra.mxu0 %v21324_v13 }
0x105b   : > { %19227 = vmatpush3.bf16.msra.mxu1 %v21325_v7  ;;  %19198 = vmatprep.subr.bf16.mxu0 %v21935_v45 }
0x105c   : > { %19258 = vmatprep.subr.bf16.mxu1 %v21935_v45 }
0x105e   : > { %19199 = vmatpush3.bf16.msra.mxu0 %v21326_v10 }
0x105f   : > { %19200 = vmatprep.subr.bf16.mxu0 %v21935_v45 }
0x1062   : > { %19201 = vmatpush3.bf16.msra.mxu0 %v21327_v14 }
0x1063   : > { %19232 = vmatprep.subr.bf16.mxu0 %v21935_v45 }
0x1108   : > { %v6656_v15 = vpop.f32.mrb[224].mxu1 }
0x1109   : > { %v19178_v16 = vpop.f32.mrb[225].mxu1 }
0x110a   : > { %v6659_v17 = vpop.f32.mrb[226].mxu1  ;;  %v21347_v16 = vld [vmem:[#allocation10 + $0x200] sm:$0xff]  }
0x110b   : > { %v19179_v18 = vpop.f32.mrb[227].mxu1 }
0x110c   : > { %v21350_v18 = vld [vmem:[#allocation10 + $0x218] sm:$0xff]  }
0x1110   : > { %v6495_v19 = vpop.f32.mrb[96].mxu0  ;;  %v6871_v20 = vpop.f32.mrb[228].mxu1 }
0x1111   : > { %v6502_v21 = vadd.f32 %v6495_v19, %v23211_v41  ;;  %v19152_v22 = vpop.f32.mrb[97].mxu0  ;;  %v19210_v23 = vpop.f32.mrb[229].mxu1  ;;  %v21334_v41 = vld [vmem:[#allocation10 + $0x190] sm:$0xff]   ;;  %v21351_v19 = vld [vmem:[#allocation10 + $0x220] sm:$0xff]  }
0x1112   : > { %v6498_v24 = vpop.f32.mrb[98].mxu0  ;;  %v6874_v25 = vpop.f32.mrb[230].mxu1  ;;  %v21354_v22 = vld [vmem:[#allocation10 + $0x238] sm:$0xff]  }
0x1113   : > { %v6503_v26 = vadd.f32 %v6498_v24, %v23213_v47  ;;  %v6878_v27 = vpack.c.bf16 %v6874_v25, %v6871_v20  ;;  %v19153_v28 = vpop.f32.mrb[99].mxu0  ;;  %v23253_v63 = vadd.f32 %v6656_v15, %v6502_v21  ;;  %v19211_v29 = vpop.f32.mrb[231].mxu1  ;;  %v21341_v47 = vld [vmem:[#allocation10 + $0x1e8] sm:$0xff]   ;;  %v21353_v21 = vld [vmem:[#allocation10 + $0x230] sm:$0xff]  }
0x1114   : > { %v21346_v15 = vld [vmem:[%s25941_s10 + $0x40] sm:$0xff]  }
0x1115   : > { %19229 = vmatmul.mubr.bf16.vlgmr.msra.gmra.mrb[232].mxu1 %v6878_v27  ;;  %v23255_v30 = vadd.f32 %v6659_v17, %v6503_v26  ;;  %v21348_v17 = vld [vmem:[#allocation10 + $0x208] sm:$0xff]  }
0x1116   : > { %19259 = vmatpush3.bf16.msra.mxu1 %v23148_v62  ;;  %19260 = vmatprep.mubr.msk.bf16.mxu1 %vm21936_vm0, %v21935_v45  ;;  %v21352_v20 = vld [vmem:[#allocation10 + $0x228] sm:$0xff]  }
0x1117   : > { %19264 = vmatprep.subr.bf16.mxu1 %v21935_v45 }
0x1118   : > { %v6710_v57 = vpop.f32.mrb[100].mxu0 }
0x1119   : > { %v19184_v12 = vpop.f32.mrb[101].mxu0 }
0x111a   : > { %v6713_v31 = vpop.f32.mrb[102].mxu0 }
0x111b   : > { %v6717_v32 = vpack.c.bf16 %v6713_v31, %v6710_v57  ;;  %v19185_v33 = vpop.f32.mrb[103].mxu0 }
0x111d   : > { %19203 = vmatmul.mubr.bf16.vlgmr.msra.gmra.mrb[104].mxu0 %v6717_v32  ;;  %19261 = vmatmul.mubr.msk.bf16.vlgmr.msra.gmra.mrb[236].mxu1 %vm6029_vm4, %v21329_v11 }
0x111e   : > { %19233 = vmatpush3.bf16.msra.mxu0 %v23148_v62  ;;  %19234 = vmatprep.mubr.msk.bf16.mxu0 %vm21936_vm0, %v21935_v45 }
0x111f   : > { %19238 = vmatprep.subr.bf16.mxu0 %v21935_v45  ;;  %19265 = vmatpush3.bf16.msra.mxu1 %v21331_v34 }
0x1120   : > { %19266 = vmatprep.subr.bf16.mxu1 %v21935_v45  ;;  %19280 = vmatprep.mubr.msk.bf16.mxu1 %vm21936_vm0, %v21935_v45 }
0x1123   : > { %19267 = vmatpush3.bf16.msra.mxu1 %v21333_v35 }
0x1124   : > { %19268 = vmatprep.subr.bf16.mxu1 %v21935_v45 }
0x1125   : > { %19235 = vmatmul.mubr.msk.bf16.vlgmr.msra.gmra.mrb[108].mxu0 %vm6029_vm4, %v21328_v36  ;;  %v21356_v36 = vld [vmem:[%s25944_s13 + $0x40] sm:$0xff]  }
0x1126   : > { %19239 = vmatpush3.bf16.msra.mxu0 %v21330_v37  ;;  %19254 = vmatprep.mubr.msk.bf16.mxu0 %vm21936_vm0, %v21935_v45 }
0x1127   : > { %19240 = vmatprep.subr.bf16.mxu0 %v21935_v45  ;;  %19269 = vmatpush3.bf16.msra.mxu1 %v21335_v38 }
0x1128   : > { %19270 = vmatprep.subr.bf16.mxu1 %v21935_v45 }
0x112a   : > { %19241 = vmatpush3.bf16.msra.mxu0 %v21332_v39 }
0x112b   : > { %19242 = vmatprep.subr.bf16.mxu0 %v21935_v45  ;;  %19271 = vmatpush3.bf16.msra.mxu1 %v21337_v40  ;;  %v16005_v40 = vld [vmem:[%s25943_s12] ss:$0 sm:$0xff] }
0x112c   : > { %19272 = vmatprep.subr.bf16.mxu1 %v21935_v45 }
0x112e   : > { %19243 = vmatpush3.bf16.msra.mxu0 %v21334_v41 }
0x112f   : > { %19244 = vmatprep.subr.bf16.mxu0 %v21935_v45  ;;  %19273 = vmatpush3.bf16.msra.mxu1 %v21339_v44 }
0x1130   : > { %19274 = vmatprep.subr.bf16.mxu1 %v21935_v45 }
0x1132   : > { %19245 = vmatpush3.bf16.msra.mxu0 %v21336_v42 }
0x1133   : > { %19246 = vmatprep.subr.bf16.mxu0 %v21935_v45  ;;  %19275 = vmatpush3.bf16.msra.mxu1 %v21341_v47 }
0x1134   : > { %19276 = vmatprep.subr.bf16.mxu1 %v21935_v45 }
0x1136   : > { %19247 = vmatpush3.bf16.msra.mxu0 %v21338_v43 }
0x1137   : > { %19248 = vmatprep.subr.bf16.mxu0 %v21935_v45  ;;  %19277 = vmatpush3.bf16.msra.mxu1 %v21343_v49  ;;  %v21358_v49 = vld [vmem:[%s25944_s13 + $0x48] sm:$0xff]  }
0x1138   : > { %19278 = vmatprep.subr.bf16.mxu1 %v21935_v45 }
0x113a   : > { %19249 = vmatpush3.bf16.msra.mxu0 %v21340_v46 }
0x113b   : > { %19250 = vmatprep.subr.bf16.mxu0 %v21935_v45  ;;  %19279 = vmatpush3.bf16.msra.mxu1 %v21345_v52  ;;  %v21360_v52 = vld [vmem:[%s25944_s13 + $0x50] sm:$0xff]  }
0x113e   : > { %19251 = vmatpush3.bf16.msra.mxu0 %v21342_v48  ;;  %v21357_v48 = vld [vmem:[%s25944_s13 + $0x8] sm:$0xff]  }
0x113f   : > { %19252 = vmatprep.subr.bf16.mxu0 %v21935_v45 }
0x1142   : > { %19253 = vmatpush3.bf16.msra.mxu0 %v21344_v50  ;;  %v21359_v50 = vld [vmem:[%s25944_s13 + $0x10] sm:$0xff]  }
0x1143   : > { %19284 = vmatprep.subr.bf16.mxu0 %v21935_v45 }
0x11e8   : > { %v6978_v53 = vpop.f32.mrb[232].mxu1 }
0x11e9   : > { %v19230_v55 = vpop.f32.mrb[233].mxu1 }
0x11ea   : > { %v6981_v56 = vpop.f32.mrb[234].mxu1  ;;  %v21361_v55 = vld [vmem:[%s25944_s13 + $0x18] sm:$0xff]  }
0x11eb   : > { %v19231_v58 = vpop.f32.mrb[235].mxu1 }
0x11ec   : > { %v21363_v58 = vld [vmem:[%s25944_s13 + $0x20] sm:$0xff]  }
0x11f0   : > { %v6817_v59 = vpop.f32.mrb[104].mxu0  ;;  %v7193_v60 = vpop.f32.mrb[236].mxu1 }
0x11f1   : > { %v6824_v61 = vadd.f32 %v6817_v59, %v23253_v63  ;;  %v19204_v51 = vpop.f32.mrb[105].mxu0  ;;  %v19262_v54 = vpop.f32.mrb[237].mxu1  ;;  %v21364_v59 = vld [vmem:[%s25944_s13 + $0x60] sm:$0xff]  }
0x11f2   : > { %v6820_v0 = vpop.f32.mrb[106].mxu0  ;;  %v7196_v1 = vpop.f32.mrb[238].mxu1  ;;  %v21367_v51 = vld [vmem:[%s25944_s13 + $0x30] sm:$0xff]  }
0x11f3   : > { %v6825_v2 = vadd.f32 %v6820_v0, %v23255_v30  ;;  %v19205_v4 = vpop.f32.mrb[107].mxu0  ;;  %v7200_v5 = vpack.c.bf16 %v7196_v1, %v7193_v60  ;;  %v6985_v6 = vadd.f32 %v6978_v53, %v6824_v61  ;;  %v19263_v8 = vpop.f32.mrb[239].mxu1  ;;  %v21385_v53 = vld [vmem:[#allocation12 + $0x40] sm:$0xff]   ;;  %v21365_v60 = vld [vmem:[%s25944_s13 + $0x28] sm:$0xff]   ;;  %v21386_v0 = vld [vmem:[#allocation12 + $0x48] sm:$0xff]  }
0x11f4   : > { %v21366_v61 = vld [vmem:[%s25944_s13 + $0x68] sm:$0xff]   ;;  %v21368_v54 = vld [vmem:[%s25944_s13 + $0x70] sm:$0xff]   ;;  %v21369_v1 = vld [vmem:[%s25944_s13 + $0x38] sm:$0xff]  }
0x11f5   : > { %19281 = vmatmul.mubr.bf16.vlgmr.msra.gmra.mrb[240].mxu1 %v7200_v5  ;;  %v6986_v3 = vadd.f32 %v6981_v56, %v6825_v2  ;;  %v21362_v56 = vld [vmem:[%s25944_s13 + $0x58] sm:$0xff]   ;;  %v21371_v4 = vld [vmem:[%s25944_s13 + $0x80] sm:$0xff]   ;;  %v21372_v8 = vld [vmem:[%s25944_s13 + $0x88] sm:$0xff]  }
0x11f6   : > { %v21370_v2 = vld [vmem:[%s25944_s13 + $0x78] sm:$0xff]   ;;  %v21387_v5 = vld [vmem:[#allocation12 + $0x50] sm:$0xff]  }
0x11f8   : > { %v7032_v9 = vpop.f32.mrb[108].mxu0 }
0x11f9   : > { %v19236_v13 = vpop.f32.mrb[109].mxu0 }
0x11fa   : > { %v7035_v7 = vpop.f32.mrb[110].mxu0  ;;  %v21374_v13 = vld [vmem:[%s25944_s13 + $0x98] sm:$0xff]  }
0x11fb   : > { %v7039_v10 = vpack.c.bf16 %v7035_v7, %v7032_v9  ;;  %v19237_v14 = vpop.f32.mrb[111].mxu0  ;;  %v21373_v9 = vld [vmem:[%s25944_s13 + $0x90] sm:$0xff]   ;;  %v21375_v7 = vld [vmem:[%s25944_s13 + $0xa0] sm:$0xff]  }
0x11fc   : > { %v21377_v14 = vld [vmem:[%s25944_s13 + $0xb0] sm:$0xff]  }
0x11fd   : > { %19255 = vmatmul.mubr.bf16.vlgmr.msra.gmra.mrb[112].mxu0 %v7039_v10  ;;  %v21376_v10 = vld [vmem:[%s25944_s13 + $0xa8] sm:$0xff]  }
0x11fe   : > { %19285 = vmatpush3.bf16.msra.mxu0 %v23148_v62  ;;  %19286 = vmatprep.mubr.msk.bf16.mxu0 %vm21936_vm0, %v21935_v45  ;;  %v21349_v62 = vld [vmem:[#allocation10 + $0x210] sm:$0xff]  }
0x11ff   : > { %19290 = vmatprep.subr.bf16.mxu0 %v21935_v45 }
0x1205   : > { %19287 = vmatmul.mubr.msk.bf16.vlgmr.msra.gmra.mrb[116].mxu0 %vm6029_vm4, %v21346_v15  ;;  %v21378_v15 = vld [vmem:[%s25944_s13 + $0xb8] sm:$0xff]  }
0x1206   : > { %19291 = vmatpush3.bf16.msra.mxu0 %v21347_v16  ;;  %19306 = vmatprep.mubr.msk.bf16.mxu0 %vm21936_vm0, %v21935_v45  ;;  %v21379_v16 = vld [vmem:[%s25944_s13 + $0xc0] sm:$0xff]  }
0x1207   : > { %19292 = vmatprep.subr.bf16.mxu0 %v21935_v45 }
0x120a   : > { %19293 = vmatpush3.bf16.msra.mxu0 %v21348_v17  ;;  %v21380_v17 = vld [vmem:[%s25944_s13 + $0xc8] sm:$0xff]  }
0x120b   : > { %19294 = vmatprep.subr.bf16.mxu0 %v21935_v45 }
0x120e   : > { %19295 = vmatpush3.bf16.msra.mxu0 %v21349_v62  ;;  %v21381_v62 = vld [vmem:[%s25944_s13 + $0xd0] sm:$0xff]  }
0x120f   : > { %19296 = vmatprep.subr.bf16.mxu0 %v21935_v45 }
0x1212   : > { %19297 = vmatpush3.bf16.msra.mxu0 %v21350_v18  ;;  %v21382_v18 = vld [vmem:[%s25944_s13 + $0xd8] sm:$0xff]  }
0x1213   : > { %19298 = vmatprep.subr.bf16.mxu0 %v21935_v45 }
0x1216   : > { %19299 = vmatpush3.bf16.msra.mxu0 %v21351_v19  ;;  %v21383_v19 = vld [vmem:[%s25944_s13 + $0xe0] sm:$0xff]  }
0x1217   : > { %19300 = vmatprep.subr.bf16.mxu0 %v21935_v45 }
0x121a   : > { %19301 = vmatpush3.bf16.msra.mxu0 %v21352_v20  ;;  %v21384_v20 = vld [vmem:[%s25944_s13 + $0xe8] sm:$0xff]  }
0x121b   : > { %19302 = vmatprep.subr.bf16.mxu0 %v21935_v45 }
0x121e   : > { %19303 = vmatpush3.bf16.msra.mxu0 %v21353_v21  ;;  %v21390_v21 = vld [vmem:[#allocation12 + $0x68] sm:$0xff]  }
0x121f   : > { %19304 = vmatprep.subr.bf16.mxu0 %v21935_v45  ;;  %v21355_v45 = vld [vmem:[%s25944_s13] sm:$0xff]  }
0x1220   : > { %19312 = vmatprep.mubr.msk.bf16.mxu1 %vm4648_vm2, %v21355_v45 }
0x1222   : > { %19305 = vmatpush3.bf16.msra.mxu0 %v21354_v22  ;;  %v21391_v22 = vld [vmem:[#allocation12 + $0x70] sm:$0xff]  }
0x12c8   : > { %v7300_v23 = vpop.f32.mrb[240].mxu1 }
0x12c9   : > { %v19282_v24 = vpop.f32.mrb[241].mxu1 }
0x12ca   : > { %v7303_v25 = vpop.f32.mrb[242].mxu1  ;;  %v21393_v24 = vld [vmem:[#allocation12] sm:$0xff]  }
0x12cb   : > { %v19283_v26 = vpop.f32.mrb[243].mxu1 }
0x12cc   : > { %v21402_v26 = vld [vmem:[%s25944_s13 + $0xf8] sm:$0xff]  }
0x12d0   : > { %v7139_v27 = vpop.f32.mrb[112].mxu0 }
0x12d1   : > { %v7146_v28 = vadd.f32 %v7139_v27, %v6985_v6  ;;  %v19256_v63 = vpop.f32.mrb[113].mxu0  ;;  %v21388_v6 = vld [vmem:[#allocation12 + $0x58] sm:$0xff]   ;;  %v21405_v27 = vld [vmem:[%s25944_s13 + $0x100] sm:$0xff]  }
0x12d2   : > { %v7142_v29 = vpop.f32.mrb[114].mxu0  ;;  %v21409_v63 = vld [vmem:[%s25944_s13 + $0x110] sm:$0xff]  }
0x12d3   : > { %v7147_v30 = vadd.f32 %v7142_v29, %v6986_v3  ;;  %v19257_v57 = vpop.f32.mrb[115].mxu0  ;;  %v7307_v12 = vadd.f32 %v7300_v23, %v7146_v28  ;;  %v21389_v3 = vld [vmem:[#allocation12 + $0x60] sm:$0xff]   ;;  %v21392_v23 = vld [vmem:[#allocation12 + $0x78] sm:$0xff]  }
0x12d4   : > { %v21406_v28 = vld [vmem:[%s25944_s13 + $0x108] sm:$0xff]   ;;  %v21410_v29 = vld [vmem:[%s25944_s13 + $0x118] sm:$0xff]  }
0x12d5   : > { %v7308_v11 = vadd.f32 %v7303_v25, %v7147_v30  ;;  %v21401_v25 = vld [vmem:[%s25944_s13 + $0xf0] sm:$0xff]  }
0x12d8   : > { %v7354_v31 = vpop.f32.mrb[116].mxu0 }
0x12d9   : > { %v19288_v32 = vpop.f32.mrb[117].mxu0 }
0x12da   : > { %v7357_v33 = vpop.f32.mrb[118].mxu0 }
0x12db   : > { %v7361_v34 = vpack.c.bf16 %v7357_v33, %v7354_v31  ;;  %v19289_v35 = vpop.f32.mrb[119].mxu0 }
0x12dd   : > { %19307 = vmatmul.mubr.bf16.vlgmr.msra.gmra.mrb[120].mxu0 %v7361_v34 }
0x12de   : > { %19380 = vmatprep.mubr.msk.bf16.mxu0 %vm4648_vm2, %v21356_v36 }
0x13b0   : > { %v7461_v37 = vpop.f32.mrb[120].mxu0 }
0x13b1   : > { %v7468_v38 = vadd.f32 %v7461_v37, %v7307_v12  ;;  %v19308_v39 = vpop.f32.mrb[121].mxu0 }
0x13b2   : > { %v7464_v41 = vpop.f32.mrb[122].mxu0 }
0x13b3   : > { %v7469_v42 = vadd.f32 %v7464_v41, %v7308_v11  ;;  %v19309_v43 = vpop.f32.mrb[123].mxu0  ;;  %v7477_v44 = vadd.f32 %v16005_v40, %v7468_v38 }
0x13b5   : > { %v7478_v46 = vadd.f32 %v16005_v40, %v7469_v42 }
0x13b7   : > { %v23322_v47 = vpack.c.bf16 %v7478_v46, %v7477_v44 }
0x13b9   : > { %19310 = vmatprep.subr.bf16.mxu1 %v23322_v47  ;;  %19378 = vmatprep.subr.bf16.mxu0 %v23322_v47 }
0x13ba   : > { %19311 = vmatpush3.bf16.msra.mxu1 %v23322_v47  ;;  %19379 = vmatpush3.bf16.msra.mxu0 %v23322_v47 }
0x13bb   : > { %19320 = vmatprep.subr.bf16.mxu1 %v23322_v47  ;;  %19412 = vmatprep.subr.bf16.mxu0 %v23322_v47 }
0x13bd   : > { %19313 = vmatmul.mubr.msk.bf16.vlgmr.msra.gmra.mrb[244].mxu1 %vm4648_vm2, %v21357_v48  ;;  %19381 = vmatmul.mubr.msk.bf16.vlgmr.msra.gmra.mrb[124].mxu0 %vm4648_vm2, %v21358_v49 }
0x13be   : > { %19321 = vmatpush3.bf16.msra.mxu1 %v23322_v47  ;;  %19413 = vmatpush3.bf16.msra.mxu0 %v23322_v47 }
0x13bf   : > { %19446 = vmatprep.subr.bf16.mxu0 %v23322_v47  ;;  %19316 = vmatprep.mubr.msk.bf16.mxu1 %vm4648_vm2, %v21359_v50 }
0x13c0   : > { %19384 = vmatprep.mubr.msk.bf16.mxu0 %vm4648_vm2, %v21360_v52  ;;  %19330 = vmatprep.subr.bf16.mxu1 %v21385_v53 }
0x13c5   : > { %19317 = vmatmul.mubr.msk.bf16.gmra.mrb[248].mxu1 %vm4648_vm2, %v21361_v55  ;;  %19385 = vmatmul.mubr.msk.bf16.gmra.mrb[128].mxu0 %vm4648_vm2, %v21362_v56 }
0x13c6   : > { %19322 = vmatprep.mubr.msk.bf16.mxu1 %vm4648_vm2, %v21363_v58  ;;  %19414 = vmatprep.mubr.msk.bf16.mxu0 %vm4648_vm2, %v21364_v59 }
0x13cd   : > { %19323 = vmatmul.mubr.msk.bf16.vlgmr.msra.gmra.mrb[252].mxu1 %vm4648_vm2, %v21365_v60  ;;  %19415 = vmatmul.mubr.msk.bf16.vlgmr.msra.gmra.mrb[132].mxu0 %vm4648_vm2, %v21366_v61 }
0x13ce   : > { %19447 = vmatpush3.bf16.msra.mxu0 %v23322_v47  ;;  %19326 = vmatprep.mubr.msk.bf16.mxu1 %vm4648_vm2, %v21367_v51 }
0x13cf   : > { %19480 = vmatprep.subr.bf16.mxu0 %v23322_v47  ;;  %19418 = vmatprep.mubr.msk.bf16.mxu0 %vm4648_vm2, %v21368_v54 }
0x13d0   : > { %19331 = vmatpush3.bf16.msra.mxu1 %v21385_v53 }
0x13d1   : > { %19332 = vmatprep.subr.bf16.mxu1 %v21386_v0 }
0x13d4   : > { %19333 = vmatpush3.bf16.msra.mxu1 %v21386_v0 }
0x13d5   : > { %19327 = vmatmul.mubr.msk.bf16.gmra.mrb[0].mxu1 %vm4648_vm2, %v21369_v1  ;;  %19419 = vmatmul.mubr.msk.bf16.gmra.mrb[136].mxu0 %vm4648_vm2, %v21370_v2  ;;  %v21394_v2 = vld [vmem:[#allocation12 + $0x8] sm:$0xff]  }
0x13d6   : > { %19448 = vmatprep.mubr.msk.bf16.mxu0 %vm4648_vm2, %v21371_v4  ;;  %19334 = vmatprep.subr.bf16.mxu1 %v21387_v5 }
0x13d8   : > { %19335 = vmatpush3.bf16.msra.mxu1 %v21387_v5 }
0x13d9   : > { %19336 = vmatprep.subr.bf16.mxu1 %v21388_v6 }
0x13dc   : > { %19337 = vmatpush3.bf16.msra.mxu1 %v21388_v6 }
0x13dd   : > { %19449 = vmatmul.mubr.msk.bf16.vlgmr.msra.gmra.mrb[140].mxu0 %vm4648_vm2, %v21372_v8  ;;  %19338 = vmatprep.subr.bf16.mxu1 %v21389_v3  ;;  %v21395_v8 = vld [vmem:[#allocation12 + $0x10] sm:$0xff]  }
0x13de   : > { %19481 = vmatpush3.bf16.msra.mxu0 %v23322_v47  ;;  %19452 = vmatprep.mubr.msk.bf16.mxu0 %vm4648_vm2, %v21373_v9 }
0x13df   : > { %19514 = vmatprep.subr.bf16.mxu0 %v23322_v47 }
0x13e0   : > { %19339 = vmatpush3.bf16.msra.mxu1 %v21389_v3 }
0x13e1   : > { %19340 = vmatprep.subr.bf16.mxu1 %v21390_v21 }
0x13e4   : > { %19341 = vmatpush3.bf16.msra.mxu1 %v21390_v21 }
0x13e5   : > { %19453 = vmatmul.mubr.msk.bf16.gmra.mrb[144].mxu0 %vm4648_vm2, %v21374_v13  ;;  %19342 = vmatprep.subr.bf16.mxu1 %v21391_v22 }
0x13e6   : > { %19482 = vmatprep.mubr.msk.bf16.mxu0 %vm4648_vm2, %v21375_v7 }
0x13e8   : > { %19343 = vmatpush3.bf16.msra.mxu1 %v21391_v22 }
0x13e9   : > { %19344 = vmatprep.subr.bf16.mxu1 %v21392_v23 }
0x13ec   : > { %19345 = vmatpush3.bf16.msra.mxu1 %v21392_v23 }
0x13ed   : > { %19483 = vmatmul.mubr.msk.bf16.vlgmr.msra.gmra.mrb[148].mxu0 %vm4648_vm2, %v21376_v10  ;;  %19354 = vmatprep.subr.bf16.mxu1 %v21393_v24 }
0x13ee   : > { %19515 = vmatpush3.bf16.msra.mxu0 %v23322_v47  ;;  %19486 = vmatprep.mubr.msk.bf16.mxu0 %vm4648_vm2, %v21377_v14 }
0x13ef   : > { %19548 = vmatprep.subr.bf16.mxu0 %v23322_v47 }
0x13f5   : > { %19487 = vmatmul.mubr.msk.bf16.gmra.mrb[152].mxu0 %vm4648_vm2, %v21378_v15 }
0x13f6   : > { %19516 = vmatprep.mubr.msk.bf16.mxu0 %vm4648_vm2, %v21379_v16 }
0x13fd   : > { %19517 = vmatmul.mubr.msk.bf16.vlgmr.msra.gmra.mrb[156].mxu0 %vm4648_vm2, %v21380_v17 }
0x13fe   : > { %19549 = vmatpush3.bf16.msra.mxu0 %v23322_v47  ;;  %19520 = vmatprep.mubr.msk.bf16.mxu0 %vm4648_vm2, %v21381_v62  ;;  %v21396_v62 = vld [vmem:[#allocation12 + $0x18] sm:$0xff]  }
0x13ff   : > { %19582 = vmatprep.subr.bf16.mxu0 %v23322_v47 }
0x1405   : > { %19521 = vmatmul.mubr.msk.bf16.gmra.mrb[160].mxu0 %vm4648_vm2, %v21382_v18 }
0x1406   : > { %19550 = vmatprep.mubr.msk.bf16.mxu0 %vm4648_vm2, %v21383_v19  ;;  %v21397_v19 = vld [vmem:[#allocation12 + $0x20] sm:$0xff]  }
0x140d   : > { %19551 = vmatmul.mubr.msk.bf16.vlgmr.msra.gmra.mrb[164].mxu0 %vm4648_vm2, %v21384_v20 }
0x140e   : > { %19583 = vmatpush3.bf16.msra.mxu0 %v23322_v47  ;;  %19554 = vmatprep.mubr.msk.bf16.mxu0 %vm4648_vm2, %v21401_v25  ;;  %v21398_v25 = vld [vmem:[#allocation12 + $0x28] sm:$0xff]  }
0x1415   : > { %19555 = vmatmul.mubr.msk.bf16.gmra.mrb[168].mxu0 %vm4648_vm2, %v21402_v26 }
0x1416   : > { %19584 = vmatprep.mubr.msk.bf16.mxu0 %vm4648_vm2, %v21405_v27  ;;  %v21399_v27 = vld [vmem:[#allocation12 + $0x30] sm:$0xff]  }
0x141d   : > { %19585 = vmatmul.mubr.msk.bf16.vlgmr.msra.gmra.mrb[172].mxu0 %vm4648_vm2, %v21406_v28 }
0x141e   : > { %19588 = vmatprep.mubr.msk.bf16.mxu0 %vm4648_vm2, %v21409_v63 }
0x1425   : > { %19589 = vmatmul.mubr.msk.bf16.gmra.mrb[176].mxu0 %vm4648_vm2, %v21410_v29 }
0x1490   : > { %v23478_v30 = vpop.f32.mrb[244].mxu1  ;;  %v23480_v57 = vpop.f32.mrb[124].mxu0 }
0x1491   : > { %v7554_v12 = vpop.f32.mrb[245].mxu1  ;;  %v23482_v11 = vpop.f32.mrb[125].mxu0 }
0x1492   : > { %v23484_v31 = vpop.f32.mrb[246].mxu1  ;;  %v23486_v32 = vpop.f32.mrb[126].mxu0 }
0x1493   : > { %v7586_v33 = vpack.c.bf16 %v23484_v31, %v23478_v30  ;;  %v7557_v34 = vpop.f32.mrb[247].mxu1  ;;  %v8065_v35 = vpack.c.bf16 %v23486_v32, %v23480_v57  ;;  %v23492_v45 = vpop.f32.mrb[127].mxu0  ;;  %v21411_v30 = vld [vmem:[#allocation12 + $0xa0] sm:$0xff]   ;;  %v21412_v31 = vld [vmem:[#allocation12 + $0xa8] sm:$0xff]  }
0x1494   : > { %v7585_v36 = vpack.c.bf16 %v7557_v34, %v7554_v12  ;;  %v8064_v37 = vpack.c.bf16 %v23492_v45, %v23482_v11  ;;  %v21413_v11 = vld [vmem:[#allocation12 + $0xb0] sm:$0xff]   ;;  %v21419_v57 = vld [vmem:[#allocation12 + $0xe0] sm:$0xff]   ;;  %v21420_v32 = vld [vmem:[#allocation12 + $0xe8] sm:$0xff]  }
0x1498   : > { %v23496_v38 = vpop.f32.mrb[248].mxu1  ;;  %v23498_v39 = vpop.f32.mrb[128].mxu0 }
0x1499   : > { %v23500_v40 = vpop.f32.mrb[249].mxu1  ;;  %v23502_v41 = vpop.f32.mrb[129].mxu0 }
0x149a   : > { %v23504_v42 = vpop.f32.mrb[250].mxu1  ;;  %v23506_v43 = vpop.f32.mrb[130].mxu0 }
0x149b   : > { %v7588_v44 = vpack.c.bf16 %v23504_v42, %v23496_v38  ;;  %v23510_v46 = vpop.f32.mrb[251].mxu1  ;;  %v8067_v47 = vpack.c.bf16 %v23506_v43, %v23498_v39  ;;  %v23514_v48 = vpop.f32.mrb[131].mxu0 }
0x149c   : > { %v7587_v49 = vpack.c.bf16 %v23510_v46, %v23500_v40  ;;  %v8066_v50 = vpack.c.bf16 %v23514_v48, %v23502_v41 }
0x14a0   : > { %v19324_v52 = vpop.f32.mrb[252].mxu1  ;;  %v23520_v53 = vpop.f32.mrb[132].mxu0 }
0x14a1   : > { %v7680_v55 = vpop.f32.mrb[253].mxu1  ;;  %v23522_v56 = vpop.f32.mrb[133].mxu0 }
0x14a2   : > { %v19325_v58 = vpop.f32.mrb[254].mxu1  ;;  %v23524_v59 = vpop.f32.mrb[134].mxu0 }
0x14a3   : > { %v7712_v60 = vpack.c.bf16 %v19325_v58, %v19324_v52  ;;  %v7683_v61 = vpop.f32.mrb[255].mxu1  ;;  %v8313_v51 = vpack.c.bf16 %v23524_v59, %v23520_v53  ;;  %v23528_v54 = vpop.f32.mrb[135].mxu0  ;;  %v21427_v53 = vld [vmem:[#allocation12 + $0x120] sm:$0xff]  }
0x14a4   : > { %v7711_v0 = vpack.c.bf16 %v7683_v61, %v7680_v55  ;;  %v8312_v1 = vpack.c.bf16 %v23528_v54, %v23522_v56  ;;  %v21403_v55 = vld [vmem:[#allocation12 + $0x80] sm:$0xff]   ;;  %v21422_v56 = vld [vmem:[#allocation12 + $0xf8] sm:$0xff]  }
0x14a6   : > { %19346 = vmatprep.mubr.bf16.mxu1 %v7711_v0 }
0x14a7   : > { %19347 = vmatmul.mubr.bf16.vlgmr.msra.gmra.mrb[4].mxu1 %v7712_v60 }
0x14a8   : > { %19355 = vmatpush3.bf16.msra.mxu1 %v21393_v24  ;;  %v19328_v4 = vpop.f32.mrb[0].mxu1  ;;  %v23532_v5 = vpop.f32.mrb[136].mxu0 }
0x14a9   : > { %v7696_v6 = vpop.f32.mrb[1].mxu1  ;;  %19356 = vmatprep.subr.bf16.mxu1 %v21394_v2  ;;  %v23534_v3 = vpop.f32.mrb[137].mxu0 }
0x14aa   : > { %v19329_v9 = vpop.f32.mrb[2].mxu1  ;;  %v23536_v13 = vpop.f32.mrb[138].mxu0 }
0x14ab   : > { %v7714_v7 = vpack.c.bf16 %v19329_v9, %v19328_v4  ;;  %v7699_v10 = vpop.f32.mrb[3].mxu1  ;;  %v8315_v14 = vpack.c.bf16 %v23536_v13, %v23532_v5  ;;  %v23540_v15 = vpop.f32.mrb[139].mxu0  ;;  %v21404_v4 = vld [vmem:[#allocation12 + $0x88] sm:$0xff]  }
0x14ac   : > { %v7713_v16 = vpack.c.bf16 %v7699_v10, %v7696_v6  ;;  %19357 = vmatpush3.bf16.msra.mxu1 %v21394_v2  ;;  %v8314_v17 = vpack.c.bf16 %v23540_v15, %v23534_v3  ;;  %v21407_v6 = vld [vmem:[#allocation12 + $0x90] sm:$0xff]  }
0x14ad   : > { %19358 = vmatprep.subr.bf16.mxu1 %v21395_v8 }
0x14ae   : > { %19350 = vmatprep.mubr.bf16.mxu1 %v7713_v16 }
0x14af   : > { %19351 = vmatmul.mubr.bf16.gmra.mrb[8].mxu1 %v7714_v7  ;;  %v21415_v7 = vld [vmem:[#allocation12 + $0xc0] sm:$0xff]  }
0x14b0   : > { %19359 = vmatpush3.bf16.msra.mxu1 %v21395_v8  ;;  %19370 = vmatprep.mubr.bf16.mxu1 %v7585_v36  ;;  %v23544_v18 = vpop.f32.mrb[140].mxu0  ;;  %v21400_v36 = vld [vmem:[#allocation12 + $0x38] sm:$0xff]  }
0x14b1   : > { %19360 = vmatprep.subr.bf16.mxu1 %v21396_v62  ;;  %v23546_v20 = vpop.f32.mrb[141].mxu0  ;;  %v21408_v8 = vld [vmem:[#allocation12 + $0x98] sm:$0xff]  }
0x14b2   : > { %v23548_v21 = vpop.f32.mrb[142].mxu0 }
0x14b3   : > { %v8561_v22 = vpack.c.bf16 %v23548_v21, %v23544_v18  ;;  %v23552_v23 = vpop.f32.mrb[143].mxu0  ;;  %v21434_v18 = vld [vmem:[#allocation12 + $0x158] sm:$0xff]   ;;  %v21435_v21 = vld [vmem:[#allocation12 + $0x160] sm:$0xff]  }
0x14b4   : > { %19361 = vmatpush3.bf16.msra.mxu1 %v21396_v62  ;;  %v8560_v24 = vpack.c.bf16 %v23552_v23, %v23546_v20  ;;  %v21430_v20 = vld [vmem:[#allocation12 + $0x138] sm:$0xff]  }
0x14b5   : > { %19362 = vmatprep.subr.bf16.mxu1 %v21397_v19 }
0x14b8   : > { %19363 = vmatpush3.bf16.msra.mxu1 %v21397_v19  ;;  %v23556_v26 = vpop.f32.mrb[144].mxu0  ;;  %v21416_v19 = vld [vmem:[#allocation12 + $0xc8] sm:$0xff]  }
0x14b9   : > { %19364 = vmatprep.subr.bf16.mxu1 %v21398_v25  ;;  %v23558_v28 = vpop.f32.mrb[145].mxu0 }
0x14ba   : > { %v23560_v63 = vpop.f32.mrb[146].mxu0 }
0x14bb   : > { %v8563_v29 = vpack.c.bf16 %v23560_v63, %v23556_v26  ;;  %v23564_v12 = vpop.f32.mrb[147].mxu0  ;;  %v21439_v26 = vld [vmem:[#allocation12 + $0x180] sm:$0xff]   ;;  %v21440_v63 = vld [vmem:[#allocation12 + $0x188] sm:$0xff]  }
0x14bc   : > { %19365 = vmatpush3.bf16.msra.mxu1 %v21398_v25  ;;  %v8562_v34 = vpack.c.bf16 %v23564_v12, %v23558_v28  ;;  %v21417_v25 = vld [vmem:[#allocation12 + $0xd0] sm:$0xff]   ;;  %v21438_v12 = vld [vmem:[#allocation12 + $0x178] sm:$0xff]  }
0x14bd   : > { %19366 = vmatprep.subr.bf16.mxu1 %v21399_v27  ;;  %v21437_v28 = vld [vmem:[#allocation12 + $0x170] sm:$0xff]  }
0x14c0   : > { %19367 = vmatpush3.bf16.msra.mxu1 %v21399_v27  ;;  %v23568_v52 = vpop.f32.mrb[148].mxu0  ;;  %v21418_v27 = vld [vmem:[#allocation12 + $0xd8] sm:$0xff]  }
0x14c1   : > { %19368 = vmatprep.subr.bf16.mxu1 %v21400_v36  ;;  %v23570_v58 = vpop.f32.mrb[149].mxu0 }
0x14c2   : > { %v23572_v60 = vpop.f32.mrb[150].mxu0 }
0x14c3   : > { %v8809_v61 = vpack.c.bf16 %v23572_v60, %v23568_v52  ;;  %v23576_v0 = vpop.f32.mrb[151].mxu0  ;;  %v21443_v52 = vld [vmem:[#allocation12 + $0x1a0] sm:$0xff]   ;;  %v21445_v60 = vld [vmem:[#allocation12 + $0x1b0] sm:$0xff]  }
0x14c4   : > { %19369 = vmatpush3.bf16.msra.mxu1 %v21400_v36  ;;  %v8808_v2 = vpack.c.bf16 %v23576_v0, %v23570_v58  ;;  %v21444_v58 = vld [vmem:[#allocation12 + $0x1a8] sm:$0xff]   ;;  %v21447_v0 = vld [vmem:[#allocation12 + $0x1c0] sm:$0xff]  }
0x14c5   : > { %19388 = vmatprep.subr.bf16.mxu1 %v21403_v55 }
0x14c7   : > { %19371 = vmatmul.mubr.bf16.vlgmr.msra.gmra.mrb[4].mxu1 %v7586_v33 }
0x14c8   : > { %19374 = vmatprep.mubr.bf16.mxu1 %v7587_v49  ;;  %19389 = vmatpush3.bf16.msra.mxu1 %v21403_v55  ;;  %v23592_v33 = vpop.f32.mrb[152].mxu0  ;;  %v21423_v55 = vld [vmem:[#allocation12 + $0x100] sm:$0xff]  }
0x14c9   : > { %19390 = vmatprep.subr.bf16.mxu1 %v21404_v4  ;;  %v23594_v40 = vpop.f32.mrb[153].mxu0 }
0x14ca   : > { %v23596_v46 = vpop.f32.mrb[154].mxu0 }
0x14cb   : > { %v8811_v38 = vpack.c.bf16 %v23596_v46, %v23592_v33  ;;  %v23600_v42 = vpop.f32.mrb[155].mxu0  ;;  %v21449_v33 = vld [vmem:[#allocation12 + $0x1d0] sm:$0xff]   ;;  %v21451_v46 = vld [vmem:[#allocation12 + $0x1e0] sm:$0xff]  }
0x14cc   : > { %19391 = vmatpush3.bf16.msra.mxu1 %v21404_v4  ;;  %v8810_v45 = vpack.c.bf16 %v23600_v42, %v23594_v40  ;;  %v21450_v40 = vld [vmem:[#allocation12 + $0x1d8] sm:$0xff]   ;;  %v21453_v42 = vld [vmem:[#allocation12 + $0x1f0] sm:$0xff]  }
0x14cd   : > { %19392 = vmatprep.subr.bf16.mxu1 %v21407_v6 }
0x14cf   : > { %19375 = vmatmul.mubr.bf16.gmra.mrb[8].mxu1 %v7588_v44 }
0x14d0   : > { %19393 = vmatpush3.bf16.msra.mxu1 %v21407_v6  ;;  %19404 = vmatprep.mubr.bf16.mxu1 %v8064_v37  ;;  %v21414_v37 = vld [vmem:[#allocation12 + $0xb8] sm:$0xff]   ;;  %v23604_v44 = vpop.f32.mrb[156].mxu0 }
0x14d1   : > { %19394 = vmatprep.subr.bf16.mxu1 %v21408_v8  ;;  %v23606_v49 = vpop.f32.mrb[157].mxu0 }
0x14d2   : > { %v23608_v9 = vpop.f32.mrb[158].mxu0 }
0x14d3   : > { %v9057_v10 = vpack.c.bf16 %v23608_v9, %v23604_v44  ;;  %v23612_v16 = vpop.f32.mrb[159].mxu0  ;;  %v21455_v44 = vld [vmem:[#allocation12 + $0x200] sm:$0xff]   ;;  %v21457_v9 = vld [vmem:[#allocation12 + $0x210] sm:$0xff]  }
0x14d4   : > { %19395 = vmatpush3.bf16.msra.mxu1 %v21408_v8  ;;  %v9056_v62 = vpack.c.bf16 %v23612_v16, %v23606_v49  ;;  %v21456_v49 = vld [vmem:[#allocation12 + $0x208] sm:$0xff]   ;;  %v21459_v16 = vld [vmem:[#allocation12 + $0x220] sm:$0xff]  }
0x14d5   : > { %19396 = vmatprep.subr.bf16.mxu1 %v21411_v30 }
0x14d8   : > { %19397 = vmatpush3.bf16.msra.mxu1 %v21411_v30  ;;  %v21424_v30 = vld [vmem:[#allocation12 + $0x108] sm:$0xff]  }
0x14d9   : > { %19398 = vmatprep.subr.bf16.mxu1 %v21412_v31 }
0x14dc   : > { %19399 = vmatpush3.bf16.msra.mxu1 %v21412_v31  ;;  %v21425_v31 = vld [vmem:[#allocation12 + $0x110] sm:$0xff]  }
0x14dd   : > { %19400 = vmatprep.subr.bf16.mxu1 %v21413_v11 }
0x14e0   : > { %19401 = vmatpush3.bf16.msra.mxu1 %v21413_v11  ;;  %v21426_v11 = vld [vmem:[#allocation12 + $0x118] sm:$0xff]  }
0x14e1   : > { %19402 = vmatprep.subr.bf16.mxu1 %v21414_v37 }
0x14e4   : > { %19403 = vmatpush3.bf16.msra.mxu1 %v21414_v37 }
0x14e5   : > { %19422 = vmatprep.subr.bf16.mxu1 %v21415_v7 }
0x14e7   : > { %19405 = vmatmul.mubr.bf16.vlgmr.msra.gmra.mrb[4].mxu1 %v8065_v35  ;;  %v23628_v35 = vpop.f32.mrb[160].mxu0 }
0x14e8   : > { %19423 = vmatpush3.bf16.msra.mxu1 %v21415_v7  ;;  %19408 = vmatprep.mubr.bf16.mxu1 %v8066_v50  ;;  %v23630_v41 = vpop.f32.mrb[161].mxu0 }
0x14e9   : > { %19424 = vmatprep.subr.bf16.mxu1 %v21416_v19  ;;  %v23632_v48 = vpop.f32.mrb[162].mxu0 }
0x14ea   : > { %v9059_v39 = vpack.c.bf16 %v23632_v48, %v23628_v35  ;;  %v23636_v43 = vpop.f32.mrb[163].mxu0  ;;  %v21461_v35 = vld [vmem:[#allocation12 + $0x230] sm:$0xff]  }
0x14eb   : > { %v9058_v50 = vpack.c.bf16 %v23636_v43, %v23630_v41  ;;  %v23640_v54 = vpop.f32.mrb[164].mxu0  ;;  %v21462_v41 = vld [vmem:[#allocation12 + $0x238] sm:$0xff]   ;;  %v21463_v48 = vld [vmem:[%s25947_s16] sm:$0xff]  }
0x14ec   : > { %19425 = vmatpush3.bf16.msra.mxu1 %v21416_v19  ;;  %19624 = vmatprep.mubr.msk.bf16.mxu0 %vm3198_vm1, %v21463_v48  ;;  %v16214_v43 = vld [vmem:[%s25946_s15] ss:$0 sm:$0xff]  ;;  %v21498_v48 = vld [vmem:[%s25947_s16 + $0x188] sm:$0xff]  }
0x14ed   : > { %19426 = vmatprep.subr.bf16.mxu1 %v21417_v25 }
0x14ef   : > { %19409 = vmatmul.mubr.bf16.gmra.mrb[8].mxu1 %v8067_v47  ;;  %v21421_v47 = vld [vmem:[#allocation12 + $0xf0] sm:$0xff]  }
0x14f0   : > { %19427 = vmatpush3.bf16.msra.mxu1 %v21417_v25  ;;  %19438 = vmatprep.mubr.bf16.mxu1 %v8312_v1  ;;  %v23642_v1 = vpop.f32.mrb[165].mxu0  ;;  %v21431_v25 = vld [vmem:[#allocation12 + $0x140] sm:$0xff]  }
0x14f1   : > { %19428 = vmatprep.subr.bf16.mxu1 %v21418_v27  ;;  %v23644_v36 = vpop.f32.mrb[166].mxu0 }
0x14f2   : > { %v9305_v4 = vpack.c.bf16 %v23644_v36, %v23640_v54  ;;  %v23648_v6 = vpop.f32.mrb[167].mxu0 }
0x14f3   : > { %v9304_v8 = vpack.c.bf16 %v23648_v6, %v23642_v1  ;;  %v23664_v59 = vpop.f32.mrb[168].mxu0 }
0x14f4   : > { %19429 = vmatpush3.bf16.msra.mxu1 %v21418_v27  ;;  %v23666_v3 = vpop.f32.mrb[169].mxu0 }
0x14f5   : > { %19430 = vmatprep.subr.bf16.mxu1 %v21419_v57  ;;  %v23668_v15 = vpop.f32.mrb[170].mxu0 }
0x14f6   : > { %v9307_v5 = vpack.c.bf16 %v23668_v15, %v23664_v59 }
0x14f8   : > { %19431 = vmatpush3.bf16.msra.mxu1 %v21419_v57  ;;  %v21432_v57 = vld [vmem:[#allocation12 + $0x148] sm:$0xff]  }
0x14f9   : > { %19432 = vmatprep.subr.bf16.mxu1 %v21420_v32 }
0x14fc   : > { %19433 = vmatpush3.bf16.msra.mxu1 %v21420_v32 }
0x14fd   : > { %19434 = vmatprep.subr.bf16.mxu1 %v21421_v47 }
0x1500   : > { %19435 = vmatpush3.bf16.msra.mxu1 %v21421_v47 }
0x1501   : > { %19436 = vmatprep.subr.bf16.mxu1 %v21422_v56 }
0x1504   : > { %19437 = vmatpush3.bf16.msra.mxu1 %v21422_v56 }
0x1505   : > { %19456 = vmatprep.subr.bf16.mxu1 %v21423_v55 }
0x1507   : > { %19439 = vmatmul.mubr.bf16.vlgmr.msra.gmra.mrb[4].mxu1 %v8313_v51  ;;  %v21428_v51 = vld [vmem:[#allocation12 + $0x128] sm:$0xff]  }
0x1508   : > { %19457 = vmatpush3.bf16.msra.mxu1 %v21423_v55  ;;  %19442 = vmatprep.mubr.bf16.mxu1 %v8314_v17  ;;  %v23670_v17 = vpop.f32.mrb[171].mxu0 }
0x1509   : > { %19458 = vmatprep.subr.bf16.mxu1 %v21424_v30  ;;  %v9306_v13 = vpack.c.bf16 %v23670_v17, %v23666_v3  ;;  %v23676_v23 = vpop.f32.mrb[172].mxu0 }
0x150c   : > { %19459 = vmatpush3.bf16.msra.mxu1 %v21424_v30 }
0x150d   : > { %19460 = vmatprep.subr.bf16.mxu1 %v21425_v31 }
0x150f   : > { %19443 = vmatmul.mubr.bf16.gmra.mrb[8].mxu1 %v8315_v14  ;;  %v21429_v14 = vld [vmem:[#allocation12 + $0x130] sm:$0xff]  }
0x1510   : > { %19461 = vmatpush3.bf16.msra.mxu1 %v21425_v31  ;;  %19472 = vmatprep.mubr.bf16.mxu1 %v8560_v24  ;;  %v23678_v24 = vpop.f32.mrb[173].mxu0  ;;  %v21433_v31 = vld [vmem:[#allocation12 + $0x150] sm:$0xff]  }
0x1511   : > { %19462 = vmatprep.subr.bf16.mxu1 %v21426_v11  ;;  %v23680_v37 = vpop.f32.mrb[174].mxu0 }
0x1512   : > { %v9553_v7 = vpack.c.bf16 %v23680_v37, %v23676_v23  ;;  %v23684_v19 = vpop.f32.mrb[175].mxu0 }
0x1513   : > { %v9552_v27 = vpack.c.bf16 %v23684_v19, %v23678_v24  ;;  %v23688_v32 = vpop.f32.mrb[176].mxu0 }
0x1514   : > { %19463 = vmatpush3.bf16.msra.mxu1 %v21426_v11  ;;  %v23690_v47 = vpop.f32.mrb[177].mxu0 }
0x1515   : > { %19464 = vmatprep.subr.bf16.mxu1 %v21427_v53  ;;  %v23695_v56 = vpop.f32.mrb[178].mxu0 }
0x1516   : > { %v9555_v55 = vpack.c.bf16 %v23695_v56, %v23688_v32  ;;  %v23702_v30 = vpop.f32.mrb[179].mxu0 }
0x1517   : > { %v9554_v11 = vpack.c.bf16 %v23702_v30, %v23690_v47  ;;  %v21466_v30 = vld [vmem:[%s25947_s16 + $0x108] sm:$0xff]  }
0x1518   : > { %19465 = vmatpush3.bf16.msra.mxu1 %v21427_v53 }
0x1519   : > { %19466 = vmatprep.subr.bf16.mxu1 %v21428_v51 }
0x151c   : > { %19467 = vmatpush3.bf16.msra.mxu1 %v21428_v51 }
0x151d   : > { %19468 = vmatprep.subr.bf16.mxu1 %v21429_v14 }
0x1520   : > { %19469 = vmatpush3.bf16.msra.mxu1 %v21429_v14 }
0x1521   : > { %19470 = vmatprep.subr.bf16.mxu1 %v21430_v20 }
0x1524   : > { %19471 = vmatpush3.bf16.msra.mxu1 %v21430_v20 }
0x1525   : > { %19490 = vmatprep.subr.bf16.mxu1 %v21431_v25 }
0x1527   : > { %19473 = vmatmul.mubr.bf16.vlgmr.msra.gmra.mrb[4].mxu1 %v8561_v22  ;;  %v21436_v22 = vld [vmem:[#allocation12 + $0x168] sm:$0xff]  }
0x1528   : > { %19491 = vmatpush3.bf16.msra.mxu1 %v21431_v25  ;;  %19476 = vmatprep.mubr.bf16.mxu1 %v8562_v34  ;;  %v21442_v34 = vld [vmem:[#allocation12 + $0x198] sm:$0xff]  }
0x1529   : > { %19492 = vmatprep.subr.bf16.mxu1 %v21432_v57 }
0x152c   : > { %19493 = vmatpush3.bf16.msra.mxu1 %v21432_v57 }
0x152d   : > { %19494 = vmatprep.subr.bf16.mxu1 %v21433_v31 }
0x152f   : > { %19477 = vmatmul.mubr.bf16.gmra.mrb[8].mxu1 %v8563_v29  ;;  %v21441_v29 = vld [vmem:[#allocation12 + $0x190] sm:$0xff]  }
0x1530   : > { %19495 = vmatpush3.bf16.msra.mxu1 %v21433_v31  ;;  %19506 = vmatprep.mubr.bf16.mxu1 %v8808_v2  ;;  %v21448_v2 = vld [vmem:[#allocation12 + $0x1c8] sm:$0xff]   ;;  %v21467_v31 = vld [vmem:[%s25947_s16 + $0x10] sm:$0xff]  }
0x1531   : > { %19496 = vmatprep.subr.bf16.mxu1 %v21434_v18 }
0x1534   : > { %19497 = vmatpush3.bf16.msra.mxu1 %v21434_v18  ;;  %v21469_v18 = vld [vmem:[%s25947_s16 + $0x18] sm:$0xff]  }
0x1535   : > { %19498 = vmatprep.subr.bf16.mxu1 %v21435_v21 }
0x1538   : > { %19499 = vmatpush3.bf16.msra.mxu1 %v21435_v21  ;;  %v21470_v21 = vld [vmem:[%s25947_s16 + $0x118] sm:$0xff]  }
0x1539   : > { %19500 = vmatprep.subr.bf16.mxu1 %v21436_v22 }
0x153c   : > { %19501 = vmatpush3.bf16.msra.mxu1 %v21436_v22  ;;  %v21471_v22 = vld [vmem:[%s25947_s16 + $0x20] sm:$0xff]  }
0x153d   : > { %19502 = vmatprep.subr.bf16.mxu1 %v21437_v28 }
0x1540   : > { %19503 = vmatpush3.bf16.msra.mxu1 %v21437_v28  ;;  %v21472_v28 = vld [vmem:[%s25947_s16 + $0x120] sm:$0xff]  }
0x1541   : > { %19504 = vmatprep.subr.bf16.mxu1 %v21438_v12 }
0x1544   : > { %19505 = vmatpush3.bf16.msra.mxu1 %v21438_v12  ;;  %v21473_v12 = vld [vmem:[%s25947_s16 + $0x28] sm:$0xff]  }
0x1545   : > { %19524 = vmatprep.subr.bf16.mxu1 %v21439_v26 }
0x1547   : > { %19507 = vmatmul.mubr.bf16.vlgmr.msra.gmra.mrb[4].mxu1 %v8809_v61  ;;  %v21446_v61 = vld [vmem:[#allocation12 + $0x1b8] sm:$0xff]  }
0x1548   : > { %19525 = vmatpush3.bf16.msra.mxu1 %v21439_v26  ;;  %19510 = vmatprep.mubr.bf16.mxu1 %v8810_v45  ;;  %v21454_v45 = vld [vmem:[#allocation12 + $0x1f8] sm:$0xff]  }
0x1549   : > { %19526 = vmatprep.subr.bf16.mxu1 %v21440_v63  ;;  %v21474_v26 = vld [vmem:[%s25947_s16 + $0x128] sm:$0xff]  }
0x154c   : > { %19527 = vmatpush3.bf16.msra.mxu1 %v21440_v63  ;;  %v21475_v63 = vld [vmem:[%s25947_s16 + $0x30] sm:$0xff]  }
0x154d   : > { %19528 = vmatprep.subr.bf16.mxu1 %v21441_v29 }
0x154f   : > { %19511 = vmatmul.mubr.bf16.gmra.mrb[8].mxu1 %v8811_v38  ;;  %v21452_v38 = vld [vmem:[#allocation12 + $0x1e8] sm:$0xff]  }
0x1550   : > { %19529 = vmatpush3.bf16.msra.mxu1 %v21441_v29  ;;  %19540 = vmatprep.mubr.bf16.mxu1 %v9056_v62  ;;  %v21460_v62 = vld [vmem:[#allocation12 + $0x228] sm:$0xff]   ;;  %v21476_v29 = vld [vmem:[%s25947_s16 + $0x130] sm:$0xff]  }
0x1551   : > { %19530 = vmatprep.subr.bf16.mxu1 %v21442_v34 }
0x1554   : > { %19531 = vmatpush3.bf16.msra.mxu1 %v21442_v34  ;;  %v21477_v34 = vld [vmem:[%s25947_s16 + $0x38] sm:$0xff]  }
0x1555   : > { %19532 = vmatprep.subr.bf16.mxu1 %v21443_v52 }
0x1558   : > { %19533 = vmatpush3.bf16.msra.mxu1 %v21443_v52  ;;  %v21478_v52 = vld [vmem:[%s25947_s16 + $0x138] sm:$0xff]  }
0x1559   : > { %19534 = vmatprep.subr.bf16.mxu1 %v21444_v58 }
0x155c   : > { %19535 = vmatpush3.bf16.msra.mxu1 %v21444_v58  ;;  %v21479_v58 = vld [vmem:[%s25947_s16 + $0x40] sm:$0xff]  }
0x155d   : > { %19536 = vmatprep.subr.bf16.mxu1 %v21445_v60 }
0x1560   : > { %19537 = vmatpush3.bf16.msra.mxu1 %v21445_v60  ;;  %v21480_v60 = vld [vmem:[%s25947_s16 + $0x140] sm:$0xff]  }
0x1561   : > { %19538 = vmatprep.subr.bf16.mxu1 %v21446_v61 }
0x1564   : > { %19539 = vmatpush3.bf16.msra.mxu1 %v21446_v61  ;;  %v21481_v61 = vld [vmem:[%s25947_s16 + $0x48] sm:$0xff]  }
0x1565   : > { %19558 = vmatprep.subr.bf16.mxu1 %v21447_v0 }
0x1567   : > { %19541 = vmatmul.mubr.bf16.vlgmr.msra.gmra.mrb[4].mxu1 %v9057_v10  ;;  %v21458_v10 = vld [vmem:[#allocation12 + $0x218] sm:$0xff]  }
0x1568   : > { %19559 = vmatpush3.bf16.msra.mxu1 %v21447_v0  ;;  %19544 = vmatprep.mubr.bf16.mxu1 %v9058_v50  ;;  %v21482_v0 = vld [vmem:[%s25947_s16 + $0x148] sm:$0xff]  }
0x1569   : > { %19560 = vmatprep.subr.bf16.mxu1 %v21448_v2 }
0x156c   : > { %19561 = vmatpush3.bf16.msra.mxu1 %v21448_v2  ;;  %v21483_v2 = vld [vmem:[%s25947_s16 + $0x50] sm:$0xff]  }
0x156d   : > { %19562 = vmatprep.subr.bf16.mxu1 %v21449_v33 }
0x156f   : > { %19545 = vmatmul.mubr.bf16.gmra.mrb[8].mxu1 %v9059_v39  ;;  %v21464_v39 = vld [vmem:[%s25947_s16 + $0x100] sm:$0xff]  }
0x1570   : > { %19563 = vmatpush3.bf16.msra.mxu1 %v21449_v33  ;;  %19574 = vmatprep.mubr.bf16.mxu1 %v9304_v8  ;;  %v21484_v33 = vld [vmem:[%s25947_s16 + $0x150] sm:$0xff]  }
0x1571   : > { %19564 = vmatprep.subr.bf16.mxu1 %v21450_v40 }
0x1574   : > { %19565 = vmatpush3.bf16.msra.mxu1 %v21450_v40  ;;  %v21485_v40 = vld [vmem:[%s25947_s16 + $0x58] sm:$0xff]  }
0x1575   : > { %19566 = vmatprep.subr.bf16.mxu1 %v21451_v46 }
0x1578   : > { %19567 = vmatpush3.bf16.msra.mxu1 %v21451_v46  ;;  %v21486_v46 = vld [vmem:[%s25947_s16 + $0x158] sm:$0xff]  }
0x1579   : > { %19568 = vmatprep.subr.bf16.mxu1 %v21452_v38 }
0x157c   : > { %19569 = vmatpush3.bf16.msra.mxu1 %v21452_v38  ;;  %v21487_v38 = vld [vmem:[%s25947_s16 + $0x60] sm:$0xff]  }
0x157d   : > { %19570 = vmatprep.subr.bf16.mxu1 %v21453_v42 }
0x1580   : > { %19571 = vmatpush3.bf16.msra.mxu1 %v21453_v42  ;;  %v21488_v42 = vld [vmem:[%s25947_s16 + $0x160] sm:$0xff]  }
0x1581   : > { %19572 = vmatprep.subr.bf16.mxu1 %v21454_v45 }
0x1584   : > { %19573 = vmatpush3.bf16.msra.mxu1 %v21454_v45  ;;  %v21489_v45 = vld [vmem:[%s25947_s16 + $0x68] sm:$0xff]  }
0x1585   : > { %19592 = vmatprep.subr.bf16.mxu1 %v21455_v44 }
0x1587   : > { %19575 = vmatmul.mubr.bf16.vlgmr.msra.gmra.mrb[4].mxu1 %v9305_v4 }
0x1588   : > { %19593 = vmatpush3.bf16.msra.mxu1 %v21455_v44  ;;  %19578 = vmatprep.mubr.bf16.mxu1 %v9306_v13  ;;  %v21490_v44 = vld [vmem:[%s25947_s16 + $0x168] sm:$0xff]  }
0x1589   : > { %19594 = vmatprep.subr.bf16.mxu1 %v21456_v49 }
0x158c   : > { %19595 = vmatpush3.bf16.msra.mxu1 %v21456_v49  ;;  %v21491_v49 = vld [vmem:[%s25947_s16 + $0x70] sm:$0xff]  }
0x158d   : > { %19596 = vmatprep.subr.bf16.mxu1 %v21457_v9 }
0x158f   : > { %19579 = vmatmul.mubr.bf16.gmra.mrb[8].mxu1 %v9307_v5 }
0x1590   : > { %19597 = vmatpush3.bf16.msra.mxu1 %v21457_v9  ;;  %19608 = vmatprep.mubr.bf16.mxu1 %v9552_v27  ;;  %v21492_v9 = vld [vmem:[%s25947_s16 + $0x170] sm:$0xff]  }
0x1591   : > { %19598 = vmatprep.subr.bf16.mxu1 %v21458_v10 }
0x1594   : > { %19599 = vmatpush3.bf16.msra.mxu1 %v21458_v10  ;;  %v21493_v10 = vld [vmem:[%s25947_s16 + $0x78] sm:$0xff]  }
0x1595   : > { %19600 = vmatprep.subr.bf16.mxu1 %v21459_v16 }
0x1598   : > { %19601 = vmatpush3.bf16.msra.mxu1 %v21459_v16  ;;  %v21494_v16 = vld [vmem:[%s25947_s16 + $0x178] sm:$0xff]  }
0x1599   : > { %19602 = vmatprep.subr.bf16.mxu1 %v21460_v62 }
0x159c   : > { %19603 = vmatpush3.bf16.msra.mxu1 %v21460_v62  ;;  %v21495_v62 = vld [vmem:[%s25947_s16 + $0x80] sm:$0xff]  }
0x159d   : > { %19604 = vmatprep.subr.bf16.mxu1 %v21461_v35 }
0x15a0   : > { %19605 = vmatpush3.bf16.msra.mxu1 %v21461_v35  ;;  %v21496_v35 = vld [vmem:[%s25947_s16 + $0x180] sm:$0xff]  }
0x15a1   : > { %19606 = vmatprep.subr.bf16.mxu1 %v21462_v41 }
0x15a4   : > { %19607 = vmatpush3.bf16.msra.mxu1 %v21462_v41  ;;  %v21497_v41 = vld [vmem:[%s25947_s16 + $0x88] sm:$0xff]  }
0x15a7   : > { %19609 = vmatmul.mubr.bf16.vlgmr.msra.gmra.mrb[4].mxu1 %v9553_v7 }
0x15a8   : > { %19612 = vmatprep.mubr.bf16.mxu1 %v9554_v11  ;;  %v21468_v11 = vld [vmem:[%s25947_s16 + $0x110] sm:$0xff]  }
0x15af   : > { %19613 = vmatmul.mubr.bf16.gmra.mrb[8].mxu1 %v9555_v55  ;;  %v21465_v55 = vld [vmem:[%s25947_s16 + $0x8] sm:$0xff]  }
0x15b0   : > { %19800 = vmatprep.mubr.msk.bf16.mxu1 %vm3198_vm1, %v21464_v39  ;;  %v21499_v39 = vld [vmem:[%s25947_s16 + $0x90] sm:$0xff]  }
0x167a   : > { %v19610_v50 = vpop.f32.mrb[4].mxu1 }
0x167b   : > { %v9703_v54 = vadd.f32 %v19610_v50, %v16214_v43  ;;  %v9655_v1 = vpop.f32.mrb[5].mxu1  ;;  %v21501_v50 = vld [vmem:[%s25947_s16 + $0x98] sm:$0xff]  }
0x167c   : > { %v9701_v36 = vadd.f32 %v16214_v43, %v9655_v1  ;;  %v19611_v4 = vpop.f32.mrb[6].mxu1  ;;  %v21503_v1 = vld [vmem:[%s25947_s16 + $0xa0] sm:$0xff]  }
0x167d   : > { %v9704_v6 = vadd.f32 %v19611_v4, %v16214_v43  ;;  %v9658_v8 = vpop.f32.mrb[7].mxu1  ;;  %v9711_v59 = vmax.f32 %v9703_v54, 0.0  ;;  %v21502_v54 = vld [vmem:[%s25947_s16 + $0x198] sm:$0xff]   ;;  %v21505_v4 = vld [vmem:[%s25947_s16 + $0xa8] sm:$0xff]  }
0x167e   : > { %v9702_v53 = vadd.f32 %v16214_v43, %v9658_v8  ;;  %v9709_v3 = vmax.f32 %v9701_v36, 0.0  ;;  %v21504_v36 = vld [vmem:[%s25947_s16 + $0x1a0] sm:$0xff]   ;;  %v21507_v8 = vld [vmem:[%s25947_s16 + $0xb0] sm:$0xff]  }
0x167f   : > { %v9712_v51 = vmax.f32 %v9704_v6, 0.0  ;;  %v21506_v6 = vld [vmem:[%s25947_s16 + $0x1a8] sm:$0xff]  }
0x1680   : > { %v9710_v15 = vmax.f32 %v9702_v53, 0.0  ;;  %v21508_v53 = vld [vmem:[%s25947_s16 + $0x1b0] sm:$0xff]  }
0x1681   : > { %v23768_v17 = vpack.c.bf16 %v9712_v51, %v9711_v59  ;;  %v21509_v59 = vld [vmem:[%s25947_s16 + $0xb8] sm:$0xff]  }
0x1682   : > { %v23770_v5 = vpack.c.bf16 %v9710_v15, %v9709_v3  ;;  %v19614_v13 = vpop.f32.mrb[8].mxu1  ;;  %v21510_v51 = vld [vmem:[%s25947_s16 + $0x1b8] sm:$0xff]   ;;  %v21511_v3 = vld [vmem:[%s25947_s16 + $0xc0] sm:$0xff]  }
0x1683   : > { %v9707_v14 = vadd.f32 %v19614_v13, %v16214_v43  ;;  %v9671_v20 = vpop.f32.mrb[9].mxu1  ;;  %v21512_v15 = vld [vmem:[%s25947_s16 + $0x1c0] sm:$0xff]   ;;  %v21513_v13 = vld [vmem:[%s25947_s16 + $0xc8] sm:$0xff]  }
0x1684   : > { %v9705_v23 = vadd.f32 %v16214_v43, %v9671_v20  ;;  %v19615_v24 = vpop.f32.mrb[10].mxu1  ;;  %19616 = vmatprep.subr.bf16.mxu0 %v23770_v5  ;;  %19792 = vmatprep.subr.bf16.mxu1 %v23770_v5  ;;  %v21515_v20 = vld [vmem:[%s25947_s16 + $0xd0] sm:$0xff]  }
0x1685   : > { %v9708_v37 = vadd.f32 %v19615_v24, %v16214_v43  ;;  %v9674_v7 = vpop.f32.mrb[11].mxu1  ;;  %19617 = vmatpush3.bf16.msra.mxu0 %v23770_v5  ;;  %19793 = vmatpush3.bf16.msra.mxu1 %v23770_v5  ;;  %v9715_v25 = vmax.f32 %v9707_v14, 0.0  ;;  %v21514_v14 = vld [vmem:[%s25947_s16 + $0x1c8] sm:$0xff]   ;;  %v21517_v24 = vld [vmem:[%s25947_s16 + $0xd8] sm:$0xff]  }
0x1686   : > { %v9706_v19 = vadd.f32 %v16214_v43, %v9674_v7  ;;  %19618 = vmatprep.subr.bf16.mxu0 %v23768_v17  ;;  %19794 = vmatprep.subr.bf16.mxu1 %v23768_v17  ;;  %v9713_v57 = vmax.f32 %v9705_v23, 0.0  ;;  %v21500_v43 = vld [vmem:[%s25947_s16 + $0x190] sm:$0xff]   ;;  %v21519_v7 = vld [vmem:[%s25947_s16 + $0xe0] sm:$0xff]  }
0x1687   : > { %v9716_v27 = vmax.f32 %v9708_v37, 0.0  ;;  %v21516_v23 = vld [vmem:[%s25947_s16 + $0x1d0] sm:$0xff]   ;;  %v21518_v37 = vld [vmem:[%s25947_s16 + $0x1d8] sm:$0xff]  }
0x1688   : > { %v9714_v32 = vmax.f32 %v9706_v19, 0.0  ;;  %v21520_v19 = vld [vmem:[%s25947_s16 + $0x1e0] sm:$0xff]  }
0x1689   : > { %v23778_v47 = vpack.c.bf16 %v9716_v27, %v9715_v25  ;;  %19619 = vmatpush3.bf16.msra.mxu0 %v23768_v17  ;;  %19795 = vmatpush3.bf16.msra.mxu1 %v23768_v17  ;;  %v21555_v25 = vld [vmem:[%s25948_s17 + $0x40] sm:$0xff]   ;;  %v21521_v27 = vld [vmem:[%s25947_s16 + $0xe8] sm:$0xff]  }
0x168a   : > { %v23782_v56 = vpack.c.bf16 %v9714_v32, %v9713_v57  ;;  %v21522_v57 = vld [vmem:[%s25947_s16 + $0x1e8] sm:$0xff]   ;;  %v21523_v32 = vld [vmem:[%s25947_s16 + $0xf0] sm:$0xff]  }
0x168c   : > { %19620 = vmatprep.subr.bf16.mxu0 %v23782_v56  ;;  %19796 = vmatprep.subr.bf16.mxu1 %v23782_v56 }
0x168d   : > { %19621 = vmatpush3.bf16.msra.mxu0 %v23782_v56  ;;  %19797 = vmatpush3.bf16.msra.mxu1 %v23782_v56 }
0x168e   : > { %19622 = vmatprep.subr.bf16.mxu0 %v23778_v47  ;;  %19798 = vmatprep.subr.bf16.mxu1 %v23778_v47 }
0x1691   : > { %19623 = vmatpush3.bf16.msra.mxu0 %v23778_v47  ;;  %19799 = vmatpush3.bf16.msra.mxu1 %v23778_v47 }
0x1692   : > { %19656 = vmatprep.subr.bf16.mxu0 %v23770_v5  ;;  %19880 = vmatprep.subr.bf16.mxu1 %v23770_v5 }
0x1694   : > { %19625 = vmatmul.mubr.msk.bf16.vlgmr.msra.gmra.mrb[180].mxu0 %vm3198_vm1, %v21465_v55  ;;  %19801 = vmatmul.mubr.msk.bf16.vlgmr.msra.gmra.mrb[12].mxu1 %vm3198_vm1, %v21466_v30  ;;  %v21524_v55 = vld [vmem:[%s25947_s16 + $0x1f0] sm:$0xff]   ;;  %v21558_v30 = vld [vmem:[%s25948_s17 + $0x48] sm:$0xff]  }
0x1695   : > { %19657 = vmatpush3.bf16.msra.mxu0 %v23770_v5  ;;  %19881 = vmatpush3.bf16.msra.mxu1 %v23770_v5 }
0x1696   : > { %19658 = vmatprep.subr.bf16.mxu0 %v23768_v17  ;;  %19882 = vmatprep.subr.bf16.mxu1 %v23768_v17 }
0x1697   : > { %19628 = vmatprep.mubr.msk.bf16.mxu0 %vm3198_vm1, %v21467_v31  ;;  %19804 = vmatprep.mubr.msk.bf16.mxu1 %vm3198_vm1, %v21468_v11  ;;  %v21525_v31 = vld [vmem:[%s25947_s16 + $0xf8] sm:$0xff]  }
0x1698   : > { %v21526_v11 = vld [vmem:[%s25947_s16 + $0x1f8] sm:$0xff]  }
0x1699   : > { %19659 = vmatpush3.bf16.msra.mxu0 %v23768_v17  ;;  %19883 = vmatpush3.bf16.msra.mxu1 %v23768_v17 }
0x169a   : > { %19660 = vmatprep.subr.bf16.mxu0 %v23782_v56  ;;  %19884 = vmatprep.subr.bf16.mxu1 %v23782_v56 }
0x169c   : > { %19629 = vmatmul.mubr.msk.bf16.gmra.mrb[184].mxu0 %vm3198_vm1, %v21469_v18  ;;  %19805 = vmatmul.mubr.msk.bf16.gmra.mrb[16].mxu1 %vm3198_vm1, %v21470_v21  ;;  %v21527_v18 = vld [vmem:[%s25947_s16 + $0x200] sm:$0xff]   ;;  %v21561_v21 = vld [vmem:[%s25948_s17 + $0x50] sm:$0xff]  }
0x169d   : > { %19661 = vmatpush3.bf16.msra.mxu0 %v23782_v56  ;;  %19885 = vmatpush3.bf16.msra.mxu1 %v23782_v56 }
0x169e   : > { %19662 = vmatprep.subr.bf16.mxu0 %v23778_v47  ;;  %19886 = vmatprep.subr.bf16.mxu1 %v23778_v47 }
0x169f   : > { %19632 = vmatprep.mubr.msk.bf16.mxu0 %vm3198_vm1, %v21471_v22  ;;  %19808 = vmatprep.mubr.msk.bf16.mxu1 %vm3198_vm1, %v21472_v28  ;;  %v21528_v22 = vld [vmem:[%s25947_s16 + $0x208] sm:$0xff]   ;;  %v21529_v28 = vld [vmem:[%s25947_s16 + $0x210] sm:$0xff]  }
0x16a1   : > { %19663 = vmatpush3.bf16.msra.mxu0 %v23778_v47  ;;  %19887 = vmatpush3.bf16.msra.mxu1 %v23778_v47 }
0x16a2   : > { %19968 = vmatprep.subr.bf16.mxu1 %v23770_v5  ;;  %19696 = vmatprep.subr.bf16.mxu0 %v21555_v25 }
0x16a4   : > { %19633 = vmatmul.mubr.msk.bf16.gmra.mrb[188].mxu0 %vm3198_vm1, %v21473_v12  ;;  %19809 = vmatmul.mubr.msk.bf16.gmra.mrb[20].mxu1 %vm3198_vm1, %v21474_v26  ;;  %v21564_v12 = vld [vmem:[%s25948_s17 + $0x58] sm:$0xff]  }
0x16a5   : > { %19636 = vmatprep.mubr.msk.bf16.mxu0 %vm3198_vm1, %v21475_v63  ;;  %19812 = vmatprep.mubr.msk.bf16.mxu1 %vm3198_vm1, %v21476_v29  ;;  %v21530_v26 = vld [vmem:[%s25947_s16 + $0x218] sm:$0xff]   ;;  %v21531_v63 = vld [vmem:[%s25947_s16 + $0x220] sm:$0xff]  }
0x16a6   : > { %v21567_v29 = vld [vmem:[%s25948_s17 + $0x60] sm:$0xff]  }
0x16ac   : > { %19637 = vmatmul.mubr.msk.bf16.gmra.mrb[192].mxu0 %vm3198_vm1, %v21477_v34  ;;  %19813 = vmatmul.mubr.msk.bf16.gmra.mrb[24].mxu1 %vm3198_vm1, %v21478_v52  ;;  %v21532_v34 = vld [vmem:[%s25947_s16 + $0x228] sm:$0xff]   ;;  %v21533_v52 = vld [vmem:[%s25947_s16 + $0x230] sm:$0xff]  }
0x16ad   : > { %19640 = vmatprep.mubr.msk.bf16.mxu0 %vm3198_vm1, %v21479_v58  ;;  %19816 = vmatprep.mubr.msk.bf16.mxu1 %vm3198_vm1, %v21480_v60  ;;  %v21568_v58 = vld [vmem:[%s25948_s17 + $0x68] sm:$0xff]   ;;  %v21571_v60 = vld [vmem:[%s25948_s17 + $0x70] sm:$0xff]  }
0x16b4   : > { %19641 = vmatmul.mubr.msk.bf16.gmra.mrb[196].mxu0 %vm3198_vm1, %v21481_v61  ;;  %19817 = vmatmul.mubr.msk.bf16.gmra.mrb[28].mxu1 %vm3198_vm1, %v21482_v0  ;;  %v21534_v61 = vld [vmem:[%s25947_s16 + $0x238] sm:$0xff]   ;;  %v21535_v0 = vld [vmem:[%s25947_s16 + $0x240] sm:$0xff]  }
0x16b5   : > { %19644 = vmatprep.mubr.msk.bf16.mxu0 %vm3198_vm1, %v21483_v2  ;;  %19820 = vmatprep.mubr.msk.bf16.mxu1 %vm3198_vm1, %v21484_v33  ;;  %v21572_v2 = vld [vmem:[%s25948_s17 + $0x78] sm:$0xff]   ;;  %v21536_v33 = vld [vmem:[%s25947_s16 + $0x248] sm:$0xff]  }
0x16bc   : > { %19645 = vmatmul.mubr.msk.bf16.gmra.mrb[200].mxu0 %vm3198_vm1, %v21485_v40  ;;  %19821 = vmatmul.mubr.msk.bf16.gmra.mrb[32].mxu1 %vm3198_vm1, %v21486_v46  ;;  %v21537_v40 = vld [vmem:[%s25947_s16 + $0x250] sm:$0xff]   ;;  %v21538_v46 = vld [vmem:[%s25947_s16 + $0x258] sm:$0xff]  }
0x16bd   : > { %19648 = vmatprep.mubr.msk.bf16.mxu0 %vm3198_vm1, %v21487_v38  ;;  %19824 = vmatprep.mubr.msk.bf16.mxu1 %vm3198_vm1, %v21488_v42  ;;  %v21539_v38 = vld [vmem:[%s25947_s16 + $0x260] sm:$0xff]  }
0x16be   : > { %v24152_v42 = vld [vmem:[%s25948_s17] sm:$0xff]  }
0x16c4   : > { %19649 = vmatmul.mubr.msk.bf16.gmra.mrb[204].mxu0 %vm3198_vm1, %v21489_v45  ;;  %19825 = vmatmul.mubr.msk.bf16.gmra.mrb[36].mxu1 %vm3198_vm1, %v21490_v44  ;;  %v21540_v45 = vld [vmem:[%s25947_s16 + $0x268] sm:$0xff]   ;;  %v21541_v44 = vld [vmem:[%s25947_s16 + $0x270] sm:$0xff]  }
0x16c5   : > { %19652 = vmatprep.mubr.msk.bf16.mxu0 %vm3198_vm1, %v21491_v49  ;;  %19828 = vmatprep.mubr.msk.bf16.mxu1 %vm3198_vm1, %v21492_v9  ;;  %v21542_v49 = vld [vmem:[%s25947_s16 + $0x278] sm:$0xff]   ;;  %v21543_v9 = vld [vmem:[%s25947_s16 + $0x280] sm:$0xff]  }
0x16cc   : > { %19653 = vmatmul.mubr.msk.bf16.gmra.mrb[208].mxu0 %vm3198_vm1, %v21493_v10  ;;  %19829 = vmatmul.mubr.msk.bf16.gmra.mrb[40].mxu1 %vm3198_vm1, %v21494_v16  ;;  %v21544_v10 = vld [vmem:[%s25947_s16 + $0x288] sm:$0xff]   ;;  %v21545_v16 = vld [vmem:[%s25947_s16 + $0x290] sm:$0xff]  }
0x16cd   : > { %19664 = vmatprep.mubr.msk.bf16.mxu0 %vm3198_vm1, %v21495_v62  ;;  %19888 = vmatprep.mubr.msk.bf16.mxu1 %vm3198_vm1, %v21496_v35  ;;  %v21546_v62 = vld [vmem:[%s25947_s16 + $0x298] sm:$0xff]   ;;  %v21547_v35 = vld [vmem:[%s25947_s16 + $0x2a0] sm:$0xff]  }
0x16d4   : > { %19665 = vmatmul.mubr.msk.bf16.vlgmr.msra.gmra.mrb[212].mxu0 %vm3198_vm1, %v21497_v41  ;;  %19889 = vmatmul.mubr.msk.bf16.vlgmr.msra.gmra.mrb[44].mxu1 %vm3198_vm1, %v21498_v48  ;;  %v21548_v41 = vld [vmem:[%s25947_s16 + $0x2a8] sm:$0xff]   ;;  %v21549_v48 = vld [vmem:[%s25947_s16 + $0x2b0] sm:$0xff]  }
0x16d5   : > { %19969 = vmatpush3.bf16.msra.mxu1 %v23770_v5  ;;  %19668 = vmatprep.mubr.msk.bf16.mxu0 %vm3198_vm1, %v21499_v39 }
0x16d6   : > { %19970 = vmatprep.subr.bf16.mxu1 %v23768_v17  ;;  %19892 = vmatprep.mubr.msk.bf16.mxu1 %vm3198_vm1, %v21500_v43  ;;  %v21550_v43 = vld [vmem:[%s25947_s16 + $0x2b8] sm:$0xff]  }
0x16d7   : > { %19697 = vmatpush3.bf16.msra.mxu0 %v21555_v25 }
0x16d8   : > { %19698 = vmatprep.subr.bf16.mxu0 %v21558_v30 }
0x16d9   : > { %19971 = vmatpush3.bf16.msra.mxu1 %v23768_v17 }
0x16da   : > { %19972 = vmatprep.subr.bf16.mxu1 %v23782_v56 }
0x16db   : > { %19699 = vmatpush3.bf16.msra.mxu0 %v21558_v30  ;;  %v21559_v30 = vld [vmem:[%s25947_s16 + $0x2f0] sm:$0xff]  }
0x16dc   : > { %19669 = vmatmul.mubr.msk.bf16.gmra.mrb[216].mxu0 %vm3198_vm1, %v21501_v50  ;;  %19893 = vmatmul.mubr.msk.bf16.gmra.mrb[48].mxu1 %vm3198_vm1, %v21502_v54  ;;  %v21551_v54 = vld [vmem:[%s25947_s16 + $0x2c0] sm:$0xff]  }
0x16dd   : > { %19973 = vmatpush3.bf16.msra.mxu1 %v23782_v56  ;;  %19672 = vmatprep.mubr.msk.bf16.mxu0 %vm3198_vm1, %v21503_v1 }
0x16de   : > { %19974 = vmatprep.subr.bf16.mxu1 %v23778_v47  ;;  %19896 = vmatprep.mubr.msk.bf16.mxu1 %vm3198_vm1, %v21504_v36 }
0x16df   : > { %19700 = vmatprep.subr.bf16.mxu0 %v21561_v21 }
0x16e0   : > { %19701 = vmatpush3.bf16.msra.mxu0 %v21561_v21 }
0x16e1   : > { %19975 = vmatpush3.bf16.msra.mxu1 %v23778_v47  ;;  %19702 = vmatprep.subr.bf16.mxu0 %v21564_v12 }
0x16e2   : > { %20056 = vmatprep.subr.bf16.mxu1 %v23770_v5 }
0x16e4   : > { %19673 = vmatmul.mubr.msk.bf16.gmra.mrb[220].mxu0 %vm3198_vm1, %v21505_v4  ;;  %19897 = vmatmul.mubr.msk.bf16.gmra.mrb[52].mxu1 %vm3198_vm1, %v21506_v6 }
0x16e5   : > { %19676 = vmatprep.mubr.msk.bf16.mxu0 %vm3198_vm1, %v21507_v8  ;;  %19900 = vmatprep.mubr.msk.bf16.mxu1 %vm3198_vm1, %v21508_v53  ;;  %v21552_v53 = vld [vmem:[%s25947_s16 + $0x2c8] sm:$0xff]  }
0x16e6   : > { %19703 = vmatpush3.bf16.msra.mxu0 %v21564_v12 }
0x16e7   : > { %19704 = vmatprep.subr.bf16.mxu0 %v21567_v29 }
0x16ea   : > { %19705 = vmatpush3.bf16.msra.mxu0 %v21567_v29 }
0x16eb   : > { %19706 = vmatprep.subr.bf16.mxu0 %v21568_v58 }
0x16ec   : > { %19677 = vmatmul.mubr.msk.bf16.gmra.mrb[224].mxu0 %vm3198_vm1, %v21509_v59  ;;  %19901 = vmatmul.mubr.msk.bf16.gmra.mrb[56].mxu1 %vm3198_vm1, %v21510_v51  ;;  %v21553_v51 = vld [vmem:[%s25947_s16 + $0x2d0] sm:$0xff]  }
0x16ed   : > { %19680 = vmatprep.mubr.msk.bf16.mxu0 %vm3198_vm1, %v21511_v3  ;;  %19904 = vmatprep.mubr.msk.bf16.mxu1 %vm3198_vm1, %v21512_v15 }
0x16ee   : > { %19707 = vmatpush3.bf16.msra.mxu0 %v21568_v58 }
0x16ef   : > { %19708 = vmatprep.subr.bf16.mxu0 %v21571_v60 }
0x16f2   : > { %19709 = vmatpush3.bf16.msra.mxu0 %v21571_v60  ;;  %v21563_v60 = vld [vmem:[%s25947_s16 + $0x308] sm:$0xff]  }
0x16f3   : > { %19710 = vmatprep.subr.bf16.mxu0 %v21572_v2 }
0x16f4   : > { %19681 = vmatmul.mubr.msk.bf16.gmra.mrb[228].mxu0 %vm3198_vm1, %v21513_v13  ;;  %19905 = vmatmul.mubr.msk.bf16.gmra.mrb[60].mxu1 %vm3198_vm1, %v21514_v14 }
0x16f5   : > { %19684 = vmatprep.mubr.msk.bf16.mxu0 %vm3198_vm1, %v21515_v20  ;;  %19908 = vmatprep.mubr.msk.bf16.mxu1 %vm3198_vm1, %v21516_v23  ;;  %v21554_v23 = vld [vmem:[%s25947_s16 + $0x2d8] sm:$0xff]  }
0x16f6   : > { %19711 = vmatpush3.bf16.msra.mxu0 %v21572_v2 }
0x16f7   : > { %19744 = vmatprep.subr.bf16.mxu0 %v24152_v42 }
0x16fc   : > { %19685 = vmatmul.mubr.msk.bf16.gmra.mrb[232].mxu0 %vm3198_vm1, %v21517_v24  ;;  %19909 = vmatmul.mubr.msk.bf16.gmra.mrb[64].mxu1 %vm3198_vm1, %v21518_v37  ;;  %v21556_v37 = vld [vmem:[%s25947_s16 + $0x2e0] sm:$0xff]  }
0x16fd   : > { %19688 = vmatprep.mubr.msk.bf16.mxu0 %vm3198_vm1, %v21519_v7  ;;  %19912 = vmatprep.mubr.msk.bf16.mxu1 %vm3198_vm1, %v21520_v19 }
0x1704   : > { %19689 = vmatmul.mubr.msk.bf16.gmra.mrb[236].mxu0 %vm3198_vm1, %v21521_v27  ;;  %19913 = vmatmul.mubr.msk.bf16.gmra.mrb[68].mxu1 %vm3198_vm1, %v21522_v57 }
0x1705   : > { %19692 = vmatprep.mubr.msk.bf16.mxu0 %vm3198_vm1, %v21523_v32  ;;  %19916 = vmatprep.mubr.msk.bf16.mxu1 %vm3198_vm1, %v21524_v55  ;;  %v21557_v32 = vld [vmem:[%s25947_s16 + $0x2e8] sm:$0xff]  }
0x170c   : > { %19693 = vmatmul.mubr.msk.bf16.gmra.mrb[240].mxu0 %vm3198_vm1, %v21525_v31  ;;  %19917 = vmatmul.mubr.msk.bf16.gmra.mrb[72].mxu1 %vm3198_vm1, %v21526_v11 }
0x170d   : > { %19976 = vmatprep.mubr.msk.bf16.mxu1 %vm3198_vm1, %v21527_v18 }
0x1714   : > { %19977 = vmatmul.mubr.msk.bf16.vlgmr.msra.gmra.mrb[76].mxu1 %vm3198_vm1, %v21528_v22 }
0x1715   : > { %20057 = vmatpush3.bf16.msra.mxu1 %v23770_v5  ;;  %19980 = vmatprep.mubr.msk.bf16.mxu1 %vm3198_vm1, %v21529_v28  ;;  %v21560_v28 = vld [vmem:[%s25947_s16 + $0x2f8] sm:$0xff]  }
0x1716   : > { %20058 = vmatprep.subr.bf16.mxu1 %v23768_v17 }
0x1719   : > { %20059 = vmatpush3.bf16.msra.mxu1 %v23768_v17 }
0x171a   : > { %20060 = vmatprep.subr.bf16.mxu1 %v23782_v56 }
0x171c   : > { %19981 = vmatmul.mubr.msk.bf16.gmra.mrb[80].mxu1 %vm3198_vm1, %v21530_v26  ;;  %v21562_v26 = vld [vmem:[%s25947_s16 + $0x300] sm:$0xff]  }
0x171d   : > { %20061 = vmatpush3.bf16.msra.mxu1 %v23782_v56  ;;  %19984 = vmatprep.mubr.msk.bf16.mxu1 %vm3198_vm1, %v21531_v63 }
0x171e   : > { %20062 = vmatprep.subr.bf16.mxu1 %v23778_v47 }
0x1721   : > { %20063 = vmatpush3.bf16.msra.mxu1 %v23778_v47 }
0x1722   : > { %20144 = vmatprep.subr.bf16.mxu1 %v23770_v5 }
0x1724   : > { %19985 = vmatmul.mubr.msk.bf16.gmra.mrb[84].mxu1 %vm3198_vm1, %v21532_v34 }
0x1725   : > { %19988 = vmatprep.mubr.msk.bf16.mxu1 %vm3198_vm1, %v21533_v52 }
0x172c   : > { %19989 = vmatmul.mubr.msk.bf16.gmra.mrb[88].mxu1 %vm3198_vm1, %v21534_v61 }
0x172d   : > { %19992 = vmatprep.mubr.msk.bf16.mxu1 %vm3198_vm1, %v21535_v0  ;;  %v21565_v0 = vld [vmem:[%s25947_s16 + $0x310] sm:$0xff]  }
0x1734   : > { %19993 = vmatmul.mubr.msk.bf16.gmra.mrb[92].mxu1 %vm3198_vm1, %v21536_v33 }
0x1735   : > { %19996 = vmatprep.mubr.msk.bf16.mxu1 %vm3198_vm1, %v21537_v40 }
0x173c   : > { %19997 = vmatmul.mubr.msk.bf16.gmra.mrb[96].mxu1 %vm3198_vm1, %v21538_v46 }
0x173d   : > { %20000 = vmatprep.mubr.msk.bf16.mxu1 %vm3198_vm1, %v21539_v38 }
0x1744   : > { %20001 = vmatmul.mubr.msk.bf16.gmra.mrb[100].mxu1 %vm3198_vm1, %v21540_v45  ;;  %v21566_v45 = vld [vmem:[%s25947_s16 + $0x318] sm:$0xff]  }
0x1745   : > { %20004 = vmatprep.mubr.msk.bf16.mxu1 %vm3198_vm1, %v21541_v44 }
0x174c   : > { %20005 = vmatmul.mubr.msk.bf16.gmra.mrb[104].mxu1 %vm3198_vm1, %v21542_v49 }
0x174d   : > { %20064 = vmatprep.mubr.msk.bf16.mxu1 %vm3198_vm1, %v21543_v9  ;;  %v21569_v9 = vld [vmem:[%s25947_s16 + $0x320] sm:$0xff]  }
0x1754   : > { %20065 = vmatmul.mubr.msk.bf16.vlgmr.msra.gmra.mrb[108].mxu1 %vm3198_vm1, %v21544_v10 }
0x1755   : > { %20145 = vmatpush3.bf16.msra.mxu1 %v23770_v5  ;;  %20068 = vmatprep.mubr.msk.bf16.mxu1 %vm3198_vm1, %v21545_v16 }
0x1756   : > { %20146 = vmatprep.subr.bf16.mxu1 %v23768_v17 }
0x1759   : > { %20147 = vmatpush3.bf16.msra.mxu1 %v23768_v17 }
0x175a   : > { %20148 = vmatprep.subr.bf16.mxu1 %v23782_v56 }
0x175c   : > { %20069 = vmatmul.mubr.msk.bf16.gmra.mrb[112].mxu1 %vm3198_vm1, %v21546_v62  ;;  %v21582_v62 = vld [vmem:[%s25948_s17 + $0x8] sm:$0xff]  }
0x175d   : > { %20149 = vmatpush3.bf16.msra.mxu1 %v23782_v56  ;;  %20072 = vmatprep.mubr.msk.bf16.mxu1 %vm3198_vm1, %v21547_v35 }
0x175e   : > { %20150 = vmatprep.subr.bf16.mxu1 %v23778_v47 }
0x1761   : > { %20151 = vmatpush3.bf16.msra.mxu1 %v23778_v47 }
0x1762   : > { %20232 = vmatprep.subr.bf16.mxu1 %v23770_v5 }
0x1764   : > { %20073 = vmatmul.mubr.msk.bf16.gmra.mrb[116].mxu1 %vm3198_vm1, %v21548_v41 }
0x1765   : > { %20076 = vmatprep.mubr.msk.bf16.mxu1 %vm3198_vm1, %v21549_v48  ;;  %v21570_v48 = vld [vmem:[%s25947_s16 + $0x328] sm:$0xff]  }
0x1767   : > { %v24203_v39 = vpop.f32.mrb[180].mxu0 }
0x1768   : > { %v24208_v50 = vpop.f32.mrb[181].mxu0 }
0x1769   : > { %v24213_v1 = vpop.f32.mrb[182].mxu0 }
0x176a   : > { %v24217_v4 = vpop.f32.mrb[183].mxu0 }
0x176c   : > { %20077 = vmatmul.mubr.msk.bf16.gmra.mrb[120].mxu1 %vm3198_vm1, %v21550_v43 }
0x176d   : > { %20080 = vmatprep.mubr.msk.bf16.mxu1 %vm3198_vm1, %v21551_v54  ;;  %v21573_v54 = vld [vmem:[%s25947_s16 + $0x330] sm:$0xff]  }
0x176f   : > { %v24223_v8 = vpop.f32.mrb[184].mxu0 }
0x1770   : > { %v24228_v59 = vpop.f32.mrb[185].mxu0 }
0x1771   : > { %v24233_v3 = vpop.f32.mrb[186].mxu0 }
0x1772   : > { %v24237_v13 = vpop.f32.mrb[187].mxu0 }
0x1774   : > { %20081 = vmatmul.mubr.msk.bf16.gmra.mrb[124].mxu1 %vm3198_vm1, %v21552_v53 }
0x1775   : > { %20084 = vmatprep.mubr.msk.bf16.mxu1 %vm3198_vm1, %v21553_v51 }
0x1777   : > { %v24243_v20 = vpop.f32.mrb[188].mxu0 }
0x1778   : > { %v24248_v24 = vpop.f32.mrb[189].mxu0 }
0x1779   : > { %v24253_v7 = vpop.f32.mrb[190].mxu0 }
0x177a   : > { %v24257_v25 = vpop.f32.mrb[191].mxu0 }
0x177c   : > { %20085 = vmatmul.mubr.msk.bf16.gmra.mrb[128].mxu1 %vm3198_vm1, %v21554_v23 }
0x177d   : > { %20088 = vmatprep.mubr.msk.bf16.mxu1 %vm3198_vm1, %v21556_v37  ;;  %v24371_v37 = vpop.f32.mrb[12].mxu1 }
0x177f   : > { %v24263_v57 = vpop.f32.mrb[192].mxu0 }
0x1780   : > { %v24268_v55 = vpop.f32.mrb[193].mxu0 }
0x1781   : > { %v24273_v31 = vpop.f32.mrb[194].mxu0 }
0x1782   : > { %v24277_v18 = vpop.f32.mrb[195].mxu0 }
0x1784   : > { %20089 = vmatmul.mubr.msk.bf16.gmra.mrb[132].mxu1 %vm3198_vm1, %v21557_v32  ;;  %v24373_v32 = vpop.f32.mrb[13].mxu1 }
0x1785   : > { %20092 = vmatprep.mubr.msk.bf16.mxu1 %vm3198_vm1, %v21559_v30 }
0x1787   : > { %v24283_v22 = vpop.f32.mrb[196].mxu0 }
0x1788   : > { %v24288_v12 = vpop.f32.mrb[197].mxu0 }
0x1789   : > { %v24293_v63 = vpop.f32.mrb[198].mxu0 }
0x178a   : > { %v24297_v34 = vpop.f32.mrb[199].mxu0 }
0x178c   : > { %20093 = vmatmul.mubr.msk.bf16.gmra.mrb[136].mxu1 %vm3198_vm1, %v21560_v28  ;;  %v24375_v28 = vpop.f32.mrb[14].mxu1 }
0x178d   : > { %20152 = vmatprep.mubr.msk.bf16.mxu1 %vm3198_vm1, %v21562_v26 }
0x178f   : > { %v24303_v58 = vpop.f32.mrb[200].mxu0 }
0x1790   : > { %v24308_v61 = vpop.f32.mrb[201].mxu0 }
0x1791   : > { %v24313_v2 = vpop.f32.mrb[202].mxu0 }
0x1792   : > { %v24317_v40 = vpop.f32.mrb[203].mxu0 }
0x1794   : > { %20153 = vmatmul.mubr.msk.bf16.vlgmr.msra.gmra.mrb[140].mxu1 %vm3198_vm1, %v21563_v60  ;;  %v21574_v60 = vld [vmem:[%s25947_s16 + $0x338] sm:$0xff]  }
0x1795   : > { %20233 = vmatpush3.bf16.msra.mxu1 %v23770_v5  ;;  %20156 = vmatprep.mubr.msk.bf16.mxu1 %vm3198_vm1, %v21565_v0 }
0x1796   : > { %20234 = vmatprep.subr.bf16.mxu1 %v23768_v17 }
0x1797   : > { %v24325_v38 = vpop.f32.mrb[204].mxu0 }
0x1798   : > { %v24330_v44 = vpop.f32.mrb[205].mxu0 }
0x1799   : > { %20235 = vmatpush3.bf16.msra.mxu1 %v23768_v17  ;;  %v24333_v49 = vpop.f32.mrb[206].mxu0 }
0x179a   : > { %20236 = vmatprep.subr.bf16.mxu1 %v23782_v56  ;;  %v24341_v16 = vpop.f32.mrb[207].mxu0 }
0x179c   : > { %20157 = vmatmul.mubr.msk.bf16.gmra.mrb[144].mxu1 %vm3198_vm1, %v21566_v45  ;;  %v24382_v45 = vpop.f32.mrb[15].mxu1 }
0x179d   : > { %20237 = vmatpush3.bf16.msra.mxu1 %v23782_v56  ;;  %20160 = vmatprep.mubr.msk.bf16.mxu1 %vm3198_vm1, %v21569_v9  ;;  %v24394_v0 = vpop.f32.mrb[16].mxu1 }
0x179e   : > { %20238 = vmatprep.subr.bf16.mxu1 %v23778_v47  ;;  %v24396_v33 = vpop.f32.mrb[17].mxu1 }
0x179f   : > { %v24349_v35 = vpop.f32.mrb[208].mxu0 }
0x17a0   : > { %v24351_v41 = vpop.f32.mrb[209].mxu0 }
0x17a1   : > { %20239 = vmatpush3.bf16.msra.mxu1 %v23778_v47  ;;  %v24357_v43 = vpop.f32.mrb[210].mxu0 }
0x17a2   : > { %20320 = vmatprep.subr.bf16.mxu1 %v23770_v5  ;;  %v24365_v51 = vpop.f32.mrb[211].mxu0 }
0x17a4   : > { %20161 = vmatmul.mubr.msk.bf16.gmra.mrb[148].mxu1 %vm3198_vm1, %v21570_v48  ;;  %v21575_v48 = vld [vmem:[%s25947_s16 + $0x340] sm:$0xff]  }
0x17a5   : > { %20164 = vmatprep.mubr.msk.bf16.mxu1 %vm3198_vm1, %v21573_v54 }
0x17a7   : > { %v19666_v30 = vpop.f32.mrb[212].mxu0 }
0x17a8   : > { %v10269_v26 = vpop.f32.mrb[213].mxu0 }
0x17a9   : > { %v19667_v9 = vpop.f32.mrb[214].mxu0 }
0x17aa   : > { %v10397_v53 = vpack.c.bf16 %v19667_v9, %v19666_v30  ;;  %v10272_v23 = vpop.f32.mrb[215].mxu0  ;;  %v24399_v30 = vpop.f32.mrb[18].mxu1 }
0x17ab   : > { %v10396_v10 = vpack.c.bf16 %v10272_v23, %v10269_v26  ;;  %v21576_v26 = vld [vmem:[%s25947_s16 + $0x348] sm:$0xff]  }
0x17ac   : > { %20165 = vmatmul.mubr.msk.bf16.gmra.mrb[152].mxu1 %vm3198_vm1, %v21574_v60  ;;  %v24409_v60 = vpop.f32.mrb[19].mxu1 }
0x17ad   : > { %19712 = vmatprep.mubr.bf16.mxu0 %v10396_v10  ;;  %20168 = vmatprep.mubr.msk.bf16.mxu1 %vm3198_vm1, %v21575_v48  ;;  %v21585_v10 = vld [vmem:[%s25948_s17 + $0x10] sm:$0xff]   ;;  %v24421_v11 = vpop.f32.mrb[20].mxu1 }
0x17ae   : > { %19713 = vmatmul.mubr.bf16.vlgmr.msra.gmra.mrb[244].mxu0 %v10397_v53  ;;  %v21588_v53 = vld [vmem:[%s25948_s17 + $0x18] sm:$0xff]   ;;  %26044 = vst [vmem:[#allocation18_spill] sm:$0xff] %v24421_v11  ;;  %v24423_v21 = vpop.f32.mrb[21].mxu1 }
0x17af   : > { %v19670_v46 = vpop.f32.mrb[216].mxu0  ;;  %19745 = vmatpush3.bf16.msra.mxu0 %v24152_v42  ;;  %v21577_v42 = vld [vmem:[%s25947_s16 + $0x350] sm:$0xff]  }
0x17b0   : > { %v10285_v23 = vpop.f32.mrb[217].mxu0  ;;  %19746 = vmatprep.subr.bf16.mxu0 %v21582_v62 }
0x17b1   : > { %v19671_v9 = vpop.f32.mrb[218].mxu0 }
0x17b2   : > { %v10399_v54 = vpack.c.bf16 %v19671_v9, %v19670_v46  ;;  %v10288_v29 = vpop.f32.mrb[219].mxu0  ;;  %v24425_v46 = vpop.f32.mrb[22].mxu1 }
0x17b3   : > { %v10398_v52 = vpack.c.bf16 %v10288_v29, %v10285_v23  ;;  %19747 = vmatpush3.bf16.msra.mxu0 %v21582_v62  ;;  %v21578_v62 = vld [vmem:[%s25947_s16 + $0x358] sm:$0xff]   ;;  %v21590_v23 = vld [vmem:[%s25948_s17 + $0x28] sm:$0xff]  }
0x17b4   : > { %20169 = vmatmul.mubr.msk.bf16.gmra.mrb[156].mxu1 %vm3198_vm1, %v21576_v26  ;;  %19748 = vmatprep.subr.bf16.mxu0 %v21585_v10 }
0x17b5   : > { %19716 = vmatprep.mubr.bf16.mxu0 %v10398_v52  ;;  %20172 = vmatprep.mubr.msk.bf16.mxu1 %vm3198_vm1, %v21577_v42  ;;  %v21589_v52 = vld [vmem:[%s25948_s17 + $0x20] sm:$0xff]  }
0x17b6   : > { %19717 = vmatmul.mubr.bf16.gmra.mrb[248].mxu0 %v10399_v54  ;;  %v24435_v54 = vpop.f32.mrb[23].mxu1 }
0x17b7   : > { %v19674_v48 = vpop.f32.mrb[220].mxu0  ;;  %19749 = vmatpush3.bf16.msra.mxu0 %v21585_v10  ;;  %v21580_v10 = vld [vmem:[%s25947_s16 + $0x360] sm:$0xff]   ;;  %v24447_v15 = vpop.f32.mrb[24].mxu1 }
0x17b8   : > { %v10301_v29 = vpop.f32.mrb[221].mxu0  ;;  %19750 = vmatprep.subr.bf16.mxu0 %v21588_v53  ;;  %26045 = vst [vmem:[#allocation19_spill] sm:$0xff] %v24447_v15  ;;  %v24449_v14 = vpop.f32.mrb[25].mxu1 }
0x17b9   : > { %v19675_v26 = vpop.f32.mrb[222].mxu0  ;;  %26046 = vst [vmem:[#allocation20_spill] sm:$0xff] %v24449_v14 }
0x17ba   : > { %v10401_v42 = vpack.c.bf16 %v19675_v26, %v19674_v48  ;;  %v10304_v19 = vpop.f32.mrb[223].mxu0  ;;  %v24451_v48 = vpop.f32.mrb[26].mxu1 }
0x17bb   : > { %v10400_v27 = vpack.c.bf16 %v10304_v19, %v10301_v29  ;;  %19751 = vmatpush3.bf16.msra.mxu0 %v21588_v53  ;;  %26047 = vst [vmem:[#allocation21_spill] sm:$0xff] %v24451_v48  ;;  %v21581_v53 = vld [vmem:[%s25947_s16 + $0x368] sm:$0xff]   ;;  %v21592_v29 = vld [vmem:[%s25948_s17 + $0x38] sm:$0xff]  }
0x17bc   : > { %20173 = vmatmul.mubr.msk.bf16.gmra.mrb[160].mxu1 %vm3198_vm1, %v21578_v62  ;;  %19752 = vmatprep.subr.bf16.mxu0 %v21589_v52  ;;  %v24461_v62 = vpop.f32.mrb[27].mxu1 }
0x17bd   : > { %19720 = vmatprep.mubr.bf16.mxu0 %v10400_v27  ;;  %20176 = vmatprep.mubr.msk.bf16.mxu1 %vm3198_vm1, %v21580_v10  ;;  %v21591_v27 = vld [vmem:[%s25948_s17 + $0x30] sm:$0xff]   ;;  %26048 = vst [vmem:[#allocation22_spill] sm:$0xff] %v24461_v62  ;;  %v24473_v15 = vpop.f32.mrb[28].mxu1 }
0x17be   : > { %19721 = vmatmul.mubr.bf16.gmra.mrb[252].mxu0 %v10401_v42  ;;  %26049 = vst [vmem:[#allocation23_spill] sm:$0xff] %v24473_v15  ;;  %v24475_v48 = vpop.f32.mrb[29].mxu1 }
0x17bf   : > { %v19678_v9 = vpop.f32.mrb[224].mxu0  ;;  %19753 = vmatpush3.bf16.msra.mxu0 %v21589_v52  ;;  %v21583_v52 = vld [vmem:[%s25947_s16 + $0x370] sm:$0xff]   ;;  %26050 = vst [vmem:[#allocation24_spill] sm:$0xff] %v24475_v48 }
0x17c0   : > { %v10317_v19 = vpop.f32.mrb[225].mxu0  ;;  %19754 = vmatprep.subr.bf16.mxu0 %v21590_v23 }
0x17c1   : > { %v19679_v26 = vpop.f32.mrb[226].mxu0 }
0x17c2   : > { %v10403_v42 = vpack.c.bf16 %v19679_v26, %v19678_v9  ;;  %v10320_v36 = vpop.f32.mrb[227].mxu0  ;;  %v24477_v9 = vpop.f32.mrb[30].mxu1 }
0x17c3   : > { %v10402_v6 = vpack.c.bf16 %v10320_v36, %v10317_v19  ;;  %19755 = vmatpush3.bf16.msra.mxu0 %v21590_v23  ;;  %26051 = vst [vmem:[#allocation25_spill] sm:$0xff] %v24477_v9  ;;  %v21584_v23 = vld [vmem:[%s25947_s16 + $0x378] sm:$0xff]  }
0x17c4   : > { %20177 = vmatmul.mubr.msk.bf16.gmra.mrb[164].mxu1 %vm3198_vm1, %v21581_v53  ;;  %19756 = vmatprep.subr.bf16.mxu0 %v21591_v27  ;;  %v24489_v53 = vpop.f32.mrb[31].mxu1 }
0x17c5   : > { %19724 = vmatprep.mubr.bf16.mxu0 %v10402_v6  ;;  %20180 = vmatprep.mubr.msk.bf16.mxu1 %vm3198_vm1, %v21583_v52  ;;  %v24485_v6 = vld [vmem:[%s25948_s17 + $0x80] sm:$0xff]   ;;  %v24499_v19 = vpop.f32.mrb[32].mxu1 }
0x17c6   : > { %19725 = vmatmul.mubr.bf16.gmra.mrb[0].mxu0 %v10403_v42  ;;  %26052 = vst [vmem:[#allocation26_spill] sm:$0xff] %v24499_v19  ;;  %v24501_v15 = vpop.f32.mrb[33].mxu1 }
0x17c7   : > { %v19682_v10 = vpop.f32.mrb[228].mxu0  ;;  %19757 = vmatpush3.bf16.msra.mxu0 %v21591_v27  ;;  %v21586_v27 = vld [vmem:[%s25947_s16 + $0x380] sm:$0xff]   ;;  %v24503_v11 = vpop.f32.mrb[34].mxu1 }
0x17c8   : > { %v10333_v36 = vpop.f32.mrb[229].mxu0  ;;  %19758 = vmatprep.subr.bf16.mxu0 %v21592_v29  ;;  %26053 = vst [vmem:[#allocation27_spill] sm:$0xff] %v24503_v11 }
0x17c9   : > { %v19683_v26 = vpop.f32.mrb[230].mxu0 }
0x17ca   : > { %v10405_v42 = vpack.c.bf16 %v19683_v26, %v19682_v10  ;;  %v10336_v14 = vpop.f32.mrb[231].mxu0  ;;  %v24510_v10 = vpop.f32.mrb[35].mxu1 }
0x17cb   : > { %v10404_v62 = vpack.c.bf16 %v10336_v14, %v10333_v36  ;;  %19759 = vmatpush3.bf16.msra.mxu0 %v21592_v29  ;;  %v21587_v14 = vld [vmem:[%s25947_s16 + $0x388] sm:$0xff]  }
0x17cc   : > { %20181 = vmatmul.mubr.msk.bf16.gmra.mrb[168].mxu1 %vm3198_vm1, %v21584_v23  ;;  %19832 = vmatprep.subr.bf16.mxu0 %v24485_v6 }
0x17cd   : > { %19728 = vmatprep.mubr.bf16.mxu0 %v10404_v62  ;;  %20240 = vmatprep.mubr.msk.bf16.mxu1 %vm3198_vm1, %v21586_v27 }
0x17ce   : > { %19729 = vmatmul.mubr.bf16.gmra.mrb[4].mxu0 %v10405_v42  ;;  %v24516_v42 = vpop.f32.mrb[36].mxu1 }
0x17cf   : > { %v19686_v9 = vpop.f32.mrb[232].mxu0  ;;  %26054 = vst [vmem:[#allocation28_spill] sm:$0xff] %v24516_v42  ;;  %v24519_v29 = vpop.f32.mrb[37].mxu1 }
0x17d0   : > { %v10349_v52 = vpop.f32.mrb[233].mxu0  ;;  %v24521_v11 = vpop.f32.mrb[38].mxu1 }
0x17d1   : > { %v19687_v62 = vpop.f32.mrb[234].mxu0  ;;  %26055 = vst [vmem:[#allocation29_spill] sm:$0xff] %v24521_v11 }
0x17d2   : > { %v10407_v23 = vpack.c.bf16 %v19687_v62, %v19686_v9  ;;  %v10352_v26 = vpop.f32.mrb[235].mxu0 }
0x17d3   : > { %v10406_v27 = vpack.c.bf16 %v10352_v26, %v10349_v52  ;;  %v24525_v52 = vpop.f32.mrb[39].mxu1 }
0x17d4   : > { %20241 = vmatmul.mubr.msk.bf16.vlgmr.msra.gmra.mrb[172].mxu1 %vm3198_vm1, %v21587_v14 }
0x17d5   : > { %20321 = vmatpush3.bf16.msra.mxu1 %v23770_v5  ;;  %19732 = vmatprep.mubr.bf16.mxu0 %v10406_v27  ;;  %v24532_v27 = vpop.f32.mrb[40].mxu1 }
0x17d6   : > { %20322 = vmatprep.subr.bf16.mxu1 %v23768_v17  ;;  %19733 = vmatmul.mubr.bf16.gmra.mrb[8].mxu0 %v10407_v23  ;;  %26056 = vst [vmem:[#allocation30_spill] sm:$0xff] %v24532_v27  ;;  %v24535_v9 = vpop.f32.mrb[41].mxu1 }
0x17d7   : > { %v19690_v19 = vpop.f32.mrb[236].mxu0  ;;  %v24537_v36 = vpop.f32.mrb[42].mxu1 }
0x17d8   : > { %v10365_v48 = vpop.f32.mrb[237].mxu0  ;;  %26057 = vst [vmem:[#allocation31_spill] sm:$0xff] %v24537_v36 }
0x17d9   : > { %20323 = vmatpush3.bf16.msra.mxu1 %v23768_v17  ;;  %v19691_v5 = vpop.f32.mrb[238].mxu0 }
0x17da   : > { %v10409_v62 = vpack.c.bf16 %v19691_v5, %v19690_v19  ;;  %20324 = vmatprep.subr.bf16.mxu1 %v23782_v56  ;;  %v10368_v23 = vpop.f32.mrb[239].mxu0  ;;  %v24541_v5 = vpop.f32.mrb[43].mxu1  ;;  %v26058_v19 = vpack.c.bf16 %v24217_v4, %v24208_v50  ;;  %v26059_v50 = vpack.c.bf16 %v24213_v1, %v24203_v39 }
0x17db   : > { %v10408_v26 = vpack.c.bf16 %v10368_v23, %v10365_v48  ;;  %v24546_v14 = vpop.f32.mrb[44].mxu1 }
0x17dc   : > { %v24548_v11 = vpop.f32.mrb[45].mxu1 }
0x17dd   : > { %20325 = vmatpush3.bf16.msra.mxu1 %v23782_v56  ;;  %19736 = vmatprep.mubr.bf16.mxu0 %v10408_v26  ;;  %v24553_v27 = vpop.f32.mrb[46].mxu1 }
0x17de   : > { %20326 = vmatprep.subr.bf16.mxu1 %v23778_v47  ;;  %19737 = vmatmul.mubr.bf16.gmra.mrb[12].mxu0 %v10409_v62  ;;  %v24557_v36 = vpop.f32.mrb[47].mxu1 }
0x17df   : > { %v19694_v17 = vpop.f32.mrb[240].mxu0 }
0x17e0   : > { %v10381_v42 = vpop.f32.mrb[241].mxu0 }
0x17e1   : > { %20327 = vmatpush3.bf16.msra.mxu1 %v23778_v47  ;;  %v19695_v56 = vpop.f32.mrb[242].mxu0 }
0x17e2   : > { %v10411_v23 = vpack.c.bf16 %v19695_v56, %v19694_v17  ;;  %v10384_v26 = vpop.f32.mrb[243].mxu0  ;;  %v21594_v17 = vld [vmem:[%s25948_s17 + $0x88] sm:$0xff]   ;;  %v24564_v56 = vpop.f32.mrb[48].mxu1 }
0x17e3   : > { %v10410_v62 = vpack.c.bf16 %v10384_v26, %v10381_v42  ;;  %v24569_v4 = vpop.f32.mrb[49].mxu1  ;;  %v21595_v26 = vld [vmem:[%s25948_s17 + $0x90] sm:$0xff]  }
0x17e5   : > { %19740 = vmatprep.mubr.bf16.mxu0 %v10410_v62 }
0x17e6   : > { %19741 = vmatmul.mubr.bf16.gmra.mrb[16].mxu0 %v10411_v23  ;;  %v24575_v23 = vpop.f32.mrb[50].mxu1 }
0x17e7   : > { %19760 = vmatprep.mubr.bf16.mxu0 %v26058_v19  ;;  %v26060_v19 = vpack.c.bf16 %v24237_v13, %v24228_v59  ;;  %v24582_v39 = vpop.f32.mrb[51].mxu1  ;;  %v21596_v59 = vld [vmem:[%s25948_s17 + $0x98] sm:$0xff]  }
0x17e8   : > { %v24589_v13 = vpop.f32.mrb[52].mxu1 }
0x17ee   : > { %19761 = vmatmul.mubr.bf16.vlgmr.msra.gmra.mrb[244].mxu0 %v26059_v50  ;;  %v24594_v50 = vpop.f32.mrb[53].mxu1 }
0x17ef   : > { %19764 = vmatprep.mubr.bf16.mxu0 %v26060_v19  ;;  %19833 = vmatpush3.bf16.msra.mxu0 %v24485_v6  ;;  %v26061_v6 = vpack.c.bf16 %v24233_v3, %v24223_v8  ;;  %v26062_v19 = vpack.c.bf16 %v24257_v25, %v24248_v24  ;;  %v24599_v62 = vpop.f32.mrb[54].mxu1  ;;  %v21598_v3 = vld [vmem:[%s25948_s17 + $0xa8] sm:$0xff]   ;;  %v26063_v25 = vpack.c.bf16 %v24253_v7, %v24243_v20  ;;  %v21600_v7 = vld [vmem:[%s25948_s17 + $0xb8] sm:$0xff]  }
0x17f0   : > { %19834 = vmatprep.subr.bf16.mxu0 %v21594_v17  ;;  %v24606_v47 = vpop.f32.mrb[55].mxu1 }
0x17f1   : > { %v24613_v24 = vpop.f32.mrb[56].mxu1 }
0x17f3   : > { %19835 = vmatpush3.bf16.msra.mxu0 %v21594_v17  ;;  %v21597_v17 = vld [vmem:[%s25948_s17 + $0xa0] sm:$0xff]  }
0x17f4   : > { %19836 = vmatprep.subr.bf16.mxu0 %v21595_v26 }
0x17f6   : > { %19765 = vmatmul.mubr.bf16.gmra.mrb[248].mxu0 %v26061_v6  ;;  %v26064_v6 = vpack.c.bf16 %v24277_v18, %v24268_v55  ;;  %v26065_v18 = vpack.c.bf16 %v24273_v31, %v24263_v57 }
0x17f7   : > { %19768 = vmatprep.mubr.bf16.mxu0 %v26062_v19  ;;  %19837 = vmatpush3.bf16.msra.mxu0 %v21595_v26  ;;  %v24618_v26 = vpop.f32.mrb[57].mxu1 }
0x17f8   : > { %19838 = vmatprep.subr.bf16.mxu0 %v21596_v59  ;;  %v24623_v19 = vpop.f32.mrb[58].mxu1 }
0x17f9   : > { %v24630_v8 = vpop.f32.mrb[59].mxu1 }
0x17fa   : > { %v24637_v55 = vpop.f32.mrb[60].mxu1 }
0x17fb   : > { %19839 = vmatpush3.bf16.msra.mxu0 %v21596_v59  ;;  %v21599_v59 = vld [vmem:[%s25948_s17 + $0xb0] sm:$0xff]  }
0x17fc   : > { %19840 = vmatprep.subr.bf16.mxu0 %v21597_v17 }
0x17fe   : > { %19769 = vmatmul.mubr.bf16.gmra.mrb[252].mxu0 %v26063_v25  ;;  %v26066_v25 = vpack.c.bf16 %v24297_v34, %v24288_v12  ;;  %v26067_v12 = vpack.c.bf16 %v24293_v63, %v24283_v22  ;;  %v26069_v22 = vpack.c.bf16 %v24313_v2, %v24303_v58  ;;  %v26072_v58 = vpack.c.bf16 %v24365_v51, %v24351_v41 }
0x17ff   : > { %19772 = vmatprep.mubr.bf16.mxu0 %v26064_v6  ;;  %19841 = vmatpush3.bf16.msra.mxu0 %v21597_v17  ;;  %v24642_v17 = vpop.f32.mrb[61].mxu1  ;;  %v26073_v41 = vpack.c.bf16 %v24357_v43, %v24349_v35  ;;  %v26076_v35 = vpack.c.bf16 %v24409_v60, %v24396_v33  ;;  %v21604_v33 = vld [vmem:[%s25948_s17 + $0xd8] sm:$0xff]  }
0x1800   : > { %19842 = vmatprep.subr.bf16.mxu0 %v21598_v3  ;;  %v24647_v6 = vpop.f32.mrb[62].mxu1 }
0x1801   : > { %v24654_v20 = vpop.f32.mrb[63].mxu1 }
0x1802   : > { %v24658_v31 = vpop.f32.mrb[64].mxu1 }
0x1803   : > { %19843 = vmatpush3.bf16.msra.mxu0 %v21598_v3  ;;  %v21601_v3 = vld [vmem:[%s25948_s17 + $0xc0] sm:$0xff]   ;;  %v24663_v34 = vpop.f32.mrb[65].mxu1 }
0x1804   : > { %19844 = vmatprep.subr.bf16.mxu0 %v21599_v59 }
0x1806   : > { %19773 = vmatmul.mubr.bf16.gmra.mrb[0].mxu0 %v26065_v18  ;;  %v24668_v18 = vpop.f32.mrb[66].mxu1 }
0x1807   : > { %19776 = vmatprep.mubr.bf16.mxu0 %v26066_v25  ;;  %19845 = vmatpush3.bf16.msra.mxu0 %v21599_v59  ;;  %v26068_v59 = vpack.c.bf16 %v24317_v40, %v24308_v61  ;;  %v24672_v1 = vpop.f32.mrb[67].mxu1  ;;  %v21613_v61 = vld [vmem:[%s25947_s16 + $0x390] sm:$0xff]   ;;  %v21614_v40 = vld [vmem:[%s25947_s16 + $0x398] sm:$0xff]  }
0x1808   : > { %19846 = vmatprep.subr.bf16.mxu0 %v21600_v7  ;;  %v24676_v57 = vpop.f32.mrb[68].mxu1  ;;  %20244 = vmatprep.mubr.msk.bf16.mxu1 %vm3198_vm1, %v21613_v61  ;;  %v21618_v61 = vld [vmem:[%s25947_s16 + $0x3a8] sm:$0xff]  }
0x1809   : > { %v24681_v63 = vpop.f32.mrb[69].mxu1  ;;  %20245 = vmatmul.mubr.msk.bf16.gmra.mrb[176].mxu1 %vm3198_vm1, %v21614_v40 }
0x180b   : > { %19847 = vmatpush3.bf16.msra.mxu0 %v21600_v7  ;;  %v26085_v7 = vld [vmem:[#allocation20_spill] sm:$0xff] }
0x180c   : > { %19920 = vmatprep.subr.bf16.mxu0 %v21601_v3 }
0x180e   : > { %19777 = vmatmul.mubr.bf16.gmra.mrb[4].mxu0 %v26067_v12  ;;  %v26070_v12 = vpack.c.bf16 %v24341_v16, %v24330_v44  ;;  %v26071_v44 = vpack.c.bf16 %v24333_v49, %v24325_v38  ;;  %v26074_v38 = vpack.c.bf16 %v24382_v45, %v24373_v32  ;;  %v26075_v45 = vpack.c.bf16 %v24375_v28, %v24371_v37  ;;  %v21603_v37 = vld [vmem:[%s25948_s17 + $0xd0] sm:$0xff]  }
0x180f   : > { %19780 = vmatprep.mubr.bf16.mxu0 %v26068_v59  ;;  %v24692_v59 = vpop.f32.mrb[70].mxu1 }
0x1810   : > { %v24696_v2 = vpop.f32.mrb[71].mxu1 }
0x1811   : > { %v24702_v25 = vpop.f32.mrb[72].mxu1 }
0x1812   : > { %v24707_v16 = vpop.f32.mrb[73].mxu1 }
0x1813   : > { %v24718_v40 = vpop.f32.mrb[74].mxu1 }
0x1814   : > { %v24722_v49 = vpop.f32.mrb[75].mxu1 }
0x1816   : > { %19781 = vmatmul.mubr.bf16.gmra.mrb[8].mxu0 %v26069_v22  ;;  %v24728_v22 = vpop.f32.mrb[76].mxu1 }
0x1817   : > { %19784 = vmatprep.mubr.bf16.mxu0 %v26070_v12  ;;  %v21617_v12 = vld [vmem:[%s25947_s16 + $0x3a0] sm:$0xff]   ;;  %v24733_v51 = vpop.f32.mrb[77].mxu1 }
0x1818   : > { %20248 = vmatprep.mubr.msk.bf16.mxu1 %vm3198_vm1, %v21617_v12  ;;  %v21622_v12 = vld [vmem:[%s25947_s16 + $0x3b8] sm:$0xff]  }
0x1819   : > { %20249 = vmatmul.mubr.msk.bf16.gmra.mrb[180].mxu1 %vm3198_vm1, %v21618_v61  ;;  %v24744_v61 = vpop.f32.mrb[78].mxu1 }
0x181a   : > { %v24748_v43 = vpop.f32.mrb[79].mxu1 }
0x181b   : > { %v24757_v32 = vpop.f32.mrb[80].mxu1 }
0x181e   : > { %19785 = vmatmul.mubr.bf16.gmra.mrb[12].mxu0 %v26071_v44  ;;  %v21602_v44 = vld [vmem:[%s25948_s17 + $0xc8] sm:$0xff]  }
0x181f   : > { %19788 = vmatprep.mubr.bf16.mxu0 %v26072_v58  ;;  %v21621_v58 = vld [vmem:[%s25947_s16 + $0x3b0] sm:$0xff]  }
0x1820   : > { %20252 = vmatprep.mubr.msk.bf16.mxu1 %vm3198_vm1, %v21621_v58  ;;  %v21623_v58 = vld [vmem:[%s25947_s16 + $0x3c0] sm:$0xff]  }
0x1821   : > { %20253 = vmatmul.mubr.msk.bf16.gmra.mrb[184].mxu1 %vm3198_vm1, %v21622_v12  ;;  %v21624_v12 = vld [vmem:[%s25947_s16 + $0x3c8] sm:$0xff]  }
0x1822   : > { %20256 = vmatprep.mubr.msk.bf16.mxu1 %vm3198_vm1, %v21623_v58  ;;  %v21625_v58 = vld [vmem:[%s25947_s16 + $0x3d0] sm:$0xff]  }
0x1826   : > { %19789 = vmatmul.mubr.bf16.gmra.mrb[16].mxu0 %v26073_v41 }
0x1827   : > { %19848 = vmatprep.mubr.bf16.mxu0 %v26074_v38  ;;  %v24762_v38 = vpop.f32.mrb[81].mxu1 }
0x1828   : > { %v24773_v41 = vpop.f32.mrb[82].mxu1 }
0x1829   : > { %20257 = vmatmul.mubr.msk.bf16.gmra.mrb[188].mxu1 %vm3198_vm1, %v21624_v12  ;;  %v26079_v12 = vpack.c.bf16 %v24435_v54, %v24423_v21  ;;  %v21606_v21 = vld [vmem:[%s25948_s17 + $0xe8] sm:$0xff]  }
0x182a   : > { %20260 = vmatprep.mubr.msk.bf16.mxu1 %vm3198_vm1, %v21625_v58  ;;  %v21628_v58 = vld [vmem:[%s25947_s16 + $0x3e0] sm:$0xff]  }
0x182e   : > { %19849 = vmatmul.mubr.bf16.vlgmr.msra.gmra.mrb[244].mxu0 %v26075_v45  ;;  %v24780_v45 = vpop.f32.mrb[83].mxu1 }
0x182f   : > { %19852 = vmatprep.mubr.bf16.mxu0 %v26076_v35  ;;  %19921 = vmatpush3.bf16.msra.mxu0 %v21601_v3  ;;  %v24789_v60 = vpop.f32.mrb[84].mxu1  ;;  %v26078_v3 = vpack.c.bf16 %v24399_v30, %v24394_v0  ;;  %v21605_v0 = vld [vmem:[%s25948_s17 + $0xe0] sm:$0xff]  }
0x1830   : > { %19922 = vmatprep.subr.bf16.mxu0 %v21602_v44  ;;  %26077 = vst [vmem:[#allocation32_spill] sm:$0xff] %v24789_v60  ;;  %v24794_v35 = vpop.f32.mrb[85].mxu1 }
0x1831   : > { %v24805_v28 = vpop.f32.mrb[86].mxu1 }
0x1833   : > { %19923 = vmatpush3.bf16.msra.mxu0 %v21602_v44  ;;  %v21626_v44 = vld [vmem:[%s25947_s16 + $0x3d8] sm:$0xff]  }
0x1834   : > { %19924 = vmatprep.subr.bf16.mxu0 %v21603_v37  ;;  %20261 = vmatmul.mubr.msk.bf16.gmra.mrb[192].mxu1 %vm3198_vm1, %v21626_v44  ;;  %v26084_v44 = vld [vmem:[#allocation22_spill] sm:$0xff] }
0x1835   : > { %v26086_v42 = vpack.c.bf16 %v26084_v44, %v26085_v7  ;;  %20264 = vmatprep.mubr.msk.bf16.mxu1 %vm3198_vm1, %v21628_v58  ;;  %v26091_v44 = vld [vmem:[#allocation19_spill] sm:$0xff]  ;;  %v21631_v58 = vld [vmem:[%s25947_s16 + $0x3f0] sm:$0xff]  }
0x1836   : > { %19853 = vmatmul.mubr.bf16.gmra.mrb[248].mxu0 %v26078_v3  ;;  %v24812_v3 = vpop.f32.mrb[87].mxu1 }
0x1837   : > { %19856 = vmatprep.mubr.bf16.mxu0 %v26079_v12  ;;  %19925 = vmatpush3.bf16.msra.mxu0 %v21603_v37  ;;  %v24821_v54 = vpop.f32.mrb[88].mxu1  ;;  %v26081_v37 = vld [vmem:[#allocation18_spill] sm:$0xff] }
0x1838   : > { %19926 = vmatprep.subr.bf16.mxu0 %v21604_v33  ;;  %26080 = vst [vmem:[#allocation33_spill] sm:$0xff] %v24821_v54  ;;  %v26082_v12 = vpack.c.bf16 %v24425_v46, %v26081_v37  ;;  %v24826_v30 = vpop.f32.mrb[89].mxu1  ;;  %v21607_v46 = vld [vmem:[%s25948_s17 + $0xf0] sm:$0xff]  }
0x1839   : > { %26083 = vst [vmem:[#allocation18_spill] sm:$0xff] %v24826_v30  ;;  %v24837_v48 = vpop.f32.mrb[90].mxu1 }
0x183a   : > { %26087 = vst [vmem:[#allocation22_spill] sm:$0xff] %v24837_v48 }
0x183b   : > { %19927 = vmatpush3.bf16.msra.mxu0 %v21604_v33  ;;  %v21629_v33 = vld [vmem:[%s25947_s16 + $0x3e8] sm:$0xff]  }
0x183c   : > { %19928 = vmatprep.subr.bf16.mxu0 %v21605_v0  ;;  %20265 = vmatmul.mubr.msk.bf16.gmra.mrb[196].mxu1 %vm3198_vm1, %v21629_v33  ;;  %v26093_v33 = vld [vmem:[#allocation24_spill] sm:$0xff] }
0x183d   : > { %v26094_v60 = vpack.c.bf16 %v24489_v53, %v26093_v33  ;;  %20268 = vmatprep.mubr.msk.bf16.mxu1 %vm3198_vm1, %v21631_v58  ;;  %v21635_v58 = vld [vmem:[%s25947_s16 + $0x408] sm:$0xff]  }
0x183e   : > { %19857 = vmatmul.mubr.bf16.gmra.mrb[252].mxu0 %v26082_v12  ;;  %v24844_v12 = vpop.f32.mrb[91].mxu1 }
0x183f   : > { %19860 = vmatprep.mubr.bf16.mxu0 %v26086_v42  ;;  %19929 = vmatpush3.bf16.msra.mxu0 %v21605_v0  ;;  %26088 = vst [vmem:[#allocation20_spill] sm:$0xff] %v24844_v12  ;;  %v21608_v42 = vld [vmem:[%s25948_s17 + $0xf8] sm:$0xff]   ;;  %v24853_v7 = vpop.f32.mrb[92].mxu1  ;;  %v26090_v0 = vld [vmem:[#allocation21_spill] sm:$0xff] }
0x1840   : > { %19930 = vmatprep.subr.bf16.mxu0 %v21606_v21  ;;  %26089 = vst [vmem:[#allocation34_spill] sm:$0xff] %v24853_v7  ;;  %v26092_v37 = vpack.c.bf16 %v26090_v0, %v26091_v44  ;;  %v24858_v54 = vpop.f32.mrb[93].mxu1  ;;  %v21634_v0 = vld [vmem:[%s25947_s16 + $0x400] sm:$0xff]  }
0x1841   : > { %v24869_v48 = vpop.f32.mrb[94].mxu1  ;;  %v26103_v7 = vld [vmem:[#allocation27_spill] sm:$0xff] }
0x1842   : > { %26095 = vst [vmem:[#allocation21_spill] sm:$0xff] %v24869_v48  ;;  %v24876_v44 = vpop.f32.mrb[95].mxu1  ;;  %v26104_v48 = vld [vmem:[#allocation26_spill] sm:$0xff] }
0x1843   : > { %19931 = vmatpush3.bf16.msra.mxu0 %v21606_v21  ;;  %v21632_v21 = vld [vmem:[%s25947_s16 + $0x3f8] sm:$0xff]   ;;  %v24882_v53 = vpop.f32.mrb[96].mxu1 }
0x1844   : > { %19932 = vmatprep.subr.bf16.mxu0 %v21607_v46  ;;  %20269 = vmatmul.mubr.msk.bf16.gmra.mrb[200].mxu1 %vm3198_vm1, %v21632_v21  ;;  %26096 = vst [vmem:[#allocation19_spill] sm:$0xff] %v24882_v53  ;;  %v24887_v12 = vpop.f32.mrb[97].mxu1  ;;  %v26108_v53 = vld [vmem:[#allocation29_spill] sm:$0xff] }
0x1845   : > { %v24898_v21 = vpop.f32.mrb[98].mxu1  ;;  %20328 = vmatprep.mubr.msk.bf16.mxu1 %vm3198_vm1, %v21634_v0  ;;  %v21638_v0 = vld [vmem:[%s25947_s16 + $0x418] sm:$0xff]  }
0x1846   : > { %19861 = vmatmul.mubr.bf16.gmra.mrb[0].mxu0 %v26092_v37  ;;  %v21609_v37 = vld [vmem:[%s25948_s17 + $0x100] sm:$0xff]   ;;  %26101 = vst [vmem:[#allocation24_spill] sm:$0xff] %v24898_v21 }
0x1847   : > { %19864 = vmatprep.mubr.bf16.mxu0 %v26094_v60  ;;  %19933 = vmatpush3.bf16.msra.mxu0 %v21607_v46  ;;  %v26097_v60 = vld [vmem:[#allocation25_spill] sm:$0xff]  ;;  %v26098_v46 = vld [vmem:[#allocation23_spill] sm:$0xff]  ;;  %v26109_v21 = vld [vmem:[#allocation28_spill] sm:$0xff] }
0x1848   : > { %19934 = vmatprep.subr.bf16.mxu0 %v21608_v42  ;;  %v26099_v33 = vpack.c.bf16 %v26097_v60, %v26098_v46  ;;  %v24902_v46 = vpop.f32.mrb[99].mxu1  ;;  %v26106_v60 = vpack.c.bf16 %v24525_v52, %v24519_v29  ;;  %v26110_v29 = vpack.c.bf16 %v26108_v53, %v26109_v21  ;;  %v26116_v53 = vpack.c.bf16 %v24557_v36, %v24548_v11 }
0x1849   : > { %v24908_v30 = vpop.f32.mrb[100].mxu1  ;;  %v26117_v36 = vpack.c.bf16 %v24553_v27, %v24546_v14  ;;  %v21611_v14 = vld [vmem:[%s25948_s17 + $0x110] sm:$0xff]  }
0x184a   : > { %26102 = vst [vmem:[#allocation25_spill] sm:$0xff] %v24908_v30  ;;  %v26113_v30 = vld [vmem:[#allocation31_spill] sm:$0xff] }
0x184b   : > { %19935 = vmatpush3.bf16.msra.mxu0 %v21608_v42  ;;  %v26100_v42 = vpack.c.bf16 %v24510_v10, %v24501_v15  ;;  %v26105_v15 = vpack.c.bf16 %v26103_v7, %v26104_v48  ;;  %v24913_v10 = vpop.f32.mrb[101].mxu1  ;;  %v26111_v48 = vpack.c.bf16 %v24541_v5, %v24535_v9 }
0x184c   : > { %20008 = vmatprep.subr.bf16.mxu0 %v21609_v37  ;;  %20329 = vmatmul.mubr.msk.bf16.vlgmr.msra.gmra.mrb[204].mxu1 %vm3198_vm1, %v21635_v58  ;;  %v24924_v58 = vpop.f32.mrb[102].mxu1 }
0x184d   : > { %26107 = vst [vmem:[#allocation23_spill] sm:$0xff] %v24924_v58  ;;  %v24928_v7 = vpop.f32.mrb[103].mxu1  ;;  %v26114_v58 = vld [vmem:[#allocation30_spill] sm:$0xff] }
0x184e   : > { %19865 = vmatmul.mubr.bf16.gmra.mrb[4].mxu0 %v26099_v33  ;;  %v24934_v33 = vpop.f32.mrb[104].mxu1  ;;  %v26115_v9 = vpack.c.bf16 %v26113_v30, %v26114_v58  ;;  %v26118_v30 = vpack.c.bf16 %v24582_v39, %v24569_v4  ;;  %v21612_v4 = vld [vmem:[%s25948_s17 + $0x118] sm:$0xff]  }
0x184f   : > { %19868 = vmatprep.mubr.bf16.mxu0 %v26100_v42  ;;  %v21637_v42 = vld [vmem:[%s25947_s16 + $0x410] sm:$0xff]   ;;  %v24939_v52 = vpop.f32.mrb[105].mxu1 }
0x1850   : > { %20332 = vmatprep.mubr.msk.bf16.mxu1 %vm3198_vm1, %v21637_v42  ;;  %v21642_v42 = vld [vmem:[%s25947_s16 + $0x428] sm:$0xff]  }
0x1854   : > { %20333 = vmatmul.mubr.msk.bf16.gmra.mrb[208].mxu1 %vm3198_vm1, %v21638_v0  ;;  %v24950_v0 = vpop.f32.mrb[106].mxu1 }
0x1855   : > { %v24954_v21 = vpop.f32.mrb[107].mxu1 }
0x1856   : > { %19869 = vmatmul.mubr.bf16.gmra.mrb[8].mxu0 %v26105_v15  ;;  %v24960_v15 = vpop.f32.mrb[108].mxu1 }
0x1857   : > { %19872 = vmatprep.mubr.bf16.mxu0 %v26106_v60  ;;  %v21641_v60 = vld [vmem:[%s25947_s16 + $0x420] sm:$0xff]   ;;  %26112 = vst [vmem:[#allocation27_spill] sm:$0xff] %v24960_v15  ;;  %v24965_v5 = vpop.f32.mrb[109].mxu1 }
0x1858   : > { %20336 = vmatprep.mubr.msk.bf16.mxu1 %vm3198_vm1, %v21641_v60  ;;  %v21646_v60 = vld [vmem:[%s25947_s16 + $0x438] sm:$0xff]  }
0x185c   : > { %20337 = vmatmul.mubr.msk.bf16.gmra.mrb[212].mxu1 %vm3198_vm1, %v21642_v42  ;;  %v24976_v42 = vpop.f32.mrb[110].mxu1 }
0x185d   : > { %v24980_v58 = vpop.f32.mrb[111].mxu1 }
0x185e   : > { %19873 = vmatmul.mubr.bf16.gmra.mrb[12].mxu0 %v26110_v29  ;;  %v21610_v29 = vld [vmem:[%s25948_s17 + $0x108] sm:$0xff]   ;;  %v24989_v11 = vpop.f32.mrb[112].mxu1 }
0x185f   : > { %19876 = vmatprep.mubr.bf16.mxu0 %v26111_v48  ;;  %v21645_v48 = vld [vmem:[%s25947_s16 + $0x430] sm:$0xff]  }
0x1860   : > { %20340 = vmatprep.mubr.msk.bf16.mxu1 %vm3198_vm1, %v21645_v48  ;;  %v21647_v48 = vld [vmem:[%s25947_s16 + $0x440] sm:$0xff]  }
0x1864   : > { %20341 = vmatmul.mubr.msk.bf16.gmra.mrb[216].mxu1 %vm3198_vm1, %v21646_v60  ;;  %v21648_v60 = vld [vmem:[%s25947_s16 + $0x448] sm:$0xff]  }
0x1865   : > { %20344 = vmatprep.mubr.msk.bf16.mxu1 %vm3198_vm1, %v21647_v48  ;;  %v21649_v48 = vld [vmem:[%s25947_s16 + $0x450] sm:$0xff]  }
0x1866   : > { %19877 = vmatmul.mubr.bf16.gmra.mrb[16].mxu0 %v26115_v9 }
0x1867   : > { %19936 = vmatprep.mubr.bf16.mxu0 %v26116_v53  ;;  %v24994_v53 = vpop.f32.mrb[113].mxu1 }
0x1868   : > { %v25005_v9 = vpop.f32.mrb[114].mxu1 }
0x186c   : > { %20345 = vmatmul.mubr.msk.bf16.gmra.mrb[220].mxu1 %vm3198_vm1, %v21648_v60  ;;  %v26120_v60 = vpack.c.bf16 %v24606_v47, %v24594_v50  ;;  %v21616_v47 = vld [vmem:[%s25948_s17 + $0x128] sm:$0xff]  }
0x186d   : > { %20348 = vmatprep.mubr.msk.bf16.mxu1 %vm3198_vm1, %v21649_v48  ;;  %v21652_v48 = vld [vmem:[%s25947_s16 + $0x460] sm:$0xff]  }
0x186e   : > { %19937 = vmatmul.mubr.bf16.vlgmr.msra.gmra.mrb[244].mxu0 %v26117_v36  ;;  %v25012_v36 = vpop.f32.mrb[115].mxu1 }
0x186f   : > { %19940 = vmatprep.mubr.bf16.mxu0 %v26118_v30  ;;  %20009 = vmatpush3.bf16.msra.mxu0 %v21609_v37  ;;  %v25021_v39 = vpop.f32.mrb[116].mxu1  ;;  %v26119_v37 = vpack.c.bf16 %v24575_v23, %v24564_v56  ;;  %v21615_v56 = vld [vmem:[%s25948_s17 + $0x120] sm:$0xff]  }
0x1870   : > { %20010 = vmatprep.subr.bf16.mxu0 %v21610_v29  ;;  %v25026_v30 = vpop.f32.mrb[117].mxu1 }
0x1871   : > { %v25037_v27 = vpop.f32.mrb[118].mxu1 }
0x1873   : > { %20011 = vmatpush3.bf16.msra.mxu0 %v21610_v29  ;;  %v21650_v29 = vld [vmem:[%s25947_s16 + $0x458] sm:$0xff]  }
0x1874   : > { %20012 = vmatprep.subr.bf16.mxu0 %v21611_v14  ;;  %20349 = vmatmul.mubr.msk.bf16.gmra.mrb[224].mxu1 %vm3198_vm1, %v21650_v29  ;;  %v26122_v29 = vpack.c.bf16 %v24630_v8, %v24618_v26  ;;  %v21620_v8 = vld [vmem:[%s25948_s17 + $0x138] sm:$0xff]  }
0x1875   : > { %20352 = vmatprep.mubr.msk.bf16.mxu1 %vm3198_vm1, %v21652_v48  ;;  %v21655_v48 = vld [vmem:[%s25947_s16 + $0x470] sm:$0xff]  }
0x1876   : > { %19941 = vmatmul.mubr.bf16.gmra.mrb[248].mxu0 %v26119_v37  ;;  %v25044_v37 = vpop.f32.mrb[119].mxu1 }
0x1877   : > { %19944 = vmatprep.mubr.bf16.mxu0 %v26120_v60  ;;  %20013 = vmatpush3.bf16.msra.mxu0 %v21611_v14  ;;  %v25053_v50 = vpop.f32.mrb[120].mxu1  ;;  %v26121_v14 = vpack.c.bf16 %v24599_v62, %v24589_v13  ;;  %v21619_v62 = vld [vmem:[%s25948_s17 + $0x130] sm:$0xff]  }
0x1878   : > { %20014 = vmatprep.subr.bf16.mxu0 %v21612_v4  ;;  %v25058_v60 = vpop.f32.mrb[121].mxu1 }
0x1879   : > { %v25069_v23 = vpop.f32.mrb[122].mxu1 }
0x187b   : > { %20015 = vmatpush3.bf16.msra.mxu0 %v21612_v4  ;;  %v21653_v4 = vld [vmem:[%s25947_s16 + $0x468] sm:$0xff]  }
0x187c   : > { %20016 = vmatprep.subr.bf16.mxu0 %v21615_v56  ;;  %20353 = vmatmul.mubr.msk.bf16.gmra.mrb[228].mxu1 %vm3198_vm1, %v21653_v4  ;;  %v26124_v4 = vpack.c.bf16 %v24654_v20, %v24642_v17  ;;  %v26125_v17 = vpack.c.bf16 %v24647_v6, %v24637_v55  ;;  %v26127_v55 = vpack.c.bf16 %v24668_v18, %v24658_v31 }
0x187d   : > { %20356 = vmatprep.mubr.msk.bf16.mxu1 %vm3198_vm1, %v21655_v48  ;;  %v26129_v31 = vpack.c.bf16 %v24692_v59, %v24676_v57  ;;  %v26131_v57 = vpack.c.bf16 %v24718_v40, %v24702_v25  ;;  %v21630_v25 = vld [vmem:[%s25948_s17 + $0x148] sm:$0xff]  }
0x187e   : > { %19945 = vmatmul.mubr.bf16.gmra.mrb[252].mxu0 %v26121_v14  ;;  %v25076_v14 = vpop.f32.mrb[123].mxu1 }
0x187f   : > { %19948 = vmatprep.mubr.bf16.mxu0 %v26122_v29  ;;  %20017 = vmatpush3.bf16.msra.mxu0 %v21615_v56  ;;  %v25085_v26 = vpop.f32.mrb[124].mxu1  ;;  %v26123_v56 = vpack.c.bf16 %v24623_v19, %v24613_v24  ;;  %v21627_v24 = vld [vmem:[%s25948_s17 + $0x140] sm:$0xff]  }
0x1880   : > { %20018 = vmatprep.subr.bf16.mxu0 %v21616_v47  ;;  %v25090_v29 = vpop.f32.mrb[125].mxu1 }
0x1881   : > { %v25101_v13 = vpop.f32.mrb[126].mxu1 }
0x1883   : > { %20019 = vmatpush3.bf16.msra.mxu0 %v21616_v47  ;;  %v21656_v47 = vld [vmem:[%s25947_s16 + $0x478] sm:$0xff]  }
0x1884   : > { %20020 = vmatprep.subr.bf16.mxu0 %v21619_v62  ;;  %20357 = vmatmul.mubr.msk.bf16.gmra.mrb[232].mxu1 %vm3198_vm1, %v21656_v47 }
0x1886   : > { %19949 = vmatmul.mubr.bf16.gmra.mrb[0].mxu0 %v26123_v56  ;;  %v25108_v56 = vpop.f32.mrb[127].mxu1 }
0x1887   : > { %19952 = vmatprep.mubr.bf16.mxu0 %v26124_v4  ;;  %20021 = vmatpush3.bf16.msra.mxu0 %v21619_v62  ;;  %v25114_v20 = vpop.f32.mrb[128].mxu1  ;;  %v26126_v4 = vpack.c.bf16 %v24672_v1, %v24663_v34  ;;  %v26128_v1 = vpack.c.bf16 %v24696_v2, %v24681_v63  ;;  %v26130_v63 = vpack.c.bf16 %v24722_v49, %v24707_v16 }
0x1888   : > { %20022 = vmatprep.subr.bf16.mxu0 %v21620_v8  ;;  %v25119_v62 = vpop.f32.mrb[129].mxu1  ;;  %v26132_v16 = vpack.c.bf16 %v24748_v43, %v24733_v51  ;;  %v26133_v51 = vpack.c.bf16 %v24744_v61, %v24728_v22  ;;  %v21636_v61 = vld [vmem:[%s25948_s17 + $0x158] sm:$0xff]  }
0x1889   : > { %v25124_v48 = vpop.f32.mrb[130].mxu1 }
0x188a   : > { %v25128_v47 = vpop.f32.mrb[131].mxu1 }
0x188b   : > { %20023 = vmatpush3.bf16.msra.mxu0 %v21620_v8  ;;  %v25132_v15 = vpop.f32.mrb[132].mxu1 }
0x188c   : > { %20096 = vmatprep.subr.bf16.mxu0 %v21627_v24  ;;  %v25137_v6 = vpop.f32.mrb[133].mxu1 }
0x188d   : > { %v25142_v34 = vpop.f32.mrb[134].mxu1 }
0x188e   : > { %19953 = vmatmul.mubr.bf16.gmra.mrb[4].mxu0 %v26125_v17 }
0x188f   : > { %19956 = vmatprep.mubr.bf16.mxu0 %v26126_v4  ;;  %v25146_v4 = vpop.f32.mrb[135].mxu1 }
0x1890   : > { %v25150_v8 = vpop.f32.mrb[136].mxu1 }
0x1891   : > { %v25155_v18 = vpop.f32.mrb[137].mxu1 }
0x1892   : > { %v25160_v2 = vpop.f32.mrb[138].mxu1 }
0x1896   : > { %19957 = vmatmul.mubr.bf16.gmra.mrb[8].mxu0 %v26127_v55  ;;  %v26144_v55 = vld [vmem:[#allocation18_spill] sm:$0xff] }
0x1897   : > { %19960 = vmatprep.mubr.bf16.mxu0 %v26128_v1  ;;  %v25164_v1 = vpop.f32.mrb[139].mxu1 }
0x1898   : > { %v25168_v19 = vpop.f32.mrb[140].mxu1 }
0x1899   : > { %v25173_v59 = vpop.f32.mrb[141].mxu1 }
0x189a   : > { %v25178_v49 = vpop.f32.mrb[142].mxu1 }
0x189e   : > { %19961 = vmatmul.mubr.bf16.gmra.mrb[12].mxu0 %v26129_v31  ;;  %v21633_v31 = vld [vmem:[%s25948_s17 + $0x150] sm:$0xff]  }
0x189f   : > { %19964 = vmatprep.mubr.bf16.mxu0 %v26130_v63  ;;  %v25182_v63 = vpop.f32.mrb[143].mxu1 }
0x18a0   : > { %v25189_v40 = vpop.f32.mrb[144].mxu1 }
0x18a1   : > { %v25194_v43 = vpop.f32.mrb[145].mxu1 }
0x18a6   : > { %19965 = vmatmul.mubr.bf16.gmra.mrb[16].mxu0 %v26131_v57  ;;  %v26134_v57 = vpack.c.bf16 %v24780_v45, %v24762_v38  ;;  %v26136_v45 = vpack.c.bf16 %v24773_v41, %v24757_v32  ;;  %v21640_v32 = vld [vmem:[%s25948_s17 + $0x168] sm:$0xff]  }
0x18a7   : > { %20024 = vmatprep.mubr.bf16.mxu0 %v26132_v16  ;;  %v25199_v16 = vpop.f32.mrb[146].mxu1 }
0x18a8   : > { %v25206_v17 = vpop.f32.mrb[147].mxu1 }
0x18a9   : > { %v25213_v38 = vpop.f32.mrb[148].mxu1 }
0x18aa   : > { %26135 = vst [vmem:[#allocation26_spill] sm:$0xff] %v25213_v38 }
0x18ae   : > { %20025 = vmatmul.mubr.bf16.vlgmr.msra.gmra.mrb[244].mxu0 %v26133_v51  ;;  %v26138_v51 = vpack.c.bf16 %v24812_v3, %v24794_v35  ;;  %v26141_v3 = vld [vmem:[#allocation32_spill] sm:$0xff] }
0x18af   : > { %20028 = vmatprep.mubr.bf16.mxu0 %v26134_v57  ;;  %20097 = vmatpush3.bf16.msra.mxu0 %v21627_v24  ;;  %v25218_v24 = vpop.f32.mrb[149].mxu1 }
0x18b0   : > { %20098 = vmatprep.subr.bf16.mxu0 %v21630_v25  ;;  %26137 = vst [vmem:[#allocation29_spill] sm:$0xff] %v25218_v24  ;;  %v25223_v57 = vpop.f32.mrb[150].mxu1 }
0x18b1   : > { %26139 = vst [vmem:[#allocation28_spill] sm:$0xff] %v25223_v57  ;;  %v25230_v22 = vpop.f32.mrb[151].mxu1  ;;  %v26152_v57 = vpack.c.bf16 %v24876_v44, %v24858_v54  ;;  %v26155_v44 = vld [vmem:[#allocation21_spill] sm:$0xff] }
0x18b2   : > { %v25237_v35 = vpop.f32.mrb[152].mxu1 }
0x18b3   : > { %20099 = vmatpush3.bf16.msra.mxu0 %v21630_v25  ;;  %v21639_v25 = vld [vmem:[%s25948_s17 + $0x160] sm:$0xff]   ;;  %26140 = vst [vmem:[#allocation31_spill] sm:$0xff] %v25237_v35 }
0x18b4   : > { %20100 = vmatprep.subr.bf16.mxu0 %v21633_v31 }
0x18b6   : > { %20029 = vmatmul.mubr.bf16.gmra.mrb[248].mxu0 %v26136_v45  ;;  %v25242_v45 = vpop.f32.mrb[153].mxu1 }
0x18b7   : > { %20032 = vmatprep.mubr.bf16.mxu0 %v26138_v51  ;;  %20101 = vmatpush3.bf16.msra.mxu0 %v21633_v31  ;;  %v26142_v31 = vpack.c.bf16 %v24805_v28, %v26141_v3  ;;  %v26143_v51 = vld [vmem:[#allocation20_spill] sm:$0xff]  ;;  %v25247_v41 = vpop.f32.mrb[154].mxu1  ;;  %v26149_v3 = vld [vmem:[#allocation33_spill] sm:$0xff] }
0x18b8   : > { %20102 = vmatprep.subr.bf16.mxu0 %v21636_v61  ;;  %v26145_v38 = vpack.c.bf16 %v26143_v51, %v26144_v55  ;;  %26146 = vst [vmem:[#allocation30_spill] sm:$0xff] %v25247_v41  ;;  %v25254_v24 = vpop.f32.mrb[155].mxu1  ;;  %v21644_v55 = vld [vmem:[%s25948_s17 + $0x178] sm:$0xff]  }
0x18bb   : > { %20103 = vmatpush3.bf16.msra.mxu0 %v21636_v61  ;;  %v21643_v61 = vld [vmem:[%s25948_s17 + $0x170] sm:$0xff]  }
0x18bc   : > { %20104 = vmatprep.subr.bf16.mxu0 %v21639_v25 }
0x18be   : > { %20033 = vmatmul.mubr.bf16.gmra.mrb[252].mxu0 %v26142_v31 }
0x18bf   : > { %20036 = vmatprep.mubr.bf16.mxu0 %v26145_v38  ;;  %20105 = vmatpush3.bf16.msra.mxu0 %v21639_v25  ;;  %v25261_v38 = vpop.f32.mrb[156].mxu1  ;;  %v26148_v25 = vld [vmem:[#allocation22_spill] sm:$0xff] }
0x18c0   : > { %20106 = vmatprep.subr.bf16.mxu0 %v21640_v32  ;;  %26147 = vst [vmem:[#allocation32_spill] sm:$0xff] %v25261_v38  ;;  %v26150_v31 = vpack.c.bf16 %v26148_v25, %v26149_v3  ;;  %v25266_v51 = vpop.f32.mrb[157].mxu1 }
0x18c1   : > { %26151 = vst [vmem:[#allocation20_spill] sm:$0xff] %v25266_v51  ;;  %v25271_v28 = vpop.f32.mrb[158].mxu1 }
0x18c2   : > { %26153 = vst [vmem:[#allocation18_spill] sm:$0xff] %v25271_v28  ;;  %v25278_v41 = vpop.f32.mrb[159].mxu1 }
0x18c3   : > { %20107 = vmatpush3.bf16.msra.mxu0 %v21640_v32  ;;  %v21651_v32 = vld [vmem:[%s25948_s17 + $0x180] sm:$0xff]   ;;  %v25282_v54 = vpop.f32.mrb[160].mxu1 }
0x18c4   : > { %20108 = vmatprep.subr.bf16.mxu0 %v21643_v61  ;;  %26154 = vst [vmem:[#allocation22_spill] sm:$0xff] %v25282_v54  ;;  %v25287_v3 = vpop.f32.mrb[161].mxu1 }
0x18c5   : > { %v25292_v35 = vpop.f32.mrb[162].mxu1 }
0x18c6   : > { %20037 = vmatmul.mubr.bf16.gmra.mrb[0].mxu0 %v26150_v31  ;;  %v26158_v31 = vpack.c.bf16 %v24902_v46, %v24887_v12  ;;  %26159 = vst [vmem:[#allocation33_spill] sm:$0xff] %v25292_v35  ;;  %v25296_v25 = vpop.f32.mrb[163].mxu1  ;;  %v26164_v12 = vpack.c.bf16 %v24928_v7, %v24913_v10  ;;  %v26168_v10 = vpack.c.bf16 %v24954_v21, %v24939_v52 }
0x18c7   : > { %20040 = vmatprep.mubr.bf16.mxu0 %v26152_v57  ;;  %20109 = vmatpush3.bf16.msra.mxu0 %v21643_v61  ;;  %v26156_v57 = vld [vmem:[#allocation34_spill] sm:$0xff]  ;;  %v25300_v28 = vpop.f32.mrb[164].mxu1  ;;  %v26171_v52 = vpack.c.bf16 %v24980_v58, %v24965_v5 }
0x18c8   : > { %20110 = vmatprep.subr.bf16.mxu0 %v21644_v55  ;;  %v26157_v61 = vpack.c.bf16 %v26155_v44, %v26156_v57  ;;  %26160 = vst [vmem:[#allocation21_spill] sm:$0xff] %v25300_v28  ;;  %v26161_v44 = vld [vmem:[#allocation24_spill] sm:$0xff]  ;;  %v26162_v57 = vld [vmem:[#allocation19_spill] sm:$0xff]  ;;  %v25305_v51 = vpop.f32.mrb[165].mxu1 }
0x18c9   : > { %v25310_v46 = vpop.f32.mrb[166].mxu1 }
0x18ca   : > { %v25314_v38 = vpop.f32.mrb[167].mxu1 }
0x18cb   : > { %20111 = vmatpush3.bf16.msra.mxu0 %v21644_v55  ;;  %v25318_v54 = vpop.f32.mrb[168].mxu1 }
0x18cc   : > { %20184 = vmatprep.subr.bf16.mxu0 %v21651_v32  ;;  %v25323_v35 = vpop.f32.mrb[169].mxu1 }
0x18cd   : > { %v25328_v7 = vpop.f32.mrb[170].mxu1 }
0x18ce   : > { %20041 = vmatmul.mubr.bf16.gmra.mrb[4].mxu0 %v26157_v61  ;;  %v26163_v61 = vpack.c.bf16 %v26161_v44, %v26162_v57  ;;  %v26165_v44 = vld [vmem:[#allocation23_spill] sm:$0xff]  ;;  %v26166_v57 = vld [vmem:[#allocation25_spill] sm:$0xff] }
0x18cf   : > { %20044 = vmatprep.mubr.bf16.mxu0 %v26158_v31  ;;  %v25332_v31 = vpop.f32.mrb[171].mxu1 }
0x18d0   : > { %v25336_v28 = vpop.f32.mrb[172].mxu1 }
0x18d1   : > { %26169 = vst [vmem:[#allocation34_spill] sm:$0xff] %v25336_v28 }
0x18d6   : > { %20045 = vmatmul.mubr.bf16.gmra.mrb[8].mxu0 %v26163_v61  ;;  %v26167_v61 = vpack.c.bf16 %v26165_v44, %v26166_v57  ;;  %v26170_v44 = vpack.c.bf16 %v24950_v0, %v24934_v33  ;;  %v25341_v57 = vpop.f32.mrb[173].mxu1  ;;  %v21654_v33 = vld [vmem:[%s25948_s17 + $0x188] sm:$0xff]  }
0x18d7   : > { %20048 = vmatprep.mubr.bf16.mxu0 %v26164_v12  ;;  %v25346_v21 = vpop.f32.mrb[174].mxu1  ;;  %v21657_v12 = vld [vmem:[%s25948_s17 + $0x190] sm:$0xff]  }
0x18de   : > { %20049 = vmatmul.mubr.bf16.gmra.mrb[12].mxu0 %v26167_v61 }
0x18df   : > { %20052 = vmatprep.mubr.bf16.mxu0 %v26168_v10  ;;  %v25350_v10 = vpop.f32.mrb[175].mxu1 }
0x18e0   : > { %v25357_v0 = vpop.f32.mrb[176].mxu1 }
0x18e1   : > { %v25362_v58 = vpop.f32.mrb[177].mxu1 }
0x18e2   : > { %v25367_v61 = vpop.f32.mrb[178].mxu1 }
0x18e3   : > { %v25374_v28 = vpop.f32.mrb[179].mxu1 }
0x18e6   : > { %20053 = vmatmul.mubr.bf16.gmra.mrb[16].mxu0 %v26170_v44  ;;  %v26172_v44 = vld [vmem:[#allocation27_spill] sm:$0xff] }
0x18e7   : > { %20112 = vmatprep.mubr.bf16.mxu0 %v26171_v52  ;;  %v26173_v5 = vpack.c.bf16 %v24976_v42, %v26172_v44  ;;  %v26174_v52 = vpack.c.bf16 %v25012_v36, %v24994_v53  ;;  %v21658_v53 = vld [vmem:[%s25948_s17 + $0x198] sm:$0xff]  }
0x18ec   : > { %v25381_v36 = vpop.f32.mrb[180].mxu1 }
0x18ed   : > { %v25386_v44 = vpop.f32.mrb[181].mxu1 }
0x18ee   : > { %20113 = vmatmul.mubr.bf16.vlgmr.msra.gmra.mrb[244].mxu0 %v26173_v5  ;;  %v26176_v5 = vpack.c.bf16 %v25044_v37, %v25026_v30  ;;  %v26177_v37 = vpack.c.bf16 %v25037_v27, %v25021_v39  ;;  %v21662_v39 = vld [vmem:[%s25948_s17 + $0x1b8] sm:$0xff]  }
0x18ef   : > { %20116 = vmatprep.mubr.bf16.mxu0 %v26174_v52  ;;  %20185 = vmatpush3.bf16.msra.mxu0 %v21651_v32  ;;  %v26175_v32 = vpack.c.bf16 %v25005_v9, %v24989_v11  ;;  %v25391_v52 = vpop.f32.mrb[182].mxu1  ;;  %v21660_v11 = vld [vmem:[%s25948_s17 + $0x1a8] sm:$0xff]  }
0x18f0   : > { %20186 = vmatprep.subr.bf16.mxu0 %v21654_v33  ;;  %v25398_v42 = vpop.f32.mrb[183].mxu1 }
0x18f3   : > { %20187 = vmatpush3.bf16.msra.mxu0 %v21654_v33  ;;  %v21659_v33 = vld [vmem:[%s25948_s17 + $0x1a0] sm:$0xff]  }
0x18f4   : > { %20188 = vmatprep.subr.bf16.mxu0 %v21657_v12  ;;  %v25405_v30 = vpop.f32.mrb[184].mxu1 }
0x18f6   : > { %20117 = vmatmul.mubr.bf16.gmra.mrb[248].mxu0 %v26175_v32  ;;  %v26178_v32 = vpack.c.bf16 %v25076_v14, %v25058_v60  ;;  %v26179_v14 = vpack.c.bf16 %v25069_v23, %v25053_v50 }
0x18f7   : > { %20120 = vmatprep.mubr.bf16.mxu0 %v26176_v5  ;;  %20189 = vmatpush3.bf16.msra.mxu0 %v21657_v12  ;;  %v25410_v12 = vpop.f32.mrb[185].mxu1 }
0x18f8   : > { %20190 = vmatprep.subr.bf16.mxu0 %v21658_v53  ;;  %v25415_v5 = vpop.f32.mrb[186].mxu1 }
0x18f9   : > { %v25422_v9 = vpop.f32.mrb[187].mxu1 }
0x18fb   : > { %20191 = vmatpush3.bf16.msra.mxu0 %v21658_v53  ;;  %v21661_v53 = vld [vmem:[%s25948_s17 + $0x1b0] sm:$0xff]  }
0x18fc   : > { %20192 = vmatprep.subr.bf16.mxu0 %v21659_v33  ;;  %v25429_v60 = vpop.f32.mrb[188].mxu1 }
0x18fe   : > { %20121 = vmatmul.mubr.bf16.gmra.mrb[252].mxu0 %v26177_v37  ;;  %v26180_v37 = vpack.c.bf16 %v25108_v56, %v25090_v29  ;;  %v26181_v29 = vpack.c.bf16 %v25101_v13, %v25085_v26  ;;  %v26183_v13 = vpack.c.bf16 %v25124_v48, %v25114_v20  ;;  %v26185_v20 = vpack.c.bf16 %v25142_v34, %v25132_v15 }
0x18ff   : > { %20124 = vmatprep.mubr.bf16.mxu0 %v26178_v32  ;;  %20193 = vmatpush3.bf16.msra.mxu0 %v21659_v33  ;;  %v25434_v33 = vpop.f32.mrb[189].mxu1  ;;  %v26187_v15 = vpack.c.bf16 %v25160_v2, %v25150_v8  ;;  %v21664_v8 = vld [vmem:[%s25948_s17 + $0x1c8] sm:$0xff]  }
0x1900   : > { %20194 = vmatprep.subr.bf16.mxu0 %v21660_v11  ;;  %v25439_v32 = vpop.f32.mrb[190].mxu1 }
0x1901   : > { %v25446_v27 = vpop.f32.mrb[191].mxu1 }
0x1903   : > { %20195 = vmatpush3.bf16.msra.mxu0 %v21660_v11  ;;  %v21663_v11 = vld [vmem:[%s25948_s17 + $0x1c0] sm:$0xff]  }
0x1904   : > { %20196 = vmatprep.subr.bf16.mxu0 %v21661_v53 }
0x1906   : > { %20125 = vmatmul.mubr.bf16.gmra.mrb[0].mxu0 %v26179_v14 }
0x1907   : > { %20128 = vmatprep.mubr.bf16.mxu0 %v26180_v37  ;;  %20197 = vmatpush3.bf16.msra.mxu0 %v21661_v53  ;;  %v25450_v50 = vpop.f32.mrb[192].mxu1  ;;  %v26182_v53 = vpack.c.bf16 %v25128_v47, %v25119_v62  ;;  %v26184_v62 = vpack.c.bf16 %v25146_v4, %v25137_v6  ;;  %v26186_v6 = vpack.c.bf16 %v25164_v1, %v25155_v18 }
0x1908   : > { %20198 = vmatprep.subr.bf16.mxu0 %v21662_v39  ;;  %v25455_v56 = vpop.f32.mrb[193].mxu1  ;;  %v26188_v18 = vpack.c.bf16 %v25182_v63, %v25173_v59  ;;  %v26190_v59 = vpack.c.bf16 %v25178_v49, %v25168_v19  ;;  %v26202_v19 = vpack.c.bf16 %v25254_v24, %v25242_v45  ;;  %v21670_v24 = vld [vmem:[%s25948_s17 + $0x1f8] sm:$0xff]  }
0x1909   : > { %v25460_v14 = vpop.f32.mrb[194].mxu1 }
0x190a   : > { %v25464_v55 = vpop.f32.mrb[195].mxu1 }
0x190b   : > { %20199 = vmatpush3.bf16.msra.mxu0 %v21662_v39 }
0x190c   : > { %20272 = vmatprep.subr.bf16.mxu0 %v21663_v11 }
0x190e   : > { %20129 = vmatmul.mubr.bf16.gmra.mrb[4].mxu0 %v26181_v29 }
0x190f   : > { %20132 = vmatprep.mubr.bf16.mxu0 %v26182_v53  ;;  %v25468_v23 = vpop.f32.mrb[196].mxu1 }
0x1910   : > { %v25473_v26 = vpop.f32.mrb[197].mxu1 }
0x1911   : > { %v25478_v47 = vpop.f32.mrb[198].mxu1 }
0x1912   : > { %v25482_v53 = vpop.f32.mrb[199].mxu1 }
0x1916   : > { %20133 = vmatmul.mubr.bf16.gmra.mrb[8].mxu0 %v26183_v13 }
0x1917   : > { %20136 = vmatprep.mubr.bf16.mxu0 %v26184_v62  ;;  %v25486_v39 = vpop.f32.mrb[200].mxu1 }
0x1918   : > { %v25491_v48 = vpop.f32.mrb[201].mxu1 }
0x1919   : > { %v25496_v4 = vpop.f32.mrb[202].mxu1 }
0x191a   : > { %v25500_v62 = vpop.f32.mrb[203].mxu1 }
0x191e   : > { %20137 = vmatmul.mubr.bf16.gmra.mrb[12].mxu0 %v26185_v20  ;;  %v21665_v20 = vld [vmem:[%s25948_s17 + $0x1d0] sm:$0xff]  }
0x191f   : > { %20140 = vmatprep.mubr.bf16.mxu0 %v26186_v6  ;;  %v25504_v37 = vpop.f32.mrb[204].mxu1 }
0x1920   : > { %v25509_v34 = vpop.f32.mrb[205].mxu1 }
0x1921   : > { %v25514_v1 = vpop.f32.mrb[206].mxu1 }
0x1922   : > { %v25518_v6 = vpop.f32.mrb[207].mxu1 }
0x1926   : > { %20141 = vmatmul.mubr.bf16.gmra.mrb[16].mxu0 %v26187_v15  ;;  %v26191_v15 = vpack.c.bf16 %v25206_v17, %v25194_v43  ;;  %v21666_v17 = vld [vmem:[%s25948_s17 + $0x1d8] sm:$0xff]   ;;  %v26193_v43 = vpack.c.bf16 %v25199_v16, %v25189_v40  ;;  %v21668_v16 = vld [vmem:[%s25948_s17 + $0x1e8] sm:$0xff]  }
0x1927   : > { %20200 = vmatprep.mubr.bf16.mxu0 %v26188_v18  ;;  %v25525_v2 = vpop.f32.mrb[208].mxu1 }
0x1928   : > { %26189 = vst [vmem:[#allocation24_spill] sm:$0xff] %v25525_v2  ;;  %v25530_v63 = vpop.f32.mrb[209].mxu1 }
0x1929   : > { %v25535_v18 = vpop.f32.mrb[210].mxu1 }
0x192a   : > { %v25542_v29 = vpop.f32.mrb[211].mxu1 }
0x192e   : > { %20201 = vmatmul.mubr.bf16.vlgmr.msra.gmra.mrb[244].mxu0 %v26190_v59  ;;  %v26194_v59 = vld [vmem:[#allocation29_spill] sm:$0xff] }
0x192f   : > { %20204 = vmatprep.mubr.bf16.mxu0 %v26191_v15  ;;  %20273 = vmatpush3.bf16.msra.mxu0 %v21663_v11  ;;  %v25549_v49 = vpop.f32.mrb[212].mxu1  ;;  %v26195_v15 = vpack.c.bf16 %v25230_v22, %v26194_v59 }
0x1930   : > { %20274 = vmatprep.subr.bf16.mxu0 %v21664_v8  ;;  %26192 = vst [vmem:[#allocation19_spill] sm:$0xff] %v25549_v49  ;;  %v25554_v11 = vpop.f32.mrb[213].mxu1  ;;  %v26209_v49 = vld [vmem:[#allocation20_spill] sm:$0xff] }
0x1931   : > { %v25559_v13 = vpop.f32.mrb[214].mxu1 }
0x1932   : > { %26196 = vst [vmem:[#allocation23_spill] sm:$0xff] %v25559_v13  ;;  %v25566_v2 = vpop.f32.mrb[215].mxu1 }
0x1933   : > { %20275 = vmatpush3.bf16.msra.mxu0 %v21664_v8  ;;  %v21667_v8 = vld [vmem:[%s25948_s17 + $0x1e0] sm:$0xff]  }
0x1934   : > { %20276 = vmatprep.subr.bf16.mxu0 %v21665_v20 }
0x1936   : > { %20205 = vmatmul.mubr.bf16.gmra.mrb[248].mxu0 %v26193_v43  ;;  %v26199_v43 = vld [vmem:[#allocation26_spill] sm:$0xff] }
0x1937   : > { %20208 = vmatprep.mubr.bf16.mxu0 %v26195_v15  ;;  %20277 = vmatpush3.bf16.msra.mxu0 %v21665_v20  ;;  %v25573_v22 = vpop.f32.mrb[216].mxu1  ;;  %v26198_v20 = vld [vmem:[#allocation28_spill] sm:$0xff] }
0x1938   : > { %20278 = vmatprep.subr.bf16.mxu0 %v21666_v17  ;;  %26197 = vst [vmem:[#allocation25_spill] sm:$0xff] %v25573_v22  ;;  %v26200_v59 = vpack.c.bf16 %v26198_v20, %v26199_v43  ;;  %v25578_v15 = vpop.f32.mrb[217].mxu1  ;;  %v26210_v22 = vpack.c.bf16 %v25278_v41, %v26209_v49  ;;  %v26213_v49 = vld [vmem:[#allocation18_spill] sm:$0xff] }
0x1939   : > { %26201 = vst [vmem:[#allocation27_spill] sm:$0xff] %v25578_v15  ;;  %v25583_v40 = vpop.f32.mrb[218].mxu1 }
0x193a   : > { %26203 = vst [vmem:[#allocation29_spill] sm:$0xff] %v25583_v40  ;;  %v25590_v13 = vpop.f32.mrb[219].mxu1 }
0x193b   : > { %20279 = vmatpush3.bf16.msra.mxu0 %v21666_v17  ;;  %v21669_v17 = vld [vmem:[%s25948_s17 + $0x1f0] sm:$0xff]  }
0x193c   : > { %20280 = vmatprep.subr.bf16.mxu0 %v21667_v8 }
0x193e   : > { %20209 = vmatmul.mubr.bf16.gmra.mrb[252].mxu0 %v26200_v59 }
0x193f   : > { %20212 = vmatprep.mubr.bf16.mxu0 %v26202_v19  ;;  %20281 = vmatpush3.bf16.msra.mxu0 %v21667_v8  ;;  %v25597_v45 = vpop.f32.mrb[220].mxu1  ;;  %v26205_v19 = vld [vmem:[#allocation30_spill] sm:$0xff]  ;;  %v26206_v8 = vld [vmem:[#allocation31_spill] sm:$0xff] }
0x1940   : > { %20282 = vmatprep.subr.bf16.mxu0 %v21668_v16  ;;  %26204 = vst [vmem:[#allocation28_spill] sm:$0xff] %v25597_v45  ;;  %v26207_v43 = vpack.c.bf16 %v26205_v19, %v26206_v8  ;;  %v25602_v59 = vpop.f32.mrb[221].mxu1 }
0x1941   : > { %26208 = vst [vmem:[#allocation26_spill] sm:$0xff] %v25602_v59  ;;  %v25607_v20 = vpop.f32.mrb[222].mxu1 }
0x1942   : > { %26211 = vst [vmem:[#allocation30_spill] sm:$0xff] %v25607_v20  ;;  %v25614_v15 = vpop.f32.mrb[223].mxu1 }
0x1943   : > { %20283 = vmatpush3.bf16.msra.mxu0 %v21668_v16  ;;  %v21671_v16 = vld [vmem:[%s25948_s17 + $0x200] sm:$0xff]  }
0x1944   : > { %20284 = vmatprep.subr.bf16.mxu0 %v21669_v17 }
0x1946   : > { %20213 = vmatmul.mubr.bf16.gmra.mrb[0].mxu0 %v26207_v43  ;;  %v26216_v43 = vpack.c.bf16 %v25296_v25, %v25287_v3  ;;  %v26220_v25 = vpack.c.bf16 %v25314_v38, %v25305_v51  ;;  %v26223_v38 = vpack.c.bf16 %v25332_v31, %v25323_v35  ;;  %v21680_v35 = vld [vmem:[%s26225_s5 + $0x8] sm:$0xff]   ;;  %v26226_v31 = vpack.c.bf16 %v25350_v10, %v25341_v57  ;;  %v21682_v57 = vld [vmem:[%s26225_s5 + $0x18] sm:$0xff]  }
0x1947   : > { %20216 = vmatprep.mubr.bf16.mxu0 %v26210_v22  ;;  %20285 = vmatpush3.bf16.msra.mxu0 %v21669_v17  ;;  %v25618_v41 = vpop.f32.mrb[224].mxu1  ;;  %v26214_v22 = vld [vmem:[#allocation32_spill] sm:$0xff]  ;;  %v26229_v10 = vpack.c.bf16 %v25374_v28, %v25362_v58  ;;  %v26230_v28 = vpack.c.bf16 %v25367_v61, %v25357_v0  ;;  %v26232_v0 = vpack.c.bf16 %v25391_v52, %v25381_v36 }
0x1948   : > { %20286 = vmatprep.subr.bf16.mxu0 %v21670_v24  ;;  %26212 = vst [vmem:[#allocation31_spill] sm:$0xff] %v25618_v41  ;;  %v26215_v17 = vpack.c.bf16 %v26213_v49, %v26214_v22  ;;  %v25623_v8 = vpop.f32.mrb[225].mxu1  ;;  %v26217_v49 = vld [vmem:[#allocation33_spill] sm:$0xff]  ;;  %v26218_v22 = vld [vmem:[#allocation22_spill] sm:$0xff]  ;;  %v26234_v36 = vpack.c.bf16 %v25415_v5, %v25405_v30  ;;  %v26235_v52 = vpack.c.bf16 %v25446_v27, %v25434_v33 }
0x1949   : > { %v25628_v40 = vpop.f32.mrb[226].mxu1  ;;  %v21684_v58 = vld [vmem:[%s26225_s5 + $0x28] sm:$0xff]   ;;  %v26239_v30 = vpack.c.bf16 %v25482_v53, %v25473_v26  ;;  %v26240_v5 = vpack.c.bf16 %v25478_v47, %v25468_v23  ;;  %v26241_v27 = vpack.c.bf16 %v25500_v62, %v25491_v48  ;;  %v26244_v33 = vpack.c.bf16 %v25514_v1, %v25504_v37  ;;  %v26252_v47 = vld [vmem:[#allocation27_spill] sm:$0xff] }
0x194a   : > { %v25632_v19 = vpop.f32.mrb[227].mxu1  ;;  %v21676_v61 = vld [vmem:[%s25948_s17 + $0x228] sm:$0xff]   ;;  %v26253_v37 = vpack.c.bf16 %v25590_v13, %v26252_v47 }
0x194b   : > { %20287 = vmatpush3.bf16.msra.mxu0 %v21670_v24  ;;  %v26246_v23 = vld [vmem:[#allocation24_spill] sm:$0xff]  ;;  %v26254_v53 = vld [vmem:[#allocation29_spill] sm:$0xff] }
0x194c   : > { %20360 = vmatprep.subr.bf16.mxu0 %v21671_v16  ;;  %v26255_v48 = vld [vmem:[#allocation25_spill] sm:$0xff]  ;;  %v26260_v1 = vld [vmem:[#allocation28_spill] sm:$0xff] }
0x194e   : > { %20217 = vmatmul.mubr.bf16.gmra.mrb[4].mxu0 %v26215_v17  ;;  %v26219_v17 = vpack.c.bf16 %v26217_v49, %v26218_v22  ;;  %v26221_v49 = vld [vmem:[#allocation21_spill] sm:$0xff] }
0x194f   : > { %20220 = vmatprep.mubr.bf16.mxu0 %v26216_v43  ;;  %v25636_v20 = vpop.f32.mrb[228].mxu1  ;;  %v26222_v22 = vpack.c.bf16 %v25310_v46, %v26221_v49  ;;  %v26224_v46 = vpack.c.bf16 %v25328_v7, %v25318_v54  ;;  %v21679_v49 = vld [vmem:[%s26225_s5] sm:$0xff]   ;;  %v21681_v54 = vld [vmem:[%s26225_s5 + $0x10] sm:$0xff]   ;;  %v21672_v7 = vld [vmem:[%s25948_s17 + $0x208] sm:$0xff]  }
0x1950   : > { %v25641_v59 = vpop.f32.mrb[229].mxu1  ;;  %20408 = vmatprep.subr.bf16.mxu1 %v21679_v49 }
0x1951   : > { %v25646_v3 = vpop.f32.mrb[230].mxu1  ;;  %20409 = vmatpush3.bf16.msra.mxu1 %v21679_v49  ;;  %v21674_v49 = vld [vmem:[%s25948_s17 + $0x218] sm:$0xff]  }
0x1952   : > { %v25650_v45 = vpop.f32.mrb[231].mxu1  ;;  %20410 = vmatprep.subr.bf16.mxu1 %v21680_v35 }
0x1955   : > { %20411 = vmatpush3.bf16.msra.mxu1 %v21680_v35  ;;  %v21675_v35 = vld [vmem:[%s25948_s17 + $0x220] sm:$0xff]  }
0x1956   : > { %20221 = vmatmul.mubr.bf16.gmra.mrb[8].mxu0 %v26219_v17  ;;  %20412 = vmatprep.subr.bf16.mxu1 %v21681_v54 }
0x1957   : > { %20224 = vmatprep.mubr.bf16.mxu0 %v26220_v25  ;;  %v25654_v41 = vpop.f32.mrb[232].mxu1 }
0x1958   : > { %v25659_v17 = vpop.f32.mrb[233].mxu1 }
0x1959   : > { %v25664_v51 = vpop.f32.mrb[234].mxu1  ;;  %20413 = vmatpush3.bf16.msra.mxu1 %v21681_v54  ;;  %v26238_v54 = vpack.c.bf16 %v25460_v14, %v25450_v50  ;;  %v26247_v50 = vpack.c.bf16 %v25535_v18, %v26246_v23  ;;  %v26249_v14 = vld [vmem:[#allocation23_spill] sm:$0xff]  ;;  %v26265_v18 = vpack.c.bf16 %v25650_v45, %v25641_v59 }
0x195a   : > { %v14760_v25 = vpack.c.bf16 %v25664_v51, %v25654_v41  ;;  %v25668_v43 = vpop.f32.mrb[235].mxu1  ;;  %20414 = vmatprep.subr.bf16.mxu1 %v21682_v57  ;;  %v25819_v45 = vld [vmem:[%s26267_s26] ss:$0 sm:$0xff] }
0x195b   : > { %v14759_v24 = vpack.c.bf16 %v25668_v43, %v25659_v17 }
0x195d   : > { %20415 = vmatpush3.bf16.msra.mxu1 %v21682_v57 }
0x195e   : > { %20225 = vmatmul.mubr.bf16.gmra.mrb[12].mxu0 %v26222_v22  ;;  %v26227_v22 = vld [vmem:[#allocation34_spill] sm:$0xff] }
0x195f   : > { %20228 = vmatprep.mubr.bf16.mxu0 %v26223_v38  ;;  %v26228_v38 = vpack.c.bf16 %v25346_v21, %v26227_v22  ;;  %v21683_v21 = vld [vmem:[%s26225_s5 + $0x20] sm:$0xff]  }
0x1960   : > { %20416 = vmatprep.subr.bf16.mxu1 %v21683_v21 }
0x1961   : > { %20417 = vmatpush3.bf16.msra.mxu1 %v21683_v21 }
0x1962   : > { %20418 = vmatprep.subr.bf16.mxu1 %v21684_v58 }
0x1965   : > { %20419 = vmatpush3.bf16.msra.mxu1 %v21684_v58 }
0x1966   : > { %20229 = vmatmul.mubr.bf16.gmra.mrb[16].mxu0 %v26224_v46  ;;  %v21673_v46 = vld [vmem:[%s25948_s17 + $0x210] sm:$0xff]  }
0x1967   : > { %20288 = vmatprep.mubr.bf16.mxu0 %v26226_v31  ;;  %v21678_v31 = vld [vmem:[%s25948_s17 + $0x238] sm:$0xff]  }
0x196e   : > { %20289 = vmatmul.mubr.bf16.vlgmr.msra.gmra.mrb[244].mxu0 %v26228_v38 }
0x196f   : > { %20292 = vmatprep.mubr.bf16.mxu0 %v26229_v10  ;;  %20361 = vmatpush3.bf16.msra.mxu0 %v21671_v16  ;;  %v26231_v16 = vpack.c.bf16 %v25398_v42, %v25386_v44  ;;  %v26233_v42 = vpack.c.bf16 %v25422_v9, %v25410_v12  ;;  %v21677_v44 = vld [vmem:[%s25948_s17 + $0x230] sm:$0xff]   ;;  %v26236_v9 = vpack.c.bf16 %v25439_v32, %v25429_v60 }
0x1970   : > { %20362 = vmatprep.subr.bf16.mxu0 %v21672_v7  ;;  %v26237_v12 = vpack.c.bf16 %v25464_v55, %v25455_v56  ;;  %v26242_v55 = vpack.c.bf16 %v25496_v4, %v25486_v39  ;;  %v26243_v60 = vpack.c.bf16 %v25518_v6, %v25509_v34  ;;  %v26245_v32 = vpack.c.bf16 %v25542_v29, %v25530_v63  ;;  %v26250_v39 = vld [vmem:[#allocation19_spill] sm:$0xff]  ;;  %v26257_v4 = vld [vmem:[#allocation26_spill] sm:$0xff] }
0x1971   : > { %v26248_v56 = vpack.c.bf16 %v25566_v2, %v25554_v11  ;;  %v26251_v26 = vpack.c.bf16 %v26249_v14, %v26250_v39  ;;  %v26256_v29 = vpack.c.bf16 %v26254_v53, %v26255_v48  ;;  %v26258_v62 = vpack.c.bf16 %v25614_v15, %v26257_v4  ;;  %v26259_v34 = vld [vmem:[#allocation30_spill] sm:$0xff]  ;;  %v26263_v63 = vld [vmem:[#allocation31_spill] sm:$0xff] }
0x1972   : > { %v26261_v6 = vpack.c.bf16 %v26259_v34, %v26260_v1  ;;  %v26262_v2 = vpack.c.bf16 %v25632_v19, %v25623_v8  ;;  %v26264_v13 = vpack.c.bf16 %v25628_v40, %v26263_v63  ;;  %v26266_v11 = vpack.c.bf16 %v25646_v3, %v25636_v20  ;;  %v21685_v40 = vld [vmem:[%s26225_s5 + $0x30] sm:$0xff]   ;;  %v21686_v15 = vld [vmem:[%s26225_s5 + $0x38] sm:$0xff]  }
0x1973   : > { %20363 = vmatpush3.bf16.msra.mxu0 %v21672_v7  ;;  %20420 = vmatprep.subr.bf16.mxu1 %v21685_v40 }
0x1974   : > { %20364 = vmatprep.subr.bf16.mxu0 %v21673_v46  ;;  %20421 = vmatpush3.bf16.msra.mxu1 %v21685_v40 }
0x1975   : > { %20422 = vmatprep.subr.bf16.mxu1 %v21686_v15 }
0x1976   : > { %20293 = vmatmul.mubr.bf16.gmra.mrb[248].mxu0 %v26230_v28 }
0x1977   : > { %20296 = vmatprep.mubr.bf16.mxu0 %v26231_v16  ;;  %20365 = vmatpush3.bf16.msra.mxu0 %v21673_v46 }
0x1978   : > { %20366 = vmatprep.subr.bf16.mxu0 %v21674_v49  ;;  %20423 = vmatpush3.bf16.msra.mxu1 %v21686_v15 }
0x197b   : > { %20367 = vmatpush3.bf16.msra.mxu0 %v21674_v49 }
0x197c   : > { %20368 = vmatprep.subr.bf16.mxu0 %v21675_v35 }
0x197e   : > { %20297 = vmatmul.mubr.bf16.gmra.mrb[252].mxu0 %v26232_v0 }
0x197f   : > { %20300 = vmatprep.mubr.bf16.mxu0 %v26233_v42  ;;  %20369 = vmatpush3.bf16.msra.mxu0 %v21675_v35 }
0x1980   : > { %20370 = vmatprep.subr.bf16.mxu0 %v21676_v61 }
0x1983   : > { %20371 = vmatpush3.bf16.msra.mxu0 %v21676_v61 }
0x1984   : > { %20372 = vmatprep.subr.bf16.mxu0 %v21677_v44 }
0x1986   : > { %20301 = vmatmul.mubr.bf16.gmra.mrb[0].mxu0 %v26234_v36 }
0x1987   : > { %20304 = vmatprep.mubr.bf16.mxu0 %v26235_v52  ;;  %20373 = vmatpush3.bf16.msra.mxu0 %v21677_v44 }
0x1988   : > { %20374 = vmatprep.subr.bf16.mxu0 %v21678_v31 }
0x198b   : > { %20375 = vmatpush3.bf16.msra.mxu0 %v21678_v31 }
0x198e   : > { %20305 = vmatmul.mubr.bf16.gmra.mrb[4].mxu0 %v26236_v9 }
0x198f   : > { %20308 = vmatprep.mubr.bf16.mxu0 %v26237_v12 }
0x1996   : > { %20309 = vmatmul.mubr.bf16.gmra.mrb[8].mxu0 %v26238_v54 }
0x1997   : > { %20312 = vmatprep.mubr.bf16.mxu0 %v26239_v30 }
0x199e   : > { %20313 = vmatmul.mubr.bf16.gmra.mrb[12].mxu0 %v26240_v5 }
0x199f   : > { %20316 = vmatprep.mubr.bf16.mxu0 %v26241_v27 }
0x19a6   : > { %20317 = vmatmul.mubr.bf16.gmra.mrb[16].mxu0 %v26242_v55 }
0x19a7   : > { %20376 = vmatprep.mubr.bf16.mxu0 %v26243_v60 }
0x19ae   : > { %20377 = vmatmul.mubr.bf16.vlgmr.msra.gmra.mrb[244].mxu0 %v26244_v33 }
0x19af   : > { %20380 = vmatprep.mubr.bf16.mxu0 %v26245_v32 }
0x19b6   : > { %20381 = vmatmul.mubr.bf16.gmra.mrb[248].mxu0 %v26247_v50 }
0x19b7   : > { %20384 = vmatprep.mubr.bf16.mxu0 %v26248_v56 }
0x19be   : > { %20385 = vmatmul.mubr.bf16.gmra.mrb[252].mxu0 %v26251_v26 }
0x19bf   : > { %20388 = vmatprep.mubr.bf16.mxu0 %v26253_v37 }
0x19c6   : > { %20389 = vmatmul.mubr.bf16.gmra.mrb[0].mxu0 %v26256_v29 }
0x19c7   : > { %20392 = vmatprep.mubr.bf16.mxu0 %v26258_v62 }
0x19ce   : > { %20393 = vmatmul.mubr.bf16.gmra.mrb[4].mxu0 %v26261_v6 }
0x19cf   : > { %20396 = vmatprep.mubr.bf16.mxu0 %v26262_v2 }
0x19d6   : > { %20397 = vmatmul.mubr.bf16.gmra.mrb[8].mxu0 %v26264_v13 }
0x19d7   : > { %20400 = vmatprep.mubr.bf16.mxu0 %v26265_v18 }
0x19de   : > { %20401 = vmatmul.mubr.bf16.gmra.mrb[12].mxu0 %v26266_v11 }
0x19df   : > { %20404 = vmatprep.mubr.bf16.mxu0 %v14759_v24 }
0x19e6   : > { %20405 = vmatmul.mubr.bf16.gmra.mrb[16].mxu0 %v14760_v25 }
0x1a81   : > { %v20378_v20 = vpop.f32.mrb[244].mxu0 }
0x1a82   : > { %v14860_v59 = vpop.f32.mrb[245].mxu0  ;;  %v15028_v41 = vadd.f32 %v20378_v20, %v25819_v45 }
0x1a83   : > { %v20379_v19 = vpop.f32.mrb[246].mxu0  ;;  %v15026_v3 = vadd.f32 %v25819_v45, %v14860_v59 }
0x1a84   : > { %v15029_v8 = vadd.f32 %v20379_v19, %v25819_v45  ;;  %v14863_v24 = vpop.f32.mrb[247].mxu0 }
0x1a85   : > { %v15027_v43 = vadd.f32 %v25819_v45, %v14863_v24 }
0x1a86   : > { %v15059_v17 = vpack.c.bf16 %v15029_v8, %v15028_v41 }
0x1a87   : > { %v15058_v51 = vpack.c.bf16 %v15027_v43, %v15026_v3 }
0x1a89   : > { %v20382_v25 = vpop.f32.mrb[248].mxu0  ;;  %20424 = vmatprep.mubr.bf16.mxu1 %v15058_v51 }
0x1a8a   : > { %v14876_v7 = vpop.f32.mrb[249].mxu0  ;;  %20425 = vmatmul.mubr.bf16.vlgmr.msra.gmra.mrb[236].mxu1 %v15059_v17  ;;  %v15032_v38 = vadd.f32 %v20382_v25, %v25819_v45 }
0x1a8b   : > { %v20383_v22 = vpop.f32.mrb[250].mxu0  ;;  %v15030_v46 = vadd.f32 %v25819_v45, %v14876_v7 }
0x1a8c   : > { %v15033_v57 = vadd.f32 %v20383_v22, %v25819_v45  ;;  %v14879_v10 = vpop.f32.mrb[251].mxu0 }
0x1a8d   : > { %v15031_v21 = vadd.f32 %v25819_v45, %v14879_v10 }
0x1a8e   : > { %v15061_v49 = vpack.c.bf16 %v15033_v57, %v15032_v38 }
0x1a8f   : > { %v15060_v28 = vpack.c.bf16 %v15031_v21, %v15030_v46  ;;  %v25857_v21 = vld [vmem:[%s26268_s30] ss:$0 sm:$0xff] }
0x1a91   : > { %v20386_v58 = vpop.f32.mrb[252].mxu0  ;;  %20428 = vmatprep.mubr.bf16.mxu1 %v15060_v28 }
0x1a92   : > { %v14892_v16 = vpop.f32.mrb[253].mxu0  ;;  %20429 = vmatmul.mubr.bf16.gmra.mrb[240].mxu1 %v15061_v49  ;;  %v15036_v61 = vadd.f32 %v20386_v58, %v25819_v45 }
0x1a93   : > { %v20387_v35 = vpop.f32.mrb[254].mxu0  ;;  %v15034_v44 = vadd.f32 %v25819_v45, %v14892_v16 }
0x1a94   : > { %v15037_v0 = vadd.f32 %v20387_v35, %v25819_v45  ;;  %v14895_v42 = vpop.f32.mrb[255].mxu0 }
0x1a95   : > { %v15035_v31 = vadd.f32 %v25819_v45, %v14895_v42 }
0x1a96   : > { %v15063_v36 = vpack.c.bf16 %v15037_v0, %v15036_v61 }
0x1a97   : > { %v15062_v52 = vpack.c.bf16 %v15035_v31, %v15034_v44 }
0x1a99   : > { %v20390_v9 = vpop.f32.mrb[0].mxu0  ;;  %20432 = vmatprep.mubr.bf16.mxu1 %v15062_v52 }
0x1a9a   : > { %v14908_v12 = vpop.f32.mrb[1].mxu0  ;;  %20433 = vmatmul.mubr.bf16.gmra.mrb[244].mxu1 %v15063_v36  ;;  %v15040_v30 = vadd.f32 %v20390_v9, %v25819_v45 }
0x1a9b   : > { %v20391_v54 = vpop.f32.mrb[2].mxu0  ;;  %v15038_v55 = vadd.f32 %v25819_v45, %v14908_v12 }
0x1a9c   : > { %v15041_v5 = vadd.f32 %v20391_v54, %v25819_v45  ;;  %v14911_v27 = vpop.f32.mrb[3].mxu0 }
0x1a9d   : > { %v15039_v60 = vadd.f32 %v25819_v45, %v14911_v27 }
0x1a9e   : > { %v15065_v33 = vpack.c.bf16 %v15041_v5, %v15040_v30 }
0x1a9f   : > { %v15064_v32 = vpack.c.bf16 %v15039_v60, %v15038_v55 }
0x1aa1   : > { %v20394_v23 = vpop.f32.mrb[4].mxu0  ;;  %20436 = vmatprep.mubr.bf16.mxu1 %v15064_v32 }
0x1aa2   : > { %v14924_v50 = vpop.f32.mrb[5].mxu0  ;;  %20437 = vmatmul.mubr.bf16.gmra.mrb[248].mxu1 %v15065_v33  ;;  %v15044_v14 = vadd.f32 %v20394_v23, %v25819_v45 }
0x1aa3   : > { %v20395_v56 = vpop.f32.mrb[6].mxu0  ;;  %v15042_v47 = vadd.f32 %v25819_v45, %v14924_v50 }
0x1aa4   : > { %v15045_v39 = vadd.f32 %v20395_v56, %v25819_v45  ;;  %v14927_v26 = vpop.f32.mrb[7].mxu0 }
0x1aa5   : > { %v15043_v37 = vadd.f32 %v25819_v45, %v14927_v26 }
0x1aa6   : > { %v15067_v53 = vpack.c.bf16 %v15045_v39, %v15044_v14 }
0x1aa7   : > { %v15066_v48 = vpack.c.bf16 %v15043_v37, %v15042_v47 }
0x1aa9   : > { %v20398_v29 = vpop.f32.mrb[8].mxu0  ;;  %20440 = vmatprep.mubr.bf16.mxu1 %v15066_v48 }
0x1aaa   : > { %v14940_v4 = vpop.f32.mrb[9].mxu0  ;;  %20441 = vmatmul.mubr.bf16.gmra.mrb[252].mxu1 %v15067_v53  ;;  %v15048_v34 = vadd.f32 %v20398_v29, %v25819_v45 }
0x1aab   : > { %v20399_v62 = vpop.f32.mrb[10].mxu0  ;;  %v15046_v2 = vadd.f32 %v25819_v45, %v14940_v4 }
0x1aac   : > { %v15049_v1 = vadd.f32 %v20399_v62, %v25819_v45  ;;  %v14943_v6 = vpop.f32.mrb[11].mxu0 }
0x1aad   : > { %v15047_v63 = vadd.f32 %v25819_v45, %v14943_v6 }
0x1aae   : > { %v15069_v13 = vpack.c.bf16 %v15049_v1, %v15048_v34 }
0x1aaf   : > { %v15068_v18 = vpack.c.bf16 %v15047_v63, %v15046_v2 }
0x1ab1   : > { %v20402_v11 = vpop.f32.mrb[12].mxu0  ;;  %20444 = vmatprep.mubr.bf16.mxu1 %v15068_v18 }
0x1ab2   : > { %v14956_v40 = vpop.f32.mrb[13].mxu0  ;;  %20445 = vmatmul.mubr.bf16.gmra.mrb[0].mxu1 %v15069_v13  ;;  %v15052_v20 = vadd.f32 %v20402_v11, %v25819_v45 }
0x1ab3   : > { %v20403_v15 = vpop.f32.mrb[14].mxu0  ;;  %v15050_v41 = vadd.f32 %v25819_v45, %v14956_v40 }
0x1ab4   : > { %v15053_v59 = vadd.f32 %v20403_v15, %v25819_v45  ;;  %v14959_v19 = vpop.f32.mrb[15].mxu0 }
0x1ab5   : > { %v15051_v8 = vadd.f32 %v25819_v45, %v14959_v19 }
0x1ab6   : > { %v15071_v24 = vpack.c.bf16 %v15053_v59, %v15052_v20 }
0x1ab7   : > { %v15070_v3 = vpack.c.bf16 %v15051_v8, %v15050_v41 }
0x1ab9   : > { %v20406_v43 = vpop.f32.mrb[16].mxu0  ;;  %20448 = vmatprep.mubr.bf16.mxu1 %v15070_v3 }
0x1aba   : > { %v14972_v17 = vpop.f32.mrb[17].mxu0  ;;  %20449 = vmatmul.mubr.bf16.gmra.mrb[4].mxu1 %v15071_v24  ;;  %v15056_v25 = vadd.f32 %v20406_v43, %v25819_v45 }
0x1abb   : > { %v20407_v51 = vpop.f32.mrb[18].mxu0  ;;  %v15054_v38 = vadd.f32 %v25819_v45, %v14972_v17 }
0x1abc   : > { %v15057_v7 = vadd.f32 %v20407_v51, %v25819_v45  ;;  %v14975_v22 = vpop.f32.mrb[19].mxu0 }
0x1abd   : > { %v15055_v57 = vadd.f32 %v25819_v45, %v14975_v22 }
0x1abe   : > { %v15073_v10 = vpack.c.bf16 %v15057_v7, %v15056_v25 }
0x1abf   : > { %v15072_v46 = vpack.c.bf16 %v15055_v57, %v15054_v38 }
0x1ac1   : > { %20452 = vmatprep.mubr.bf16.mxu1 %v15072_v46 }
0x1ac2   : > { %20453 = vmatmul.mubr.bf16.gmra.mrb[8].mxu1 %v15073_v10 }
0x1b5d   : > { %v20426_v45 = vpop.f32.mrb[236].mxu1 }
0x1b5e   : > { %v15188_v49 = vadd.f32 %v20426_v45, %v25857_v21  ;;  %v15179_v28 = vpop.f32.mrb[237].mxu1 }
0x1b5f   : > { %v15180_v58 = vadd.f32 %v25857_v21, %v15179_v28  ;;  %v20427_v16 = vpop.f32.mrb[238].mxu1 }
0x1b60   : > { %15308 = vst [vmem:[%s25862_s28 + $0x10] sm:$0xff] %v15188_v49  ;;  %v15191_v35 = vadd.f32 %v20427_v16, %v25857_v21  ;;  %v15182_v61 = vpop.f32.mrb[239].mxu1 }
0x1b61   : > { %15306 = vst [vmem:[%s25862_s28] sm:$0xff] %v15180_v58  ;;  %v15183_v0 = vadd.f32 %v25857_v21, %v15182_v61 }
0x1b62   : > { %15309 = vst [vmem:[%s25862_s28 + $0x18] sm:$0xff] %v15191_v35 }
0x1b63   : > { %15307 = vst [vmem:[%s25862_s28 + $0x8] sm:$0xff] %v15183_v0 }
0x1b65   : > { %v20430_v42 = vpop.f32.mrb[240].mxu1 }
0x1b66   : > { %v15204_v44 = vadd.f32 %v20430_v42, %v25857_v21  ;;  %v15195_v31 = vpop.f32.mrb[241].mxu1 }
0x1b67   : > { %v15196_v36 = vadd.f32 %v25857_v21, %v15195_v31  ;;  %v20431_v52 = vpop.f32.mrb[242].mxu1 }
0x1b68   : > { %15312 = vst [vmem:[%s25862_s28 + $0x30] sm:$0xff] %v15204_v44  ;;  %v15207_v9 = vadd.f32 %v20431_v52, %v25857_v21  ;;  %v15198_v12 = vpop.f32.mrb[243].mxu1 }
0x1b69   : > { %15310 = vst [vmem:[%s25862_s28 + $0x20] sm:$0xff] %v15196_v36  ;;  %v15199_v54 = vadd.f32 %v25857_v21, %v15198_v12 }
0x1b6a   : > { %15313 = vst [vmem:[%s25862_s28 + $0x38] sm:$0xff] %v15207_v9 }
0x1b6b   : > { %15311 = vst [vmem:[%s25862_s28 + $0x28] sm:$0xff] %v15199_v54 }
0x1b6d   : > { %v20434_v30 = vpop.f32.mrb[244].mxu1 }
0x1b6e   : > { %v15220_v5 = vadd.f32 %v20434_v30, %v25857_v21  ;;  %v15211_v27 = vpop.f32.mrb[245].mxu1 }
0x1b6f   : > { %v15212_v55 = vadd.f32 %v25857_v21, %v15211_v27  ;;  %v20435_v60 = vpop.f32.mrb[246].mxu1 }
0x1b70   : > { %15316 = vst [vmem:[%s25862_s28 + $0x50] sm:$0xff] %v15220_v5  ;;  %v15223_v33 = vadd.f32 %v20435_v60, %v25857_v21  ;;  %v15214_v32 = vpop.f32.mrb[247].mxu1 }
0x1b71   : > { %15314 = vst [vmem:[%s25862_s28 + $0x40] sm:$0xff] %v15212_v55  ;;  %v15215_v23 = vadd.f32 %v25857_v21, %v15214_v32 }
0x1b72   : > { %15317 = vst [vmem:[%s25862_s28 + $0x58] sm:$0xff] %v15223_v33 }
0x1b73   : > { %15315 = vst [vmem:[%s25862_s28 + $0x48] sm:$0xff] %v15215_v23 }
0x1b75   : > { %v20438_v50 = vpop.f32.mrb[248].mxu1 }
0x1b76   : > { %v15236_v56 = vadd.f32 %v20438_v50, %v25857_v21  ;;  %v15227_v14 = vpop.f32.mrb[249].mxu1 }
0x1b77   : > { %v15228_v39 = vadd.f32 %v25857_v21, %v15227_v14  ;;  %v20439_v26 = vpop.f32.mrb[250].mxu1 }
0x1b78   : > { %15320 = vst [vmem:[%s25862_s28 + $0x70] sm:$0xff] %v15236_v56  ;;  %v15239_v47 = vadd.f32 %v20439_v26, %v25857_v21  ;;  %v15230_v37 = vpop.f32.mrb[251].mxu1 }
0x1b79   : > { %15318 = vst [vmem:[%s25862_s28 + $0x60] sm:$0xff] %v15228_v39  ;;  %v15231_v53 = vadd.f32 %v25857_v21, %v15230_v37 }
0x1b7a   : > { %15321 = vst [vmem:[%s25862_s28 + $0x78] sm:$0xff] %v15239_v47 }
0x1b7b   : > { %15319 = vst [vmem:[%s25862_s28 + $0x68] sm:$0xff] %v15231_v53 }
0x1b7d   : > { %v20442_v48 = vpop.f32.mrb[252].mxu1 }
0x1b7e   : > { %v15252_v29 = vadd.f32 %v20442_v48, %v25857_v21  ;;  %v15243_v4 = vpop.f32.mrb[253].mxu1 }
0x1b7f   : > { %v15244_v62 = vadd.f32 %v25857_v21, %v15243_v4  ;;  %v20443_v34 = vpop.f32.mrb[254].mxu1 }
0x1b80   : > { %15324 = vst [vmem:[%s25862_s28 + $0x90] sm:$0xff] %v15252_v29  ;;  %v15255_v1 = vadd.f32 %v20443_v34, %v25857_v21  ;;  %v15246_v6 = vpop.f32.mrb[255].mxu1 }
0x1b81   : > { %15322 = vst [vmem:[%s25862_s28 + $0x80] sm:$0xff] %v15244_v62  ;;  %v15247_v2 = vadd.f32 %v25857_v21, %v15246_v6 }
0x1b82   : > { %15325 = vst [vmem:[%s25862_s28 + $0x98] sm:$0xff] %v15255_v1 }
0x1b83   : > { %15323 = vst [vmem:[%s25862_s28 + $0x88] sm:$0xff] %v15247_v2 }
0x1b85   : > { %v20446_v63 = vpop.f32.mrb[0].mxu1 }
0x1b86   : > { %v15268_v13 = vadd.f32 %v20446_v63, %v25857_v21  ;;  %v15259_v18 = vpop.f32.mrb[1].mxu1 }
0x1b87   : > { %v15260_v11 = vadd.f32 %v25857_v21, %v15259_v18  ;;  %v20447_v40 = vpop.f32.mrb[2].mxu1 }
0x1b88   : > { %15328 = vst [vmem:[%s25862_s28 + $0xb0] sm:$0xff] %v15268_v13  ;;  %v15271_v15 = vadd.f32 %v20447_v40, %v25857_v21  ;;  %v15262_v20 = vpop.f32.mrb[3].mxu1 }
0x1b89   : > { %15326 = vst [vmem:[%s25862_s28 + $0xa0] sm:$0xff] %v15260_v11  ;;  %v15263_v59 = vadd.f32 %v25857_v21, %v15262_v20 }
0x1b8a   : > { %15329 = vst [vmem:[%s25862_s28 + $0xb8] sm:$0xff] %v15271_v15 }
0x1b8b   : > { %15327 = vst [vmem:[%s25862_s28 + $0xa8] sm:$0xff] %v15263_v59 }
0x1b8d   : > { %v20450_v19 = vpop.f32.mrb[4].mxu1 }
0x1b8e   : > { %v15284_v41 = vadd.f32 %v20450_v19, %v25857_v21  ;;  %v15275_v8 = vpop.f32.mrb[5].mxu1 }
0x1b8f   : > { %v15276_v24 = vadd.f32 %v25857_v21, %v15275_v8  ;;  %v20451_v3 = vpop.f32.mrb[6].mxu1 }
0x1b90   : > { %15332 = vst [vmem:[%s25862_s28 + $0xd0] sm:$0xff] %v15284_v41  ;;  %v15287_v43 = vadd.f32 %v20451_v3, %v25857_v21  ;;  %v15278_v17 = vpop.f32.mrb[7].mxu1 }
0x1b91   : > { %15330 = vst [vmem:[%s25862_s28 + $0xc0] sm:$0xff] %v15276_v24  ;;  %v15279_v51 = vadd.f32 %v25857_v21, %v15278_v17 }
0x1b92   : > { %15333 = vst [vmem:[%s25862_s28 + $0xd8] sm:$0xff] %v15287_v43 }
0x1b93   : > { %15331 = vst [vmem:[%s25862_s28 + $0xc8] sm:$0xff] %v15279_v51 }
0x1b95   : > { %v20454_v25 = vpop.f32.mrb[8].mxu1 }
0x1b96   : > { %v15300_v7 = vadd.f32 %v20454_v25, %v25857_v21  ;;  %v15291_v22 = vpop.f32.mrb[9].mxu1 }
0x1b97   : > { %v15292_v38 = vadd.f32 %v25857_v21, %v15291_v22  ;;  %v20455_v57 = vpop.f32.mrb[10].mxu1 }
0x1b98   : > { %15336 = vst [vmem:[%s25862_s28 + $0xf0] sm:$0xff] %v15300_v7  ;;  %v15303_v10 = vadd.f32 %v20455_v57, %v25857_v21  ;;  %v15294_v46 = vpop.f32.mrb[11].mxu1 }
0x1b99   : > { %15334 = vst [vmem:[%s25862_s28 + $0xe0] sm:$0xff] %v15292_v38  ;;  %v15295_v45 = vadd.f32 %v25857_v21, %v15294_v46 }
0x1b9a   : > { %15337 = vst [vmem:[%s25862_s28 + $0xf8] sm:$0xff] %v15303_v10 }
0x1b9b   : > { %15335 = vst [vmem:[%s25862_s28 + $0xe8] sm:$0xff] %v15295_v45 }
0x1b9c PF: > { %s26270_s27 = sld [smem:[#allocation17_spill]] }
0x1ba2   : > { %s35_s2 = sadd.s32 1, %s26270_s27  }
0x1ba3   : > { %p32_p13 = scmp.ge.s32.totalorder %s35_s2, 4  }
0x1ba5   :  { %34 = sbr.rel (!%p32_p13) target bundleno = 17 (0x11), region = 259 }
0x1bac   :  { %15359 = vsyncpa [#allocation3], 1 }
0x1bad   :  { %15361 = vsyncpa [#allocation3 + $0x1], 1 }
0x1bae   :  { %15362 = vsyncpa [#allocation5], 1 }
0x1baf   :  { %15363 = vsyncpa [#allocation8], 1 }
0x1bb0   :  { %15364 = vsyncpa [#allocation11], 1 }

</bundles_post_ra>
